<compile_context>
chip_gen: v7x
topology: tpu7x:2x2x1
jax: 0.10.0
libtpu: 0.0.40
codegen_flags: <defaults>
</compile_context>

<pallas_src>
import jax
import jax.numpy as jnp
from jax import lax
from jax.experimental import pallas as pl
from jax.experimental.pallas import tpu as pltpu


# ----------------------------------------------------------------------------
# Pallas kernels
# ----------------------------------------------------------------------------
def _conv_relu_pool_kernel(w_ref, b_ref, p00_ref, p01_ref, p10_ref, p11_ref, o_ref):
    """o[n] = relu(max_{q in 2x2 pool window}(W @ P_q[n]) + b)  for each sample n.

    W: (C_out, K) bf16, P_q: (N, K, Hp*Wp) bf16, o: (N, C_out, Hp*Wp) f32.
    max(relu(.)) == relu(max(.)) and the per-channel bias is shared across the
    pool window, so this matches conv -> ReLU -> maxpool exactly.
    """
    w = w_ref[...]
    b = b_ref[...]
    for n in range(o_ref.shape[0]):          # N is tiny (2); static unroll
        s = jnp.dot(w, p00_ref[n], preferred_element_type=jnp.float32)
        s = jnp.maximum(s, jnp.dot(w, p01_ref[n], preferred_element_type=jnp.float32))
        s = jnp.maximum(s, jnp.dot(w, p10_ref[n], preferred_element_type=jnp.float32))
        s = jnp.maximum(s, jnp.dot(w, p11_ref[n], preferred_element_type=jnp.float32))
        o_ref[n] = jnp.maximum(s + b, 0.0).astype(o_ref.dtype)


def _fc_stack_kernel(x_ref, w1_ref, b1_ref, w2_ref, b2_ref, w3_ref, b3_ref, o_ref):
    """fc1 -> ReLU -> fc2 -> ReLU -> fc3 -> log_softmax, fully resident in VMEM.

    w1/w2 are bf16 (weight-bandwidth bound at M=2); accumulation is f32.
    """
    h = jnp.dot(x_ref[...].astype(w1_ref.dtype), w1_ref[...],
                preferred_element_type=jnp.float32) + b1_ref[...]
    h = jnp.maximum(h, 0.0)
    h = jnp.dot(h.astype(w2_ref.dtype), w2_ref[...],
                preferred_element_type=jnp.float32) + b2_ref[...]
    h = jnp.maximum(h, 0.0)
    logits = jnp.dot(h, w3_ref[...], preferred_element_type=jnp.float32) + b3_ref[...]
    m = jnp.max(logits, axis=-1, keepdims=True)
    s = logits - m
    lse = jnp.log(jnp.sum(jnp.exp(s), axis=-1, keepdims=True))
    o_ref[...] = (s - lse).astype(o_ref.dtype)


# ----------------------------------------------------------------------------
# Wrappers around pallas_call
# ----------------------------------------------------------------------------
def _pool_quadrant_patches(x, kh, kw):
    """Four patch tensors (N, C*kh*kw, Hp*Wp), one per position of a 2x2 maxpool
    over the stride-1 VALID conv output.  Feature order is (c_in, kh, kw),
    matching torch's weight.reshape(C_out, -1).  Dtype follows x (bf16 here)."""
    N, C, H, W = x.shape
    Ho, Wo = H - kh + 1, W - kw + 1
    Hp, Wp = Ho // 2, Wo // 2
    patches = []
    for dh in (0, 1):
        for dw in (0, 1):
            xs = x[:, :, dh:dh + 2 * (Hp - 1) + kh, dw:dw + 2 * (Wp - 1) + kw]
            p = lax.conv_general_dilated_patches(xs, (kh, kw), (2, 2), "VALID")
            # p: (N, C*kh*kw, Hp, Wp) -> merge trailing spatial dims (contiguous).
            patches.append(p.reshape(N, C * kh * kw, Hp * Wp))
    return patches, (Hp, Wp)


def conv_relu_pool(x, w, b):
    """PyTorch Conv2d(stride=1, no padding) + ReLU + MaxPool2d(2), fused into one
    Pallas call per conv stage.  x: (N, C_in, H, W) NCHW f32, returns NCHW f32."""
    C_out, C_in, KH, KW = w.shape
    N = x.shape[0]
    K = C_in * KH * KW
    # bf16 im2col (patches are written to HBM in bf16 directly); no K padding.
    patches, (Hp, Wp) = _pool_quadrant_patches(x.astype(jnp.bfloat16), KH, KW)
    Mp = Hp * Wp
    w2 = w.reshape(C_out, K).astype(jnp.bfloat16)    # (C_out, K) bf16
    b2 = b.reshape(C_out, 1)                          # f32 bias

    patch_spec = pl.BlockSpec((N, K, Mp), lambda i: (0, 0, 0))
    out = pl.pallas_call(
        _conv_relu_pool_kernel,
        out_shape=jax.ShapeDtypeStruct((N, C_out, Mp), jnp.float32),
        grid_spec=pltpu.PrefetchScalarGridSpec(
            num_scalar_prefetch=0,
            grid=(1,),                                # single step, batch in-kernel
            in_specs=[
                pl.BlockSpec((C_out, K), lambda i: (0, 0)),
                pl.BlockSpec((C_out, 1), lambda i: (0, 0)),
                patch_spec, patch_spec, patch_spec, patch_spec,
            ],
            out_specs=pl.BlockSpec((N, C_out, Mp), lambda i: (0, 0, 0)),
        ),
        compiler_params=pltpu.CompilerParams(
            dimension_semantics=("arbitrary",),
        ),
    )(w2, b2, *patches)
    return out.reshape(N, C_out, Hp, Wp)              # contiguous split of last dim


def fc_stack_logsoftmax(x, w1, b1, w2, b2, w3, b3):
    """log_softmax(relu(relu(x@w1+b1)@w2+b2)@w3+b3) in a single pallas_call."""
    M = x.shape[0]
    N_out = w3.shape[1]

    def full(shape):
        return pl.BlockSpec(shape, lambda i, _n=len(shape): (0,) * _n)

    return pl.pallas_call(
        _fc_stack_kernel,
        out_shape=jax.ShapeDtypeStruct((M, N_out), jnp.float32),
        grid_spec=pltpu.PrefetchScalarGridSpec(
            num_scalar_prefetch=0,
            grid=(1,),
            in_specs=[
                full(x.shape),
                full(w1.shape), full((1, w1.shape[1])),
                full(w2.shape), full((1, w2.shape[1])),
                full(w3.shape), full((1, w3.shape[1])),
            ],
            out_specs=full((M, N_out)),
        ),
        compiler_params=pltpu.CompilerParams(
            dimension_semantics=("arbitrary",),
            vmem_limit_bytes=32 * 1024 * 1024,        # well under v7x's 64 MiB/TC
        ),
    )(x, w1, b1.reshape(1, -1), w2, b2.reshape(1, -1), w3, b3.reshape(1, -1))


# ----------------------------------------------------------------------------
# Model: deterministic parameter init + forward
# ----------------------------------------------------------------------------
def init_params(key):
    ks = jax.random.split(key, 10)

    def u(k, shape, fan_in):
        bound = 1.0 / float(fan_in) ** 0.5
        return jax.random.uniform(k, shape, jnp.float32, -bound, bound)

    return {
        "conv1_w": u(ks[0], (6, 3, 5, 5), 3 * 5 * 5),
        "conv1_b": u(ks[1], (6,), 3 * 5 * 5),
        "conv2_w": u(ks[2], (16, 6, 5, 5), 6 * 5 * 5),
        "conv2_b": u(ks[3], (16,), 6 * 5 * 5),
        # fc1/fc2 weights stored bf16: FC stack is pure weight-bandwidth bound.
        "fc1_w": u(ks[4], (16 * 2 * 29, 2048), 16 * 2 * 29).astype(jnp.bfloat16),
        "fc1_b": u(ks[5], (2048,), 16 * 2 * 29),
        "fc2_w": u(ks[6], (2048, 512), 2048).astype(jnp.bfloat16),
        "fc2_b": u(ks[7], (512,), 2048),
        "fc3_w": u(ks[8], (512, 2), 512),
        "fc3_b": u(ks[9], (2,), 512),
    }


def conv_network_forward(params, x):
    x = conv_relu_pool(x, params["conv1_w"], params["conv1_b"])   # (N, 6, 8, 62)
    x = conv_relu_pool(x, params["conv2_w"], params["conv2_b"])   # (N, 16, 2, 29)
    x = x.reshape(x.shape[0], -1)                                 # torch.flatten(x, 1)
    return fc_stack_logsoftmax(
        x, params["fc1_w"], params["fc1_b"],
        params["fc2_w"], params["fc2_b"],
        params["fc3_w"], params["fc3_b"])                         # (N, 2) log-probs


# ----------------------------------------------------------------------------
# Pure-JAX reference (same bf16 conv / fc casts) for a correctness check.
# ----------------------------------------------------------------------------
def reference_forward(params, x):
    def conv_relu(x, w, b):
        y = lax.conv_general_dilated(
            x.astype(jnp.bfloat16), w.astype(jnp.bfloat16), (1, 1), "VALID",
            dimension_numbers=("NCHW", "OIHW", "NCHW"),
            preferred_element_type=jnp.float32)
        return jnp.maximum(y + b[None, :, None, None], 0.0)

    def pool(x):
        n, c, h, w = x.shape
        return x.reshape(n, c, h // 2, 2, w // 2, 2).max(axis=(3, 5))

    x = pool(conv_relu(x, params["conv1_w"], params["conv1_b"]))
    x = pool(conv_relu(x, params["conv2_w"], params["conv2_b"]))
    x = x.reshape(x.shape[0], -1)
    h = jnp.maximum(jnp.dot(x.astype(jnp.bfloat16), params["fc1_w"],
                            preferred_element_type=jnp.float32) + params["fc1_b"], 0.0)
    h = jnp.maximum(jnp.dot(h.astype(jnp.bfloat16), params["fc2_w"],
                            preferred_element_type=jnp.float32) + params["fc2_b"], 0.0)
    logits = jnp.dot(h, params["fc3_w"],
                     preferred_element_type=jnp.float32) + params["fc3_b"]
    return jax.nn.log_softmax(logits, axis=-1)


if __name__ == "__main__":
    key = jax.random.PRNGKey(0)
    pkey, xkey = jax.random.split(key)
    params = init_params(pkey)
    # (H, W) = (20, 128): conv1 -> 16x124, pool -> 8x62, conv2 -> 4x58,
    # pool -> 2x29, flatten -> 16*2*29 = 928 (matches fc1 in_features).
    x = jax.random.normal(xkey, (2, 3, 20, 128), jnp.float32)

    out = jax.jit(conv_network_forward)(params, x)
    out = jax.block_until_ready(out)

    assert out.shape == (2, 2)
    # log_softmax sanity: probabilities sum to 1 per row.
    assert bool(jnp.allclose(jnp.exp(out).sum(axis=1), 1.0, atol=1e-5))
    # Numerical check against a pure-JAX reference (loose tol for bf16 path).
    ref = jax.jit(reference_forward)(params, x)
    assert bool(jnp.max(jnp.abs(out - ref)) < 3e-2)
    print("KERNEL_OK")
</pallas_src>

<mosaic_0001>
module attributes {stable_mosaic.version = 11 : i64} {
  func.func @_conv_relu_pool_kernel(%arg0: i32, %arg1: memref<6x75xbf16, #tpu.memory_space<vmem>>, %arg2: memref<6x1xf32, #tpu.memory_space<vmem>>, %arg3: memref<2x75x496xbf16, #tpu.memory_space<vmem>>, %arg4: memref<2x75x496xbf16, #tpu.memory_space<vmem>>, %arg5: memref<2x75x496xbf16, #tpu.memory_space<vmem>>, %arg6: memref<2x75x496xbf16, #tpu.memory_space<vmem>>, %arg7: memref<2x6x496xf32, #tpu.memory_space<vmem>>) attributes {dimension_semantics = [#tpu.dimension_semantics<arbitrary>], iteration_bounds = array<i64: 1>, scalar_prefetch = 0 : i64, scratch_operands = 0 : i64, tpu.core_type = #tpu.core_type<tc>, window_params = [{pipeline_mode = #tpu.pipeline_mode<synchronous>, transform_indices = @transform_0, window_bounds = array<i64: 6, 75>}, {pipeline_mode = #tpu.pipeline_mode<synchronous>, transform_indices = @transform_1, window_bounds = array<i64: 6, 1>}, {pipeline_mode = #tpu.pipeline_mode<synchronous>, transform_indices = @transform_2, window_bounds = array<i64: 2, 75, 496>}, {pipeline_mode = #tpu.pipeline_mode<synchronous>, transform_indices = @transform_3, window_bounds = array<i64: 2, 75, 496>}, {pipeline_mode = #tpu.pipeline_mode<synchronous>, transform_indices = @transform_4, window_bounds = array<i64: 2, 75, 496>}, {pipeline_mode = #tpu.pipeline_mode<synchronous>, transform_indices = @transform_5, window_bounds = array<i64: 2, 75, 496>}, {pipeline_mode = #tpu.pipeline_mode<synchronous>, transform_indices = @transform_6, window_bounds = array<i64: 2, 6, 496>}]} {
    %c0 = arith.constant 0 : index
    %c0_0 = arith.constant 0 : index
    %0 = vector.load %arg1[%c0, %c0_0] : memref<6x75xbf16, #tpu.memory_space<vmem>>, vector<6x75xbf16>
    %c0_1 = arith.constant 0 : index
    %c0_2 = arith.constant 0 : index
    %1 = vector.load %arg2[%c0_1, %c0_2] : memref<6x1xf32, #tpu.memory_space<vmem>>, vector<6x1xf32>
    %c0_3 = arith.constant 0 : index
    %c0_4 = arith.constant 0 : index
    %c0_5 = arith.constant 0 : index
    %2 = vector.load %arg3[%c0_3, %c0_4, %c0_5] : memref<2x75x496xbf16, #tpu.memory_space<vmem>>, vector<1x75x496xbf16>
    %3 = vector.shape_cast %2 : vector<1x75x496xbf16> to vector<75x496xbf16>
    %cst = arith.constant dense<0.000000e+00> : vector<6x496xf32>
    %4 = tpu.matmul %0, %3, %cst {dimension_numbers = #tpu.dot_dimension_numbers<[1], [0], [0], [1], [0, 0, 1, 1], [], []>} : vector<6x75xbf16>, vector<75x496xbf16>, vector<6x496xf32> -> vector<6x496xf32>
    %c0_6 = arith.constant 0 : index
    %c0_7 = arith.constant 0 : index
    %c0_8 = arith.constant 0 : index
    %5 = vector.load %arg4[%c0_6, %c0_7, %c0_8] : memref<2x75x496xbf16, #tpu.memory_space<vmem>>, vector<1x75x496xbf16>
    %6 = vector.shape_cast %5 : vector<1x75x496xbf16> to vector<75x496xbf16>
    %cst_9 = arith.constant dense<0.000000e+00> : vector<6x496xf32>
    %7 = tpu.matmul %0, %6, %cst_9 {dimension_numbers = #tpu.dot_dimension_numbers<[1], [0], [0], [1], [0, 0, 1, 1], [], []>} : vector<6x75xbf16>, vector<75x496xbf16>, vector<6x496xf32> -> vector<6x496xf32>
    %8 = arith.maximumf %4, %7 : vector<6x496xf32>
    %c0_10 = arith.constant 0 : index
    %c0_11 = arith.constant 0 : index
    %c0_12 = arith.constant 0 : index
    %9 = vector.load %arg5[%c0_10, %c0_11, %c0_12] : memref<2x75x496xbf16, #tpu.memory_space<vmem>>, vector<1x75x496xbf16>
    %10 = vector.shape_cast %9 : vector<1x75x496xbf16> to vector<75x496xbf16>
    %cst_13 = arith.constant dense<0.000000e+00> : vector<6x496xf32>
    %11 = tpu.matmul %0, %10, %cst_13 {dimension_numbers = #tpu.dot_dimension_numbers<[1], [0], [0], [1], [0, 0, 1, 1], [], []>} : vector<6x75xbf16>, vector<75x496xbf16>, vector<6x496xf32> -> vector<6x496xf32>
    %12 = arith.maximumf %8, %11 : vector<6x496xf32>
    %c0_14 = arith.constant 0 : index
    %c0_15 = arith.constant 0 : index
    %c0_16 = arith.constant 0 : index
    %13 = vector.load %arg6[%c0_14, %c0_15, %c0_16] : memref<2x75x496xbf16, #tpu.memory_space<vmem>>, vector<1x75x496xbf16>
    %14 = vector.shape_cast %13 : vector<1x75x496xbf16> to vector<75x496xbf16>
    %cst_17 = arith.constant dense<0.000000e+00> : vector<6x496xf32>
    %15 = tpu.matmul %0, %14, %cst_17 {dimension_numbers = #tpu.dot_dimension_numbers<[1], [0], [0], [1], [0, 0, 1, 1], [], []>} : vector<6x75xbf16>, vector<75x496xbf16>, vector<6x496xf32> -> vector<6x496xf32>
    %16 = arith.maximumf %12, %15 : vector<6x496xf32>
    %17 = vector.broadcast %1 : vector<6x1xf32> to vector<6x496xf32>
    %18 = arith.addf %16, %17 : vector<6x496xf32>
    %cst_18 = arith.constant 0.000000e+00 : f32
    %19 = vector.broadcast %cst_18 : f32 to vector<6x496xf32>
    %20 = arith.maximumf %18, %19 : vector<6x496xf32>
    %c0_19 = arith.constant 0 : index
    %c0_20 = arith.constant 0 : index
    %c0_21 = arith.constant 0 : index
    %21 = vector.load %arg7[%c0_19, %c0_20, %c0_21] : memref<2x6x496xf32, #tpu.memory_space<vmem>>, vector<1x6x496xf32>
    %22 = vector.shape_cast %21 : vector<1x6x496xf32> to vector<6x496xf32>
    %23 = vector.shape_cast %20 : vector<6x496xf32> to vector<1x6x496xf32>
    tpu.vector_store %arg7[%c0_19, %c0_20, %c0_21], %23 {strides = array<i32>} : memref<2x6x496xf32, #tpu.memory_space<vmem>>, vector<1x6x496xf32>,
    %c1 = arith.constant 1 : index
    %c0_22 = arith.constant 0 : index
    %c0_23 = arith.constant 0 : index
    %24 = vector.load %arg3[%c1, %c0_22, %c0_23] : memref<2x75x496xbf16, #tpu.memory_space<vmem>>, vector<1x75x496xbf16>
    %25 = vector.shape_cast %24 : vector<1x75x496xbf16> to vector<75x496xbf16>
    %cst_24 = arith.constant dense<0.000000e+00> : vector<6x496xf32>
    %26 = tpu.matmul %0, %25, %cst_24 {dimension_numbers = #tpu.dot_dimension_numbers<[1], [0], [0], [1], [0, 0, 1, 1], [], []>} : vector<6x75xbf16>, vector<75x496xbf16>, vector<6x496xf32> -> vector<6x496xf32>
    %c1_25 = arith.constant 1 : index
    %c0_26 = arith.constant 0 : index
    %c0_27 = arith.constant 0 : index
    %27 = vector.load %arg4[%c1_25, %c0_26, %c0_27] : memref<2x75x496xbf16, #tpu.memory_space<vmem>>, vector<1x75x496xbf16>
    %28 = vector.shape_cast %27 : vector<1x75x496xbf16> to vector<75x496xbf16>
    %cst_28 = arith.constant dense<0.000000e+00> : vector<6x496xf32>
    %29 = tpu.matmul %0, %28, %cst_28 {dimension_numbers = #tpu.dot_dimension_numbers<[1], [0], [0], [1], [0, 0, 1, 1], [], []>} : vector<6x75xbf16>, vector<75x496xbf16>, vector<6x496xf32> -> vector<6x496xf32>
    %30 = arith.maximumf %26, %29 : vector<6x496xf32>
    %c1_29 = arith.constant 1 : index
    %c0_30 = arith.constant 0 : index
    %c0_31 = arith.constant 0 : index
    %31 = vector.load %arg5[%c1_29, %c0_30, %c0_31] : memref<2x75x496xbf16, #tpu.memory_space<vmem>>, vector<1x75x496xbf16>
    %32 = vector.shape_cast %31 : vector<1x75x496xbf16> to vector<75x496xbf16>
    %cst_32 = arith.constant dense<0.000000e+00> : vector<6x496xf32>
    %33 = tpu.matmul %0, %32, %cst_32 {dimension_numbers = #tpu.dot_dimension_numbers<[1], [0], [0], [1], [0, 0, 1, 1], [], []>} : vector<6x75xbf16>, vector<75x496xbf16>, vector<6x496xf32> -> vector<6x496xf32>
    %34 = arith.maximumf %30, %33 : vector<6x496xf32>
    %c1_33 = arith.constant 1 : index
    %c0_34 = arith.constant 0 : index
    %c0_35 = arith.constant 0 : index
    %35 = vector.load %arg6[%c1_33, %c0_34, %c0_35] : memref<2x75x496xbf16, #tpu.memory_space<vmem>>, vector<1x75x496xbf16>
    %36 = vector.shape_cast %35 : vector<1x75x496xbf16> to vector<75x496xbf16>
    %cst_36 = arith.constant dense<0.000000e+00> : vector<6x496xf32>
    %37 = tpu.matmul %0, %36, %cst_36 {dimension_numbers = #tpu.dot_dimension_numbers<[1], [0], [0], [1], [0, 0, 1, 1], [], []>} : vector<6x75xbf16>, vector<75x496xbf16>, vector<6x496xf32> -> vector<6x496xf32>
    %38 = arith.maximumf %34, %37 : vector<6x496xf32>
    %39 = vector.broadcast %1 : vector<6x1xf32> to vector<6x496xf32>
    %40 = arith.addf %38, %39 : vector<6x496xf32>
    %cst_37 = arith.constant 0.000000e+00 : f32
    %41 = vector.broadcast %cst_37 : f32 to vector<6x496xf32>
    %42 = arith.maximumf %40, %41 : vector<6x496xf32>
    %c1_38 = arith.constant 1 : index
    %c0_39 = arith.constant 0 : index
    %c0_40 = arith.constant 0 : index
    %43 = vector.load %arg7[%c1_38, %c0_39, %c0_40] : memref<2x6x496xf32, #tpu.memory_space<vmem>>, vector<1x6x496xf32>
    %44 = vector.shape_cast %43 : vector<1x6x496xf32> to vector<6x496xf32>
    %45 = vector.shape_cast %42 : vector<6x496xf32> to vector<1x6x496xf32>
    tpu.vector_store %arg7[%c1_38, %c0_39, %c0_40], %45 {strides = array<i32>} : memref<2x6x496xf32, #tpu.memory_space<vmem>>, vector<1x6x496xf32>,
    return
  }
  func.func @transform_0(%arg0: i32) -> (i32, i32) {
    %c0_i32 = arith.constant 0 : i32
    %c0_i32_0 = arith.constant 0 : i32
    %c0_i32_1 = arith.constant 0 : i32
    return %c0_i32, %c0_i32_0 : i32, i32
  }
  func.func @transform_1(%arg0: i32) -> (i32, i32) {
    %c0_i32 = arith.constant 0 : i32
    %c0_i32_0 = arith.constant 0 : i32
    %c0_i32_1 = arith.constant 0 : i32
    return %c0_i32, %c0_i32_0 : i32, i32
  }
  func.func @transform_2(%arg0: i32) -> (i32, i32, i32) {
    %c0_i32 = arith.constant 0 : i32
    %c0_i32_0 = arith.constant 0 : i32
    %c0_i32_1 = arith.constant 0 : i32
    %c0_i32_2 = arith.constant 0 : i32
    return %c0_i32, %c0_i32_0, %c0_i32_1 : i32, i32, i32
  }
  func.func @transform_3(%arg0: i32) -> (i32, i32, i32) {
    %c0_i32 = arith.constant 0 : i32
    %c0_i32_0 = arith.constant 0 : i32
    %c0_i32_1 = arith.constant 0 : i32
    %c0_i32_2 = arith.constant 0 : i32
    return %c0_i32, %c0_i32_0, %c0_i32_1 : i32, i32, i32
  }
  func.func @transform_4(%arg0: i32) -> (i32, i32, i32) {
    %c0_i32 = arith.constant 0 : i32
    %c0_i32_0 = arith.constant 0 : i32
    %c0_i32_1 = arith.constant 0 : i32
    %c0_i32_2 = arith.constant 0 : i32
    return %c0_i32, %c0_i32_0, %c0_i32_1 : i32, i32, i32
  }
  func.func @transform_5(%arg0: i32) -> (i32, i32, i32) {
    %c0_i32 = arith.constant 0 : i32
    %c0_i32_0 = arith.constant 0 : i32
    %c0_i32_1 = arith.constant 0 : i32
    %c0_i32_2 = arith.constant 0 : i32
    return %c0_i32, %c0_i32_0, %c0_i32_1 : i32, i32, i32
  }
  func.func @transform_6(%arg0: i32) -> (i32, i32, i32) {
    %c0_i32 = arith.constant 0 : i32
    %c0_i32_0 = arith.constant 0 : i32
    %c0_i32_1 = arith.constant 0 : i32
    %c0_i32_2 = arith.constant 0 : i32
    return %c0_i32, %c0_i32_0, %c0_i32_1 : i32, i32, i32
  }
}

module attributes {stable_mosaic.version = 11 : i64} {
  func.func @_fc_stack_kernel(%arg0: i32, %arg1: memref<2x928xf32, #tpu.memory_space<vmem>>, %arg2: memref<928x2048xbf16, #tpu.memory_space<vmem>>, %arg3: memref<1x2048xf32, #tpu.memory_space<vmem>>, %arg4: memref<2048x512xbf16, #tpu.memory_space<vmem>>, %arg5: memref<1x512xf32, #tpu.memory_space<vmem>>, %arg6: memref<512x2xf32, #tpu.memory_space<vmem>>, %arg7: memref<1x2xf32, #tpu.memory_space<vmem>>, %arg8: memref<2x2xf32, #tpu.memory_space<vmem>>) attributes {dimension_semantics = [#tpu.dimension_semantics<arbitrary>], iteration_bounds = array<i64: 1>, scalar_prefetch = 0 : i64, scratch_operands = 0 : i64, tpu.core_type = #tpu.core_type<tc>, window_params = [{pipeline_mode = #tpu.pipeline_mode<synchronous>, transform_indices = @transform_0, window_bounds = array<i64: 2, 928>}, {pipeline_mode = #tpu.pipeline_mode<synchronous>, transform_indices = @transform_1, window_bounds = array<i64: 928, 2048>}, {pipeline_mode = #tpu.pipeline_mode<synchronous>, transform_indices = @transform_2, window_bounds = array<i64: 1, 2048>}, {pipeline_mode = #tpu.pipeline_mode<synchronous>, transform_indices = @transform_3, window_bounds = array<i64: 2048, 512>}, {pipeline_mode = #tpu.pipeline_mode<synchronous>, transform_indices = @transform_4, window_bounds = array<i64: 1, 512>}, {pipeline_mode = #tpu.pipeline_mode<synchronous>, transform_indices = @transform_5, window_bounds = array<i64: 512, 2>}, {pipeline_mode = #tpu.pipeline_mode<synchronous>, transform_indices = @transform_6, window_bounds = array<i64: 1, 2>}, {pipeline_mode = #tpu.pipeline_mode<synchronous>, transform_indices = @transform_7, window_bounds = array<i64: 2, 2>}]} {
    %c0 = arith.constant 0 : index
    %c0_0 = arith.constant 0 : index
    %0 = vector.load %arg1[%c0, %c0_0] : memref<2x928xf32, #tpu.memory_space<vmem>>, vector<2x928xf32>
    %1 = arith.truncf %0 : vector<2x928xf32> to vector<2x928xbf16>
    %c0_1 = arith.constant 0 : index
    %c0_2 = arith.constant 0 : index
    %2 = vector.load %arg2[%c0_1, %c0_2] : memref<928x2048xbf16, #tpu.memory_space<vmem>>, vector<928x2048xbf16>
    %cst = arith.constant dense<0.000000e+00> : vector<2x2048xf32>
    %3 = tpu.matmul %1, %2, %cst {dimension_numbers = #tpu.dot_dimension_numbers<[1], [0], [0], [1], [0, 0, 1, 1], [], []>} : vector<2x928xbf16>, vector<928x2048xbf16>, vector<2x2048xf32> -> vector<2x2048xf32>
    %c0_3 = arith.constant 0 : index
    %c0_4 = arith.constant 0 : index
    %4 = vector.load %arg3[%c0_3, %c0_4] : memref<1x2048xf32, #tpu.memory_space<vmem>>, vector<1x2048xf32>
    %5 = vector.broadcast %4 : vector<1x2048xf32> to vector<2x2048xf32>
    %6 = arith.addf %3, %5 : vector<2x2048xf32>
    %cst_5 = arith.constant 0.000000e+00 : f32
    %7 = vector.broadcast %cst_5 : f32 to vector<2x2048xf32>
    %8 = arith.maximumf %6, %7 : vector<2x2048xf32>
    %9 = arith.truncf %8 : vector<2x2048xf32> to vector<2x2048xbf16>
    %c0_6 = arith.constant 0 : index
    %c0_7 = arith.constant 0 : index
    %10 = vector.load %arg4[%c0_6, %c0_7] : memref<2048x512xbf16, #tpu.memory_space<vmem>>, vector<2048x512xbf16>
    %cst_8 = arith.constant dense<0.000000e+00> : vector<2x512xf32>
    %11 = tpu.matmul %9, %10, %cst_8 {dimension_numbers = #tpu.dot_dimension_numbers<[1], [0], [0], [1], [0, 0, 1, 1], [], []>} : vector<2x2048xbf16>, vector<2048x512xbf16>, vector<2x512xf32> -> vector<2x512xf32>
    %c0_9 = arith.constant 0 : index
    %c0_10 = arith.constant 0 : index
    %12 = vector.load %arg5[%c0_9, %c0_10] : memref<1x512xf32, #tpu.memory_space<vmem>>, vector<1x512xf32>
    %13 = vector.broadcast %12 : vector<1x512xf32> to vector<2x512xf32>
    %14 = arith.addf %11, %13 : vector<2x512xf32>
    %cst_11 = arith.constant 0.000000e+00 : f32
    %15 = vector.broadcast %cst_11 : f32 to vector<2x512xf32>
    %16 = arith.maximumf %14, %15 : vector<2x512xf32>
    %c0_12 = arith.constant 0 : index
    %c0_13 = arith.constant 0 : index
    %17 = vector.load %arg6[%c0_12, %c0_13] : memref<512x2xf32, #tpu.memory_space<vmem>>, vector<512x2xf32>
    %cst_14 = arith.constant dense<0.000000e+00> : vector<2x2xf32>
    %18 = tpu.matmul %16, %17, %cst_14 {dimension_numbers = #tpu.dot_dimension_numbers<[1], [0], [0], [1], [0, 0, 1, 1], [], []>} : vector<2x512xf32>, vector<512x2xf32>, vector<2x2xf32> -> vector<2x2xf32>
    %c0_15 = arith.constant 0 : index
    %c0_16 = arith.constant 0 : index
    %19 = vector.load %arg7[%c0_15, %c0_16] : memref<1x2xf32, #tpu.memory_space<vmem>>, vector<1x2xf32>
    %20 = vector.broadcast %19 : vector<1x2xf32> to vector<2x2xf32>
    %21 = arith.addf %18, %20 : vector<2x2xf32>
    %cst_17 = arith.constant dense<0xFF800000> : vector<2xf32>
    %22 = vector.multi_reduction <maximumf>, %21, %cst_17 [1] : vector<2x2xf32> to vector<2xf32>
    %23 = vector.shape_cast %22 : vector<2xf32> to vector<2x1xf32>
    %24 = vector.broadcast %23 : vector<2x1xf32> to vector<2x2xf32>
    %25 = arith.subf %21, %24 : vector<2x2xf32>
    %26 = math.exp %25 : vector<2x2xf32>
    %cst_18 = arith.constant dense<0.000000e+00> : vector<2xf32>
    %27 = vector.multi_reduction <add>, %26, %cst_18 [1] : vector<2x2xf32> to vector<2xf32>
    %28 = vector.shape_cast %27 : vector<2xf32> to vector<2x1xf32>
    %29 = math.log %28 : vector<2x1xf32>
    %30 = vector.broadcast %29 : vector<2x1xf32> to vector<2x2xf32>
    %31 = arith.subf %25, %30 : vector<2x2xf32>
    %c0_19 = arith.constant 0 : index
    %c0_20 = arith.constant 0 : index
    %32 = vector.load %arg8[%c0_19, %c0_20] : memref<2x2xf32, #tpu.memory_space<vmem>>, vector<2x2xf32>
    tpu.vector_store %arg8[%c0_19, %c0_20], %31 {strides = array<i32>} : memref<2x2xf32, #tpu.memory_space<vmem>>, vector<2x2xf32>,
    return
  }
  func.func @transform_0(%arg0: i32) -> (i32, i32) {
    %c0_i32 = arith.constant 0 : i32
    %c0_i32_0 = arith.constant 0 : i32
    %c0_i32_1 = arith.constant 0 : i32
    return %c0_i32, %c0_i32_0 : i32, i32
  }
  func.func @transform_1(%arg0: i32) -> (i32, i32) {
    %c0_i32 = arith.constant 0 : i32
    %c0_i32_0 = arith.constant 0 : i32
    %c0_i32_1 = arith.constant 0 : i32
    return %c0_i32, %c0_i32_0 : i32, i32
  }
  func.func @transform_2(%arg0: i32) -> (i32, i32) {
    %c0_i32 = arith.constant 0 : i32
    %c0_i32_0 = arith.constant 0 : i32
    %c0_i32_1 = arith.constant 0 : i32
    return %c0_i32, %c0_i32_0 : i32, i32
  }
  func.func @transform_3(%arg0: i32) -> (i32, i32) {
    %c0_i32 = arith.constant 0 : i32
    %c0_i32_0 = arith.constant 0 : i32
    %c0_i32_1 = arith.constant 0 : i32
    return %c0_i32, %c0_i32_0 : i32, i32
  }
  func.func @transform_4(%arg0: i32) -> (i32, i32) {
    %c0_i32 = arith.constant 0 : i32
    %c0_i32_0 = arith.constant 0 : i32
    %c0_i32_1 = arith.constant 0 : i32
    return %c0_i32, %c0_i32_0 : i32, i32
  }
  func.func @transform_5(%arg0: i32) -> (i32, i32) {
    %c0_i32 = arith.constant 0 : i32
    %c0_i32_0 = arith.constant 0 : i32
    %c0_i32_1 = arith.constant 0 : i32
    return %c0_i32, %c0_i32_0 : i32, i32
  }
  func.func @transform_6(%arg0: i32) -> (i32, i32) {
    %c0_i32 = arith.constant 0 : i32
    %c0_i32_0 = arith.constant 0 : i32
    %c0_i32_1 = arith.constant 0 : i32
    return %c0_i32, %c0_i32_0 : i32, i32
  }
  func.func @transform_7(%arg0: i32) -> (i32, i32) {
    %c0_i32 = arith.constant 0 : i32
    %c0_i32_0 = arith.constant 0 : i32
    %c0_i32_1 = arith.constant 0 : i32
    return %c0_i32, %c0_i32_0 : i32, i32
  }
}

module attributes {stable_mosaic.version = 11 : i64} {
  func.func @_conv_relu_pool_kernel(%arg0: i32, %arg1: memref<16x150xbf16, #tpu.memory_space<vmem>>, %arg2: memref<16x1xf32, #tpu.memory_space<vmem>>, %arg3: memref<2x150x58xbf16, #tpu.memory_space<vmem>>, %arg4: memref<2x150x58xbf16, #tpu.memory_space<vmem>>, %arg5: memref<2x150x58xbf16, #tpu.memory_space<vmem>>, %arg6: memref<2x150x58xbf16, #tpu.memory_space<vmem>>, %arg7: memref<2x16x58xf32, #tpu.memory_space<vmem>>) attributes {dimension_semantics = [#tpu.dimension_semantics<arbitrary>], iteration_bounds = array<i64: 1>, scalar_prefetch = 0 : i64, scratch_operands = 0 : i64, tpu.core_type = #tpu.core_type<tc>, window_params = [{pipeline_mode = #tpu.pipeline_mode<synchronous>, transform_indices = @transform_0, window_bounds = array<i64: 16, 150>}, {pipeline_mode = #tpu.pipeline_mode<synchronous>, transform_indices = @transform_1, window_bounds = array<i64: 16, 1>}, {pipeline_mode = #tpu.pipeline_mode<synchronous>, transform_indices = @transform_2, window_bounds = array<i64: 2, 150, 58>}, {pipeline_mode = #tpu.pipeline_mode<synchronous>, transform_indices = @transform_3, window_bounds = array<i64: 2, 150, 58>}, {pipeline_mode = #tpu.pipeline_mode<synchronous>, transform_indices = @transform_4, window_bounds = array<i64: 2, 150, 58>}, {pipeline_mode = #tpu.pipeline_mode<synchronous>, transform_indices = @transform_5, window_bounds = array<i64: 2, 150, 58>}, {pipeline_mode = #tpu.pipeline_mode<synchronous>, transform_indices = @transform_6, window_bounds = array<i64: 2, 16, 58>}]} {
    %c0 = arith.constant 0 : index
    %c0_0 = arith.constant 0 : index
    %0 = vector.load %arg1[%c0, %c0_0] : memref<16x150xbf16, #tpu.memory_space<vmem>>, vector<16x150xbf16>
    %c0_1 = arith.constant 0 : index
    %c0_2 = arith.constant 0 : index
    %1 = vector.load %arg2[%c0_1, %c0_2] : memref<16x1xf32, #tpu.memory_space<vmem>>, vector<16x1xf32>
    %c0_3 = arith.constant 0 : index
    %c0_4 = arith.constant 0 : index
    %c0_5 = arith.constant 0 : index
    %2 = vector.load %arg3[%c0_3, %c0_4, %c0_5] : memref<2x150x58xbf16, #tpu.memory_space<vmem>>, vector<1x150x58xbf16>
    %3 = vector.shape_cast %2 : vector<1x150x58xbf16> to vector<150x58xbf16>
    %cst = arith.constant dense<0.000000e+00> : vector<16x58xf32>
    %4 = tpu.matmul %0, %3, %cst {dimension_numbers = #tpu.dot_dimension_numbers<[1], [0], [0], [1], [0, 0, 1, 1], [], []>} : vector<16x150xbf16>, vector<150x58xbf16>, vector<16x58xf32> -> vector<16x58xf32>
    %c0_6 = arith.constant 0 : index
    %c0_7 = arith.constant 0 : index
    %c0_8 = arith.constant 0 : index
    %5 = vector.load %arg4[%c0_6, %c0_7, %c0_8] : memref<2x150x58xbf16, #tpu.memory_space<vmem>>, vector<1x150x58xbf16>
    %6 = vector.shape_cast %5 : vector<1x150x58xbf16> to vector<150x58xbf16>
    %cst_9 = arith.constant dense<0.000000e+00> : vector<16x58xf32>
    %7 = tpu.matmul %0, %6, %cst_9 {dimension_numbers = #tpu.dot_dimension_numbers<[1], [0], [0], [1], [0, 0, 1, 1], [], []>} : vector<16x150xbf16>, vector<150x58xbf16>, vector<16x58xf32> -> vector<16x58xf32>
    %8 = arith.maximumf %4, %7 : vector<16x58xf32>
    %c0_10 = arith.constant 0 : index
    %c0_11 = arith.constant 0 : index
    %c0_12 = arith.constant 0 : index
    %9 = vector.load %arg5[%c0_10, %c0_11, %c0_12] : memref<2x150x58xbf16, #tpu.memory_space<vmem>>, vector<1x150x58xbf16>
    %10 = vector.shape_cast %9 : vector<1x150x58xbf16> to vector<150x58xbf16>
    %cst_13 = arith.constant dense<0.000000e+00> : vector<16x58xf32>
    %11 = tpu.matmul %0, %10, %cst_13 {dimension_numbers = #tpu.dot_dimension_numbers<[1], [0], [0], [1], [0, 0, 1, 1], [], []>} : vector<16x150xbf16>, vector<150x58xbf16>, vector<16x58xf32> -> vector<16x58xf32>
    %12 = arith.maximumf %8, %11 : vector<16x58xf32>
    %c0_14 = arith.constant 0 : index
    %c0_15 = arith.constant 0 : index
    %c0_16 = arith.constant 0 : index
    %13 = vector.load %arg6[%c0_14, %c0_15, %c0_16] : memref<2x150x58xbf16, #tpu.memory_space<vmem>>, vector<1x150x58xbf16>
    %14 = vector.shape_cast %13 : vector<1x150x58xbf16> to vector<150x58xbf16>
    %cst_17 = arith.constant dense<0.000000e+00> : vector<16x58xf32>
    %15 = tpu.matmul %0, %14, %cst_17 {dimension_numbers = #tpu.dot_dimension_numbers<[1], [0], [0], [1], [0, 0, 1, 1], [], []>} : vector<16x150xbf16>, vector<150x58xbf16>, vector<16x58xf32> -> vector<16x58xf32>
    %16 = arith.maximumf %12, %15 : vector<16x58xf32>
    %17 = vector.broadcast %1 : vector<16x1xf32> to vector<16x58xf32>
    %18 = arith.addf %16, %17 : vector<16x58xf32>
    %cst_18 = arith.constant 0.000000e+00 : f32
    %19 = vector.broadcast %cst_18 : f32 to vector<16x58xf32>
    %20 = arith.maximumf %18, %19 : vector<16x58xf32>
    %c0_19 = arith.constant 0 : index
    %c0_20 = arith.constant 0 : index
    %c0_21 = arith.constant 0 : index
    %21 = vector.load %arg7[%c0_19, %c0_20, %c0_21] : memref<2x16x58xf32, #tpu.memory_space<vmem>>, vector<1x16x58xf32>
    %22 = vector.shape_cast %21 : vector<1x16x58xf32> to vector<16x58xf32>
    %23 = vector.shape_cast %20 : vector<16x58xf32> to vector<1x16x58xf32>
    tpu.vector_store %arg7[%c0_19, %c0_20, %c0_21], %23 {strides = array<i32>} : memref<2x16x58xf32, #tpu.memory_space<vmem>>, vector<1x16x58xf32>,
    %c1 = arith.constant 1 : index
    %c0_22 = arith.constant 0 : index
    %c0_23 = arith.constant 0 : index
    %24 = vector.load %arg3[%c1, %c0_22, %c0_23] : memref<2x150x58xbf16, #tpu.memory_space<vmem>>, vector<1x150x58xbf16>
    %25 = vector.shape_cast %24 : vector<1x150x58xbf16> to vector<150x58xbf16>
    %cst_24 = arith.constant dense<0.000000e+00> : vector<16x58xf32>
    %26 = tpu.matmul %0, %25, %cst_24 {dimension_numbers = #tpu.dot_dimension_numbers<[1], [0], [0], [1], [0, 0, 1, 1], [], []>} : vector<16x150xbf16>, vector<150x58xbf16>, vector<16x58xf32> -> vector<16x58xf32>
    %c1_25 = arith.constant 1 : index
    %c0_26 = arith.constant 0 : index
    %c0_27 = arith.constant 0 : index
    %27 = vector.load %arg4[%c1_25, %c0_26, %c0_27] : memref<2x150x58xbf16, #tpu.memory_space<vmem>>, vector<1x150x58xbf16>
    %28 = vector.shape_cast %27 : vector<1x150x58xbf16> to vector<150x58xbf16>
    %cst_28 = arith.constant dense<0.000000e+00> : vector<16x58xf32>
    %29 = tpu.matmul %0, %28, %cst_28 {dimension_numbers = #tpu.dot_dimension_numbers<[1], [0], [0], [1], [0, 0, 1, 1], [], []>} : vector<16x150xbf16>, vector<150x58xbf16>, vector<16x58xf32> -> vector<16x58xf32>
    %30 = arith.maximumf %26, %29 : vector<16x58xf32>
    %c1_29 = arith.constant 1 : index
    %c0_30 = arith.constant 0 : index
    %c0_31 = arith.constant 0 : index
    %31 = vector.load %arg5[%c1_29, %c0_30, %c0_31] : memref<2x150x58xbf16, #tpu.memory_space<vmem>>, vector<1x150x58xbf16>
    %32 = vector.shape_cast %31 : vector<1x150x58xbf16> to vector<150x58xbf16>
    %cst_32 = arith.constant dense<0.000000e+00> : vector<16x58xf32>
    %33 = tpu.matmul %0, %32, %cst_32 {dimension_numbers = #tpu.dot_dimension_numbers<[1], [0], [0], [1], [0, 0, 1, 1], [], []>} : vector<16x150xbf16>, vector<150x58xbf16>, vector<16x58xf32> -> vector<16x58xf32>
    %34 = arith.maximumf %30, %33 : vector<16x58xf32>
    %c1_33 = arith.constant 1 : index
    %c0_34 = arith.constant 0 : index
    %c0_35 = arith.constant 0 : index
    %35 = vector.load %arg6[%c1_33, %c0_34, %c0_35] : memref<2x150x58xbf16, #tpu.memory_space<vmem>>, vector<1x150x58xbf16>
    %36 = vector.shape_cast %35 : vector<1x150x58xbf16> to vector<150x58xbf16>
    %cst_36 = arith.constant dense<0.000000e+00> : vector<16x58xf32>
    %37 = tpu.matmul %0, %36, %cst_36 {dimension_numbers = #tpu.dot_dimension_numbers<[1], [0], [0], [1], [0, 0, 1, 1], [], []>} : vector<16x150xbf16>, vector<150x58xbf16>, vector<16x58xf32> -> vector<16x58xf32>
    %38 = arith.maximumf %34, %37 : vector<16x58xf32>
    %39 = vector.broadcast %1 : vector<16x1xf32> to vector<16x58xf32>
    %40 = arith.addf %38, %39 : vector<16x58xf32>
    %cst_37 = arith.constant 0.000000e+00 : f32
    %41 = vector.broadcast %cst_37 : f32 to vector<16x58xf32>
    %42 = arith.maximumf %40, %41 : vector<16x58xf32>
    %c1_38 = arith.constant 1 : index
    %c0_39 = arith.constant 0 : index
    %c0_40 = arith.constant 0 : index
    %43 = vector.load %arg7[%c1_38, %c0_39, %c0_40] : memref<2x16x58xf32, #tpu.memory_space<vmem>>, vector<1x16x58xf32>
    %44 = vector.shape_cast %43 : vector<1x16x58xf32> to vector<16x58xf32>
    %45 = vector.shape_cast %42 : vector<16x58xf32> to vector<1x16x58xf32>
    tpu.vector_store %arg7[%c1_38, %c0_39, %c0_40], %45 {strides = array<i32>} : memref<2x16x58xf32, #tpu.memory_space<vmem>>, vector<1x16x58xf32>,
    return
  }
  func.func @transform_0(%arg0: i32) -> (i32, i32) {
    %c0_i32 = arith.constant 0 : i32
    %c0_i32_0 = arith.constant 0 : i32
    %c0_i32_1 = arith.constant 0 : i32
    return %c0_i32, %c0_i32_0 : i32, i32
  }
  func.func @transform_1(%arg0: i32) -> (i32, i32) {
    %c0_i32 = arith.constant 0 : i32
    %c0_i32_0 = arith.constant 0 : i32
    %c0_i32_1 = arith.constant 0 : i32
    return %c0_i32, %c0_i32_0 : i32, i32
  }
  func.func @transform_2(%arg0: i32) -> (i32, i32, i32) {
    %c0_i32 = arith.constant 0 : i32
    %c0_i32_0 = arith.constant 0 : i32
    %c0_i32_1 = arith.constant 0 : i32
    %c0_i32_2 = arith.constant 0 : i32
    return %c0_i32, %c0_i32_0, %c0_i32_1 : i32, i32, i32
  }
  func.func @transform_3(%arg0: i32) -> (i32, i32, i32) {
    %c0_i32 = arith.constant 0 : i32
    %c0_i32_0 = arith.constant 0 : i32
    %c0_i32_1 = arith.constant 0 : i32
    %c0_i32_2 = arith.constant 0 : i32
    return %c0_i32, %c0_i32_0, %c0_i32_1 : i32, i32, i32
  }
  func.func @transform_4(%arg0: i32) -> (i32, i32, i32) {
    %c0_i32 = arith.constant 0 : i32
    %c0_i32_0 = arith.constant 0 : i32
    %c0_i32_1 = arith.constant 0 : i32
    %c0_i32_2 = arith.constant 0 : i32
    return %c0_i32, %c0_i32_0, %c0_i32_1 : i32, i32, i32
  }
  func.func @transform_5(%arg0: i32) -> (i32, i32, i32) {
    %c0_i32 = arith.constant 0 : i32
    %c0_i32_0 = arith.constant 0 : i32
    %c0_i32_1 = arith.constant 0 : i32
    %c0_i32_2 = arith.constant 0 : i32
    return %c0_i32, %c0_i32_0, %c0_i32_1 : i32, i32, i32
  }
  func.func @transform_6(%arg0: i32) -> (i32, i32, i32) {
    %c0_i32 = arith.constant 0 : i32
    %c0_i32_0 = arith.constant 0 : i32
    %c0_i32_1 = arith.constant 0 : i32
    %c0_i32_2 = arith.constant 0 : i32
    return %c0_i32, %c0_i32_0, %c0_i32_1 : i32, i32, i32
  }
}

</mosaic_0001>

<bundles_post_ra>
// kernel: conv_network_forward.3
= control target key start
LH: loop header
LB: loop body
LE: loop exit
PB: predicated region body
PF: predicated region fallthrough
CT: control target
= control target key end

     0   :  { %v2280_v1 = vmov 0   ;;  %vm146_vm0 = vcmask 1044480   ;;  %vm147_vm1 = vcmask 1045504   ;;  %v2281_v10 = vmov 65535   ;;  %s2924_s2 = inlined_call_operand.vmem [shape: bf16[2,75,496], index: 2, kind: input, shape index: {}]   ;;  %s2925_s3 = inlined_call_operand.vmem [shape: bf16[2,75,496], index: 3, kind: input, shape index: {}]   ;;  %s2926_s0 = inlined_call_operand.vmem [shape: bf16[6,75], index: 0, kind: input, shape index: {}]   ;;  %s2927_s4 = inlined_call_operand.vmem [shape: bf16[2,75,496], index: 4, kind: input, shape index: {}]   ;;  %s2928_s5 = inlined_call_operand.vmem [shape: bf16[2,75,496], index: 5, kind: input, shape index: {}]   ;;  %s2929_s1 = inlined_call_operand.vmem [shape: f32[6,1], index: 1, kind: input, shape index: {}]   ;;  %s2930_s6 = inlined_call_operand.vmem [shape: f32[2,6,496], index: 6, kind: output, shape index: {}]  }
   0x1   :  { %v2040_v0 = vld [vmem:[%s2924_s2 + $0x4] ss:$16 sps:$4 sm:$0xff]   ;;  %194 = vmatprep.mubr.bf16.mxu0 %v2280_v1  ;;  %235 = vmatprep.mubr.bf16.mxu1 %v2280_v1  ;;  %v2042_v2 = vld [vmem:[%s2924_s2 + $0xc] ss:$16 sps:$4 sm:$0xff]   ;;  %v2044_v3 = vld [vmem:[%s2924_s2] ss:$16 sps:$4 sm:$0xff]  }
   0x2   :  { %2039 = vset.pattern.permute.xlu0 %v2280_v1  ;;  %162 = vmatprep.subr.bf16.mxu0 %v2040_v0  ;;  %v2045_v4 = vld [vmem:[%s2924_s2 + $0x8] ss:$16 sps:$4 sm:$0xff]   ;;  %v2046_v5 = vld [vmem:[%s2924_s2 + $0x24] ss:$16 sps:$4 sm:$0xff]   ;;  %v2048_v6 = vld [vmem:[%s2924_s2 + $0x2c] ss:$16 sps:$4 sm:$0xff]  }
   0x3   :  { %203 = vmatprep.subr.bf16.mxu1 %v2042_v2  ;;  %163 = vmatpush1.bf16.msra.mxu0 %v2044_v3  ;;  %v2050_v7 = vld [vmem:[%s2924_s2 + $0x20] ss:$16 sps:$4 sm:$0xff]   ;;  %v2051_v8 = vld [vmem:[%s2924_s2 + $0x28] ss:$16 sps:$4 sm:$0xff]   ;;  %v2052_v9 = vld [vmem:[%s2924_s2 + $0x44] ss:$16 sps:$4 sm:$0xff]  }
   0x4   :  { %204 = vmatpush1.bf16.msra.mxu1 %v2045_v4  ;;  %164 = vmatprep.subr.bf16.mxu0 %v2046_v5  ;;  %v148_v11 = vsel %vm146_vm0, 4294967295, %v2281_v10  ;;  %v2054_v12 = vld [vmem:[%s2924_s2 + $0x4c] ss:$16 sps:$4 sm:$0xff]   ;;  %v2056_v13 = vld [vmem:[%s2924_s2 + $0x40] ss:$16 sps:$4 sm:$0xff]   ;;  %vm142_vm2 = vcmask 613376  }
   0x5   :  { %205 = vmatprep.subr.bf16.mxu1 %v2048_v6  ;;  %v2057_v14 = vld [vmem:[%s2924_s2 + $0x48] ss:$16 sps:$4 sm:$0xff]   ;;  %v2058_v15 = vld [vmem:[%s2924_s2 + $0x64] ss:$16 sps:$4 sm:$0xff]   ;;  %v2060_v16 = vld [vmem:[%s2924_s2 + $0x6c] ss:$16 sps:$4 sm:$0xff]  }
   0x6   :  { %v2062_v17 = vld [vmem:[%s2924_s2 + $0x60] ss:$16 sps:$4 sm:$0xff]   ;;  %v2063_v18 = vld [vmem:[%s2924_s2 + $0x68] ss:$16 sps:$4 sm:$0xff]   ;;  %v2368_v19 = vsel %vm147_vm1, %v148_v11, 0  ;;  %vm902_vm3 = vcmask 914432  }
   0x7   :  { %165 = vmatpush1.bf16.msra.mxu0 %v2050_v7  ;;  %v2064_v20 = vld [vmem:[%s2924_s2 + $0x84] ss:$16 sps:$4 sm:$0x3f]   ;;  %v2066_v21 = vld [vmem:[%s2924_s2 + $0x8c] ss:$16 sps:$4 sm:$0x3f]  }
   0x8   :  { %206 = vmatpush1.bf16.msra.mxu1 %v2051_v8  ;;  %166 = vmatprep.subr.bf16.mxu0 %v2052_v9  ;;  %v154_v22 = vand.u32 %v2064_v20, %v2368_v19  ;;  %v2068_v23 = vld [vmem:[%s2924_s2 + $0x80] ss:$16 sps:$4 sm:$0x3f]   ;;  %v2069_v24 = vld [vmem:[%s2924_s2 + $0x88] ss:$16 sps:$4 sm:$0x3f]   ;;  %v160_v25 = vand.u32 %v2066_v21, %v2368_v19 }
   0x9   :  { %207 = vmatprep.subr.bf16.mxu1 %v2054_v12  ;;  %v151_v26 = vand.u32 %v2068_v23, %v2368_v19  ;;  %v157_v27 = vand.u32 %v2069_v24, %v2368_v19  ;;  %v2072_v28 = vld [vmem:[%s2925_s3 + $0x4] ss:$16 sps:$4 sm:$0xff]   ;;  %v2075_v29 = vld [vmem:[%s2925_s3 + $0xc] ss:$16 sps:$4 sm:$0xff]   ;;  %v2395_v30 = vld [vmem:[%s2926_s0] sm:$0x7] }
   0xa   :  { %v2070_v31 = vld [vmem:[%s2925_s3] ss:$16 sps:$4 sm:$0xff]   ;;  %v2073_v32 = vld [vmem:[%s2925_s3 + $0x8] ss:$16 sps:$4 sm:$0xff]   ;;  %v2078_v33 = vld [vmem:[%s2925_s3 + $0x24] ss:$16 sps:$4 sm:$0xff]  }
   0xb   :  { %167 = vmatpush1.bf16.msra.mxu0 %v2056_v13  ;;  %v2081_v34 = vld [vmem:[%s2925_s3 + $0x2c] ss:$16 sps:$4 sm:$0xff]   ;;  %v2076_v35 = vld [vmem:[%s2925_s3 + $0x20] ss:$16 sps:$4 sm:$0xff]   ;;  %v2079_v36 = vld [vmem:[%s2925_s3 + $0x28] ss:$16 sps:$4 sm:$0xff]  }
   0xc   :  { %208 = vmatpush1.bf16.msra.mxu1 %v2057_v14  ;;  %168 = vmatprep.subr.bf16.mxu0 %v2058_v15  ;;  %v2084_v37 = vld [vmem:[%s2925_s3 + $0x44] ss:$16 sps:$4 sm:$0xff]   ;;  %v2087_v38 = vld [vmem:[%s2925_s3 + $0x4c] ss:$16 sps:$4 sm:$0xff]   ;;  %v2082_v39 = vld [vmem:[%s2925_s3 + $0x40] ss:$16 sps:$4 sm:$0xff]  }
   0xd   :  { %209 = vmatprep.subr.bf16.mxu1 %v2060_v16  ;;  %v2085_v40 = vld [vmem:[%s2925_s3 + $0x48] ss:$16 sps:$4 sm:$0xff]   ;;  %v2090_v41 = vld [vmem:[%s2925_s3 + $0x64] ss:$16 sps:$4 sm:$0xff]   ;;  %v2093_v42 = vld [vmem:[%s2925_s3 + $0x6c] ss:$16 sps:$4 sm:$0xff]  }
   0xe   :  { %v2096_v43 = vld [vmem:[%s2925_s3 + $0x84] ss:$16 sps:$4 sm:$0x3f]   ;;  %v2099_v44 = vld [vmem:[%s2925_s3 + $0x8c] ss:$16 sps:$4 sm:$0x3f]  }
   0xf   :  { %169 = vmatpush1.bf16.msra.mxu0 %v2062_v17  ;;  %v2088_v45 = vld [vmem:[%s2925_s3 + $0x60] ss:$16 sps:$4 sm:$0xff]   ;;  %v2091_v47 = vld [vmem:[%s2925_s3 + $0x68] ss:$16 sps:$4 sm:$0xff]   ;;  %v364_v49 = vand.u32 %v2096_v43, %v2368_v19  ;;  %v370_v50 = vand.u32 %v2099_v44, %v2368_v19  ;;  %v2102_v53 = vld [vmem:[%s2927_s4 + $0x4] ss:$16 sps:$4 sm:$0xff]  }
  0x10   :  { %210 = vmatpush1.bf16.msra.mxu1 %v2063_v18  ;;  %170 = vmatprep.subr.bf16.mxu0 %v154_v22  ;;  %v2094_v46 = vld [vmem:[%s2925_s3 + $0x80] ss:$16 sps:$4 sm:$0x3f]   ;;  %v2097_v48 = vld [vmem:[%s2925_s3 + $0x88] ss:$16 sps:$4 sm:$0x3f]  }
  0x11   :  { %211 = vmatprep.subr.bf16.mxu1 %v160_v25  ;;  %v361_v51 = vand.u32 %v2094_v46, %v2368_v19  ;;  %v367_v52 = vand.u32 %v2097_v48, %v2368_v19  ;;  %v2105_v54 = vld [vmem:[%s2927_s4 + $0xc] ss:$16 sps:$4 sm:$0xff]   ;;  %v2100_v55 = vld [vmem:[%s2927_s4] ss:$16 sps:$4 sm:$0xff]   ;;  %v2103_v56 = vld [vmem:[%s2927_s4 + $0x8] ss:$16 sps:$4 sm:$0xff]  }
  0x12   :  { %v2108_v57 = vld [vmem:[%s2927_s4 + $0x24] ss:$16 sps:$4 sm:$0xff]   ;;  %v2111_v58 = vld [vmem:[%s2927_s4 + $0x2c] ss:$16 sps:$4 sm:$0xff]   ;;  %v2106_v59 = vld [vmem:[%s2927_s4 + $0x20] ss:$16 sps:$4 sm:$0xff]  }
  0x13   :  { %171 = vmatpush1.bf16.msra.mxu0 %v151_v26  ;;  %v2109_v60 = vld [vmem:[%s2927_s4 + $0x28] ss:$16 sps:$4 sm:$0xff]   ;;  %v2114_v61 = vld [vmem:[%s2927_s4 + $0x44] ss:$16 sps:$4 sm:$0xff]   ;;  %v2117_v62 = vld [vmem:[%s2927_s4 + $0x4c] ss:$16 sps:$4 sm:$0xff]  }
  0x14   :  { %212 = vmatpush1.bf16.msra.mxu1 %v157_v27  ;;  %372 = vmatprep.subr.bf16.mxu0 %v2072_v28  ;;  %v2112_v63 = vld [vmem:[%s2927_s4 + $0x40] ss:$16 sps:$4 sm:$0xff]   ;;  %v2115_v0 = vld [vmem:[%s2927_s4 + $0x48] ss:$16 sps:$4 sm:$0xff]   ;;  %v2120_v2 = vld [vmem:[%s2927_s4 + $0x64] ss:$16 sps:$4 sm:$0xff]  }
  0x15   :  { %413 = vmatprep.subr.bf16.mxu1 %v2075_v29  ;;  %v2123_v3 = vld [vmem:[%s2927_s4 + $0x6c] ss:$16 sps:$4 sm:$0xff]   ;;  %v2126_v4 = vld [vmem:[%s2927_s4 + $0x84] ss:$16 sps:$4 sm:$0x3f]  }
  0x16   :  { %1797 = vmatmul.mubr.msk.bf16.vlgmr.msra.gmra.mrb[0].mxu0 %vm142_vm2, %v2395_v30  ;;  %v2129_v5 = vld [vmem:[%s2927_s4 + $0x8c] ss:$16 sps:$4 sm:$0x3f]   ;;  %v2118_v6 = vld [vmem:[%s2927_s4 + $0x60] ss:$16 sps:$4 sm:$0xff]   ;;  %v578_v10 = vand.u32 %v2126_v4, %v2368_v19 }
  0x17   :  { %1798 = vmatmul.mubr.msk.bf16.vlgmr.msra.gmra.mrb[0].mxu1 %vm142_vm2, %v2395_v30  ;;  %373 = vmatpush1.bf16.msra.mxu0 %v2070_v31  ;;  %v2121_v7 = vld [vmem:[%s2927_s4 + $0x68] ss:$16 sps:$4 sm:$0xff]   ;;  %v2124_v8 = vld [vmem:[%s2927_s4 + $0x80] ss:$16 sps:$4 sm:$0x3f]   ;;  %v584_v11 = vand.u32 %v2129_v5, %v2368_v19 }
  0x18   :  { %414 = vmatpush1.bf16.msra.mxu1 %v2073_v32  ;;  %374 = vmatprep.subr.bf16.mxu0 %v2078_v33  ;;  %v2127_v9 = vld [vmem:[%s2927_s4 + $0x88] ss:$16 sps:$4 sm:$0x3f]   ;;  %v575_v12 = vand.u32 %v2124_v8, %v2368_v19  ;;  %v2132_v14 = vld [vmem:[%s2928_s5 + $0x4] ss:$16 sps:$4 sm:$0xff]  }
  0x19   :  { %415 = vmatprep.subr.bf16.mxu1 %v2081_v34  ;;  %404 = vmatprep.mubr.bf16.mxu0 %v2280_v1  ;;  %v581_v13 = vand.u32 %v2127_v9, %v2368_v19  ;;  %v2135_v15 = vld [vmem:[%s2928_s5 + $0xc] ss:$16 sps:$4 sm:$0xff]   ;;  %v2130_v16 = vld [vmem:[%s2928_s5] ss:$16 sps:$4 sm:$0xff]   ;;  %v2133_v17 = vld [vmem:[%s2928_s5 + $0x8] ss:$16 sps:$4 sm:$0xff]  }
  0x1a   :  { %445 = vmatprep.mubr.bf16.mxu1 %v2280_v1  ;;  %v2138_v18 = vld [vmem:[%s2928_s5 + $0x24] ss:$16 sps:$4 sm:$0xff]   ;;  %v2141_v20 = vld [vmem:[%s2928_s5 + $0x2c] ss:$16 sps:$4 sm:$0xff]   ;;  %v2136_v21 = vld [vmem:[%s2928_s5 + $0x20] ss:$16 sps:$4 sm:$0xff]  }
  0x1b   :  { %375 = vmatpush1.bf16.msra.mxu0 %v2076_v35  ;;  %v2139_v22 = vld [vmem:[%s2928_s5 + $0x28] ss:$16 sps:$4 sm:$0xff]   ;;  %v2144_v23 = vld [vmem:[%s2928_s5 + $0x44] ss:$16 sps:$4 sm:$0xff]   ;;  %v2147_v24 = vld [vmem:[%s2928_s5 + $0x4c] ss:$16 sps:$4 sm:$0xff]  }
  0x1c   :  { %416 = vmatpush1.bf16.msra.mxu1 %v2079_v36  ;;  %376 = vmatprep.subr.bf16.mxu0 %v2084_v37  ;;  %v2142_v25 = vld [vmem:[%s2928_s5 + $0x40] ss:$16 sps:$4 sm:$0xff]   ;;  %v2145_v26 = vld [vmem:[%s2928_s5 + $0x48] ss:$16 sps:$4 sm:$0xff]   ;;  %v2150_v27 = vld [vmem:[%s2928_s5 + $0x64] ss:$16 sps:$4 sm:$0xff]  }
  0x1d   :  { %417 = vmatprep.subr.bf16.mxu1 %v2087_v38  ;;  %v2156_v28 = vld [vmem:[%s2928_s5 + $0x84] ss:$16 sps:$4 sm:$0x3f]   ;;  %v2153_v29 = vld [vmem:[%s2928_s5 + $0x6c] ss:$16 sps:$4 sm:$0xff]  }
  0x1e   :  { %v2159_v31 = vld [vmem:[%s2928_s5 + $0x8c] ss:$16 sps:$4 sm:$0x3f]   ;;  %v2148_v32 = vld [vmem:[%s2928_s5 + $0x60] ss:$16 sps:$4 sm:$0xff]   ;;  %v792_v36 = vand.u32 %v2156_v28, %v2368_v19 }
  0x1f   :  { %377 = vmatpush1.bf16.msra.mxu0 %v2082_v39  ;;  %v2154_v33 = vld [vmem:[%s2928_s5 + $0x80] ss:$16 sps:$4 sm:$0x3f]   ;;  %v2151_v34 = vld [vmem:[%s2928_s5 + $0x68] ss:$16 sps:$4 sm:$0xff]   ;;  %v798_v37 = vand.u32 %v2159_v31, %v2368_v19 }
  0x20   :  { %418 = vmatpush1.bf16.msra.mxu1 %v2085_v40  ;;  %378 = vmatprep.subr.bf16.mxu0 %v2090_v41  ;;  %v2157_v35 = vld [vmem:[%s2928_s5 + $0x88] ss:$16 sps:$4 sm:$0x3f]   ;;  %v789_v38 = vand.u32 %v2154_v33, %v2368_v19  ;;  %v2162_v40 = vld [vmem:[%s2924_s2 + $0xa4] ss:$16 sps:$4 sm:$0xff]  }
  0x21   :  { %419 = vmatprep.subr.bf16.mxu1 %v2093_v42  ;;  %v795_v39 = vand.u32 %v2157_v35, %v2368_v19  ;;  %v2165_v41 = vld [vmem:[%s2924_s2 + $0xac] ss:$16 sps:$4 sm:$0xff]   ;;  %v2160_v42 = vld [vmem:[%s2924_s2 + $0xa0] ss:$16 sps:$4 sm:$0xff]   ;;  %v2163_v43 = vld [vmem:[%s2924_s2 + $0xa8] ss:$16 sps:$4 sm:$0xff]  }
  0x22   :  { %v2168_v44 = vld [vmem:[%s2924_s2 + $0xc4] ss:$16 sps:$4 sm:$0xff]   ;;  %v2166_v46 = vld [vmem:[%s2924_s2 + $0xc0] ss:$16 sps:$4 sm:$0xff]   ;;  %v2193_v4 = vld [vmem:[%s2925_s3 + $0xa8] ss:$16 sps:$4 sm:$0xff]  }
  0x23   :  { %379 = vmatpush1.bf16.msra.mxu0 %v2088_v45  ;;  %v2171_v45 = vld [vmem:[%s2924_s2 + $0xcc] ss:$16 sps:$4 sm:$0xff]   ;;  %v2174_v48 = vld [vmem:[%s2924_s2 + $0xe4] ss:$16 sps:$4 sm:$0xff]   ;;  %v2199_v8 = vld [vmem:[%s2925_s3 + $0xc8] ss:$16 sps:$4 sm:$0xff]  }
  0x24   :  { %420 = vmatpush1.bf16.msra.mxu1 %v2091_v47  ;;  %380 = vmatprep.subr.bf16.mxu0 %v364_v49  ;;  %v2169_v47 = vld [vmem:[%s2924_s2 + $0xc8] ss:$16 sps:$4 sm:$0xff]   ;;  %v2177_v49 = vld [vmem:[%s2924_s2 + $0xec] ss:$16 sps:$4 sm:$0xff]   ;;  %v2198_v5 = vld [vmem:[%s2925_s3 + $0xc4] ss:$16 sps:$4 sm:$0xff]  }
  0x25   :  { %421 = vmatprep.subr.bf16.mxu1 %v370_v50  ;;  %v2172_v50 = vld [vmem:[%s2924_s2 + $0xe0] ss:$16 sps:$4 sm:$0xff]   ;;  %v2204_v9 = vld [vmem:[%s2925_s3 + $0xe4] ss:$16 sps:$4 sm:$0xff]   ;;  %v2225_v28 = vld [vmem:[%s2927_s4 + $0xac] ss:$16 sps:$4 sm:$0xff]  }
  0x26   :  { %v2223_v31 = vld [vmem:[%s2927_s4 + $0xa8] ss:$16 sps:$4 sm:$0xff]   ;;  %v2231_v33 = vld [vmem:[%s2927_s4 + $0xcc] ss:$16 sps:$4 sm:$0xff]  }
  0x27   :  { %381 = vmatpush1.bf16.msra.mxu0 %v361_v51  ;;  %v2175_v51 = vld [vmem:[%s2924_s2 + $0xe8] ss:$16 sps:$4 sm:$0xff]  }
  0x28   :  { %422 = vmatpush1.bf16.msra.mxu1 %v367_v52  ;;  %586 = vmatprep.subr.bf16.mxu0 %v2102_v53  ;;  %v2180_v52 = vld [vmem:[%s2924_s2 + $0x104] ss:$16 sps:$4 sm:$0xff]   ;;  %v2183_v53 = vld [vmem:[%s2924_s2 + $0x10c] ss:$16 sps:$4 sm:$0xff]   ;;  %v2229_v35 = vld [vmem:[%s2927_s4 + $0xc8] ss:$16 sps:$4 sm:$0xff]  }
  0x29   :  { %627 = vmatprep.subr.bf16.mxu1 %v2105_v54  ;;  %v2186_v54 = vld [vmem:[%s2924_s2 + $0x124] ss:$16 sps:$4 sm:$0x3f]  }
  0x2a   :  { %1819 = vmatmul.mubr.msk.bf16.vlgmr.msra.gmra.mrb[4].mxu0 %vm142_vm2, %v2395_v30 }
  0x2b   :  { %1820 = vmatmul.mubr.msk.bf16.vlgmr.msra.gmra.mrb[4].mxu1 %vm142_vm2, %v2395_v30  ;;  %587 = vmatpush1.bf16.msra.mxu0 %v2100_v55  ;;  %v2189_v55 = vld [vmem:[%s2924_s2 + $0x12c] ss:$16 sps:$4 sm:$0x3f]  }
  0x2c   :  { %628 = vmatpush1.bf16.msra.mxu1 %v2103_v56  ;;  %588 = vmatprep.subr.bf16.mxu0 %v2108_v57  ;;  %v2178_v56 = vld [vmem:[%s2924_s2 + $0x100] ss:$16 sps:$4 sm:$0xff]  }
  0x2d   :  { %629 = vmatprep.subr.bf16.mxu1 %v2111_v58  ;;  %618 = vmatprep.mubr.bf16.mxu0 %v2280_v1  ;;  %v2184_v57 = vld [vmem:[%s2924_s2 + $0x120] ss:$16 sps:$4 sm:$0x3f]   ;;  %v2181_v58 = vld [vmem:[%s2924_s2 + $0x108] ss:$16 sps:$4 sm:$0xff]  }
  0x2e   :  { %659 = vmatprep.mubr.bf16.mxu1 %v2280_v1 }
  0x2f   :  { %589 = vmatpush1.bf16.msra.mxu0 %v2106_v59  ;;  %v2187_v59 = vld [vmem:[%s2924_s2 + $0x128] ss:$16 sps:$4 sm:$0x3f]  }
  0x30   :  { %630 = vmatpush1.bf16.msra.mxu1 %v2109_v60  ;;  %590 = vmatprep.subr.bf16.mxu0 %v2114_v61  ;;  %v1025_v60 = vand.u32 %v2186_v54, %v2368_v19  ;;  %v1031_v61 = vand.u32 %v2189_v55, %v2368_v19  ;;  %v2250_v54 = vld [vmem:[%s2928_s5 + $0xa0] ss:$16 sps:$4 sm:$0xff]   ;;  %v2253_v55 = vld [vmem:[%s2928_s5 + $0xa8] ss:$16 sps:$4 sm:$0xff]  }
  0x31   :  { %631 = vmatprep.subr.bf16.mxu1 %v2117_v62  ;;  %v1022_v62 = vand.u32 %v2184_v57, %v2368_v19  ;;  %v2261_v57 = vld [vmem:[%s2928_s5 + $0xcc] ss:$16 sps:$4 sm:$0xff]  }
  0x33   :  { %591 = vmatpush1.bf16.msra.mxu0 %v2112_v63  ;;  %v1028_v63 = vand.u32 %v2187_v59, %v2368_v19  ;;  %v2259_v59 = vld [vmem:[%s2928_s5 + $0xc8] ss:$16 sps:$4 sm:$0xff]  }
  0x34   :  { %632 = vmatpush1.bf16.msra.mxu1 %v2115_v0  ;;  %592 = vmatprep.subr.bf16.mxu0 %v2120_v2  ;;  %v2192_v0 = vld [vmem:[%s2925_s3 + $0xa4] ss:$16 sps:$4 sm:$0xff]   ;;  %v2195_v2 = vld [vmem:[%s2925_s3 + $0xac] ss:$16 sps:$4 sm:$0xff]  }
  0x35   :  { %633 = vmatprep.subr.bf16.mxu1 %v2123_v3  ;;  %v2190_v3 = vld [vmem:[%s2925_s3 + $0xa0] ss:$16 sps:$4 sm:$0xff]  }
  0x37   :  { %593 = vmatpush1.bf16.msra.mxu0 %v2118_v6  ;;  %v2201_v6 = vld [vmem:[%s2925_s3 + $0xcc] ss:$16 sps:$4 sm:$0xff]  }
  0x38   :  { %634 = vmatpush1.bf16.msra.mxu1 %v2121_v7  ;;  %594 = vmatprep.subr.bf16.mxu0 %v578_v10  ;;  %v2196_v7 = vld [vmem:[%s2925_s3 + $0xc0] ss:$16 sps:$4 sm:$0xff]   ;;  %v2207_v10 = vld [vmem:[%s2925_s3 + $0xec] ss:$16 sps:$4 sm:$0xff]  }
  0x39   :  { %635 = vmatprep.subr.bf16.mxu1 %v584_v11  ;;  %v2202_v11 = vld [vmem:[%s2925_s3 + $0xe0] ss:$16 sps:$4 sm:$0xff]  }
  0x3b   :  { %595 = vmatpush1.bf16.msra.mxu0 %v575_v12  ;;  %v2205_v12 = vld [vmem:[%s2925_s3 + $0xe8] ss:$16 sps:$4 sm:$0xff]  }
  0x3c   :  { %636 = vmatpush1.bf16.msra.mxu1 %v581_v13  ;;  %800 = vmatprep.subr.bf16.mxu0 %v2132_v14  ;;  %v2210_v13 = vld [vmem:[%s2925_s3 + $0x104] ss:$16 sps:$4 sm:$0xff]   ;;  %v2213_v14 = vld [vmem:[%s2925_s3 + $0x10c] ss:$16 sps:$4 sm:$0xff]  }
  0x3d   :  { %841 = vmatprep.subr.bf16.mxu1 %v2135_v15  ;;  %v2216_v15 = vld [vmem:[%s2925_s3 + $0x124] ss:$16 sps:$4 sm:$0x3f]  }
  0x3e   :  { %1841 = vmatmul.mubr.msk.bf16.vlgmr.msra.gmra.mrb[8].mxu0 %vm142_vm2, %v2395_v30 }
  0x3f   :  { %1842 = vmatmul.mubr.msk.bf16.vlgmr.msra.gmra.mrb[8].mxu1 %vm142_vm2, %v2395_v30  ;;  %801 = vmatpush1.bf16.msra.mxu0 %v2130_v16  ;;  %v2219_v16 = vld [vmem:[%s2925_s3 + $0x12c] ss:$16 sps:$4 sm:$0x3f]  }
  0x40   :  { %842 = vmatpush1.bf16.msra.mxu1 %v2133_v17  ;;  %802 = vmatprep.subr.bf16.mxu0 %v2138_v18  ;;  %v25_v17 = vld [vmem:[%s2929_s1] sm:$0x3f] }
  0x41   :  { %843 = vmatprep.subr.bf16.mxu1 %v2141_v20  ;;  %832 = vmatprep.mubr.bf16.mxu0 %v2280_v1  ;;  %v2208_v18 = vld [vmem:[%s2925_s3 + $0x100] ss:$16 sps:$4 sm:$0xff]   ;;  %v2211_v20 = vld [vmem:[%s2925_s3 + $0x108] ss:$16 sps:$4 sm:$0xff]  }
  0x42   :  { %873 = vmatprep.mubr.bf16.mxu1 %v2280_v1  ;;  %888 = vperm.xlu0 %2039, %v25_v17  }
  0x43   :  { %803 = vmatpush1.bf16.msra.mxu0 %v2136_v21  ;;  %v2214_v21 = vld [vmem:[%s2925_s3 + $0x120] ss:$16 sps:$4 sm:$0x3f]  }
  0x44   :  { %844 = vmatpush1.bf16.msra.mxu1 %v2139_v22  ;;  %804 = vmatprep.subr.bf16.mxu0 %v2144_v23  ;;  %v2217_v22 = vld [vmem:[%s2925_s3 + $0x128] ss:$16 sps:$4 sm:$0x3f]   ;;  %v1236_v23 = vand.u32 %v2216_v15, %v2368_v19 }
  0x45   :  { %845 = vmatprep.subr.bf16.mxu1 %v2147_v24  ;;  %v1242_v24 = vand.u32 %v2219_v16, %v2368_v19 }
  0x47   :  { %805 = vmatpush1.bf16.msra.mxu0 %v2142_v25  ;;  %v1233_v25 = vand.u32 %v2214_v21, %v2368_v19 }
  0x48   :  { %846 = vmatpush1.bf16.msra.mxu1 %v2145_v26  ;;  %806 = vmatprep.subr.bf16.mxu0 %v2150_v27  ;;  %v1239_v26 = vand.u32 %v2217_v22, %v2368_v19  ;;  %v2222_v27 = vld [vmem:[%s2927_s4 + $0xa4] ss:$16 sps:$4 sm:$0xff]  }
  0x49   :  { %847 = vmatprep.subr.bf16.mxu1 %v2153_v29  ;;  %v2220_v29 = vld [vmem:[%s2927_s4 + $0xa0] ss:$16 sps:$4 sm:$0xff]  }
  0x4b   :  { %807 = vmatpush1.bf16.msra.mxu0 %v2148_v32  ;;  %v2228_v32 = vld [vmem:[%s2927_s4 + $0xc4] ss:$16 sps:$4 sm:$0xff]  }
  0x4c   :  { %848 = vmatpush1.bf16.msra.mxu1 %v2151_v34  ;;  %808 = vmatprep.subr.bf16.mxu0 %v792_v36  ;;  %v2226_v34 = vld [vmem:[%s2927_s4 + $0xc0] ss:$16 sps:$4 sm:$0xff]   ;;  %v2234_v36 = vld [vmem:[%s2927_s4 + $0xe4] ss:$16 sps:$4 sm:$0xff]  }
  0x4d   :  { %849 = vmatprep.subr.bf16.mxu1 %v798_v37  ;;  %v2237_v37 = vld [vmem:[%s2927_s4 + $0xec] ss:$16 sps:$4 sm:$0xff]  }
  0x4f   :  { %809 = vmatpush1.bf16.msra.mxu0 %v789_v38  ;;  %v2232_v38 = vld [vmem:[%s2927_s4 + $0xe0] ss:$16 sps:$4 sm:$0xff]  }
  0x50   :  { %850 = vmatpush1.bf16.msra.mxu1 %v795_v39  ;;  %1033 = vmatprep.subr.bf16.mxu0 %v2162_v40  ;;  %v2235_v39 = vld [vmem:[%s2927_s4 + $0xe8] ss:$16 sps:$4 sm:$0xff]   ;;  %v2240_v40 = vld [vmem:[%s2927_s4 + $0x104] ss:$16 sps:$4 sm:$0xff]  }
  0x51   :  { %1074 = vmatprep.subr.bf16.mxu1 %v2165_v41  ;;  %v2243_v41 = vld [vmem:[%s2927_s4 + $0x10c] ss:$16 sps:$4 sm:$0xff]  }
  0x52   :  { %1863 = vmatmul.mubr.msk.bf16.vlgmr.msra.gmra.mrb[12].mxu0 %vm142_vm2, %v2395_v30 }
  0x53   :  { %1864 = vmatmul.mubr.msk.bf16.vlgmr.msra.gmra.mrb[12].mxu1 %vm142_vm2, %v2395_v30  ;;  %1034 = vmatpush1.bf16.msra.mxu0 %v2160_v42  ;;  %v2246_v42 = vld [vmem:[%s2927_s4 + $0x124] ss:$16 sps:$4 sm:$0x3f]  }
  0x54   :  { %1075 = vmatpush1.bf16.msra.mxu1 %v2163_v43  ;;  %1035 = vmatprep.subr.bf16.mxu0 %v2168_v44  ;;  %v2249_v43 = vld [vmem:[%s2927_s4 + $0x12c] ss:$16 sps:$4 sm:$0x3f]   ;;  %v2238_v44 = vld [vmem:[%s2927_s4 + $0x100] ss:$16 sps:$4 sm:$0xff]  }
  0x55   :  { %1076 = vmatprep.subr.bf16.mxu1 %v2171_v45  ;;  %1065 = vmatprep.mubr.bf16.mxu0 %v2280_v1  ;;  %v2241_v45 = vld [vmem:[%s2927_s4 + $0x108] ss:$16 sps:$4 sm:$0xff]  }
  0x56   :  { %1106 = vmatprep.mubr.bf16.mxu1 %v2280_v1 }
  0x57   :  { %1036 = vmatpush1.bf16.msra.mxu0 %v2166_v46  ;;  %v2244_v46 = vld [vmem:[%s2927_s4 + $0x120] ss:$16 sps:$4 sm:$0x3f]  }
  0x58   :  { %1077 = vmatpush1.bf16.msra.mxu1 %v2169_v47  ;;  %1037 = vmatprep.subr.bf16.mxu0 %v2174_v48  ;;  %v2247_v47 = vld [vmem:[%s2927_s4 + $0x128] ss:$16 sps:$4 sm:$0x3f]   ;;  %v1451_v48 = vand.u32 %v2246_v42, %v2368_v19 }
  0x59   :  { %1078 = vmatprep.subr.bf16.mxu1 %v2177_v49  ;;  %v1457_v49 = vand.u32 %v2249_v43, %v2368_v19 }
  0x5b   :  { %1038 = vmatpush1.bf16.msra.mxu0 %v2172_v50  ;;  %v1448_v50 = vand.u32 %v2244_v46, %v2368_v19 }
  0x5c   :  { %1079 = vmatpush1.bf16.msra.mxu1 %v2175_v51  ;;  %1039 = vmatprep.subr.bf16.mxu0 %v2180_v52  ;;  %v1454_v51 = vand.u32 %v2247_v47, %v2368_v19  ;;  %v2252_v52 = vld [vmem:[%s2928_s5 + $0xa4] ss:$16 sps:$4 sm:$0xff]  }
  0x5d   :  { %1080 = vmatprep.subr.bf16.mxu1 %v2183_v53  ;;  %v2255_v53 = vld [vmem:[%s2928_s5 + $0xac] ss:$16 sps:$4 sm:$0xff]  }
  0x5f   :  { %1040 = vmatpush1.bf16.msra.mxu0 %v2178_v56  ;;  %v2258_v56 = vld [vmem:[%s2928_s5 + $0xc4] ss:$16 sps:$4 sm:$0xff]  }
  0x60   :  { %1081 = vmatpush1.bf16.msra.mxu1 %v2181_v58  ;;  %1041 = vmatprep.subr.bf16.mxu0 %v1025_v60  ;;  %v2256_v58 = vld [vmem:[%s2928_s5 + $0xc0] ss:$16 sps:$4 sm:$0xff]   ;;  %v2264_v60 = vld [vmem:[%s2928_s5 + $0xe4] ss:$16 sps:$4 sm:$0xff]  }
  0x61   :  { %1082 = vmatprep.subr.bf16.mxu1 %v1031_v61  ;;  %v2267_v61 = vld [vmem:[%s2928_s5 + $0xec] ss:$16 sps:$4 sm:$0xff]  }
  0x63   :  { %1042 = vmatpush1.bf16.msra.mxu0 %v1022_v62  ;;  %v2262_v62 = vld [vmem:[%s2928_s5 + $0xe0] ss:$16 sps:$4 sm:$0xff]  }
  0x64   :  { %1083 = vmatpush1.bf16.msra.mxu1 %v1028_v63  ;;  %1244 = vmatprep.subr.bf16.mxu0 %v2192_v0  ;;  %v2265_v63 = vld [vmem:[%s2928_s5 + $0xe8] ss:$16 sps:$4 sm:$0xff]   ;;  %v2270_v0 = vld [vmem:[%s2928_s5 + $0x104] ss:$16 sps:$4 sm:$0xff]  }
  0x65   :  { %1285 = vmatprep.subr.bf16.mxu1 %v2195_v2  ;;  %v2273_v2 = vld [vmem:[%s2928_s5 + $0x10c] ss:$16 sps:$4 sm:$0xff]  }
  0x66   :  { %1905 = vmatmul.mubr.msk.bf16.vlgmr.msra.gmra.mrb[16].mxu0 %vm142_vm2, %v2395_v30 }
  0x67   :  { %1906 = vmatmul.mubr.msk.bf16.vlgmr.msra.gmra.mrb[16].mxu1 %vm142_vm2, %v2395_v30  ;;  %1245 = vmatpush1.bf16.msra.mxu0 %v2190_v3  ;;  %v2279_v3 = vld [vmem:[%s2928_s5 + $0x12c] ss:$16 sps:$4 sm:$0x3f]  }
  0x68   :  { %1286 = vmatpush1.bf16.msra.mxu1 %v2193_v4  ;;  %1246 = vmatprep.subr.bf16.mxu0 %v2198_v5  ;;  %v2268_v4 = vld [vmem:[%s2928_s5 + $0x100] ss:$16 sps:$4 sm:$0xff]   ;;  %v2271_v5 = vld [vmem:[%s2928_s5 + $0x108] ss:$16 sps:$4 sm:$0xff]  }
  0x69   :  { %1287 = vmatprep.subr.bf16.mxu1 %v2201_v6  ;;  %1276 = vmatprep.mubr.bf16.mxu0 %v2280_v1  ;;  %v2274_v6 = vld [vmem:[%s2928_s5 + $0x120] ss:$16 sps:$4 sm:$0x3f]  }
  0x6a   :  { %1317 = vmatprep.mubr.bf16.mxu1 %v2280_v1 }
  0x6b   :  { %1247 = vmatpush1.bf16.msra.mxu0 %v2196_v7  ;;  %v2277_v7 = vld [vmem:[%s2928_s5 + $0x128] ss:$16 sps:$4 sm:$0x3f]  }
  0x6c   :  { %1288 = vmatpush1.bf16.msra.mxu1 %v2199_v8  ;;  %1248 = vmatprep.subr.bf16.mxu0 %v2204_v9  ;;  %v1672_v9 = vand.u32 %v2279_v3, %v2368_v19 }
  0x6d   :  { %1289 = vmatprep.subr.bf16.mxu1 %v2207_v10  ;;  %v1663_v10 = vand.u32 %v2274_v6, %v2368_v19 }
  0x6f   :  { %1249 = vmatpush1.bf16.msra.mxu0 %v2202_v11  ;;  %v1669_v11 = vand.u32 %v2277_v7, %v2368_v19 }
  0x70   :  { %1290 = vmatpush1.bf16.msra.mxu1 %v2205_v12  ;;  %1250 = vmatprep.subr.bf16.mxu0 %v2210_v13 }
  0x71   :  { %1291 = vmatprep.subr.bf16.mxu1 %v2213_v14 }
  0x73   :  { %1251 = vmatpush1.bf16.msra.mxu0 %v2208_v18 }
  0x74   :  { %1292 = vmatpush1.bf16.msra.mxu1 %v2211_v20  ;;  %1252 = vmatprep.subr.bf16.mxu0 %v1236_v23 }
  0x75   :  { %1293 = vmatprep.subr.bf16.mxu1 %v1242_v24 }
  0x77   :  { %1253 = vmatpush1.bf16.msra.mxu0 %v1233_v25 }
  0x78   :  { %1294 = vmatpush1.bf16.msra.mxu1 %v1239_v26  ;;  %1459 = vmatprep.subr.bf16.mxu0 %v2222_v27 }
  0x79   :  { %1500 = vmatprep.subr.bf16.mxu1 %v2225_v28 }
  0x7a   :  { %1947 = vmatmul.mubr.msk.bf16.vlgmr.msra.gmra.mrb[20].mxu0 %vm142_vm2, %v2395_v30 }
  0x7b   :  { %1948 = vmatmul.mubr.msk.bf16.vlgmr.msra.gmra.mrb[20].mxu1 %vm142_vm2, %v2395_v30  ;;  %1460 = vmatpush1.bf16.msra.mxu0 %v2220_v29 }
  0x7c   :  { %1501 = vmatpush1.bf16.msra.mxu1 %v2223_v31  ;;  %1461 = vmatprep.subr.bf16.mxu0 %v2228_v32 }
  0x7d   :  { %1502 = vmatprep.subr.bf16.mxu1 %v2231_v33  ;;  %1491 = vmatprep.mubr.bf16.mxu0 %v2280_v1 }
  0x7e   :  { %1532 = vmatprep.mubr.bf16.mxu1 %v2280_v1 }
  0x7f   :  { %1462 = vmatpush1.bf16.msra.mxu0 %v2226_v34 }
  0x80   :  { %1503 = vmatpush1.bf16.msra.mxu1 %v2229_v35  ;;  %1463 = vmatprep.subr.bf16.mxu0 %v2234_v36 }
  0x81   :  { %1504 = vmatprep.subr.bf16.mxu1 %v2237_v37 }
  0x83   :  { %1464 = vmatpush1.bf16.msra.mxu0 %v2232_v38 }
  0x84   :  { %1505 = vmatpush1.bf16.msra.mxu1 %v2235_v39  ;;  %1465 = vmatprep.subr.bf16.mxu0 %v2240_v40 }
  0x85   :  { %1506 = vmatprep.subr.bf16.mxu1 %v2243_v41 }
  0x87   :  { %1466 = vmatpush1.bf16.msra.mxu0 %v2238_v44 }
  0x88   :  { %1507 = vmatpush1.bf16.msra.mxu1 %v2241_v45  ;;  %1467 = vmatprep.subr.bf16.mxu0 %v1451_v48 }
  0x89   :  { %1508 = vmatprep.subr.bf16.mxu1 %v1457_v49 }
  0x8b   :  { %1468 = vmatpush1.bf16.msra.mxu0 %v1448_v50 }
  0x8c   :  { %1509 = vmatpush1.bf16.msra.mxu1 %v1454_v51  ;;  %1674 = vmatprep.subr.bf16.mxu0 %v2252_v52 }
  0x8d   :  { %1715 = vmatprep.subr.bf16.mxu1 %v2255_v53 }
  0x8e   :  { %1989 = vmatmul.mubr.msk.bf16.vlgmr.msra.gmra.mrb[24].mxu0 %vm142_vm2, %v2395_v30 }
  0x8f   :  { %1990 = vmatmul.mubr.msk.bf16.vlgmr.msra.gmra.mrb[24].mxu1 %vm142_vm2, %v2395_v30  ;;  %1675 = vmatpush1.bf16.msra.mxu0 %v2250_v54 }
  0x90   :  { %1716 = vmatpush1.bf16.msra.mxu1 %v2253_v55  ;;  %1676 = vmatprep.subr.bf16.mxu0 %v2258_v56 }
  0x91   :  { %1717 = vmatprep.subr.bf16.mxu1 %v2261_v57  ;;  %1706 = vmatprep.mubr.bf16.mxu0 %v2280_v1 }
  0x92   :  { %1747 = vmatprep.mubr.bf16.mxu1 %v2280_v1  ;;  %v2276_v1 = vld [vmem:[%s2928_s5 + $0x124] ss:$16 sps:$4 sm:$0x3f]  }
  0x93   :  { %1677 = vmatpush1.bf16.msra.mxu0 %v2256_v58  ;;  %v1666_v8 = vand.u32 %v2276_v1, %v2368_v19 }
  0x94   :  { %1718 = vmatpush1.bf16.msra.mxu1 %v2259_v59  ;;  %1678 = vmatprep.subr.bf16.mxu0 %v2264_v60 }
  0x95   :  { %1719 = vmatprep.subr.bf16.mxu1 %v2267_v61 }
  0x97   :  { %1679 = vmatpush1.bf16.msra.mxu0 %v2262_v62 }
  0x98   :  { %1720 = vmatpush1.bf16.msra.mxu1 %v2265_v63  ;;  %1680 = vmatprep.subr.bf16.mxu0 %v2270_v0 }
  0x99   :  { %1721 = vmatprep.subr.bf16.mxu1 %v2273_v2 }
  0x9b   :  { %1681 = vmatpush1.bf16.msra.mxu0 %v2268_v4 }
  0x9c   :  { %1722 = vmatpush1.bf16.msra.mxu1 %v2271_v5  ;;  %1682 = vmatprep.subr.bf16.mxu0 %v1666_v8 }
  0x9d   :  { %1723 = vmatprep.subr.bf16.mxu1 %v1672_v9 }
  0x9f   :  { %1683 = vmatpush1.bf16.msra.mxu0 %v1663_v10 }
  0xa0   :  { %1724 = vmatpush1.bf16.msra.mxu1 %v1669_v11 }
  0xa2   :  { %2031 = vmatmul.mubr.msk.bf16.vlgmr.msra.gmra.mrb[28].mxu0 %vm142_vm2, %v2395_v30 }
  0xa3   :  { %2032 = vmatmul.mubr.msk.bf16.vlgmr.msra.gmra.mrb[28].mxu1 %vm142_vm2, %v2395_v30 }
  0xc1   :  { %v2888_v44 = vpop.permute.xlu0 %888 }
  0xe9   :  { %v196_v12 = vpop.f32.mrb[0].mxu0 }
  0xea   :  { %v237_v13 = vpop.f32.mrb[0].mxu1  ;;  %v198_v14 = vpop.f32.mrb[1].mxu0 }
  0xeb   :  { %v239_v15 = vpop.f32.mrb[1].mxu1  ;;  %v200_v16 = vpop.f32.mrb[2].mxu0 }
  0xec   :  { %v241_v17 = vpop.f32.mrb[2].mxu1  ;;  %v201_v18 = vpop.f32.mrb[3].mxu0 }
  0xed   :  { %v242_v20 = vpop.f32.mrb[3].mxu1 }
  0xfd   :  { %v406_v21 = vpop.f32.mrb[4].mxu0 }
  0xfe   :  { %v447_v19 = vpop.f32.mrb[4].mxu1  ;;  %v454_v22 = vmax.f32 %v196_v12, %v406_v21  ;;  %v408_v24 = vpop.f32.mrb[5].mxu0 }
  0xff   :  { %v456_v23 = vmax.f32 %v237_v13, %v447_v19  ;;  %v449_v25 = vpop.f32.mrb[5].mxu1  ;;  %v455_v26 = vmax.f32 %v198_v14, %v408_v24  ;;  %v410_v28 = vpop.f32.mrb[6].mxu0 }
 0x100   :  { %v457_v27 = vmax.f32 %v239_v15, %v449_v25  ;;  %v451_v29 = vpop.f32.mrb[6].mxu1  ;;  %v411_v31 = vpop.f32.mrb[7].mxu0 }
 0x101   :  { %v452_v30 = vpop.f32.mrb[7].mxu1 }
 0x111   :  { %v620_v32 = vpop.f32.mrb[8].mxu0 }
 0x112   :  { %v661_v33 = vpop.f32.mrb[8].mxu1  ;;  %v668_v34 = vmax.f32 %v454_v22, %v620_v32  ;;  %v622_v36 = vpop.f32.mrb[9].mxu0 }
 0x113   :  { %v670_v35 = vmax.f32 %v456_v23, %v661_v33  ;;  %v663_v37 = vpop.f32.mrb[9].mxu1  ;;  %v669_v38 = vmax.f32 %v455_v26, %v622_v36  ;;  %v624_v40 = vpop.f32.mrb[10].mxu0 }
 0x114   :  { %v671_v39 = vmax.f32 %v457_v27, %v663_v37  ;;  %v665_v41 = vpop.f32.mrb[10].mxu1  ;;  %v625_v42 = vpop.f32.mrb[11].mxu0 }
 0x115   :  { %v666_v43 = vpop.f32.mrb[11].mxu1 }
 0x125   :  { %v834_v45 = vpop.f32.mrb[12].mxu0 }
 0x126   :  { %v875_v46 = vpop.f32.mrb[12].mxu1  ;;  %v882_v47 = vmax.f32 %v668_v34, %v834_v45  ;;  %v836_v49 = vpop.f32.mrb[13].mxu0 }
 0x127   :  { %v884_v48 = vmax.f32 %v670_v35, %v875_v46  ;;  %v877_v50 = vpop.f32.mrb[13].mxu1  ;;  %v883_v51 = vmax.f32 %v669_v38, %v836_v49  ;;  %v838_v53 = vpop.f32.mrb[14].mxu0 }
 0x128   :  { %v885_v52 = vmax.f32 %v671_v39, %v877_v50  ;;  %v879_v54 = vpop.f32.mrb[14].mxu1  ;;  %v891_v55 = vadd.f32 %v2888_v44, %v882_v47  ;;  %v839_v57 = vpop.f32.mrb[15].mxu0 }
 0x129   :  { %v893_v56 = vadd.f32 %v2888_v44, %v884_v48  ;;  %v880_v58 = vpop.f32.mrb[15].mxu1  ;;  %v892_v59 = vadd.f32 %v2888_v44, %v883_v51 }
 0x12a   :  { %v894_v60 = vadd.f32 %v2888_v44, %v885_v52  ;;  %v895_v61 = vmax.f32 %v891_v55, 0.0 }
 0x12b   :  { %v897_v62 = vmax.f32 %v893_v56, 0.0  ;;  %v896_v63 = vmax.f32 %v892_v59, 0.0 }
 0x12c   :  { %v898_v0 = vmax.f32 %v894_v60, 0.0  ;;  %899 = vst [vmem:[%s2930_s6] sm:$0x3f] %v895_v61 }
 0x12d   :  { %901 = vst [vmem:[%s2930_s6 + $0x10] sm:$0x3f] %v897_v62  ;;  %900 = vst [vmem:[%s2930_s6 + $0x8] sm:$0x3f] %v896_v63 }
 0x12e   :  { %903 = vst.msk [vmem:[%s2930_s6 + $0x18] sm:$0x3f] %vm902_vm3, %v898_v0 }
 0x139   :  { %v1067_v2 = vpop.f32.mrb[16].mxu0 }
 0x13a   :  { %v1108_v1 = vpop.f32.mrb[16].mxu1  ;;  %v1069_v3 = vpop.f32.mrb[17].mxu0 }
 0x13b   :  { %v1110_v4 = vpop.f32.mrb[17].mxu1  ;;  %v1071_v5 = vpop.f32.mrb[18].mxu0 }
 0x13c   :  { %v1112_v6 = vpop.f32.mrb[18].mxu1  ;;  %v1072_v7 = vpop.f32.mrb[19].mxu0 }
 0x13d   :  { %v1113_v8 = vpop.f32.mrb[19].mxu1 }
 0x14d   :  { %v1278_v9 = vpop.f32.mrb[20].mxu0 }
 0x14e   :  { %v1319_v10 = vpop.f32.mrb[20].mxu1  ;;  %v1326_v11 = vmax.f32 %v1067_v2, %v1278_v9  ;;  %v1280_v13 = vpop.f32.mrb[21].mxu0 }
 0x14f   :  { %v1328_v12 = vmax.f32 %v1108_v1, %v1319_v10  ;;  %v1321_v14 = vpop.f32.mrb[21].mxu1  ;;  %v1327_v15 = vmax.f32 %v1069_v3, %v1280_v13  ;;  %v1282_v17 = vpop.f32.mrb[22].mxu0 }
 0x150   :  { %v1329_v16 = vmax.f32 %v1110_v4, %v1321_v14  ;;  %v1323_v18 = vpop.f32.mrb[22].mxu1  ;;  %v1283_v20 = vpop.f32.mrb[23].mxu0 }
 0x151   :  { %v1324_v21 = vpop.f32.mrb[23].mxu1 }
 0x161   :  { %v1493_v19 = vpop.f32.mrb[24].mxu0 }
 0x162   :  { %v1534_v22 = vpop.f32.mrb[24].mxu1  ;;  %v1541_v23 = vmax.f32 %v1326_v11, %v1493_v19  ;;  %v1495_v25 = vpop.f32.mrb[25].mxu0 }
 0x163   :  { %v1543_v24 = vmax.f32 %v1328_v12, %v1534_v22  ;;  %v1536_v26 = vpop.f32.mrb[25].mxu1  ;;  %v1542_v27 = vmax.f32 %v1327_v15, %v1495_v25  ;;  %v1497_v29 = vpop.f32.mrb[26].mxu0 }
 0x164   :  { %v1544_v28 = vmax.f32 %v1329_v16, %v1536_v26  ;;  %v1538_v31 = vpop.f32.mrb[26].mxu1  ;;  %v1498_v30 = vpop.f32.mrb[27].mxu0 }
 0x165   :  { %v1539_v32 = vpop.f32.mrb[27].mxu1 }
 0x175   :  { %v1708_v33 = vpop.f32.mrb[28].mxu0 }
 0x176   :  { %v1749_v34 = vpop.f32.mrb[28].mxu1  ;;  %v1756_v35 = vmax.f32 %v1541_v23, %v1708_v33  ;;  %v1710_v37 = vpop.f32.mrb[29].mxu0 }
 0x177   :  { %v1758_v36 = vmax.f32 %v1543_v24, %v1749_v34  ;;  %v1751_v38 = vpop.f32.mrb[29].mxu1  ;;  %v1757_v39 = vmax.f32 %v1542_v27, %v1710_v37  ;;  %v1712_v41 = vpop.f32.mrb[30].mxu0 }
 0x178   :  { %v1759_v40 = vmax.f32 %v1544_v28, %v1751_v38  ;;  %v1753_v42 = vpop.f32.mrb[30].mxu1  ;;  %v1760_v43 = vadd.f32 %v1756_v35, %v2888_v44  ;;  %v1713_v46 = vpop.f32.mrb[31].mxu0 }
 0x179   :  { %v1762_v45 = vadd.f32 %v1758_v36, %v2888_v44  ;;  %v1754_v47 = vpop.f32.mrb[31].mxu1  ;;  %v1761_v48 = vadd.f32 %v1757_v39, %v2888_v44 }
 0x17a   :  { %v1763_v49 = vadd.f32 %v1759_v40, %v2888_v44  ;;  %v1764_v50 = vmax.f32 %v1760_v43, 0.0 }
 0x17b   :  { %v1766_v51 = vmax.f32 %v1762_v45, 0.0  ;;  %v1765_v52 = vmax.f32 %v1761_v48, 0.0 }
 0x17c   :  { %v1767_v53 = vmax.f32 %v1763_v49, 0.0  ;;  %2033 = vst [vmem:[%s2930_s6 + $0x20] sm:$0x3f] %v1764_v50 }
 0x17d   :  { %2035 = vst [vmem:[%s2930_s6 + $0x30] sm:$0x3f] %v1766_v51  ;;  %2034 = vst [vmem:[%s2930_s6 + $0x28] sm:$0x3f] %v1765_v52 }
 0x17e   :  { %2036 = vst.msk [vmem:[%s2930_s6 + $0x38] sm:$0x3f] %vm902_vm3, %v1767_v53 }

// kernel: conv_network_forward.4
= control target key start
LH: loop header
LB: loop body
LE: loop exit
PB: predicated region body
PF: predicated region fallthrough
CT: control target
= control target key end

     0   :  { %v1299_v0 = vmov 0   ;;  %vm113_vm0 = vcmask 179200   ;;  %vm117_vm1 = vcmask 1042432   ;;  %vm542_vm2 = vcmask 474112   ;;  %s1732_s2 = inlined_call_operand.vmem [shape: bf16[2,150,58], index: 2, kind: input, shape index: {}]   ;;  %s1733_s3 = inlined_call_operand.vmem [shape: bf16[2,150,58], index: 3, kind: input, shape index: {}]   ;;  %s1734_s0 = inlined_call_operand.vmem [shape: bf16[16,150], index: 0, kind: input, shape index: {}]   ;;  %s1735_s4 = inlined_call_operand.vmem [shape: bf16[2,150,58], index: 4, kind: input, shape index: {}]   ;;  %s1736_s5 = inlined_call_operand.vmem [shape: bf16[2,150,58], index: 5, kind: input, shape index: {}]   ;;  %s1737_s1 = inlined_call_operand.vmem [shape: f32[16,1], index: 1, kind: input, shape index: {}]   ;;  %s1738_s6 = inlined_call_operand.vmem [shape: f32[2,16,58], index: 6, kind: output, shape index: {}]  }
   0x1   :  { %121 = vmatprep.subr.bf16.mxu0 %v1299_v0  ;;  %241 = vmatprep.subr.bf16.mxu1 %v1299_v0  ;;  %v1216_v1 = vld [vmem:[%s1732_s2] sm:$0xff]   ;;  %v1218_v3 = vld [vmem:[%s1732_s2 + $0x8] sm:$0xff]   ;;  %v1220_v5 = vld [vmem:[%s1732_s2 + $0x10] sm:$0xff]  }
   0x2   :  { %v1217_v2 = vld [vmem:[%s1733_s3] sm:$0xff]   ;;  %1215 = vset.pattern.permute.xlu0 %v1299_v0  ;;  %122 = vmatpush1.bf16.msra.mxu0 %v1216_v1  ;;  %v1219_v4 = vld [vmem:[%s1733_s3 + $0x8] sm:$0xff]   ;;  %v1221_v6 = vld [vmem:[%s1733_s3 + $0x10] sm:$0xff]  }
   0x3   :  { %242 = vmatpush1.bf16.msra.mxu1 %v1217_v2  ;;  %123 = vmatprep.subr.bf16.mxu0 %v1299_v0  ;;  %v1222_v7 = vld [vmem:[%s1732_s2 + $0x18] sm:$0xff]   ;;  %v1224_v9 = vld [vmem:[%s1732_s2 + $0x20] sm:$0xff]   ;;  %v1226_v11 = vld [vmem:[%s1732_s2 + $0x28] sm:$0xff]  }
   0x4   :  { %243 = vmatprep.subr.bf16.mxu1 %v1299_v0  ;;  %v1223_v8 = vld [vmem:[%s1733_s3 + $0x18] sm:$0xff]   ;;  %v1225_v10 = vld [vmem:[%s1733_s3 + $0x20] sm:$0xff]   ;;  %v1227_v12 = vld [vmem:[%s1733_s3 + $0x28] sm:$0xff]  }
   0x5   :  { %v1387_v13 = vld [vmem:[%s1734_s0 + $0x4] ss:$8 sps:$4 sm:$0xff]   ;;  %v1228_v14 = vld [vmem:[%s1732_s2 + $0x30] sm:$0xff]   ;;  %v1230_v16 = vld [vmem:[%s1732_s2 + $0x38] sm:$0xff]  }
   0x6   :  { %124 = vmatpush1.bf16.msra.mxu0 %v1218_v3  ;;  %1058 = vmatprep.mubr.msk.bf16.mxu0 %vm113_vm0, %v1387_v13  ;;  %v1229_v15 = vld [vmem:[%s1733_s3 + $0x30] sm:$0xff]   ;;  %v1231_v17 = vld [vmem:[%s1733_s3 + $0x38] sm:$0xff]   ;;  %v1234_v18 = vld [vmem:[%s1732_s2 + $0x48] ss:$0 sps:$4 sm:$0x77]  }
   0x7   :  { %244 = vmatpush1.bf16.msra.mxu1 %v1219_v4  ;;  %125 = vmatprep.subr.bf16.mxu0 %v1299_v0  ;;  %v1232_v19 = vld [vmem:[%s1732_s2 + $0x40] sm:$0xff]   ;;  %v1235_v20 = vld [vmem:[%s1733_s3 + $0x48] ss:$0 sps:$4 sm:$0x77]   ;;  %v119_v22 = vsel %vm117_vm1, %v1234_v18, 0  ;;  %v1243_v29 = vld [vmem:[%s1735_s4 + $0x10] sm:$0xff]  }
   0x8   :  { %245 = vmatprep.subr.bf16.mxu1 %v1299_v0  ;;  %1069 = vmatprep.mubr.msk.bf16.mxu1 %vm113_vm0, %v1387_v13  ;;  %v1233_v21 = vld [vmem:[%s1733_s3 + $0x40] sm:$0xff]   ;;  %v239_v23 = vsel %vm117_vm1, %v1235_v20, 0  ;;  %v1241_v27 = vld [vmem:[%s1735_s4 + $0x8] sm:$0xff]   ;;  %v1244_v30 = vld [vmem:[%s1736_s5 + $0x10] sm:$0xff]  }
   0x9   :  { %v1430_v24 = vld [vmem:[%s1734_s0] ss:$8 sps:$4 sm:$0xff]   ;;  %v1245_v31 = vld [vmem:[%s1735_s4 + $0x18] sm:$0xff]   ;;  %v1277_v36 = vld [vmem:[%s1732_s2 + $0x94] ss:$0 sps:$4 sm:$0x77]  }
   0xa   :  { %126 = vmatpush1.bf16.msra.mxu0 %v1220_v5  ;;  %v1239_v25 = vld [vmem:[%s1735_s4] sm:$0xff]   ;;  %v1242_v28 = vld [vmem:[%s1736_s5 + $0x8] sm:$0xff]   ;;  %v1246_v32 = vld [vmem:[%s1736_s5 + $0x18] sm:$0xff]   ;;  %v1496_v40 = vsel %vm117_vm1, %v1277_v36, 0 }
   0xb   :  { %246 = vmatpush1.bf16.msra.mxu1 %v1221_v6  ;;  %127 = vmatprep.subr.bf16.mxu0 %v1299_v0  ;;  %v1240_v26 = vld [vmem:[%s1736_s5] sm:$0xff]   ;;  %v1249_v35 = vld [vmem:[%s1735_s4 + $0x28] sm:$0xff]   ;;  %v1278_v38 = vld [vmem:[%s1733_s3 + $0x94] ss:$0 sps:$4 sm:$0x77]  }
   0xc   :  { %247 = vmatprep.subr.bf16.mxu1 %v1299_v0  ;;  %v1247_v33 = vld [vmem:[%s1735_s4 + $0x20] sm:$0xff]   ;;  %v1250_v37 = vld [vmem:[%s1736_s5 + $0x28] sm:$0xff]   ;;  %v1251_v39 = vld [vmem:[%s1735_s4 + $0x30] sm:$0xff]   ;;  %v1502_v42 = vsel %vm117_vm1, %v1278_v38, 0 }
   0xd   :  { %v1248_v34 = vld [vmem:[%s1736_s5 + $0x20] sm:$0xff]   ;;  %v1252_v41 = vld [vmem:[%s1736_s5 + $0x30] sm:$0xff]   ;;  %v1253_v43 = vld [vmem:[%s1735_s4 + $0x38] sm:$0xff]  }
   0xe   :  { %128 = vmatpush1.bf16.msra.mxu0 %v1222_v7  ;;  %v1254_v44 = vld [vmem:[%s1736_s5 + $0x38] sm:$0xff]   ;;  %v1257_v45 = vld [vmem:[%s1735_s4 + $0x48] ss:$0 sps:$4 sm:$0x77]   ;;  %v1255_v46 = vld [vmem:[%s1735_s4 + $0x40] sm:$0xff]  }
   0xf   :  { %248 = vmatpush1.bf16.msra.mxu1 %v1223_v8  ;;  %129 = vmatprep.subr.bf16.mxu0 %v1299_v0  ;;  %v1258_v47 = vld [vmem:[%s1736_s5 + $0x48] ss:$0 sps:$4 sm:$0x77]   ;;  %v1256_v48 = vld [vmem:[%s1736_s5 + $0x40] sm:$0xff]   ;;  %v361_v49 = vsel %vm117_vm1, %v1257_v45, 0  ;;  %v1259_v51 = vld [vmem:[%s1732_s2 + $0x4c] sm:$0xff]  }
  0x10   :  { %249 = vmatprep.subr.bf16.mxu1 %v1299_v0  ;;  %v483_v50 = vsel %vm117_vm1, %v1258_v47, 0  ;;  %v1297_v52 = vld [vmem:[%s1735_s4 + $0x94] ss:$0 sps:$4 sm:$0x77]   ;;  %v26_v54 = vld [vmem:[%s1737_s1] sm:$0xff]  ;;  %v1260_v55 = vld [vmem:[%s1733_s3 + $0x4c] sm:$0xff]  }
  0x11   :  { %v1298_v53 = vld [vmem:[%s1736_s5 + $0x94] ss:$0 sps:$4 sm:$0x77]   ;;  %v1549_v56 = vsel %vm117_vm1, %v1297_v52, 0  ;;  %530 = vperm.xlu0 %1215, %v26_v54   ;;  %v27_v59 = vld [vmem:[%s1737_s1 + $0x8] sm:$0xff]  ;;  %v1263_v61 = vld [vmem:[%s1732_s2 + $0x5c] sm:$0xff]  }
  0x12   :  { %130 = vmatpush1.bf16.msra.mxu0 %v1224_v9  ;;  %v1553_v57 = vsel %vm117_vm1, %v1298_v53, 0  ;;  %v1261_v58 = vld [vmem:[%s1732_s2 + $0x54] sm:$0xff]   ;;  %v1264_v62 = vld [vmem:[%s1733_s3 + $0x5c] sm:$0xff]   ;;  %v1265_v63 = vld [vmem:[%s1732_s2 + $0x64] sm:$0xff]  }
  0x13   :  { %250 = vmatpush1.bf16.msra.mxu1 %v1225_v10  ;;  %131 = vmatprep.subr.bf16.mxu0 %v1299_v0  ;;  %v1262_v60 = vld [vmem:[%s1733_s3 + $0x54] sm:$0xff]   ;;  %v1266_v1 = vld [vmem:[%s1733_s3 + $0x64] sm:$0xff]   ;;  %v1267_v2 = vld [vmem:[%s1732_s2 + $0x6c] sm:$0xff]  }
  0x14   :  { %251 = vmatprep.subr.bf16.mxu1 %v1299_v0  ;;  %v1268_v3 = vld [vmem:[%s1733_s3 + $0x6c] sm:$0xff]   ;;  %v1269_v4 = vld [vmem:[%s1732_s2 + $0x74] sm:$0xff]   ;;  %v1271_v6 = vld [vmem:[%s1732_s2 + $0x7c] sm:$0xff]  }
  0x15   :  { %535 = vperm.xlu0 %1215, %v27_v59   ;;  %v1270_v5 = vld [vmem:[%s1733_s3 + $0x74] sm:$0xff]   ;;  %v1272_v7 = vld [vmem:[%s1733_s3 + $0x7c] sm:$0xff]   ;;  %v1273_v8 = vld [vmem:[%s1732_s2 + $0x84] sm:$0xff]  }
  0x16   :  { %132 = vmatpush1.bf16.msra.mxu0 %v1226_v11  ;;  %v1274_v9 = vld [vmem:[%s1733_s3 + $0x84] sm:$0xff]   ;;  %v1275_v10 = vld [vmem:[%s1732_s2 + $0x8c] sm:$0xff]   ;;  %v1284_v18 = vld [vmem:[%s1736_s5 + $0x5c] sm:$0xff]  }
  0x17   :  { %252 = vmatpush1.bf16.msra.mxu1 %v1227_v12  ;;  %133 = vmatprep.subr.bf16.mxu0 %v1299_v0  ;;  %v1276_v11 = vld [vmem:[%s1733_s3 + $0x8c] sm:$0xff]  }
  0x18   :  { %253 = vmatprep.subr.bf16.mxu1 %v1299_v0  ;;  %v1279_v12 = vld [vmem:[%s1735_s4 + $0x4c] sm:$0xff]  }
  0x19   :  { %v1287_v20 = vld [vmem:[%s1735_s4 + $0x6c] sm:$0xff]  }
  0x1a   :  { %134 = vmatpush1.bf16.msra.mxu0 %v1228_v14  ;;  %v1280_v14 = vld [vmem:[%s1736_s5 + $0x4c] sm:$0xff]  }
  0x1b   :  { %254 = vmatpush1.bf16.msra.mxu1 %v1229_v15  ;;  %135 = vmatprep.subr.bf16.mxu0 %v1299_v0  ;;  %v1281_v15 = vld [vmem:[%s1735_s4 + $0x54] sm:$0xff]  }
  0x1c   :  { %255 = vmatprep.subr.bf16.mxu1 %v1299_v0 }
  0x1e   :  { %136 = vmatpush1.bf16.msra.mxu0 %v1230_v16  ;;  %v1282_v16 = vld [vmem:[%s1736_s5 + $0x54] sm:$0xff]  }
  0x1f   :  { %256 = vmatpush1.bf16.msra.mxu1 %v1231_v17  ;;  %137 = vmatprep.subr.bf16.mxu0 %v1299_v0  ;;  %v1283_v17 = vld [vmem:[%s1735_s4 + $0x5c] sm:$0xff]  }
  0x20   :  { %257 = vmatprep.subr.bf16.mxu1 %v1299_v0 }
  0x22   :  { %138 = vmatpush1.bf16.msra.mxu0 %v1232_v19  ;;  %v1285_v19 = vld [vmem:[%s1735_s4 + $0x64] sm:$0xff]  }
  0x23   :  { %258 = vmatpush1.bf16.msra.mxu1 %v1233_v21  ;;  %139 = vmatprep.subr.bf16.mxu0 %v1299_v0  ;;  %v1288_v21 = vld [vmem:[%s1736_s5 + $0x6c] sm:$0xff]  }
  0x24   :  { %259 = vmatprep.subr.bf16.mxu1 %v1299_v0 }
  0x26   :  { %140 = vmatpush1.bf16.msra.mxu0 %v119_v22  ;;  %v1289_v22 = vld [vmem:[%s1735_s4 + $0x74] sm:$0xff]  }
  0x27   :  { %260 = vmatpush1.bf16.msra.mxu1 %v239_v23  ;;  %363 = vmatprep.subr.bf16.mxu0 %v1299_v0  ;;  %v1290_v23 = vld [vmem:[%s1736_s5 + $0x74] sm:$0xff]  }
  0x28   :  { %485 = vmatprep.subr.bf16.mxu1 %v1299_v0 }
  0x29   :  { %154 = vmatmul.mubr.bf16.vlgmr.msra.gmra.mrb[0].mxu0 %v1430_v24 }
  0x2a   :  { %274 = vmatmul.mubr.bf16.vlgmr.msra.gmra.mrb[0].mxu1 %v1430_v24  ;;  %364 = vmatpush1.bf16.msra.mxu0 %v1239_v25  ;;  %v1291_v25 = vld [vmem:[%s1735_s4 + $0x7c] sm:$0xff]  }
  0x2b   :  { %486 = vmatpush1.bf16.msra.mxu1 %v1240_v26  ;;  %365 = vmatprep.subr.bf16.mxu0 %v1299_v0  ;;  %v1292_v26 = vld [vmem:[%s1736_s5 + $0x7c] sm:$0xff]  }
  0x2c   :  { %487 = vmatprep.subr.bf16.mxu1 %v1299_v0  ;;  %1080 = vmatprep.mubr.msk.bf16.mxu0 %vm113_vm0, %v1387_v13 }
  0x2d   :  { %1091 = vmatprep.mubr.msk.bf16.mxu1 %vm113_vm0, %v1387_v13 }
  0x2e   :  { %366 = vmatpush1.bf16.msra.mxu0 %v1241_v27  ;;  %v1293_v27 = vld [vmem:[%s1735_s4 + $0x84] sm:$0xff]  }
  0x2f   :  { %488 = vmatpush1.bf16.msra.mxu1 %v1242_v28  ;;  %367 = vmatprep.subr.bf16.mxu0 %v1299_v0  ;;  %v1294_v28 = vld [vmem:[%s1736_s5 + $0x84] sm:$0xff]  }
  0x30   :  { %489 = vmatprep.subr.bf16.mxu1 %v1299_v0 }
  0x32   :  { %368 = vmatpush1.bf16.msra.mxu0 %v1243_v29  ;;  %v1295_v29 = vld [vmem:[%s1735_s4 + $0x8c] sm:$0xff]  }
  0x33   :  { %490 = vmatpush1.bf16.msra.mxu1 %v1244_v30  ;;  %369 = vmatprep.subr.bf16.mxu0 %v1299_v0  ;;  %v1296_v30 = vld [vmem:[%s1736_s5 + $0x8c] sm:$0xff]  }
  0x34   :  { %491 = vmatprep.subr.bf16.mxu1 %v1299_v0 }
  0x36   :  { %370 = vmatpush1.bf16.msra.mxu0 %v1245_v31 }
  0x37   :  { %492 = vmatpush1.bf16.msra.mxu1 %v1246_v32  ;;  %371 = vmatprep.subr.bf16.mxu0 %v1299_v0 }
  0x38   :  { %493 = vmatprep.subr.bf16.mxu1 %v1299_v0 }
  0x3a   :  { %372 = vmatpush1.bf16.msra.mxu0 %v1247_v33 }
  0x3b   :  { %494 = vmatpush1.bf16.msra.mxu1 %v1248_v34  ;;  %373 = vmatprep.subr.bf16.mxu0 %v1299_v0 }
  0x3c   :  { %495 = vmatprep.subr.bf16.mxu1 %v1299_v0 }
  0x3e   :  { %374 = vmatpush1.bf16.msra.mxu0 %v1249_v35 }
  0x3f   :  { %496 = vmatpush1.bf16.msra.mxu1 %v1250_v37  ;;  %375 = vmatprep.subr.bf16.mxu0 %v1299_v0 }
  0x40   :  { %497 = vmatprep.subr.bf16.mxu1 %v1299_v0 }
  0x42   :  { %376 = vmatpush1.bf16.msra.mxu0 %v1251_v39 }
  0x43   :  { %498 = vmatpush1.bf16.msra.mxu1 %v1252_v41  ;;  %377 = vmatprep.subr.bf16.mxu0 %v1299_v0 }
  0x44   :  { %499 = vmatprep.subr.bf16.mxu1 %v1299_v0 }
  0x46   :  { %378 = vmatpush1.bf16.msra.mxu0 %v1253_v43 }
  0x47   :  { %500 = vmatpush1.bf16.msra.mxu1 %v1254_v44  ;;  %379 = vmatprep.subr.bf16.mxu0 %v1299_v0 }
  0x48   :  { %501 = vmatprep.subr.bf16.mxu1 %v1299_v0 }
  0x4a   :  { %380 = vmatpush1.bf16.msra.mxu0 %v1255_v46 }
  0x4b   :  { %502 = vmatpush1.bf16.msra.mxu1 %v1256_v48  ;;  %381 = vmatprep.subr.bf16.mxu0 %v1299_v0 }
  0x4c   :  { %503 = vmatprep.subr.bf16.mxu1 %v1299_v0 }
  0x4e   :  { %382 = vmatpush1.bf16.msra.mxu0 %v361_v49 }
  0x4f   :  { %504 = vmatpush1.bf16.msra.mxu1 %v483_v50  ;;  %625 = vmatprep.subr.bf16.mxu0 %v1299_v0 }
  0x50   :  { %746 = vmatprep.subr.bf16.mxu1 %v1299_v0 }
  0x51   :  { %396 = vmatmul.mubr.bf16.vlgmr.msra.gmra.mrb[4].mxu0 %v1430_v24 }
  0x52   :  { %518 = vmatmul.mubr.bf16.vlgmr.msra.gmra.mrb[4].mxu1 %v1430_v24  ;;  %626 = vmatpush1.bf16.msra.mxu0 %v1259_v51 }
  0x53   :  { %747 = vmatpush1.bf16.msra.mxu1 %v1260_v55  ;;  %627 = vmatprep.subr.bf16.mxu0 %v1299_v0 }
  0x54   :  { %748 = vmatprep.subr.bf16.mxu1 %v1299_v0  ;;  %1121 = vmatprep.mubr.msk.bf16.mxu0 %vm113_vm0, %v1387_v13 }
  0x55   :  { %1151 = vmatprep.mubr.msk.bf16.mxu1 %vm113_vm0, %v1387_v13 }
  0x56   :  { %628 = vmatpush1.bf16.msra.mxu0 %v1261_v58 }
  0x57   :  { %749 = vmatpush1.bf16.msra.mxu1 %v1262_v60  ;;  %629 = vmatprep.subr.bf16.mxu0 %v1299_v0 }
  0x58   :  { %750 = vmatprep.subr.bf16.mxu1 %v1299_v0 }
  0x5a   :  { %630 = vmatpush1.bf16.msra.mxu0 %v1263_v61 }
  0x5b   :  { %751 = vmatpush1.bf16.msra.mxu1 %v1264_v62  ;;  %631 = vmatprep.subr.bf16.mxu0 %v1299_v0 }
  0x5c   :  { %752 = vmatprep.subr.bf16.mxu1 %v1299_v0 }
  0x5e   :  { %632 = vmatpush1.bf16.msra.mxu0 %v1265_v63 }
  0x5f   :  { %753 = vmatpush1.bf16.msra.mxu1 %v1266_v1  ;;  %633 = vmatprep.subr.bf16.mxu0 %v1299_v0 }
  0x60   :  { %754 = vmatprep.subr.bf16.mxu1 %v1299_v0 }
  0x62   :  { %634 = vmatpush1.bf16.msra.mxu0 %v1267_v2 }
  0x63   :  { %755 = vmatpush1.bf16.msra.mxu1 %v1268_v3  ;;  %635 = vmatprep.subr.bf16.mxu0 %v1299_v0 }
  0x64   :  { %756 = vmatprep.subr.bf16.mxu1 %v1299_v0 }
  0x66   :  { %636 = vmatpush1.bf16.msra.mxu0 %v1269_v4 }
  0x67   :  { %757 = vmatpush1.bf16.msra.mxu1 %v1270_v5  ;;  %637 = vmatprep.subr.bf16.mxu0 %v1299_v0 }
  0x68   :  { %758 = vmatprep.subr.bf16.mxu1 %v1299_v0 }
  0x6a   :  { %638 = vmatpush1.bf16.msra.mxu0 %v1271_v6 }
  0x6b   :  { %759 = vmatpush1.bf16.msra.mxu1 %v1272_v7  ;;  %639 = vmatprep.subr.bf16.mxu0 %v1299_v0 }
  0x6c   :  { %760 = vmatprep.subr.bf16.mxu1 %v1299_v0 }
  0x6e   :  { %640 = vmatpush1.bf16.msra.mxu0 %v1273_v8 }
  0x6f   :  { %761 = vmatpush1.bf16.msra.mxu1 %v1274_v9  ;;  %641 = vmatprep.subr.bf16.mxu0 %v1299_v0 }
  0x70   :  { %762 = vmatprep.subr.bf16.mxu1 %v1299_v0 }
  0x72   :  { %642 = vmatpush1.bf16.msra.mxu0 %v1275_v10 }
  0x73   :  { %763 = vmatpush1.bf16.msra.mxu1 %v1276_v11  ;;  %643 = vmatprep.subr.bf16.mxu0 %v1299_v0 }
  0x74   :  { %764 = vmatprep.subr.bf16.mxu1 %v1299_v0 }
  0x76   :  { %644 = vmatpush1.bf16.msra.mxu0 %v1496_v40 }
  0x77   :  { %765 = vmatpush1.bf16.msra.mxu1 %v1502_v42  ;;  %869 = vmatprep.subr.bf16.mxu0 %v1299_v0 }
  0x78   :  { %992 = vmatprep.subr.bf16.mxu1 %v1299_v0 }
  0x79   :  { %658 = vmatmul.mubr.bf16.vlgmr.msra.gmra.mrb[8].mxu0 %v1430_v24 }
  0x7a   :  { %779 = vmatmul.mubr.bf16.vlgmr.msra.gmra.mrb[8].mxu1 %v1430_v24  ;;  %870 = vmatpush1.bf16.msra.mxu0 %v1279_v12 }
  0x7b   :  { %993 = vmatpush1.bf16.msra.mxu1 %v1280_v14  ;;  %871 = vmatprep.subr.bf16.mxu0 %v1299_v0 }
  0x7c   :  { %994 = vmatprep.subr.bf16.mxu1 %v1299_v0  ;;  %1181 = vmatprep.mubr.msk.bf16.mxu0 %vm113_vm0, %v1387_v13 }
  0x7d   :  { %1211 = vmatprep.mubr.msk.bf16.mxu1 %vm113_vm0, %v1387_v13  ;;  %v1286_v13 = vld [vmem:[%s1736_s5 + $0x64] sm:$0xff]  }
  0x7e   :  { %872 = vmatpush1.bf16.msra.mxu0 %v1281_v15 }
  0x7f   :  { %995 = vmatpush1.bf16.msra.mxu1 %v1282_v16  ;;  %873 = vmatprep.subr.bf16.mxu0 %v1299_v0 }
  0x80   :  { %996 = vmatprep.subr.bf16.mxu1 %v1299_v0 }
  0x82   :  { %874 = vmatpush1.bf16.msra.mxu0 %v1283_v17 }
  0x83   :  { %997 = vmatpush1.bf16.msra.mxu1 %v1284_v18  ;;  %875 = vmatprep.subr.bf16.mxu0 %v1299_v0 }
  0x84   :  { %998 = vmatprep.subr.bf16.mxu1 %v1299_v0 }
  0x86   :  { %876 = vmatpush1.bf16.msra.mxu0 %v1285_v19 }
  0x87   :  { %999 = vmatpush1.bf16.msra.mxu1 %v1286_v13  ;;  %877 = vmatprep.subr.bf16.mxu0 %v1299_v0 }
  0x88   :  { %1000 = vmatprep.subr.bf16.mxu1 %v1299_v0 }
  0x8a   :  { %878 = vmatpush1.bf16.msra.mxu0 %v1287_v20 }
  0x8b   :  { %1001 = vmatpush1.bf16.msra.mxu1 %v1288_v21  ;;  %879 = vmatprep.subr.bf16.mxu0 %v1299_v0 }
  0x8c   :  { %1002 = vmatprep.subr.bf16.mxu1 %v1299_v0 }
  0x8e   :  { %880 = vmatpush1.bf16.msra.mxu0 %v1289_v22 }
  0x8f   :  { %1003 = vmatpush1.bf16.msra.mxu1 %v1290_v23  ;;  %881 = vmatprep.subr.bf16.mxu0 %v1299_v0 }
  0x90   :  { %1004 = vmatprep.subr.bf16.mxu1 %v1299_v0  ;;  %v531_v41 = vpop.permute.xlu0 %530 }
  0x92   :  { %882 = vmatpush1.bf16.msra.mxu0 %v1291_v25 }
  0x93   :  { %1005 = vmatpush1.bf16.msra.mxu1 %v1292_v26  ;;  %883 = vmatprep.subr.bf16.mxu0 %v1299_v0 }
  0x94   :  { %1006 = vmatprep.subr.bf16.mxu1 %v1299_v0  ;;  %v536_v51 = vpop.permute.xlu0 %535 }
  0x96   :  { %884 = vmatpush1.bf16.msra.mxu0 %v1293_v27 }
  0x97   :  { %1007 = vmatpush1.bf16.msra.mxu1 %v1294_v28  ;;  %885 = vmatprep.subr.bf16.mxu0 %v1299_v0 }
  0x98   :  { %1008 = vmatprep.subr.bf16.mxu1 %v1299_v0 }
  0x9a   :  { %886 = vmatpush1.bf16.msra.mxu0 %v1295_v29 }
  0x9b   :  { %1009 = vmatpush1.bf16.msra.mxu1 %v1296_v30  ;;  %887 = vmatprep.subr.bf16.mxu0 %v1299_v0 }
  0x9c   :  { %1010 = vmatprep.subr.bf16.mxu1 %v1299_v0 }
  0x9e   :  { %888 = vmatpush1.bf16.msra.mxu0 %v1549_v56 }
  0x9f   :  { %1011 = vmatpush1.bf16.msra.mxu1 %v1553_v57 }
  0xa1   :  { %902 = vmatmul.mubr.bf16.vlgmr.msra.gmra.mrb[12].mxu0 %v1430_v24 }
  0xa2   :  { %1025 = vmatmul.mubr.bf16.vlgmr.msra.gmra.mrb[12].mxu1 %v1430_v24 }
  0xfc   :  { %v155_v31 = vpop.f32.mrb[0].mxu0 }
  0xfd   :  { %v275_v32 = vpop.f32.mrb[0].mxu1  ;;  %v157_v33 = vpop.f32.mrb[1].mxu0 }
  0xfe   :  { %v282_v34 = vmax.f32 %v155_v31, %v275_v32  ;;  %v277_v35 = vpop.f32.mrb[1].mxu1  ;;  %v158_v36 = vpop.f32.mrb[2].mxu0 }
  0xff   :  { %v278_v37 = vpop.f32.mrb[2].mxu1  ;;  %v160_v38 = vpop.f32.mrb[3].mxu0 }
 0x100   :  { %v283_v39 = vmax.f32 %v158_v36, %v278_v37  ;;  %v280_v40 = vpop.f32.mrb[3].mxu1 }
 0x124   :  { %v397_v0 = vpop.f32.mrb[4].mxu0 }
 0x125   :  { %v404_v42 = vmax.f32 %v282_v34, %v397_v0  ;;  %v519_v43 = vpop.f32.mrb[4].mxu1  ;;  %v399_v44 = vpop.f32.mrb[5].mxu0 }
 0x126   :  { %v521_v45 = vpop.f32.mrb[5].mxu1  ;;  %v400_v46 = vpop.f32.mrb[6].mxu0 }
 0x127   :  { %v526_v47 = vmax.f32 %v404_v42, %v519_v43  ;;  %v405_v48 = vmax.f32 %v283_v39, %v400_v46  ;;  %v522_v24 = vpop.f32.mrb[6].mxu1  ;;  %v402_v49 = vpop.f32.mrb[7].mxu0 }
 0x128   :  { %v524_v50 = vpop.f32.mrb[7].mxu1 }
 0x129   :  { %v538_v52 = vadd.f32 %v531_v41, %v526_v47  ;;  %v527_v53 = vmax.f32 %v405_v48, %v522_v24 }
 0x12b   :  { %v540_v54 = vmax.f32 %v538_v52, 0.0  ;;  %v539_v55 = vadd.f32 %v536_v51, %v527_v53 }
 0x12d   :  { %543 = vst.msk [vmem:[%s1738_s6] sm:$0xff] %vm542_vm2, %v540_v54  ;;  %v541_v56 = vmax.f32 %v539_v55, 0.0 }
 0x12f   :  { %544 = vst.msk [vmem:[%s1738_s6 + $0x8] sm:$0xff] %vm542_vm2, %v541_v56 }
 0x14c   :  { %v659_v57 = vpop.f32.mrb[8].mxu0 }
 0x14d   :  { %v780_v58 = vpop.f32.mrb[8].mxu1  ;;  %v661_v59 = vpop.f32.mrb[9].mxu0 }
 0x14e   :  { %v787_v60 = vmax.f32 %v659_v57, %v780_v58  ;;  %v782_v61 = vpop.f32.mrb[9].mxu1  ;;  %v662_v62 = vpop.f32.mrb[10].mxu0 }
 0x14f   :  { %v783_v63 = vpop.f32.mrb[10].mxu1  ;;  %v664_v1 = vpop.f32.mrb[11].mxu0 }
 0x150   :  { %v788_v2 = vmax.f32 %v662_v62, %v783_v63  ;;  %v785_v3 = vpop.f32.mrb[11].mxu1 }
 0x174   :  { %v903_v4 = vpop.f32.mrb[12].mxu0 }
 0x175   :  { %v910_v5 = vmax.f32 %v787_v60, %v903_v4  ;;  %v1026_v6 = vpop.f32.mrb[12].mxu1  ;;  %v905_v7 = vpop.f32.mrb[13].mxu0 }
 0x176   :  { %v1028_v8 = vpop.f32.mrb[13].mxu1  ;;  %v906_v9 = vpop.f32.mrb[14].mxu0 }
 0x177   :  { %v1033_v10 = vmax.f32 %v910_v5, %v1026_v6  ;;  %v911_v11 = vmax.f32 %v788_v2, %v906_v9  ;;  %v1029_v12 = vpop.f32.mrb[14].mxu1  ;;  %v908_v14 = vpop.f32.mrb[15].mxu0 }
 0x178   :  { %v1031_v15 = vpop.f32.mrb[15].mxu1 }
 0x179   :  { %v1035_v16 = vadd.f32 %v1033_v10, %v531_v41  ;;  %v1034_v17 = vmax.f32 %v911_v11, %v1029_v12 }
 0x17b   :  { %v1037_v18 = vmax.f32 %v1035_v16, 0.0  ;;  %v1036_v19 = vadd.f32 %v1034_v17, %v536_v51 }
 0x17d   :  { %1212 = vst.msk [vmem:[%s1738_s6 + $0x10] sm:$0xff] %vm542_vm2, %v1037_v18  ;;  %v1038_v13 = vmax.f32 %v1036_v19, 0.0 }
 0x17f   :  { %1213 = vst.msk [vmem:[%s1738_s6 + $0x18] sm:$0xff] %vm542_vm2, %v1038_v13 }

// kernel: conv_network_forward.5
= control target key start
LH: loop header
LB: loop body
LE: loop exit
PB: predicated region body
PF: predicated region fallthrough
CT: control target
= control target key end

     0   :  { %v13632_v32 = vmov 1983009808   ;;  %v36_v34 = vlaneseq  ;;  %vm5734_vm0 = vcmask 261120   ;;  %s18466_s0 = inlined_call_operand.vmem [shape: f32[2,928], index: 0, kind: input, shape index: {}]   ;;  %s18467_s1 = inlined_call_operand.vmem [shape: bf16[928,2048], index: 1, kind: input, shape index: {}]   ;;  %s18468_s2 = inlined_call_operand.vmem [shape: f32[1,2048], index: 2, kind: input, shape index: {}]   ;;  %s18469_s3 = inlined_call_operand.vmem [shape: bf16[2048,512], index: 3, kind: input, shape index: {}]   ;;  %s18470_s4 = inlined_call_operand.vmem [shape: f32[1,512], index: 4, kind: input, shape index: {}]   ;;  %s18471_s5 = inlined_call_operand.vmem [shape: f32[512,2], index: 5, kind: input, shape index: {}]   ;;  %s18472_s6 = inlined_call_operand.vmem [shape: f32[1,2], index: 6, kind: input, shape index: {}]   ;;  %s18473_s7 = inlined_call_operand.hbm [shape: f32[2,2], index: 7, kind: output, shape index: {}]  }
   0x1   :  { %v82_v0 = vld [vmem:[%s18467_s1] sm:$0xff]  ;;  %v83_v2 = vld [vmem:[%s18467_s1 + $0x8] sm:$0xff]  ;;  %v34_v33 = vunpack.c.l.s4 %v13632_v32 }
   0x2   :  { %v90_v1 = vld [vmem:[%s18467_s1 + $0x40] sm:$0xff]  ;;  %v91_v4 = vld [vmem:[%s18467_s1 + $0x48] sm:$0xff]  ;;  %v13740_v44 = vshrl.u32 %v36_v34, 7 }
   0x3   :  { %v11076_v3 = vcombine.high %v82_v0, %v90_v1  ;;  %v11075_v5 = vcombine.low %v82_v0, %v90_v1  ;;  %v98_v6 = vld [vmem:[%s18467_s1 + $0x80] sm:$0xff]  ;;  %v11078_v8 = vcombine.high %v83_v2, %v91_v4  ;;  %v11077_v9 = vcombine.low %v83_v2, %v91_v4  ;;  %v99_v11 = vld [vmem:[%s18467_s1 + $0x88] sm:$0xff] }
   0x4   :  { %v106_v7 = vld [vmem:[%s18467_s1 + $0xc0] sm:$0xff]  ;;  %v107_v12 = vld [vmem:[%s18467_s1 + $0xc8] sm:$0xff]  ;;  %v35_v43 = vunpack.c.0.s8 %v34_v33 }
   0x5   :  { %v11092_v10 = vcombine.high %v98_v6, %v106_v7  ;;  %v114_v13 = vld [vmem:[%s18467_s1 + $0x100] sm:$0xff]  ;;  %5738 = vmatprep.subr.bf16.mxu0 %v11076_v3  ;;  %v11094_v14 = vcombine.high %v99_v11, %v107_v12  ;;  %v115_v16 = vld [vmem:[%s18467_s1 + $0x108] sm:$0xff]  ;;  %5902 = vmatprep.subr.bf16.mxu1 %v11078_v8  ;;  %v11091_v18 = vcombine.low %v98_v6, %v106_v7 }
   0x6   :  { %v122_v15 = vld [vmem:[%s18467_s1 + $0x140] sm:$0xff]  ;;  %v123_v17 = vld [vmem:[%s18467_s1 + $0x148] sm:$0xff]  ;;  %5739 = vmatpush1.bf16.msra.mxu0 %v11075_v5  ;;  %5903 = vmatpush1.bf16.msra.mxu1 %v11077_v9  ;;  %v11093_v19 = vcombine.low %v99_v11, %v107_v12  ;;  %v13755_v53 = vsub.s32 %v35_v43, %v13740_v44 }
   0x7   :  { %5740 = vmatprep.subr.bf16.mxu0 %v11092_v10  ;;  %v11108_v20 = vcombine.high %v114_v13, %v122_v15  ;;  %5904 = vmatprep.subr.bf16.mxu1 %v11094_v14  ;;  %v11110_v21 = vcombine.high %v115_v16, %v123_v17  ;;  %v130_v22 = vld [vmem:[%s18467_s1 + $0x180] sm:$0xff]  ;;  %v131_v24 = vld [vmem:[%s18467_s1 + $0x188] sm:$0xff]  ;;  %v11107_v26 = vcombine.low %v114_v13, %v122_v15 }
   0x8   :  { %v138_v23 = vld [vmem:[%s18467_s1 + $0x1c0] sm:$0xff]  ;;  %v139_v25 = vld [vmem:[%s18467_s1 + $0x1c8] sm:$0xff]  ;;  %v11109_v27 = vcombine.low %v115_v16, %v123_v17 }
   0x9   :  { %v11124_v28 = vcombine.high %v130_v22, %v138_v23  ;;  %v11126_v29 = vcombine.high %v131_v24, %v139_v25  ;;  %v146_v30 = vld [vmem:[%s18467_s1 + $0x200] sm:$0xff]  ;;  %v147_v35 = vld [vmem:[%s18467_s1 + $0x208] sm:$0xff]  ;;  %v11123_v37 = vcombine.low %v130_v22, %v138_v23  ;;  %v11125_v38 = vcombine.low %v131_v24, %v139_v25 }
   0xa   :  { %5741 = vmatpush1.bf16.msra.mxu0 %v11091_v18  ;;  %5905 = vmatpush1.bf16.msra.mxu1 %v11093_v19  ;;  %v154_v31 = vld [vmem:[%s18467_s1 + $0x240] sm:$0xff]  ;;  %v155_v36 = vld [vmem:[%s18467_s1 + $0x248] sm:$0xff] }
   0xb   :  { %5742 = vmatprep.subr.bf16.mxu0 %v11108_v20  ;;  %5906 = vmatprep.subr.bf16.mxu1 %v11110_v21  ;;  %v11140_v39 = vcombine.high %v146_v30, %v154_v31  ;;  %v11142_v40 = vcombine.high %v147_v35, %v155_v36  ;;  %v162_v41 = vld [vmem:[%s18467_s1 + $0x280] sm:$0xff]  ;;  %v163_v45 = vld [vmem:[%s18467_s1 + $0x288] sm:$0xff]  ;;  %v11139_v47 = vcombine.low %v146_v30, %v154_v31 }
   0xc   :  { %v170_v42 = vld [vmem:[%s18467_s1 + $0x2c0] sm:$0xff]  ;;  %v171_v46 = vld [vmem:[%s18467_s1 + $0x2c8] sm:$0xff]  ;;  %v11141_v48 = vcombine.low %v147_v35, %v155_v36 }
   0xd   :  { %v11156_v49 = vcombine.high %v162_v41, %v170_v42  ;;  %v11158_v50 = vcombine.high %v163_v45, %v171_v46  ;;  %v178_v51 = vld [vmem:[%s18467_s1 + $0x300] sm:$0xff]  ;;  %v179_v54 = vld [vmem:[%s18467_s1 + $0x308] sm:$0xff]  ;;  %v11155_v56 = vcombine.low %v162_v41, %v170_v42  ;;  %v11157_v57 = vcombine.low %v163_v45, %v171_v46 }
   0xe   :  { %5743 = vmatpush1.bf16.msra.mxu0 %v11107_v26  ;;  %5907 = vmatpush1.bf16.msra.mxu1 %v11109_v27  ;;  %v186_v52 = vld [vmem:[%s18467_s1 + $0x340] sm:$0xff]  ;;  %v187_v55 = vld [vmem:[%s18467_s1 + $0x348] sm:$0xff] }
   0xf   :  { %5744 = vmatprep.subr.bf16.mxu0 %v11124_v28  ;;  %5908 = vmatprep.subr.bf16.mxu1 %v11126_v29  ;;  %v11172_v58 = vcombine.high %v178_v51, %v186_v52  ;;  %v13766_v59 = vld [vmem:[%s18466_s0] sm:$0xff]  ;;  %v11174_v60 = vcombine.high %v179_v54, %v187_v55  ;;  %v195_v0 = vld [vmem:[%s18467_s1 + $0x388] sm:$0xff]  ;;  %v11171_v2 = vcombine.low %v178_v51, %v186_v52 }
  0x10   :  { %v194_v61 = vld [vmem:[%s18467_s1 + $0x380] sm:$0xff]  ;;  %v13776_v63 = vrot.slane %v13766_v59, %v13755_v53  ;;  %v203_v1 = vld [vmem:[%s18467_s1 + $0x3c8] sm:$0xff]  ;;  %v11173_v4 = vcombine.low %v179_v54, %v187_v55 }
  0x11   :  { %v202_v62 = vld [vmem:[%s18467_s1 + $0x3c0] sm:$0xff]  ;;  %v11190_v6 = vcombine.high %v195_v0, %v203_v1  ;;  %v211_v10 = vld [vmem:[%s18467_s1 + $0x408] sm:$0xff]  ;;  %v11189_v13 = vcombine.low %v195_v0, %v203_v1 }
  0x12   :  { %5745 = vmatpush1.bf16.msra.mxu0 %v11123_v37  ;;  %5909 = vmatpush1.bf16.msra.mxu1 %v11125_v38  ;;  %v47_v3 = vcombine.high %v13776_v63, %v13776_v63  ;;  %v11188_v5 = vcombine.high %v194_v61, %v202_v62  ;;  %v210_v7 = vld [vmem:[%s18467_s1 + $0x400] sm:$0xff]  ;;  %v219_v11 = vld [vmem:[%s18467_s1 + $0x448] sm:$0xff]  ;;  %v11187_v12 = vcombine.low %v194_v61, %v202_v62 }
  0x13   :  { %5746 = vmatprep.subr.bf16.mxu0 %v11140_v39  ;;  %5910 = vmatprep.subr.bf16.mxu1 %v11142_v40  ;;  %v218_v8 = vld [vmem:[%s18467_s1 + $0x440] sm:$0xff]  ;;  %v11206_v15 = vcombine.high %v211_v10, %v219_v11  ;;  %v227_v18 = vld [vmem:[%s18467_s1 + $0x488] sm:$0xff]  ;;  %v11205_v21 = vcombine.low %v211_v10, %v219_v11 }
  0x14   :  { %v13792_v9 = vpack.c.bf16 %v47_v3, %v47_v3  ;;  %v11204_v14 = vcombine.high %v210_v7, %v218_v8  ;;  %v226_v16 = vld [vmem:[%s18467_s1 + $0x480] sm:$0xff]  ;;  %v235_v19 = vld [vmem:[%s18467_s1 + $0x4c8] sm:$0xff]  ;;  %v11203_v20 = vcombine.low %v210_v7, %v218_v8 }
  0x15   :  { %v234_v17 = vld [vmem:[%s18467_s1 + $0x4c0] sm:$0xff]  ;;  %v11222_v23 = vcombine.high %v227_v18, %v235_v19  ;;  %v243_v26 = vld [vmem:[%s18467_s1 + $0x508] sm:$0xff]  ;;  %v11221_v29 = vcombine.low %v227_v18, %v235_v19 }
  0x16   :  { %5747 = vmatpush1.bf16.msra.mxu0 %v11139_v47  ;;  %5911 = vmatpush1.bf16.msra.mxu1 %v11141_v48  ;;  %v11220_v22 = vcombine.high %v226_v16, %v234_v17  ;;  %v242_v24 = vld [vmem:[%s18467_s1 + $0x500] sm:$0xff]  ;;  %v251_v27 = vld [vmem:[%s18467_s1 + $0x548] sm:$0xff]  ;;  %v11219_v28 = vcombine.low %v226_v16, %v234_v17 }
  0x17   :  { %5748 = vmatprep.subr.bf16.mxu0 %v11156_v49  ;;  %5912 = vmatprep.subr.bf16.mxu1 %v11158_v50  ;;  %v250_v25 = vld [vmem:[%s18467_s1 + $0x540] sm:$0xff]  ;;  %v11238_v31 = vcombine.high %v243_v26, %v251_v27  ;;  %v259_v34 = vld [vmem:[%s18467_s1 + $0x588] sm:$0xff]  ;;  %v11237_v37 = vcombine.low %v243_v26, %v251_v27 }
  0x18   :  { %5770 = vmatprep.mubr.bf16.mxu0 %v13792_v9  ;;  %5934 = vmatprep.mubr.bf16.mxu1 %v13792_v9  ;;  %v11236_v30 = vcombine.high %v242_v24, %v250_v25  ;;  %v258_v32 = vld [vmem:[%s18467_s1 + $0x580] sm:$0xff]  ;;  %v267_v35 = vld [vmem:[%s18467_s1 + $0x5c8] sm:$0xff]  ;;  %v11235_v36 = vcombine.low %v242_v24, %v250_v25  ;;  %v13913_v25 = vpack.c.bf16 %v13776_v63, %v13776_v63 }
  0x19   :  { %v266_v33 = vld [vmem:[%s18467_s1 + $0x5c0] sm:$0xff]  ;;  %v11254_v39 = vcombine.high %v259_v34, %v267_v35  ;;  %v275_v42 = vld [vmem:[%s18467_s1 + $0x608] sm:$0xff]  ;;  %v11253_v46 = vcombine.low %v259_v34, %v267_v35 }
  0x1a   :  { %5749 = vmatpush1.bf16.msra.mxu0 %v11155_v56  ;;  %5913 = vmatpush1.bf16.msra.mxu1 %v11157_v57  ;;  %v11252_v38 = vcombine.high %v258_v32, %v266_v33  ;;  %v274_v40 = vld [vmem:[%s18467_s1 + $0x600] sm:$0xff]  ;;  %v283_v43 = vld [vmem:[%s18467_s1 + $0x648] sm:$0xff]  ;;  %v11251_v45 = vcombine.low %v258_v32, %v266_v33 }
  0x1b   :  { %5750 = vmatprep.subr.bf16.mxu0 %v11172_v58  ;;  %5914 = vmatprep.subr.bf16.mxu1 %v11174_v60  ;;  %v282_v41 = vld [vmem:[%s18467_s1 + $0x640] sm:$0xff]  ;;  %v11270_v48 = vcombine.high %v275_v42, %v283_v43  ;;  %v291_v51 = vld [vmem:[%s18467_s1 + $0x688] sm:$0xff]  ;;  %v11269_v55 = vcombine.low %v275_v42, %v283_v43 }
  0x1c   :  { %v11268_v47 = vcombine.high %v274_v40, %v282_v41  ;;  %v290_v49 = vld [vmem:[%s18467_s1 + $0x680] sm:$0xff]  ;;  %v299_v52 = vld [vmem:[%s18467_s1 + $0x6c8] sm:$0xff]  ;;  %v11267_v54 = vcombine.low %v274_v40, %v282_v41 }
  0x1d   :  { %v298_v50 = vld [vmem:[%s18467_s1 + $0x6c0] sm:$0xff]  ;;  %v11286_v57 = vcombine.high %v291_v51, %v299_v52  ;;  %v307_v61 = vld [vmem:[%s18467_s1 + $0x708] sm:$0xff]  ;;  %v11285_v1 = vcombine.low %v291_v51, %v299_v52 }
  0x1e   :  { %5751 = vmatpush1.bf16.msra.mxu0 %v11171_v2  ;;  %5915 = vmatpush1.bf16.msra.mxu1 %v11173_v4  ;;  %v11284_v56 = vcombine.high %v290_v49, %v298_v50  ;;  %v306_v58 = vld [vmem:[%s18467_s1 + $0x700] sm:$0xff]  ;;  %v315_v62 = vld [vmem:[%s18467_s1 + $0x748] sm:$0xff]  ;;  %v11283_v0 = vcombine.low %v290_v49, %v298_v50 }
  0x1f   :  { %5752 = vmatprep.subr.bf16.mxu0 %v11188_v5  ;;  %5916 = vmatprep.subr.bf16.mxu1 %v11190_v6  ;;  %v314_v60 = vld [vmem:[%s18467_s1 + $0x740] sm:$0xff]  ;;  %v11302_v3 = vcombine.high %v307_v61, %v315_v62  ;;  %v32_v6 = vcombine.high %v13766_v59, %v13766_v59  ;;  %v323_v7 = vld [vmem:[%s18467_s1 + $0x788] sm:$0xff]  ;;  %v11301_v11 = vcombine.low %v307_v61, %v315_v62 }
  0x20   :  { %v11300_v2 = vcombine.high %v306_v58, %v314_v60  ;;  %v322_v4 = vld [vmem:[%s18467_s1 + $0x780] sm:$0xff]  ;;  %v331_v8 = vld [vmem:[%s18467_s1 + $0x7c8] sm:$0xff]  ;;  %v11299_v10 = vcombine.low %v306_v58, %v314_v60 }
  0x21   :  { %v330_v5 = vld [vmem:[%s18467_s1 + $0x7c0] sm:$0xff]  ;;  %v339_v16 = vld [vmem:[%s18467_s1 + $0x808] sm:$0xff]  ;;  %v11317_v19 = vcombine.low %v323_v7, %v331_v8 }
  0x22   :  { %5753 = vmatpush1.bf16.msra.mxu0 %v11187_v12  ;;  %5917 = vmatpush1.bf16.msra.mxu1 %v11189_v13  ;;  %v11316_v12 = vcombine.high %v322_v4, %v330_v5  ;;  %v11318_v13 = vcombine.high %v323_v7, %v331_v8  ;;  %v338_v59 = vld [vmem:[%s18467_s1 + $0x800] sm:$0xff]  ;;  %v347_v17 = vld [vmem:[%s18467_s1 + $0x848] sm:$0xff]  ;;  %v11315_v18 = vcombine.low %v322_v4, %v330_v5 }
  0x23   :  { %5754 = vmatprep.subr.bf16.mxu0 %v11204_v14  ;;  %5918 = vmatprep.subr.bf16.mxu1 %v11206_v15  ;;  %v346_v14 = vld [vmem:[%s18467_s1 + $0x840] sm:$0xff]  ;;  %v13895_v15 = vrot.slane %v32_v6, %v13755_v53  ;;  %v355_v26 = vld [vmem:[%s18467_s1 + $0x888] sm:$0xff] }
  0x24   :  { %v363_v27 = vld [vmem:[%s18467_s1 + $0x8c8] sm:$0xff]  ;;  %v378_v63 = vld [vmem:[%s18467_s1 + $0x940] sm:$0xff] }
  0x25   :  { %v48_v24 = vcombine.high %v13895_v15, %v13895_v15  ;;  %v371_v32 = vld [vmem:[%s18467_s1 + $0x908] sm:$0xff]  ;;  %v11350_v33 = vcombine.high %v355_v26, %v363_v27  ;;  %v394_v40 = vld [vmem:[%s18467_s1 + $0x9c0] sm:$0xff] }
  0x26   :  { %5755 = vmatpush1.bf16.msra.mxu0 %v11203_v20  ;;  %5919 = vmatpush1.bf16.msra.mxu1 %v11205_v21  ;;  %v11332_v20 = vcombine.high %v338_v59, %v346_v14  ;;  %v11334_v21 = vcombine.high %v339_v16, %v347_v17  ;;  %v379_v34 = vld [vmem:[%s18467_s1 + $0x948] sm:$0xff]  ;;  %v410_v49 = vld [vmem:[%s18467_s1 + $0xa40] sm:$0xff] }
  0x27   :  { %5756 = vmatprep.subr.bf16.mxu0 %v11220_v22  ;;  %5920 = vmatprep.subr.bf16.mxu1 %v11222_v23  ;;  %v354_v22 = vld [vmem:[%s18467_s1 + $0x880] sm:$0xff]  ;;  %v13933_v35 = vpack.c.bf16 %v48_v24, %v48_v24  ;;  %v387_v41 = vld [vmem:[%s18467_s1 + $0x988] sm:$0xff]  ;;  %v11366_v42 = vcombine.high %v371_v32, %v379_v34 }
  0x28   :  { %v362_v23 = vld [vmem:[%s18467_s1 + $0x8c0] sm:$0xff]  ;;  %v395_v43 = vld [vmem:[%s18467_s1 + $0x9c8] sm:$0xff] }
  0x29   :  { %v403_v50 = vld [vmem:[%s18467_s1 + $0xa08] sm:$0xff]  ;;  %v11382_v51 = vcombine.high %v387_v41, %v395_v43  ;;  %v426_v58 = vld [vmem:[%s18467_s1 + $0xac0] sm:$0xff] }
  0x2a   :  { %5757 = vmatpush1.bf16.msra.mxu0 %v11219_v28  ;;  %5921 = vmatpush1.bf16.msra.mxu1 %v11221_v29  ;;  %v11331_v28 = vcombine.low %v338_v59, %v346_v14  ;;  %v11333_v29 = vcombine.low %v339_v16, %v347_v17  ;;  %v411_v52 = vld [vmem:[%s18467_s1 + $0xa48] sm:$0xff]  ;;  %v442_v4 = vld [vmem:[%s18467_s1 + $0xb40] sm:$0xff] }
  0x2b   :  { %5758 = vmatprep.subr.bf16.mxu0 %v11236_v30  ;;  %5922 = vmatprep.subr.bf16.mxu1 %v11238_v31  ;;  %v11348_v30 = vcombine.high %v354_v22, %v362_v23  ;;  %v370_v31 = vld [vmem:[%s18467_s1 + $0x900] sm:$0xff]  ;;  %v419_v60 = vld [vmem:[%s18467_s1 + $0xa88] sm:$0xff]  ;;  %v11398_v61 = vcombine.high %v403_v50, %v411_v52 }
  0x2c   :  { %v427_v62 = vld [vmem:[%s18467_s1 + $0xac8] sm:$0xff] }
  0x2d   :  { %v435_v5 = vld [vmem:[%s18467_s1 + $0xb08] sm:$0xff]  ;;  %v11414_v6 = vcombine.high %v419_v60, %v427_v62 }
  0x2e   :  { %5759 = vmatpush1.bf16.msra.mxu0 %v11235_v36  ;;  %5923 = vmatpush1.bf16.msra.mxu1 %v11237_v37  ;;  %v11347_v36 = vcombine.low %v354_v22, %v362_v23  ;;  %v11349_v37 = vcombine.low %v355_v26, %v363_v27  ;;  %v443_v7 = vld [vmem:[%s18467_s1 + $0xb48] sm:$0xff] }
  0x2f   :  { %5760 = vmatprep.subr.bf16.mxu0 %v11252_v38  ;;  %5924 = vmatprep.subr.bf16.mxu1 %v11254_v39  ;;  %v11364_v38 = vcombine.high %v370_v31, %v378_v63  ;;  %v386_v39 = vld [vmem:[%s18467_s1 + $0x980] sm:$0xff]  ;;  %v451_v59 = vld [vmem:[%s18467_s1 + $0xb88] sm:$0xff]  ;;  %v11430_v14 = vcombine.high %v435_v5, %v443_v7 }
  0x30   :  { %v459_v16 = vld [vmem:[%s18467_s1 + $0xbc8] sm:$0xff] }
  0x31   :  { %v467_v22 = vld [vmem:[%s18467_s1 + $0xc08] sm:$0xff]  ;;  %v11446_v23 = vcombine.high %v451_v59, %v459_v16  ;;  %v11445_v27 = vcombine.low %v451_v59, %v459_v16  ;;  %v578_v16 = vld [vmem:[%s18467_s1 + $0xf80] sm:$0xff] }
  0x32   :  { %5761 = vmatpush1.bf16.msra.mxu0 %v11251_v45  ;;  %5925 = vmatpush1.bf16.msra.mxu1 %v11253_v46  ;;  %v11363_v45 = vcombine.low %v370_v31, %v378_v63  ;;  %v11365_v46 = vcombine.low %v371_v32, %v379_v34  ;;  %v475_v24 = vld [vmem:[%s18467_s1 + $0xc48] sm:$0xff] }
  0x33   :  { %5762 = vmatprep.subr.bf16.mxu0 %v11268_v47  ;;  %5926 = vmatprep.subr.bf16.mxu1 %v11270_v48  ;;  %v11380_v47 = vcombine.high %v386_v39, %v394_v40  ;;  %v402_v48 = vld [vmem:[%s18467_s1 + $0xa00] sm:$0xff]  ;;  %v483_v31 = vld [vmem:[%s18467_s1 + $0xc88] sm:$0xff]  ;;  %v11462_v63 = vcombine.high %v467_v22, %v475_v24  ;;  %v11461_v34 = vcombine.low %v467_v22, %v475_v24 }
  0x34   :  { %v491_v32 = vld [vmem:[%s18467_s1 + $0xcc8] sm:$0xff] }
  0x35   :  { %v571_v59 = vld [vmem:[%s18467_s1 + $0xf48] sm:$0xff] }
  0x36   :  { %5763 = vmatpush1.bf16.msra.mxu0 %v11267_v54  ;;  %5927 = vmatpush1.bf16.msra.mxu1 %v11269_v55  ;;  %v11379_v54 = vcombine.low %v386_v39, %v394_v40  ;;  %v11381_v55 = vcombine.low %v387_v41, %v395_v43  ;;  %v499_v39 = vld [vmem:[%s18467_s1 + $0xd08] sm:$0xff]  ;;  %v11478_v40 = vcombine.high %v483_v31, %v491_v32 }
  0x37   :  { %5764 = vmatprep.subr.bf16.mxu0 %v11284_v56  ;;  %5928 = vmatprep.subr.bf16.mxu1 %v11286_v57  ;;  %v11396_v56 = vcombine.high %v402_v48, %v410_v49  ;;  %v418_v57 = vld [vmem:[%s18467_s1 + $0xa80] sm:$0xff]  ;;  %v507_v41 = vld [vmem:[%s18467_s1 + $0xd48] sm:$0xff]  ;;  %v11477_v43 = vcombine.low %v483_v31, %v491_v32 }
  0x38   :  { %v11411_v8 = vcombine.low %v418_v57, %v426_v58 }
  0x3a   :  { %5765 = vmatpush1.bf16.msra.mxu0 %v11283_v0  ;;  %5929 = vmatpush1.bf16.msra.mxu1 %v11285_v1  ;;  %v11395_v0 = vcombine.low %v402_v48, %v410_v49  ;;  %v11397_v1 = vcombine.low %v403_v50, %v411_v52  ;;  %v515_v48 = vld [vmem:[%s18467_s1 + $0xd88] sm:$0xff]  ;;  %v11494_v49 = vcombine.high %v499_v39, %v507_v41 }
  0x3b   :  { %5766 = vmatprep.subr.bf16.mxu0 %v11300_v2  ;;  %5930 = vmatprep.subr.bf16.mxu1 %v11302_v3  ;;  %v11412_v2 = vcombine.high %v418_v57, %v426_v58  ;;  %v434_v3 = vld [vmem:[%s18467_s1 + $0xb00] sm:$0xff]  ;;  %v523_v50 = vld [vmem:[%s18467_s1 + $0xdc8] sm:$0xff]  ;;  %v11493_v52 = vcombine.low %v499_v39, %v507_v41 }
  0x3c   :  { %v11427_v17 = vcombine.low %v434_v3, %v442_v4  ;;  %v531_v57 = vld [vmem:[%s18467_s1 + $0xe08] sm:$0xff]  ;;  %v11510_v58 = vcombine.high %v515_v48, %v523_v50 }
  0x3d   :  { %v611_v39 = vld [vmem:[%s18467_s1 + $0x1088] sm:$0xff] }
  0x3e   :  { %5767 = vmatpush1.bf16.msra.mxu0 %v11299_v10  ;;  %5931 = vmatpush1.bf16.msra.mxu1 %v11301_v11  ;;  %v11413_v10 = vcombine.low %v419_v60, %v427_v62  ;;  %v11428_v11 = vcombine.high %v434_v3, %v442_v4  ;;  %v539_v60 = vld [vmem:[%s18467_s1 + $0xe48] sm:$0xff]  ;;  %v11509_v62 = vcombine.low %v515_v48, %v523_v50  ;;  %v626_v48 = vld [vmem:[%s18467_s1 + $0x1100] sm:$0xff] }
  0x3f   :  { %5768 = vmatprep.subr.bf16.mxu0 %v11316_v12  ;;  %5932 = vmatprep.subr.bf16.mxu1 %v11318_v13  ;;  %v450_v12 = vld [vmem:[%s18467_s1 + $0xb80] sm:$0xff]  ;;  %v547_v3 = vld [vmem:[%s18467_s1 + $0xe88] sm:$0xff]  ;;  %v11526_v4 = vcombine.high %v531_v57, %v539_v60 }
  0x40   :  { %v458_v13 = vld [vmem:[%s18467_s1 + $0xbc0] sm:$0xff]  ;;  %v619_v41 = vld [vmem:[%s18467_s1 + $0x10c8] sm:$0xff] }
  0x41   :  { %v11443_v26 = vcombine.low %v450_v12, %v458_v13  ;;  %v627_v50 = vld [vmem:[%s18467_s1 + $0x1108] sm:$0xff] }
  0x42   :  { %5769 = vmatpush1.bf16.msra.mxu0 %v11315_v18  ;;  %5933 = vmatpush1.bf16.msra.mxu1 %v11317_v19  ;;  %v11429_v18 = vcombine.low %v435_v5, %v443_v7  ;;  %v11444_v19 = vcombine.high %v450_v12, %v458_v13  ;;  %v555_v5 = vld [vmem:[%s18467_s1 + $0xec8] sm:$0xff]  ;;  %v11525_v7 = vcombine.low %v531_v57, %v539_v60  ;;  %v642_v57 = vld [vmem:[%s18467_s1 + $0x1180] sm:$0xff] }
  0x43   :  { %5779 = vmatprep.subr.bf16.mxu0 %v11332_v20  ;;  %5943 = vmatprep.subr.bf16.mxu1 %v11334_v21  ;;  %v466_v20 = vld [vmem:[%s18467_s1 + $0xc00] sm:$0xff]  ;;  %v563_v12 = vld [vmem:[%s18467_s1 + $0xf08] sm:$0xff]  ;;  %v11542_v13 = vcombine.high %v547_v3, %v555_v5 }
  0x44   :  { %v474_v21 = vld [vmem:[%s18467_s1 + $0xc40] sm:$0xff]  ;;  %v11558_v22 = vcombine.high %v563_v12, %v571_v59  ;;  %v643_v60 = vld [vmem:[%s18467_s1 + $0x1188] sm:$0xff] }
  0x45   :  { %5771 = vmatmul.mubr.bf16.vlgmr.msra.gmra.mrb[0].mxu0 %v13913_v25  ;;  %5935 = vmatmul.mubr.bf16.vlgmr.msra.gmra.mrb[0].mxu1 %v13913_v25 }
  0x46   :  { %5780 = vmatpush1.bf16.msra.mxu0 %v11331_v28  ;;  %5944 = vmatpush1.bf16.msra.mxu1 %v11333_v29  ;;  %v11460_v28 = vcombine.high %v466_v20, %v474_v21  ;;  %v482_v29 = vld [vmem:[%s18467_s1 + $0xc80] sm:$0xff] }
  0x47   :  { %5781 = vmatprep.subr.bf16.mxu0 %v11348_v30  ;;  %5945 = vmatprep.subr.bf16.mxu1 %v11350_v33  ;;  %v490_v30 = vld [vmem:[%s18467_s1 + $0xcc0] sm:$0xff]  ;;  %v11459_v33 = vcombine.low %v466_v20, %v474_v21  ;;  %v579_v20 = vld [vmem:[%s18467_s1 + $0xf88] sm:$0xff] }
  0x48   :  { %5811 = vmatprep.mubr.bf16.mxu0 %v13933_v35  ;;  %5975 = vmatprep.mubr.bf16.mxu1 %v13933_v35  ;;  %v587_v21 = vld [vmem:[%s18467_s1 + $0xfc8] sm:$0xff] }
  0x49   :  { %v11574_v31 = vcombine.high %v579_v20, %v587_v21 }
  0x4a   :  { %5782 = vmatpush1.bf16.msra.mxu0 %v11347_v36  ;;  %5946 = vmatpush1.bf16.msra.mxu1 %v11349_v37  ;;  %v11476_v36 = vcombine.high %v482_v29, %v490_v30  ;;  %v498_v37 = vld [vmem:[%s18467_s1 + $0xd00] sm:$0xff] }
  0x4b   :  { %5783 = vmatprep.subr.bf16.mxu0 %v11364_v38  ;;  %5947 = vmatprep.subr.bf16.mxu1 %v11366_v42  ;;  %v506_v38 = vld [vmem:[%s18467_s1 + $0xd40] sm:$0xff]  ;;  %v11475_v42 = vcombine.low %v482_v29, %v490_v30  ;;  %v595_v30 = vld [vmem:[%s18467_s1 + $0x1008] sm:$0xff] }
  0x4c   :  { %v602_v29 = vld [vmem:[%s18467_s1 + $0x1040] sm:$0xff] }
  0x4e   :  { %5784 = vmatpush1.bf16.msra.mxu0 %v11363_v45  ;;  %5948 = vmatpush1.bf16.msra.mxu1 %v11365_v46  ;;  %v11492_v45 = vcombine.high %v498_v37, %v506_v38  ;;  %v514_v46 = vld [vmem:[%s18467_s1 + $0xd80] sm:$0xff] }
  0x4f   :  { %5785 = vmatprep.subr.bf16.mxu0 %v11380_v47  ;;  %5949 = vmatprep.subr.bf16.mxu1 %v11382_v51  ;;  %v522_v47 = vld [vmem:[%s18467_s1 + $0xdc0] sm:$0xff]  ;;  %v11491_v51 = vcombine.low %v498_v37, %v506_v38 }
  0x50   :  { %v610_v37 = vld [vmem:[%s18467_s1 + $0x1080] sm:$0xff] }
  0x51   :  { %v618_v38 = vld [vmem:[%s18467_s1 + $0x10c0] sm:$0xff] }
  0x52   :  { %5786 = vmatpush1.bf16.msra.mxu0 %v11379_v54  ;;  %5950 = vmatpush1.bf16.msra.mxu1 %v11381_v55  ;;  %v11508_v54 = vcombine.high %v514_v46, %v522_v47  ;;  %v530_v55 = vld [vmem:[%s18467_s1 + $0xe00] sm:$0xff] }
  0x53   :  { %5787 = vmatprep.subr.bf16.mxu0 %v11396_v56  ;;  %5951 = vmatprep.subr.bf16.mxu1 %v11398_v61  ;;  %v538_v56 = vld [vmem:[%s18467_s1 + $0xe40] sm:$0xff]  ;;  %v11507_v61 = vcombine.low %v514_v46, %v522_v47  ;;  %v11604_v47 = vcombine.high %v610_v37, %v618_v38 }
  0x56   :  { %5788 = vmatpush1.bf16.msra.mxu0 %v11395_v0  ;;  %5952 = vmatpush1.bf16.msra.mxu1 %v11397_v1  ;;  %v11524_v0 = vcombine.high %v530_v55, %v538_v56  ;;  %v546_v1 = vld [vmem:[%s18467_s1 + $0xe80] sm:$0xff] }
  0x57   :  { %5789 = vmatprep.subr.bf16.mxu0 %v11412_v2  ;;  %5953 = vmatprep.subr.bf16.mxu1 %v11414_v6  ;;  %v554_v2 = vld [vmem:[%s18467_s1 + $0xec0] sm:$0xff]  ;;  %v11523_v6 = vcombine.low %v530_v55, %v538_v56  ;;  %v11605_v55 = vcombine.low %v611_v39, %v619_v41 }
  0x5a   :  { %5790 = vmatpush1.bf16.msra.mxu0 %v11411_v8  ;;  %5954 = vmatpush1.bf16.msra.mxu1 %v11413_v10  ;;  %v11540_v8 = vcombine.high %v546_v1, %v554_v2  ;;  %v562_v10 = vld [vmem:[%s18467_s1 + $0xf00] sm:$0xff] }
  0x5b   :  { %5791 = vmatprep.subr.bf16.mxu0 %v11428_v11  ;;  %5955 = vmatprep.subr.bf16.mxu1 %v11430_v14  ;;  %v570_v11 = vld [vmem:[%s18467_s1 + $0xf40] sm:$0xff]  ;;  %v11539_v14 = vcombine.low %v546_v1, %v554_v2 }
  0x5c   :  { %v11555_v24 = vcombine.low %v562_v10, %v570_v11 }
  0x5e   :  { %5792 = vmatpush1.bf16.msra.mxu0 %v11427_v17  ;;  %5956 = vmatpush1.bf16.msra.mxu1 %v11429_v18  ;;  %v11541_v17 = vcombine.low %v547_v3, %v555_v5  ;;  %v11556_v18 = vcombine.high %v562_v10, %v570_v11  ;;  %v658_v3 = vld [vmem:[%s18467_s1 + $0x1200] sm:$0xff]  ;;  %v659_v5 = vld [vmem:[%s18467_s1 + $0x1208] sm:$0xff] }
  0x5f   :  { %5793 = vmatprep.subr.bf16.mxu0 %v11444_v19  ;;  %5957 = vmatprep.subr.bf16.mxu1 %v11446_v23  ;;  %v586_v19 = vld [vmem:[%s18467_s1 + $0xfc0] sm:$0xff]  ;;  %v14098_v23 = vld [vmem:[%s18466_s0 + $0x8] sm:$0xff] }
  0x60   :  { %v14114_v32 = vrot.slane %v14098_v23, %v13755_v53 }
  0x62   :  { %5794 = vmatpush1.bf16.msra.mxu0 %v11443_v26  ;;  %5958 = vmatpush1.bf16.msra.mxu1 %v11445_v27  ;;  %v11557_v26 = vcombine.low %v563_v12, %v571_v59  ;;  %v11572_v27 = vcombine.high %v578_v16, %v586_v19  ;;  %v674_v12 = vld [vmem:[%s18467_s1 + $0x1280] sm:$0xff]  ;;  %v675_v59 = vld [vmem:[%s18467_s1 + $0x1288] sm:$0xff] }
  0x63   :  { %5795 = vmatprep.subr.bf16.mxu0 %v11460_v28  ;;  %5959 = vmatprep.subr.bf16.mxu1 %v11462_v63  ;;  %v594_v28 = vld [vmem:[%s18467_s1 + $0x1000] sm:$0xff]  ;;  %v603_v63 = vld [vmem:[%s18467_s1 + $0x1048] sm:$0xff] }
  0x64   :  { %v11589_v46 = vcombine.low %v595_v30, %v603_v63 }
  0x66   :  { %5796 = vmatpush1.bf16.msra.mxu0 %v11459_v33  ;;  %5960 = vmatpush1.bf16.msra.mxu1 %v11461_v34  ;;  %v11571_v33 = vcombine.low %v578_v16, %v586_v19  ;;  %v11573_v34 = vcombine.low %v579_v20, %v587_v21  ;;  %v683_v16 = vld [vmem:[%s18467_s1 + $0x12c8] sm:$0xff]  ;;  %v690_v20 = vld [vmem:[%s18467_s1 + $0x1300] sm:$0xff] }
  0x67   :  { %5797 = vmatprep.subr.bf16.mxu0 %v11476_v36  ;;  %5961 = vmatprep.subr.bf16.mxu1 %v11478_v40  ;;  %v11588_v36 = vcombine.high %v594_v28, %v602_v29  ;;  %v11590_v40 = vcombine.high %v595_v30, %v603_v63  ;;  %v698_v21 = vld [vmem:[%s18467_s1 + $0x1340] sm:$0xff]  ;;  %v707_v63 = vld [vmem:[%s18467_s1 + $0x1388] sm:$0xff] }
  0x68   :  { %v706_v30 = vld [vmem:[%s18467_s1 + $0x1380] sm:$0xff] }
  0x6a   :  { %5798 = vmatpush1.bf16.msra.mxu0 %v11475_v42  ;;  %5962 = vmatpush1.bf16.msra.mxu1 %v11477_v43  ;;  %v64_v42 = vcombine.high %v14114_v32, %v14114_v32  ;;  %v14132_v43 = vpack.c.bf16 %v13895_v15, %v13895_v15  ;;  %v11606_v15 = vcombine.high %v611_v39, %v619_v41  ;;  %v722_v39 = vld [vmem:[%s18467_s1 + $0x1400] sm:$0xff]  ;;  %v723_v41 = vld [vmem:[%s18467_s1 + $0x1408] sm:$0xff] }
  0x6b   :  { %5799 = vmatprep.subr.bf16.mxu0 %v11492_v45  ;;  %5963 = vmatprep.subr.bf16.mxu1 %v11494_v49  ;;  %v11587_v45 = vcombine.low %v594_v28, %v602_v29  ;;  %v634_v49 = vld [vmem:[%s18467_s1 + $0x1140] sm:$0xff]  ;;  %v11669_v28 = vcombine.low %v675_v59, %v683_v16  ;;  %v11684_v29 = vcombine.high %v690_v20, %v698_v21 }
  0x6c   :  { %v11620_v56 = vcombine.high %v626_v48, %v634_v49 }
  0x6e   :  { %5800 = vmatpush1.bf16.msra.mxu0 %v11491_v51  ;;  %5964 = vmatpush1.bf16.msra.mxu1 %v11493_v52  ;;  %v635_v51 = vld [vmem:[%s18467_s1 + $0x1148] sm:$0xff]  ;;  %v14146_v52 = vpack.c.bf16 %v64_v42, %v64_v42 }
  0x6f   :  { %5801 = vmatprep.subr.bf16.mxu0 %v11508_v54  ;;  %5965 = vmatprep.subr.bf16.mxu1 %v11510_v58  ;;  %v11603_v54 = vcombine.low %v610_v37, %v618_v38  ;;  %v650_v58 = vld [vmem:[%s18467_s1 + $0x11c0] sm:$0xff]  ;;  %v11621_v1 = vcombine.low %v627_v50, %v635_v51 }
  0x70   :  { %v11636_v2 = vcombine.high %v642_v57, %v650_v58 }
  0x72   :  { %5802 = vmatpush1.bf16.msra.mxu0 %v11507_v61  ;;  %5966 = vmatpush1.bf16.msra.mxu1 %v11509_v62  ;;  %v11622_v61 = vcombine.high %v627_v50, %v635_v51  ;;  %v651_v62 = vld [vmem:[%s18467_s1 + $0x11c8] sm:$0xff]  ;;  %v746_v50 = vld [vmem:[%s18467_s1 + $0x14c0] sm:$0xff] }
  0x73   :  { %5803 = vmatprep.subr.bf16.mxu0 %v11524_v0  ;;  %5967 = vmatprep.subr.bf16.mxu1 %v11526_v4  ;;  %v11619_v0 = vcombine.low %v626_v48, %v634_v49  ;;  %v666_v4 = vld [vmem:[%s18467_s1 + $0x1240] sm:$0xff]  ;;  %v11637_v10 = vcombine.low %v643_v60, %v651_v62 }
  0x74   :  { %v11652_v11 = vcombine.high %v658_v3, %v666_v4  ;;  %v738_v49 = vld [vmem:[%s18467_s1 + $0x1480] sm:$0xff] }
  0x76   :  { %5804 = vmatpush1.bf16.msra.mxu0 %v11523_v6  ;;  %5968 = vmatpush1.bf16.msra.mxu1 %v11525_v7  ;;  %v11638_v6 = vcombine.high %v643_v60, %v651_v62  ;;  %v667_v7 = vld [vmem:[%s18467_s1 + $0x1248] sm:$0xff]  ;;  %v762_v60 = vld [vmem:[%s18467_s1 + $0x1540] sm:$0xff] }
  0x77   :  { %5805 = vmatprep.subr.bf16.mxu0 %v11540_v8  ;;  %5969 = vmatprep.subr.bf16.mxu1 %v11542_v13  ;;  %v11635_v8 = vcombine.low %v642_v57, %v650_v58  ;;  %v682_v13 = vld [vmem:[%s18467_s1 + $0x12c0] sm:$0xff]  ;;  %v11732_v57 = vcombine.high %v738_v49, %v746_v50 }
  0x78   :  { %v11668_v19 = vcombine.high %v674_v12, %v682_v13  ;;  %v754_v58 = vld [vmem:[%s18467_s1 + $0x1500] sm:$0xff] }
  0x7a   :  { %5806 = vmatpush1.bf16.msra.mxu0 %v11539_v14  ;;  %5970 = vmatpush1.bf16.msra.mxu1 %v11541_v17  ;;  %v11654_v14 = vcombine.high %v659_v5, %v667_v7  ;;  %v11651_v17 = vcombine.low %v658_v3, %v666_v4  ;;  %v11748_v3 = vcombine.high %v754_v58, %v762_v60  ;;  %v770_v4 = vld [vmem:[%s18467_s1 + $0x1580] sm:$0xff] }
  0x7b   :  { %5807 = vmatprep.subr.bf16.mxu0 %v11556_v18  ;;  %5971 = vmatprep.subr.bf16.mxu1 %v11558_v22  ;;  %v11653_v18 = vcombine.low %v659_v5, %v667_v7  ;;  %v691_v22 = vld [vmem:[%s18467_s1 + $0x1308] sm:$0xff]  ;;  %v778_v5 = vld [vmem:[%s18467_s1 + $0x15c0] sm:$0xff] }
  0x7e   :  { %5808 = vmatpush1.bf16.msra.mxu0 %v11555_v24  ;;  %5972 = vmatpush1.bf16.msra.mxu1 %v11557_v26  ;;  %v11670_v24 = vcombine.high %v675_v59, %v683_v16  ;;  %v699_v26 = vld [vmem:[%s18467_s1 + $0x1348] sm:$0xff]  ;;  %v794_v59 = vld [vmem:[%s18467_s1 + $0x1640] sm:$0xff] }
  0x7f   :  { %5809 = vmatprep.subr.bf16.mxu0 %v11572_v27  ;;  %5973 = vmatprep.subr.bf16.mxu1 %v11574_v31  ;;  %v11667_v27 = vcombine.low %v674_v12, %v682_v13  ;;  %v714_v31 = vld [vmem:[%s18467_s1 + $0x13c0] sm:$0xff]  ;;  %v11685_v37 = vcombine.low %v691_v22, %v699_v26  ;;  %v11764_v12 = vcombine.high %v770_v4, %v778_v5 }
  0x80   :  { %v11700_v38 = vcombine.high %v706_v30, %v714_v31  ;;  %v786_v13 = vld [vmem:[%s18467_s1 + $0x1600] sm:$0xff] }
  0x82   :  { %5810 = vmatpush1.bf16.msra.mxu0 %v11571_v33  ;;  %5974 = vmatpush1.bf16.msra.mxu1 %v11573_v34  ;;  %v11686_v33 = vcombine.high %v691_v22, %v699_v26  ;;  %v715_v34 = vld [vmem:[%s18467_s1 + $0x13c8] sm:$0xff]  ;;  %v810_v22 = vld [vmem:[%s18467_s1 + $0x16c0] sm:$0xff] }
  0x83   :  { %5820 = vmatprep.subr.bf16.mxu0 %v11588_v36  ;;  %5984 = vmatprep.subr.bf16.mxu1 %v11590_v40  ;;  %v11683_v36 = vcombine.low %v690_v20, %v698_v21  ;;  %v730_v40 = vld [vmem:[%s18467_s1 + $0x1440] sm:$0xff]  ;;  %v11702_v42 = vcombine.high %v707_v63, %v715_v34  ;;  %v11780_v20 = vcombine.high %v786_v13, %v794_v59 }
  0x84   :  { %v11716_v48 = vcombine.high %v722_v39, %v730_v40  ;;  %v802_v21 = vld [vmem:[%s18467_s1 + $0x1680] sm:$0xff] }
  0x85   :  { %5812 = vmatmul.mubr.bf16.vlgmr.msra.gmra.mrb[0].mxu0 %v14132_v43  ;;  %5976 = vmatmul.mubr.bf16.vlgmr.msra.gmra.mrb[0].mxu1 %v14132_v43 }
  0x86   :  { %5821 = vmatpush1.bf16.msra.mxu0 %v11587_v45  ;;  %5985 = vmatpush1.bf16.msra.mxu1 %v11589_v46  ;;  %v731_v45 = vld [vmem:[%s18467_s1 + $0x1448] sm:$0xff]  ;;  %v11699_v46 = vcombine.low %v706_v30, %v714_v31  ;;  %v11796_v30 = vcombine.high %v802_v21, %v810_v22  ;;  %v818_v31 = vld [vmem:[%s18467_s1 + $0x1700] sm:$0xff] }
  0x87   :  { %5822 = vmatprep.subr.bf16.mxu0 %v11604_v47  ;;  %5986 = vmatprep.subr.bf16.mxu1 %v11606_v15  ;;  %v11701_v47 = vcombine.low %v707_v63, %v715_v34  ;;  %v739_v15 = vld [vmem:[%s18467_s1 + $0x1488] sm:$0xff]  ;;  %v11718_v51 = vcombine.high %v723_v41, %v731_v45  ;;  %v826_v63 = vld [vmem:[%s18467_s1 + $0x1740] sm:$0xff] }
  0x88   :  { %5852 = vmatprep.mubr.bf16.mxu0 %v14146_v52  ;;  %6016 = vmatprep.mubr.bf16.mxu1 %v14146_v52 }
  0x8a   :  { %5823 = vmatpush1.bf16.msra.mxu0 %v11603_v54  ;;  %5987 = vmatpush1.bf16.msra.mxu1 %v11605_v55  ;;  %v747_v54 = vld [vmem:[%s18467_s1 + $0x14c8] sm:$0xff]  ;;  %v11715_v55 = vcombine.low %v722_v39, %v730_v40  ;;  %v11812_v39 = vcombine.high %v818_v31, %v826_v63  ;;  %v834_v40 = vld [vmem:[%s18467_s1 + $0x1780] sm:$0xff] }
  0x8b   :  { %5824 = vmatprep.subr.bf16.mxu0 %v11620_v56  ;;  %5988 = vmatprep.subr.bf16.mxu1 %v11622_v61  ;;  %v11717_v56 = vcombine.low %v723_v41, %v731_v45  ;;  %v755_v61 = vld [vmem:[%s18467_s1 + $0x1508] sm:$0xff]  ;;  %v11734_v62 = vcombine.high %v739_v15, %v747_v54  ;;  %v842_v41 = vld [vmem:[%s18467_s1 + $0x17c0] sm:$0xff] }
  0x8e   :  { %5825 = vmatpush1.bf16.msra.mxu0 %v11619_v0  ;;  %5989 = vmatpush1.bf16.msra.mxu1 %v11621_v1  ;;  %v763_v0 = vld [vmem:[%s18467_s1 + $0x1548] sm:$0xff]  ;;  %v11731_v1 = vcombine.low %v738_v49, %v746_v50  ;;  %v11828_v50 = vcombine.high %v834_v40, %v842_v41 }
  0x8f   :  { %5826 = vmatprep.subr.bf16.mxu0 %v11636_v2  ;;  %5990 = vmatprep.subr.bf16.mxu1 %v11638_v6  ;;  %v11733_v2 = vcombine.low %v739_v15, %v747_v54  ;;  %v771_v6 = vld [vmem:[%s18467_s1 + $0x1588] sm:$0xff]  ;;  %v11750_v7 = vcombine.high %v755_v61, %v763_v0  ;;  %v850_v15 = vld [vmem:[%s18467_s1 + $0x1800] sm:$0xff] }
  0x90   :  { %v851_v54 = vld [vmem:[%s18467_s1 + $0x1808] sm:$0xff] }
  0x92   :  { %5827 = vmatpush1.bf16.msra.mxu0 %v11635_v8  ;;  %5991 = vmatpush1.bf16.msra.mxu1 %v11637_v10  ;;  %v779_v8 = vld [vmem:[%s18467_s1 + $0x15c8] sm:$0xff]  ;;  %v11747_v10 = vcombine.low %v754_v58, %v762_v60 }
  0x93   :  { %5828 = vmatprep.subr.bf16.mxu0 %v11652_v11  ;;  %5992 = vmatprep.subr.bf16.mxu1 %v11654_v14  ;;  %v11749_v11 = vcombine.low %v755_v61, %v763_v0  ;;  %v787_v14 = vld [vmem:[%s18467_s1 + $0x1608] sm:$0xff]  ;;  %v11766_v16 = vcombine.high %v771_v6, %v779_v8  ;;  %v866_v61 = vld [vmem:[%s18467_s1 + $0x1880] sm:$0xff] }
  0x94   :  { %v867_v0 = vld [vmem:[%s18467_s1 + $0x1888] sm:$0xff] }
  0x96   :  { %5829 = vmatpush1.bf16.msra.mxu0 %v11651_v17  ;;  %5993 = vmatpush1.bf16.msra.mxu1 %v11653_v18  ;;  %v795_v17 = vld [vmem:[%s18467_s1 + $0x1648] sm:$0xff]  ;;  %v11763_v18 = vcombine.low %v770_v4, %v778_v5 }
  0x97   :  { %5830 = vmatprep.subr.bf16.mxu0 %v11668_v19  ;;  %5994 = vmatprep.subr.bf16.mxu1 %v11670_v24  ;;  %v11765_v19 = vcombine.low %v771_v6, %v779_v8  ;;  %v803_v24 = vld [vmem:[%s18467_s1 + $0x1688] sm:$0xff]  ;;  %v11782_v26 = vcombine.high %v787_v14, %v795_v17  ;;  %v890_v8 = vld [vmem:[%s18467_s1 + $0x1940] sm:$0xff] }
  0x9a   :  { %5831 = vmatpush1.bf16.msra.mxu0 %v11667_v27  ;;  %5995 = vmatpush1.bf16.msra.mxu1 %v11669_v28  ;;  %v811_v27 = vld [vmem:[%s18467_s1 + $0x16c8] sm:$0xff]  ;;  %v11779_v28 = vcombine.low %v786_v13, %v794_v59 }
  0x9b   :  { %5832 = vmatprep.subr.bf16.mxu0 %v11684_v29  ;;  %5996 = vmatprep.subr.bf16.mxu1 %v11686_v33  ;;  %v11781_v29 = vcombine.low %v787_v14, %v795_v17  ;;  %v819_v33 = vld [vmem:[%s18467_s1 + $0x1708] sm:$0xff]  ;;  %v11798_v34 = vcombine.high %v803_v24, %v811_v27  ;;  %v906_v17 = vld [vmem:[%s18467_s1 + $0x19c0] sm:$0xff] }
  0x9e   :  { %5833 = vmatpush1.bf16.msra.mxu0 %v11683_v36  ;;  %5997 = vmatpush1.bf16.msra.mxu1 %v11685_v37  ;;  %v827_v36 = vld [vmem:[%s18467_s1 + $0x1748] sm:$0xff]  ;;  %v11795_v37 = vcombine.low %v802_v21, %v810_v22 }
  0x9f   :  { %5834 = vmatprep.subr.bf16.mxu0 %v11700_v38  ;;  %5998 = vmatprep.subr.bf16.mxu1 %v11702_v42  ;;  %v11797_v38 = vcombine.low %v803_v24, %v811_v27  ;;  %v835_v42 = vld [vmem:[%s18467_s1 + $0x1788] sm:$0xff]  ;;  %v11814_v45 = vcombine.high %v819_v33, %v827_v36  ;;  %v11813_v49 = vcombine.low %v819_v33, %v827_v36  ;;  %v922_v27 = vld [vmem:[%s18467_s1 + $0x1a40] sm:$0xff] }
  0xa0   :  { %v938_v36 = vld [vmem:[%s18467_s1 + $0x1ac0] sm:$0xff] }
  0xa2   :  { %5835 = vmatpush1.bf16.msra.mxu0 %v11699_v46  ;;  %5999 = vmatpush1.bf16.msra.mxu1 %v11701_v47  ;;  %v843_v46 = vld [vmem:[%s18467_s1 + $0x17c8] sm:$0xff]  ;;  %v49_v47 = vcombine.high %v14098_v23, %v14098_v23 }
  0xa3   :  { %5836 = vmatprep.subr.bf16.mxu0 %v11716_v48  ;;  %6000 = vmatprep.subr.bf16.mxu1 %v11718_v51  ;;  %v11811_v48 = vcombine.low %v818_v31, %v826_v63  ;;  %v858_v51 = vld [vmem:[%s18467_s1 + $0x1840] sm:$0xff]  ;;  %v11830_v23 = vcombine.high %v835_v42, %v843_v46  ;;  %v11829_v58 = vcombine.low %v835_v42, %v843_v46 }
  0xa4   :  { %v11844_v60 = vcombine.high %v850_v15, %v858_v51  ;;  %v11843_v4 = vcombine.low %v850_v15, %v858_v51  ;;  %v954_v46 = vld [vmem:[%s18467_s1 + $0x1b40] sm:$0xff] }
  0xa6   :  { %5837 = vmatpush1.bf16.msra.mxu0 %v11715_v55  ;;  %6001 = vmatpush1.bf16.msra.mxu1 %v11717_v56  ;;  %v859_v55 = vld [vmem:[%s18467_s1 + $0x1848] sm:$0xff]  ;;  %v14323_v56 = vrot.slane %v49_v47, %v13755_v53 }
  0xa7   :  { %5838 = vmatprep.subr.bf16.mxu0 %v11732_v57  ;;  %6002 = vmatprep.subr.bf16.mxu1 %v11734_v62  ;;  %v11827_v57 = vcombine.low %v834_v40, %v842_v41  ;;  %v874_v62 = vld [vmem:[%s18467_s1 + $0x18c0] sm:$0xff]  ;;  %v11846_v53 = vcombine.high %v851_v54, %v859_v55  ;;  %v11845_v5 = vcombine.low %v851_v54, %v859_v55  ;;  %v947_v47 = vld [vmem:[%s18467_s1 + $0x1b08] sm:$0xff] }
  0xa8   :  { %v11860_v6 = vcombine.high %v866_v61, %v874_v62  ;;  %v11859_v13 = vcombine.low %v866_v61, %v874_v62  ;;  %v962_v54 = vld [vmem:[%s18467_s1 + $0x1b80] sm:$0xff]  ;;  %v963_v55 = vld [vmem:[%s18467_s1 + $0x1b88] sm:$0xff] }
  0xaa   :  { %5839 = vmatpush1.bf16.msra.mxu0 %v11731_v1  ;;  %6003 = vmatpush1.bf16.msra.mxu1 %v11733_v2  ;;  %v875_v1 = vld [vmem:[%s18467_s1 + $0x18c8] sm:$0xff]  ;;  %v65_v2 = vcombine.high %v14323_v56, %v14323_v56 }
  0xab   :  { %5840 = vmatprep.subr.bf16.mxu0 %v11748_v3  ;;  %6004 = vmatprep.subr.bf16.mxu1 %v11750_v7  ;;  %v14341_v3 = vpack.c.bf16 %v14114_v32, %v14114_v32  ;;  %v882_v7 = vld [vmem:[%s18467_s1 + $0x1900] sm:$0xff]  ;;  %v11862_v32 = vcombine.high %v867_v0, %v875_v1  ;;  %v11861_v59 = vcombine.low %v867_v0, %v875_v1  ;;  %v979_v1 = vld [vmem:[%s18467_s1 + $0x1c08] sm:$0xff] }
  0xac   :  { %v11876_v14 = vcombine.high %v882_v7, %v890_v8  ;;  %v11875_v21 = vcombine.low %v882_v7, %v890_v8  ;;  %v978_v0 = vld [vmem:[%s18467_s1 + $0x1c00] sm:$0xff] }
  0xad   :  { %v994_v8 = vld [vmem:[%s18467_s1 + $0x1c80] sm:$0xff] }
  0xae   :  { %5841 = vmatpush1.bf16.msra.mxu0 %v11747_v10  ;;  %6005 = vmatpush1.bf16.msra.mxu1 %v11749_v11  ;;  %v883_v10 = vld [vmem:[%s18467_s1 + $0x1908] sm:$0xff] }
  0xaf   :  { %5842 = vmatprep.subr.bf16.mxu0 %v11764_v12  ;;  %6006 = vmatprep.subr.bf16.mxu1 %v11766_v16  ;;  %v891_v11 = vld [vmem:[%s18467_s1 + $0x1948] sm:$0xff]  ;;  %v14355_v12 = vpack.c.bf16 %v65_v2, %v65_v2  ;;  %v898_v16 = vld [vmem:[%s18467_s1 + $0x1980] sm:$0xff] }
  0xb0   :  { %v11877_v22 = vcombine.low %v883_v10, %v891_v11  ;;  %v11892_v24 = vcombine.high %v898_v16, %v906_v17  ;;  %v11891_v31 = vcombine.low %v898_v16, %v906_v17  ;;  %v84_v17 = vld [vmem:[%s18467_s1 + $0x10] sm:$0xff] }
  0xb2   :  { %5843 = vmatpush1.bf16.msra.mxu0 %v11763_v18  ;;  %6007 = vmatpush1.bf16.msra.mxu1 %v11765_v19  ;;  %v899_v18 = vld [vmem:[%s18467_s1 + $0x1988] sm:$0xff]  ;;  %v11878_v19 = vcombine.high %v883_v10, %v891_v11  ;;  %v1002_v10 = vld [vmem:[%s18467_s1 + $0x1cc0] sm:$0xff] }
  0xb3   :  { %5844 = vmatprep.subr.bf16.mxu0 %v11780_v20  ;;  %6008 = vmatprep.subr.bf16.mxu1 %v11782_v26  ;;  %v907_v20 = vld [vmem:[%s18467_s1 + $0x19c8] sm:$0xff]  ;;  %v914_v26 = vld [vmem:[%s18467_s1 + $0x1a00] sm:$0xff]  ;;  %v11988_v16 = vcombine.high %v994_v8, %v1002_v10 }
  0xb4   :  { %v11893_v63 = vcombine.low %v899_v18, %v907_v20  ;;  %v11908_v33 = vcombine.high %v914_v26, %v922_v27  ;;  %v11907_v40 = vcombine.low %v914_v26, %v922_v27  ;;  %v100_v27 = vld [vmem:[%s18467_s1 + $0x90] sm:$0xff] }
  0xb6   :  { %5845 = vmatpush1.bf16.msra.mxu0 %v11779_v28  ;;  %6009 = vmatpush1.bf16.msra.mxu1 %v11781_v29  ;;  %v915_v28 = vld [vmem:[%s18467_s1 + $0x1a08] sm:$0xff]  ;;  %v11894_v29 = vcombine.high %v899_v18, %v907_v20  ;;  %v92_v18 = vld [vmem:[%s18467_s1 + $0x50] sm:$0xff] }
  0xb7   :  { %5846 = vmatprep.subr.bf16.mxu0 %v11796_v30  ;;  %6010 = vmatprep.subr.bf16.mxu1 %v11798_v34  ;;  %v923_v30 = vld [vmem:[%s18467_s1 + $0x1a48] sm:$0xff]  ;;  %v930_v34 = vld [vmem:[%s18467_s1 + $0x1a80] sm:$0xff]  ;;  %v11080_v26 = vcombine.high %v84_v17, %v92_v18 }
  0xb8   :  { %v11909_v41 = vcombine.low %v915_v28, %v923_v30  ;;  %v11924_v42 = vcombine.high %v930_v34, %v938_v36 }
  0xba   :  { %5847 = vmatpush1.bf16.msra.mxu0 %v11795_v37  ;;  %6011 = vmatpush1.bf16.msra.mxu1 %v11797_v38  ;;  %v931_v37 = vld [vmem:[%s18467_s1 + $0x1a88] sm:$0xff]  ;;  %v11910_v38 = vcombine.high %v915_v28, %v923_v30  ;;  %v108_v28 = vld [vmem:[%s18467_s1 + $0xd0] sm:$0xff] }
  0xbb   :  { %5848 = vmatprep.subr.bf16.mxu0 %v11812_v39  ;;  %6012 = vmatprep.subr.bf16.mxu1 %v11814_v45  ;;  %v939_v39 = vld [vmem:[%s18467_s1 + $0x1ac8] sm:$0xff]  ;;  %v946_v45 = vld [vmem:[%s18467_s1 + $0x1b00] sm:$0xff] }
  0xbc   :  { %v11925_v15 = vcombine.low %v931_v37, %v939_v39  ;;  %v11940_v51 = vcombine.high %v946_v45, %v954_v46 }
  0xbe   :  { %5849 = vmatpush1.bf16.msra.mxu0 %v11811_v48  ;;  %6013 = vmatpush1.bf16.msra.mxu1 %v11813_v49  ;;  %v11926_v48 = vcombine.high %v931_v37, %v939_v39  ;;  %v955_v49 = vld [vmem:[%s18467_s1 + $0x1b48] sm:$0xff]  ;;  %v116_v37 = vld [vmem:[%s18467_s1 + $0x110] sm:$0xff]  ;;  %v117_v39 = vld [vmem:[%s18467_s1 + $0x118] sm:$0xff] }
  0xbf   :  { %5850 = vmatprep.subr.bf16.mxu0 %v11828_v50  ;;  %6014 = vmatprep.subr.bf16.mxu1 %v11830_v23  ;;  %v11923_v50 = vcombine.low %v930_v34, %v938_v36  ;;  %v970_v23 = vld [vmem:[%s18467_s1 + $0x1bc0] sm:$0xff]  ;;  %v11941_v61 = vcombine.low %v947_v47, %v955_v49  ;;  %v11096_v36 = vcombine.high %v100_v27, %v108_v28 }
  0xc0   :  { %v11956_v62 = vcombine.high %v962_v54, %v970_v23 }
  0xc2   :  { %5851 = vmatpush1.bf16.msra.mxu0 %v11827_v57  ;;  %6015 = vmatpush1.bf16.msra.mxu1 %v11829_v58  ;;  %v11942_v57 = vcombine.high %v947_v47, %v955_v49  ;;  %v971_v58 = vld [vmem:[%s18467_s1 + $0x1bc8] sm:$0xff]  ;;  %v140_v47 = vld [vmem:[%s18467_s1 + $0x1d0] sm:$0xff] }
  0xc3   :  { %5861 = vmatprep.subr.bf16.mxu0 %v11844_v60  ;;  %6025 = vmatprep.subr.bf16.mxu1 %v11846_v53  ;;  %v11939_v60 = vcombine.low %v946_v45, %v954_v46  ;;  %v986_v53 = vld [vmem:[%s18467_s1 + $0x1c40] sm:$0xff]  ;;  %v11958_v2 = vcombine.high %v963_v55, %v971_v58  ;;  %v132_v46 = vld [vmem:[%s18467_s1 + $0x190] sm:$0xff] }
  0xc4   :  { %v11972_v7 = vcombine.high %v978_v0, %v986_v53 }
  0xc5   :  { %5853 = vmatmul.mubr.bf16.vlgmr.msra.gmra.mrb[0].mxu0 %v14341_v3  ;;  %6017 = vmatmul.mubr.bf16.vlgmr.msra.gmra.mrb[0].mxu1 %v14341_v3 }
  0xc6   :  { %5862 = vmatpush1.bf16.msra.mxu0 %v11843_v4  ;;  %6026 = vmatpush1.bf16.msra.mxu1 %v11845_v5  ;;  %v987_v4 = vld [vmem:[%s18467_s1 + $0x1c48] sm:$0xff]  ;;  %v11955_v5 = vcombine.low %v962_v54, %v970_v23  ;;  %v11128_v54 = vcombine.high %v132_v46, %v140_v47  ;;  %v148_v23 = vld [vmem:[%s18467_s1 + $0x210] sm:$0xff] }
  0xc7   :  { %5863 = vmatprep.subr.bf16.mxu0 %v11860_v6  ;;  %6027 = vmatprep.subr.bf16.mxu1 %v11862_v32  ;;  %v11957_v6 = vcombine.low %v963_v55, %v971_v58  ;;  %v995_v32 = vld [vmem:[%s18467_s1 + $0x1c88] sm:$0xff]  ;;  %v11974_v11 = vcombine.high %v979_v1, %v987_v4  ;;  %v156_v55 = vld [vmem:[%s18467_s1 + $0x250] sm:$0xff] }
  0xc8   :  { %12003 = vmatprep.mubr.msk.bf16.mxu0 %vm5734_vm0, %v14355_v12  ;;  %12004 = vmatprep.mubr.msk.bf16.mxu1 %vm5734_vm0, %v14355_v12 }
  0xca   :  { %5864 = vmatpush1.bf16.msra.mxu0 %v11859_v13  ;;  %6028 = vmatpush1.bf16.msra.mxu1 %v11861_v59  ;;  %v1003_v13 = vld [vmem:[%s18467_s1 + $0x1cc8] sm:$0xff]  ;;  %v11971_v59 = vcombine.low %v978_v0, %v986_v53  ;;  %v11144_v0 = vcombine.high %v148_v23, %v156_v55  ;;  %v164_v53 = vld [vmem:[%s18467_s1 + $0x290] sm:$0xff] }
  0xcb   :  { %5865 = vmatprep.subr.bf16.mxu0 %v11876_v14  ;;  %6029 = vmatprep.subr.bf16.mxu1 %v11878_v19  ;;  %v11973_v14 = vcombine.low %v979_v1, %v987_v4  ;;  %v85_v19 = vld [vmem:[%s18467_s1 + $0x18] sm:$0xff]  ;;  %v11990_v20 = vcombine.high %v995_v32, %v1003_v13  ;;  %v172_v1 = vld [vmem:[%s18467_s1 + $0x2d0] sm:$0xff] }
  0xce   :  { %5866 = vmatpush1.bf16.msra.mxu0 %v11875_v21  ;;  %6030 = vmatpush1.bf16.msra.mxu1 %v11877_v22  ;;  %v93_v21 = vld [vmem:[%s18467_s1 + $0x58] sm:$0xff]  ;;  %v11987_v22 = vcombine.low %v994_v8, %v1002_v10  ;;  %v11160_v8 = vcombine.high %v164_v53, %v172_v1  ;;  %v180_v10 = vld [vmem:[%s18467_s1 + $0x310] sm:$0xff] }
  0xcf   :  { %5867 = vmatprep.subr.bf16.mxu0 %v11892_v24  ;;  %6031 = vmatprep.subr.bf16.mxu1 %v11894_v29  ;;  %v11989_v24 = vcombine.low %v995_v32, %v1003_v13  ;;  %v101_v29 = vld [vmem:[%s18467_s1 + $0x98] sm:$0xff]  ;;  %v11082_v30 = vcombine.high %v85_v19, %v93_v21  ;;  %v11081_v34 = vcombine.low %v85_v19, %v93_v21  ;;  %v188_v32 = vld [vmem:[%s18467_s1 + $0x350] sm:$0xff] }
  0xd0   :  { %v204_v19 = vld [vmem:[%s18467_s1 + $0x3d0] sm:$0xff] }
  0xd2   :  { %5868 = vmatpush1.bf16.msra.mxu0 %v11891_v31  ;;  %6032 = vmatpush1.bf16.msra.mxu1 %v11893_v63  ;;  %v109_v31 = vld [vmem:[%s18467_s1 + $0xd8] sm:$0xff]  ;;  %v14473_v63 = vpack.c.bf16 %v14323_v56, %v14323_v56 }
  0xd3   :  { %5869 = vmatprep.subr.bf16.mxu0 %v11908_v33  ;;  %6033 = vmatprep.subr.bf16.mxu1 %v11910_v38  ;;  %v11079_v33 = vcombine.low %v84_v17, %v92_v18  ;;  %v124_v38 = vld [vmem:[%s18467_s1 + $0x150] sm:$0xff]  ;;  %v11098_v56 = vcombine.high %v101_v29, %v109_v31  ;;  %v11176_v17 = vcombine.high %v180_v10, %v188_v32 }
  0xd4   :  { %v11112_v45 = vcombine.high %v116_v37, %v124_v38  ;;  %v196_v18 = vld [vmem:[%s18467_s1 + $0x390] sm:$0xff] }
  0xd6   :  { %5870 = vmatpush1.bf16.msra.mxu0 %v11907_v40  ;;  %6034 = vmatpush1.bf16.msra.mxu1 %v11909_v41  ;;  %v125_v40 = vld [vmem:[%s18467_s1 + $0x158] sm:$0xff]  ;;  %v11095_v41 = vcombine.low %v100_v27, %v108_v28  ;;  %v11192_v27 = vcombine.high %v196_v18, %v204_v19  ;;  %v212_v28 = vld [vmem:[%s18467_s1 + $0x410] sm:$0xff] }
  0xd7   :  { %5871 = vmatprep.subr.bf16.mxu0 %v11924_v42  ;;  %6035 = vmatprep.subr.bf16.mxu1 %v11926_v48  ;;  %v11097_v42 = vcombine.low %v101_v29, %v109_v31  ;;  %v133_v48 = vld [vmem:[%s18467_s1 + $0x198] sm:$0xff]  ;;  %v11114_v49 = vcombine.high %v117_v39, %v125_v40  ;;  %v220_v29 = vld [vmem:[%s18467_s1 + $0x450] sm:$0xff] }
  0xda   :  { %5872 = vmatpush1.bf16.msra.mxu0 %v11923_v50  ;;  %6036 = vmatpush1.bf16.msra.mxu1 %v11925_v15  ;;  %v141_v50 = vld [vmem:[%s18467_s1 + $0x1d8] sm:$0xff]  ;;  %v11111_v15 = vcombine.low %v116_v37, %v124_v38  ;;  %v11208_v37 = vcombine.high %v212_v28, %v220_v29  ;;  %v228_v38 = vld [vmem:[%s18467_s1 + $0x490] sm:$0xff] }
  0xdb   :  { %5873 = vmatprep.subr.bf16.mxu0 %v11940_v51  ;;  %6037 = vmatprep.subr.bf16.mxu1 %v11942_v57  ;;  %v11113_v51 = vcombine.low %v117_v39, %v125_v40  ;;  %v149_v57 = vld [vmem:[%s18467_s1 + $0x218] sm:$0xff]  ;;  %v11130_v58 = vcombine.high %v133_v48, %v141_v50  ;;  %v236_v39 = vld [vmem:[%s18467_s1 + $0x4d0] sm:$0xff] }
  0xde   :  { %5874 = vmatpush1.bf16.msra.mxu0 %v11939_v60  ;;  %6038 = vmatpush1.bf16.msra.mxu1 %v11941_v61  ;;  %v157_v60 = vld [vmem:[%s18467_s1 + $0x258] sm:$0xff]  ;;  %v11127_v61 = vcombine.low %v132_v46, %v140_v47  ;;  %v11224_v46 = vcombine.high %v228_v38, %v236_v39  ;;  %v244_v47 = vld [vmem:[%s18467_s1 + $0x510] sm:$0xff] }
  0xdf   :  { %5875 = vmatprep.subr.bf16.mxu0 %v11956_v62  ;;  %6039 = vmatprep.subr.bf16.mxu1 %v11958_v2  ;;  %v11129_v62 = vcombine.low %v133_v48, %v141_v50  ;;  %v165_v2 = vld [vmem:[%s18467_s1 + $0x298] sm:$0xff]  ;;  %v11146_v4 = vcombine.high %v149_v57, %v157_v60  ;;  %v252_v48 = vld [vmem:[%s18467_s1 + $0x550] sm:$0xff] }
  0xe2   :  { %5876 = vmatpush1.bf16.msra.mxu0 %v11955_v5  ;;  %6040 = vmatpush1.bf16.msra.mxu1 %v11957_v6  ;;  %v173_v5 = vld [vmem:[%s18467_s1 + $0x2d8] sm:$0xff]  ;;  %v11143_v6 = vcombine.low %v148_v23, %v156_v55  ;;  %v11240_v23 = vcombine.high %v244_v47, %v252_v48  ;;  %v260_v55 = vld [vmem:[%s18467_s1 + $0x590] sm:$0xff] }
  0xe3   :  { %5877 = vmatprep.subr.bf16.mxu0 %v11972_v7  ;;  %6041 = vmatprep.subr.bf16.mxu1 %v11974_v11  ;;  %v11145_v7 = vcombine.low %v149_v57, %v157_v60  ;;  %v181_v11 = vld [vmem:[%s18467_s1 + $0x318] sm:$0xff]  ;;  %v11162_v13 = vcombine.high %v165_v2, %v173_v5  ;;  %v268_v57 = vld [vmem:[%s18467_s1 + $0x5d0] sm:$0xff] }
  0xe6   :  { %5878 = vmatpush1.bf16.msra.mxu0 %v11971_v59  ;;  %6042 = vmatpush1.bf16.msra.mxu1 %v11973_v14  ;;  %v189_v59 = vld [vmem:[%s18467_s1 + $0x358] sm:$0xff]  ;;  %v11159_v14 = vcombine.low %v164_v53, %v172_v1  ;;  %v11256_v53 = vcombine.high %v260_v55, %v268_v57  ;;  %v276_v1 = vld [vmem:[%s18467_s1 + $0x610] sm:$0xff] }
  0xe7   :  { %5879 = vmatprep.subr.bf16.mxu0 %v11988_v16  ;;  %6043 = vmatprep.subr.bf16.mxu1 %v11990_v20  ;;  %v11161_v16 = vcombine.low %v165_v2, %v173_v5  ;;  %v197_v20 = vld [vmem:[%s18467_s1 + $0x398] sm:$0xff]  ;;  %v11178_v21 = vcombine.high %v181_v11, %v189_v59  ;;  %v284_v2 = vld [vmem:[%s18467_s1 + $0x650] sm:$0xff] }
  0xea   :  { %5880 = vmatpush1.bf16.msra.mxu0 %v11987_v22  ;;  %6044 = vmatpush1.bf16.msra.mxu1 %v11989_v24  ;;  %v205_v22 = vld [vmem:[%s18467_s1 + $0x3d8] sm:$0xff]  ;;  %v11175_v24 = vcombine.low %v180_v10, %v188_v32  ;;  %v11272_v10 = vcombine.high %v276_v1, %v284_v2  ;;  %v292_v32 = vld [vmem:[%s18467_s1 + $0x690] sm:$0xff] }
  0xeb   :  { %6066 = vmatprep.subr.bf16.mxu0 %v11080_v26  ;;  %6230 = vmatprep.subr.bf16.mxu1 %v11082_v30  ;;  %v11177_v26 = vcombine.low %v181_v11, %v189_v59  ;;  %v213_v30 = vld [vmem:[%s18467_s1 + $0x418] sm:$0xff]  ;;  %v11194_v31 = vcombine.high %v197_v20, %v205_v22  ;;  %v300_v11 = vld [vmem:[%s18467_s1 + $0x6d0] sm:$0xff] }
  0xed   :  { %5894 = vmatmul.mubr.bf16.vlgmr.msra.gmra.mrb[0].mxu0 %v14473_v63  ;;  %6058 = vmatmul.mubr.bf16.vlgmr.msra.gmra.mrb[0].mxu1 %v14473_v63 }
  0xee   :  { %6067 = vmatpush1.bf16.msra.mxu0 %v11079_v33  ;;  %6231 = vmatpush1.bf16.msra.mxu1 %v11081_v34  ;;  %v221_v33 = vld [vmem:[%s18467_s1 + $0x458] sm:$0xff]  ;;  %v11191_v34 = vcombine.low %v196_v18, %v204_v19  ;;  %v11288_v18 = vcombine.high %v292_v32, %v300_v11  ;;  %v308_v19 = vld [vmem:[%s18467_s1 + $0x710] sm:$0xff] }
  0xef   :  { %6068 = vmatprep.subr.bf16.mxu0 %v11096_v36  ;;  %6232 = vmatprep.subr.bf16.mxu1 %v11098_v56  ;;  %v11193_v36 = vcombine.low %v197_v20, %v205_v22  ;;  %v229_v56 = vld [vmem:[%s18467_s1 + $0x498] sm:$0xff]  ;;  %v11210_v40 = vcombine.high %v213_v30, %v221_v33  ;;  %v316_v20 = vld [vmem:[%s18467_s1 + $0x750] sm:$0xff] }
  0xf0   :  { %6098 = vmatprep.mubr.bf16.mxu0 %v13792_v9  ;;  %6262 = vmatprep.mubr.bf16.mxu1 %v13792_v9 }
  0xf2   :  { %6069 = vmatpush1.bf16.msra.mxu0 %v11095_v41  ;;  %6233 = vmatpush1.bf16.msra.mxu1 %v11097_v42  ;;  %v237_v41 = vld [vmem:[%s18467_s1 + $0x4d8] sm:$0xff]  ;;  %v11207_v42 = vcombine.low %v212_v28, %v220_v29  ;;  %v11304_v28 = vcombine.high %v308_v19, %v316_v20  ;;  %v324_v29 = vld [vmem:[%s18467_s1 + $0x790] sm:$0xff] }
  0xf3   :  { %6070 = vmatprep.subr.bf16.mxu0 %v11112_v45  ;;  %6234 = vmatprep.subr.bf16.mxu1 %v11114_v49  ;;  %v11209_v45 = vcombine.low %v213_v30, %v221_v33  ;;  %v245_v49 = vld [vmem:[%s18467_s1 + $0x518] sm:$0xff]  ;;  %v11226_v50 = vcombine.high %v229_v56, %v237_v41  ;;  %v332_v30 = vld [vmem:[%s18467_s1 + $0x7d0] sm:$0xff] }
  0xf6   :  { %6071 = vmatpush1.bf16.msra.mxu0 %v11111_v15  ;;  %6235 = vmatpush1.bf16.msra.mxu1 %v11113_v51  ;;  %v253_v15 = vld [vmem:[%s18467_s1 + $0x558] sm:$0xff]  ;;  %v11223_v51 = vcombine.low %v228_v38, %v236_v39  ;;  %v11320_v38 = vcombine.high %v324_v29, %v332_v30  ;;  %v340_v39 = vld [vmem:[%s18467_s1 + $0x810] sm:$0xff] }
  0xf7   :  { %6072 = vmatprep.subr.bf16.mxu0 %v11128_v54  ;;  %6236 = vmatprep.subr.bf16.mxu1 %v11130_v58  ;;  %v11225_v54 = vcombine.low %v229_v56, %v237_v41  ;;  %v261_v58 = vld [vmem:[%s18467_s1 + $0x598] sm:$0xff]  ;;  %v11242_v60 = vcombine.high %v245_v49, %v253_v15  ;;  %v348_v56 = vld [vmem:[%s18467_s1 + $0x850] sm:$0xff] }
  0xfa   :  { %6073 = vmatpush1.bf16.msra.mxu0 %v11127_v61  ;;  %6237 = vmatpush1.bf16.msra.mxu1 %v11129_v62  ;;  %v269_v61 = vld [vmem:[%s18467_s1 + $0x5d8] sm:$0xff]  ;;  %v11239_v62 = vcombine.low %v244_v47, %v252_v48  ;;  %v11336_v47 = vcombine.high %v340_v39, %v348_v56  ;;  %v356_v48 = vld [vmem:[%s18467_s1 + $0x890] sm:$0xff] }
  0xfb   :  { %6074 = vmatprep.subr.bf16.mxu0 %v11144_v0  ;;  %6238 = vmatprep.subr.bf16.mxu1 %v11146_v4  ;;  %v11241_v0 = vcombine.low %v245_v49, %v253_v15  ;;  %v277_v4 = vld [vmem:[%s18467_s1 + $0x618] sm:$0xff]  ;;  %v11258_v5 = vcombine.high %v261_v58, %v269_v61  ;;  %v364_v49 = vld [vmem:[%s18467_s1 + $0x8d0] sm:$0xff] }
  0xfe   :  { %6075 = vmatpush1.bf16.msra.mxu0 %v11143_v6  ;;  %6239 = vmatpush1.bf16.msra.mxu1 %v11145_v7  ;;  %v285_v6 = vld [vmem:[%s18467_s1 + $0x658] sm:$0xff]  ;;  %v11255_v7 = vcombine.low %v260_v55, %v268_v57  ;;  %v11352_v55 = vcombine.high %v356_v48, %v364_v49  ;;  %v372_v57 = vld [vmem:[%s18467_s1 + $0x910] sm:$0xff] }
  0xff   :  { %6076 = vmatprep.subr.bf16.mxu0 %v11160_v8  ;;  %6240 = vmatprep.subr.bf16.mxu1 %v11162_v13  ;;  %v11257_v8 = vcombine.low %v261_v58, %v269_v61  ;;  %v293_v13 = vld [vmem:[%s18467_s1 + $0x698] sm:$0xff]  ;;  %v11274_v59 = vcombine.high %v277_v4, %v285_v6  ;;  %v380_v58 = vld [vmem:[%s18467_s1 + $0x950] sm:$0xff] }
 0x102   :  { %6077 = vmatpush1.bf16.msra.mxu0 %v11159_v14  ;;  %6241 = vmatpush1.bf16.msra.mxu1 %v11161_v16  ;;  %v301_v14 = vld [vmem:[%s18467_s1 + $0x6d8] sm:$0xff]  ;;  %v11271_v16 = vcombine.low %v276_v1, %v284_v2  ;;  %v11368_v1 = vcombine.high %v372_v57, %v380_v58  ;;  %v388_v2 = vld [vmem:[%s18467_s1 + $0x990] sm:$0xff] }
 0x103   :  { %6078 = vmatprep.subr.bf16.mxu0 %v11176_v17  ;;  %6242 = vmatprep.subr.bf16.mxu1 %v11178_v21  ;;  %v11273_v17 = vcombine.low %v277_v4, %v285_v6  ;;  %v309_v21 = vld [vmem:[%s18467_s1 + $0x718] sm:$0xff]  ;;  %v11290_v22 = vcombine.high %v293_v13, %v301_v14  ;;  %v396_v4 = vld [vmem:[%s18467_s1 + $0x9d0] sm:$0xff] }
 0x106   :  { %6079 = vmatpush1.bf16.msra.mxu0 %v11175_v24  ;;  %6243 = vmatpush1.bf16.msra.mxu1 %v11177_v26  ;;  %v317_v24 = vld [vmem:[%s18467_s1 + $0x758] sm:$0xff]  ;;  %v11287_v26 = vcombine.low %v292_v32, %v300_v11  ;;  %v11384_v32 = vcombine.high %v388_v2, %v396_v4  ;;  %v404_v11 = vld [vmem:[%s18467_s1 + $0xa10] sm:$0xff] }
 0x107   :  { %6080 = vmatprep.subr.bf16.mxu0 %v11192_v27  ;;  %6244 = vmatprep.subr.bf16.mxu1 %v11194_v31  ;;  %v11289_v27 = vcombine.low %v293_v13, %v301_v14  ;;  %v325_v31 = vld [vmem:[%s18467_s1 + $0x798] sm:$0xff]  ;;  %v11306_v33 = vcombine.high %v309_v21, %v317_v24  ;;  %v412_v13 = vld [vmem:[%s18467_s1 + $0xa50] sm:$0xff] }
 0x10a   :  { %6081 = vmatpush1.bf16.msra.mxu0 %v11191_v34  ;;  %6245 = vmatpush1.bf16.msra.mxu1 %v11193_v36  ;;  %v333_v34 = vld [vmem:[%s18467_s1 + $0x7d8] sm:$0xff]  ;;  %v11303_v36 = vcombine.low %v308_v19, %v316_v20  ;;  %v11400_v19 = vcombine.high %v404_v11, %v412_v13  ;;  %v420_v20 = vld [vmem:[%s18467_s1 + $0xa90] sm:$0xff] }
 0x10b   :  { %6082 = vmatprep.subr.bf16.mxu0 %v11208_v37  ;;  %6246 = vmatprep.subr.bf16.mxu1 %v11210_v40  ;;  %v11305_v37 = vcombine.low %v309_v21, %v317_v24  ;;  %v341_v40 = vld [vmem:[%s18467_s1 + $0x818] sm:$0xff]  ;;  %v11322_v41 = vcombine.high %v325_v31, %v333_v34  ;;  %v428_v21 = vld [vmem:[%s18467_s1 + $0xad0] sm:$0xff] }
 0x10e   :  { %6083 = vmatpush1.bf16.msra.mxu0 %v11207_v42  ;;  %6247 = vmatpush1.bf16.msra.mxu1 %v11209_v45  ;;  %v349_v42 = vld [vmem:[%s18467_s1 + $0x858] sm:$0xff]  ;;  %v11319_v45 = vcombine.low %v324_v29, %v332_v30  ;;  %v11416_v29 = vcombine.high %v420_v20, %v428_v21  ;;  %v436_v30 = vld [vmem:[%s18467_s1 + $0xb10] sm:$0xff] }
 0x10f   :  { %6084 = vmatprep.subr.bf16.mxu0 %v11224_v46  ;;  %6248 = vmatprep.subr.bf16.mxu1 %v11226_v50  ;;  %v11321_v46 = vcombine.low %v325_v31, %v333_v34  ;;  %v357_v50 = vld [vmem:[%s18467_s1 + $0x898] sm:$0xff]  ;;  %v11338_v15 = vcombine.high %v341_v40, %v349_v42  ;;  %v444_v31 = vld [vmem:[%s18467_s1 + $0xb50] sm:$0xff] }
 0x112   :  { %6085 = vmatpush1.bf16.msra.mxu0 %v11223_v51  ;;  %6249 = vmatpush1.bf16.msra.mxu1 %v11225_v54  ;;  %v365_v51 = vld [vmem:[%s18467_s1 + $0x8d8] sm:$0xff]  ;;  %v11335_v54 = vcombine.low %v340_v39, %v348_v56  ;;  %v11432_v39 = vcombine.high %v436_v30, %v444_v31  ;;  %v452_v56 = vld [vmem:[%s18467_s1 + $0xb90] sm:$0xff] }
 0x113   :  { %6086 = vmatprep.subr.bf16.mxu0 %v11240_v23  ;;  %6250 = vmatprep.subr.bf16.mxu1 %v11242_v60  ;;  %v11337_v23 = vcombine.low %v341_v40, %v349_v42  ;;  %v373_v60 = vld [vmem:[%s18467_s1 + $0x918] sm:$0xff]  ;;  %v11354_v61 = vcombine.high %v357_v50, %v365_v51  ;;  %v460_v40 = vld [vmem:[%s18467_s1 + $0xbd0] sm:$0xff] }
 0x114   :  { %v453_v42 = vld [vmem:[%s18467_s1 + $0xb98] sm:$0xff] }
 0x116   :  { %6087 = vmatpush1.bf16.msra.mxu0 %v11239_v62  ;;  %6251 = vmatpush1.bf16.msra.mxu1 %v11241_v0  ;;  %v381_v62 = vld [vmem:[%s18467_s1 + $0x958] sm:$0xff]  ;;  %v11351_v0 = vcombine.low %v356_v48, %v364_v49  ;;  %v11448_v48 = vcombine.high %v452_v56, %v460_v40 }
 0x117   :  { %6088 = vmatprep.subr.bf16.mxu0 %v11256_v53  ;;  %6252 = vmatprep.subr.bf16.mxu1 %v11258_v5  ;;  %v11353_v53 = vcombine.low %v357_v50, %v365_v51  ;;  %v389_v5 = vld [vmem:[%s18467_s1 + $0x998] sm:$0xff]  ;;  %v11370_v6 = vcombine.high %v373_v60, %v381_v62  ;;  %v468_v50 = vld [vmem:[%s18467_s1 + $0xc10] sm:$0xff] }
 0x11a   :  { %6089 = vmatpush1.bf16.msra.mxu0 %v11255_v7  ;;  %6253 = vmatpush1.bf16.msra.mxu1 %v11257_v8  ;;  %v397_v7 = vld [vmem:[%s18467_s1 + $0x9d8] sm:$0xff]  ;;  %v11367_v8 = vcombine.low %v372_v57, %v380_v58 }
 0x11b   :  { %6090 = vmatprep.subr.bf16.mxu0 %v11272_v10  ;;  %6254 = vmatprep.subr.bf16.mxu1 %v11274_v59  ;;  %v11369_v10 = vcombine.low %v373_v60, %v381_v62  ;;  %v405_v59 = vld [vmem:[%s18467_s1 + $0xa18] sm:$0xff]  ;;  %v11386_v14 = vcombine.high %v389_v5, %v397_v7 }
 0x11e   :  { %6091 = vmatpush1.bf16.msra.mxu0 %v11271_v16  ;;  %6255 = vmatpush1.bf16.msra.mxu1 %v11273_v17  ;;  %v413_v16 = vld [vmem:[%s18467_s1 + $0xa58] sm:$0xff]  ;;  %v11383_v17 = vcombine.low %v388_v2, %v396_v4 }
 0x11f   :  { %6092 = vmatprep.subr.bf16.mxu0 %v11288_v18  ;;  %6256 = vmatprep.subr.bf16.mxu1 %v11290_v22  ;;  %v11385_v18 = vcombine.low %v389_v5, %v397_v7  ;;  %v421_v22 = vld [vmem:[%s18467_s1 + $0xa98] sm:$0xff]  ;;  %v11402_v24 = vcombine.high %v405_v59, %v413_v16 }
 0x122   :  { %6093 = vmatpush1.bf16.msra.mxu0 %v11287_v26  ;;  %6257 = vmatpush1.bf16.msra.mxu1 %v11289_v27  ;;  %v429_v26 = vld [vmem:[%s18467_s1 + $0xad8] sm:$0xff]  ;;  %v11399_v27 = vcombine.low %v404_v11, %v412_v13 }
 0x123   :  { %6094 = vmatprep.subr.bf16.mxu0 %v11304_v28  ;;  %6258 = vmatprep.subr.bf16.mxu1 %v11306_v33  ;;  %v11401_v28 = vcombine.low %v405_v59, %v413_v16  ;;  %v437_v33 = vld [vmem:[%s18467_s1 + $0xb18] sm:$0xff]  ;;  %v11418_v34 = vcombine.high %v421_v22, %v429_v26 }
 0x126   :  { %6095 = vmatpush1.bf16.msra.mxu0 %v11303_v36  ;;  %6259 = vmatpush1.bf16.msra.mxu1 %v11305_v37  ;;  %v445_v36 = vld [vmem:[%s18467_s1 + $0xb58] sm:$0xff]  ;;  %v11415_v37 = vcombine.low %v420_v20, %v428_v21 }
 0x127   :  { %6096 = vmatprep.subr.bf16.mxu0 %v11320_v38  ;;  %6260 = vmatprep.subr.bf16.mxu1 %v11322_v41  ;;  %v11417_v38 = vcombine.low %v421_v22, %v429_v26  ;;  %v11434_v41 = vcombine.high %v437_v33, %v445_v36 }
 0x12a   :  { %6097 = vmatpush1.bf16.msra.mxu0 %v11319_v45  ;;  %6261 = vmatpush1.bf16.msra.mxu1 %v11321_v46  ;;  %v461_v45 = vld [vmem:[%s18467_s1 + $0xbd8] sm:$0xff]  ;;  %v11431_v46 = vcombine.low %v436_v30, %v444_v31 }
 0x12b   :  { %6107 = vmatprep.subr.bf16.mxu0 %v11336_v47  ;;  %6271 = vmatprep.subr.bf16.mxu1 %v11338_v15  ;;  %v11433_v47 = vcombine.low %v437_v33, %v445_v36  ;;  %v11450_v49 = vcombine.high %v453_v42, %v461_v45  ;;  %v476_v15 = vld [vmem:[%s18467_s1 + $0xc50] sm:$0xff] }
 0x12d   :  { %6099 = vmatmul.mubr.bf16.vlgmr.msra.gmra.mrb[4].mxu0 %v13913_v25  ;;  %6263 = vmatmul.mubr.bf16.vlgmr.msra.gmra.mrb[4].mxu1 %v13913_v25 }
 0x12e   :  { %6108 = vmatpush1.bf16.msra.mxu0 %v11335_v54  ;;  %6272 = vmatpush1.bf16.msra.mxu1 %v11337_v23 }
 0x12f   :  { %6109 = vmatprep.subr.bf16.mxu0 %v11352_v55  ;;  %6273 = vmatprep.subr.bf16.mxu1 %v11354_v61 }
 0x130   :  { %6139 = vmatprep.mubr.bf16.mxu0 %v13933_v35  ;;  %6303 = vmatprep.mubr.bf16.mxu1 %v13933_v35 }
 0x132   :  { %6110 = vmatpush1.bf16.msra.mxu0 %v11351_v0  ;;  %6274 = vmatpush1.bf16.msra.mxu1 %v11353_v53 }
 0x133   :  { %6111 = vmatprep.subr.bf16.mxu0 %v11368_v1  ;;  %6275 = vmatprep.subr.bf16.mxu1 %v11370_v6 }
 0x136   :  { %6112 = vmatpush1.bf16.msra.mxu0 %v11367_v8  ;;  %6276 = vmatpush1.bf16.msra.mxu1 %v11369_v10 }
 0x137   :  { %6113 = vmatprep.subr.bf16.mxu0 %v11384_v32  ;;  %6277 = vmatprep.subr.bf16.mxu1 %v11386_v14 }
 0x13a   :  { %6114 = vmatpush1.bf16.msra.mxu0 %v11383_v17  ;;  %6278 = vmatpush1.bf16.msra.mxu1 %v11385_v18 }
 0x13b   :  { %6115 = vmatprep.subr.bf16.mxu0 %v11400_v19  ;;  %6279 = vmatprep.subr.bf16.mxu1 %v11402_v24 }
 0x13e   :  { %6116 = vmatpush1.bf16.msra.mxu0 %v11399_v27  ;;  %6280 = vmatpush1.bf16.msra.mxu1 %v11401_v28 }
 0x13f   :  { %6117 = vmatprep.subr.bf16.mxu0 %v11416_v29  ;;  %6281 = vmatprep.subr.bf16.mxu1 %v11418_v34 }
 0x142   :  { %6118 = vmatpush1.bf16.msra.mxu0 %v11415_v37  ;;  %6282 = vmatpush1.bf16.msra.mxu1 %v11417_v38 }
 0x143   :  { %6119 = vmatprep.subr.bf16.mxu0 %v11432_v39  ;;  %6283 = vmatprep.subr.bf16.mxu1 %v11434_v41 }
 0x144   :  { %12 = vsyncpa [#allocation3], 0  ;;  %v469_v51 = vld [vmem:[%s18467_s1 + $0xc18] sm:$0xff]  ;;  %v11447_v23 = vcombine.low %v452_v56, %v460_v40  ;;  %v11449_v55 = vcombine.low %v453_v42, %v461_v45  ;;  %v11464_v57 = vcombine.high %v468_v50, %v476_v15  ;;  %v484_v60 = vld [vmem:[%s18467_s1 + $0xc90] sm:$0xff]  ;;  %v11463_v53 = vcombine.low %v468_v50, %v476_v15 }
 0x145   :  { %v477_v54 = vld [vmem:[%s18467_s1 + $0xc58] sm:$0xff]  ;;  %v492_v61 = vld [vmem:[%s18467_s1 + $0xcd0] sm:$0xff]  ;;  %vm11047_vm1 = vcmask 9216  }
 0x146   :  { %6120 = vmatpush1.bf16.msra.mxu0 %v11431_v46  ;;  %6284 = vmatpush1.bf16.msra.mxu1 %v11433_v47  ;;  %v11466_v58 = vcombine.high %v469_v51, %v477_v54  ;;  %v485_v62 = vld [vmem:[%s18467_s1 + $0xc98] sm:$0xff]  ;;  %v11465_v1 = vcombine.low %v469_v51, %v477_v54  ;;  %v11480_v2 = vcombine.high %v484_v60, %v492_v61  ;;  %v500_v5 = vld [vmem:[%s18467_s1 + $0xd10] sm:$0xff] }
 0x147   :  { %6121 = vmatprep.subr.bf16.mxu0 %v11448_v48  ;;  %6285 = vmatprep.subr.bf16.mxu1 %v11450_v49  ;;  %v493_v0 = vld [vmem:[%s18467_s1 + $0xcd8] sm:$0xff]  ;;  %v508_v6 = vld [vmem:[%s18467_s1 + $0xd50] sm:$0xff]  ;;  %v11479_v10 = vcombine.low %v484_v60, %v492_v61 }
 0x148   :  { %v11482_v4 = vcombine.high %v485_v62, %v493_v0  ;;  %v501_v7 = vld [vmem:[%s18467_s1 + $0xd18] sm:$0xff]  ;;  %v11481_v32 = vcombine.low %v485_v62, %v493_v0  ;;  %v11496_v11 = vcombine.high %v500_v5, %v508_v6  ;;  %v516_v59 = vld [vmem:[%s18467_s1 + $0xd90] sm:$0xff]  ;;  %v11495_v18 = vcombine.low %v500_v5, %v508_v6 }
 0x149   :  { %v509_v8 = vld [vmem:[%s18467_s1 + $0xd58] sm:$0xff]  ;;  %v524_v14 = vld [vmem:[%s18467_s1 + $0xdd0] sm:$0xff] }
 0x14a   :  { %6122 = vmatpush1.bf16.msra.mxu0 %v11447_v23  ;;  %6286 = vmatpush1.bf16.msra.mxu1 %v11449_v55  ;;  %v11498_v13 = vcombine.high %v501_v7, %v509_v8  ;;  %v517_v16 = vld [vmem:[%s18467_s1 + $0xd98] sm:$0xff]  ;;  %v11497_v19 = vcombine.low %v501_v7, %v509_v8  ;;  %v11512_v20 = vcombine.high %v516_v59, %v524_v14  ;;  %v532_v22 = vld [vmem:[%s18467_s1 + $0xe10] sm:$0xff] }
 0x14b   :  { %6123 = vmatprep.subr.bf16.mxu0 %v11464_v57  ;;  %6287 = vmatprep.subr.bf16.mxu1 %v11466_v58  ;;  %v525_v17 = vld [vmem:[%s18467_s1 + $0xdd8] sm:$0xff]  ;;  %v540_v24 = vld [vmem:[%s18467_s1 + $0xe50] sm:$0xff]  ;;  %v11511_v28 = vcombine.low %v516_v59, %v524_v14 }
 0x14c   :  { %v11514_v21 = vcombine.high %v517_v16, %v525_v17  ;;  %v533_v26 = vld [vmem:[%s18467_s1 + $0xe18] sm:$0xff]  ;;  %v11513_v29 = vcombine.low %v517_v16, %v525_v17  ;;  %v11528_v30 = vcombine.high %v532_v22, %v540_v24  ;;  %v548_v33 = vld [vmem:[%s18467_s1 + $0xe90] sm:$0xff]  ;;  %v11527_v38 = vcombine.low %v532_v22, %v540_v24 }
 0x14d   :  { %v541_v27 = vld [vmem:[%s18467_s1 + $0xe58] sm:$0xff]  ;;  %v556_v34 = vld [vmem:[%s18467_s1 + $0xed0] sm:$0xff] }
 0x14e   :  { %6124 = vmatpush1.bf16.msra.mxu0 %v11463_v53  ;;  %6288 = vmatpush1.bf16.msra.mxu1 %v11465_v1  ;;  %v11530_v31 = vcombine.high %v533_v26, %v541_v27  ;;  %v549_v36 = vld [vmem:[%s18467_s1 + $0xe98] sm:$0xff]  ;;  %v11529_v39 = vcombine.low %v533_v26, %v541_v27  ;;  %v11544_v56 = vcombine.high %v548_v33, %v556_v34  ;;  %v564_v41 = vld [vmem:[%s18467_s1 + $0xf10] sm:$0xff] }
 0x14f   :  { %6125 = vmatprep.subr.bf16.mxu0 %v11480_v2  ;;  %6289 = vmatprep.subr.bf16.mxu1 %v11482_v4  ;;  %v557_v37 = vld [vmem:[%s18467_s1 + $0xed8] sm:$0xff]  ;;  %v572_v42 = vld [vmem:[%s18467_s1 + $0xf50] sm:$0xff]  ;;  %v11543_v47 = vcombine.low %v548_v33, %v556_v34 }
 0x150   :  { %v11546_v40 = vcombine.high %v549_v36, %v557_v37  ;;  %v565_v45 = vld [vmem:[%s18467_s1 + $0xf18] sm:$0xff]  ;;  %v11545_v48 = vcombine.low %v549_v36, %v557_v37  ;;  %v11560_v49 = vcombine.high %v564_v41, %v572_v42  ;;  %v580_v15 = vld [vmem:[%s18467_s1 + $0xf90] sm:$0xff]  ;;  %v11559_v55 = vcombine.low %v564_v41, %v572_v42 }
 0x151   :  { %v573_v46 = vld [vmem:[%s18467_s1 + $0xf58] sm:$0xff]  ;;  %v588_v51 = vld [vmem:[%s18467_s1 + $0xfd0] sm:$0xff] }
 0x152   :  { %6126 = vmatpush1.bf16.msra.mxu0 %v11479_v10  ;;  %6290 = vmatpush1.bf16.msra.mxu1 %v11481_v32  ;;  %v11562_v50 = vcombine.high %v565_v45, %v573_v46  ;;  %v581_v54 = vld [vmem:[%s18467_s1 + $0xf98] sm:$0xff]  ;;  %v11561_v57 = vcombine.low %v565_v45, %v573_v46  ;;  %v11576_v58 = vcombine.high %v580_v15, %v588_v51  ;;  %v596_v61 = vld [vmem:[%s18467_s1 + $0x1010] sm:$0xff] }
 0x153   :  { %6127 = vmatprep.subr.bf16.mxu0 %v11496_v11  ;;  %6291 = vmatprep.subr.bf16.mxu1 %v11498_v13  ;;  %v589_v23 = vld [vmem:[%s18467_s1 + $0xfd8] sm:$0xff]  ;;  %v604_v62 = vld [vmem:[%s18467_s1 + $0x1050] sm:$0xff]  ;;  %v11575_v1 = vcombine.low %v580_v15, %v588_v51 }
 0x154   :  { %v11578_v60 = vcombine.high %v581_v54, %v589_v23  ;;  %v597_v0 = vld [vmem:[%s18467_s1 + $0x1018] sm:$0xff]  ;;  %v11577_v2 = vcombine.low %v581_v54, %v589_v23  ;;  %v11592_v4 = vcombine.high %v596_v61, %v604_v62  ;;  %v612_v6 = vld [vmem:[%s18467_s1 + $0x1090] sm:$0xff]  ;;  %v11591_v32 = vcombine.low %v596_v61, %v604_v62 }
 0x155   :  { %v605_v53 = vld [vmem:[%s18467_s1 + $0x1058] sm:$0xff]  ;;  %v620_v7 = vld [vmem:[%s18467_s1 + $0x10d0] sm:$0xff] }
 0x156   :  { %6128 = vmatpush1.bf16.msra.mxu0 %v11495_v18  ;;  %6292 = vmatpush1.bf16.msra.mxu1 %v11497_v19  ;;  %v11594_v5 = vcombine.high %v597_v0, %v605_v53  ;;  %v613_v8 = vld [vmem:[%s18467_s1 + $0x1098] sm:$0xff]  ;;  %v11593_v11 = vcombine.low %v597_v0, %v605_v53  ;;  %v11608_v13 = vcombine.high %v612_v6, %v620_v7  ;;  %v628_v14 = vld [vmem:[%s18467_s1 + $0x1110] sm:$0xff] }
 0x157   :  { %6129 = vmatprep.subr.bf16.mxu0 %v11512_v20  ;;  %6293 = vmatprep.subr.bf16.mxu1 %v11514_v21  ;;  %v621_v10 = vld [vmem:[%s18467_s1 + $0x10d8] sm:$0xff]  ;;  %v636_v16 = vld [vmem:[%s18467_s1 + $0x1150] sm:$0xff]  ;;  %v11607_v19 = vcombine.low %v612_v6, %v620_v7 }
 0x158   :  { %v11610_v59 = vcombine.high %v613_v8, %v621_v10  ;;  %v629_v17 = vld [vmem:[%s18467_s1 + $0x1118] sm:$0xff]  ;;  %v11609_v20 = vcombine.low %v613_v8, %v621_v10  ;;  %v11624_v21 = vcombine.high %v628_v14, %v636_v16  ;;  %v644_v24 = vld [vmem:[%s18467_s1 + $0x1190] sm:$0xff] }
 0x159   :  { %v637_v18 = vld [vmem:[%s18467_s1 + $0x1158] sm:$0xff]  ;;  %v652_v26 = vld [vmem:[%s18467_s1 + $0x11d0] sm:$0xff] }
 0x15a   :  { %6130 = vmatpush1.bf16.msra.mxu0 %v11511_v28  ;;  %6294 = vmatpush1.bf16.msra.mxu1 %v11513_v29  ;;  %v11626_v22 = vcombine.high %v629_v17, %v637_v18  ;;  %v645_v27 = vld [vmem:[%s18467_s1 + $0x1198] sm:$0xff]  ;;  %v11623_v29 = vcombine.low %v628_v14, %v636_v16  ;;  %v660_v34 = vld [vmem:[%s18467_s1 + $0x1210] sm:$0xff] }
 0x15b   :  { %6131 = vmatprep.subr.bf16.mxu0 %v11528_v30  ;;  %6295 = vmatprep.subr.bf16.mxu1 %v11530_v31  ;;  %v653_v28 = vld [vmem:[%s18467_s1 + $0x11d8] sm:$0xff]  ;;  %v11625_v30 = vcombine.low %v629_v17, %v637_v18  ;;  %v11640_v31 = vcombine.high %v644_v24, %v652_v26  ;;  %v668_v36 = vld [vmem:[%s18467_s1 + $0x1250] sm:$0xff] }
 0x15c   :  { %v11642_v33 = vcombine.high %v645_v27, %v653_v28  ;;  %v661_v37 = vld [vmem:[%s18467_s1 + $0x1218] sm:$0xff]  ;;  %v676_v42 = vld [vmem:[%s18467_s1 + $0x1290] sm:$0xff] }
 0x15d   :  { %v684_v45 = vld [vmem:[%s18467_s1 + $0x12d0] sm:$0xff]  ;;  %v677_v46 = vld [vmem:[%s18467_s1 + $0x1298] sm:$0xff] }
 0x15e   :  { %6132 = vmatpush1.bf16.msra.mxu0 %v11527_v38  ;;  %6296 = vmatpush1.bf16.msra.mxu1 %v11529_v39  ;;  %v669_v38 = vld [vmem:[%s18467_s1 + $0x1258] sm:$0xff]  ;;  %v11639_v39 = vcombine.low %v644_v24, %v652_v26  ;;  %v692_v51 = vld [vmem:[%s18467_s1 + $0x1310] sm:$0xff] }
 0x15f   :  { %6133 = vmatprep.subr.bf16.mxu0 %v11544_v56  ;;  %6297 = vmatprep.subr.bf16.mxu1 %v11546_v40  ;;  %v11641_v56 = vcombine.low %v645_v27, %v653_v28  ;;  %v11656_v40 = vcombine.high %v660_v34, %v668_v36  ;;  %v11658_v41 = vcombine.high %v661_v37, %v669_v38  ;;  %v700_v54 = vld [vmem:[%s18467_s1 + $0x1350] sm:$0xff]  ;;  %v693_v23 = vld [vmem:[%s18467_s1 + $0x1318] sm:$0xff] }
 0x160   :  { %v708_v62 = vld [vmem:[%s18467_s1 + $0x1390] sm:$0xff]  ;;  %v709_v53 = vld [vmem:[%s18467_s1 + $0x1398] sm:$0xff] }
 0x161   :  { %v716_v0 = vld [vmem:[%s18467_s1 + $0x13d0] sm:$0xff]  ;;  %v725_v10 = vld [vmem:[%s18467_s1 + $0x1418] sm:$0xff] }
 0x162   :  { %6134 = vmatpush1.bf16.msra.mxu0 %v11543_v47  ;;  %6298 = vmatpush1.bf16.msra.mxu1 %v11545_v48  ;;  %v685_v47 = vld [vmem:[%s18467_s1 + $0x12d8] sm:$0xff]  ;;  %v11655_v48 = vcombine.low %v660_v34, %v668_v36  ;;  %v724_v7 = vld [vmem:[%s18467_s1 + $0x1410] sm:$0xff] }
 0x163   :  { %6135 = vmatprep.subr.bf16.mxu0 %v11560_v49  ;;  %6299 = vmatprep.subr.bf16.mxu1 %v11562_v50  ;;  %v11657_v49 = vcombine.low %v661_v37, %v669_v38  ;;  %v11672_v50 = vcombine.high %v676_v42, %v684_v45  ;;  %v11674_v15 = vcombine.high %v677_v46, %v685_v47  ;;  %v732_v8 = vld [vmem:[%s18467_s1 + $0x1450] sm:$0xff]  ;;  %v741_v18 = vld [vmem:[%s18467_s1 + $0x1498] sm:$0xff] }
 0x164   :  { %v740_v16 = vld [vmem:[%s18467_s1 + $0x1490] sm:$0xff]  ;;  %v757_v28 = vld [vmem:[%s18467_s1 + $0x1518] sm:$0xff] }
 0x165   :  { %v748_v17 = vld [vmem:[%s18467_s1 + $0x14d0] sm:$0xff]  ;;  %v773_v38 = vld [vmem:[%s18467_s1 + $0x1598] sm:$0xff] }
 0x166   :  { %6136 = vmatpush1.bf16.msra.mxu0 %v11559_v55  ;;  %6300 = vmatpush1.bf16.msra.mxu1 %v11561_v57  ;;  %v701_v55 = vld [vmem:[%s18467_s1 + $0x1358] sm:$0xff]  ;;  %v11671_v57 = vcombine.low %v676_v42, %v684_v45  ;;  %v756_v26 = vld [vmem:[%s18467_s1 + $0x1510] sm:$0xff] }
 0x167   :  { %6137 = vmatprep.subr.bf16.mxu0 %v11576_v58  ;;  %6301 = vmatprep.subr.bf16.mxu1 %v11578_v60  ;;  %v11673_v58 = vcombine.low %v677_v46, %v685_v47  ;;  %v11688_v60 = vcombine.high %v692_v51, %v700_v54  ;;  %v11690_v61 = vcombine.high %v693_v23, %v701_v55  ;;  %v764_v27 = vld [vmem:[%s18467_s1 + $0x1550] sm:$0xff]  ;;  %v789_v47 = vld [vmem:[%s18467_s1 + $0x1618] sm:$0xff] }
 0x168   :  { %v772_v36 = vld [vmem:[%s18467_s1 + $0x1590] sm:$0xff] }
 0x169   :  { %v780_v37 = vld [vmem:[%s18467_s1 + $0x15d0] sm:$0xff] }
 0x16a   :  { %6138 = vmatpush1.bf16.msra.mxu0 %v11575_v1  ;;  %6302 = vmatpush1.bf16.msra.mxu1 %v11577_v2  ;;  %v717_v1 = vld [vmem:[%s18467_s1 + $0x13d8] sm:$0xff]  ;;  %v11687_v2 = vcombine.low %v692_v51, %v700_v54  ;;  %v788_v45 = vld [vmem:[%s18467_s1 + $0x1610] sm:$0xff] }
 0x16b   :  { %6148 = vmatprep.subr.bf16.mxu0 %v11592_v4  ;;  %6312 = vmatprep.subr.bf16.mxu1 %v11594_v5  ;;  %v11689_v4 = vcombine.low %v693_v23, %v701_v55  ;;  %v11704_v5 = vcombine.high %v708_v62, %v716_v0  ;;  %v11706_v6 = vcombine.high %v709_v53, %v717_v1  ;;  %v796_v46 = vld [vmem:[%s18467_s1 + $0x1650] sm:$0xff]  ;;  %v805_v55 = vld [vmem:[%s18467_s1 + $0x1698] sm:$0xff] }
 0x16c   :  { %v804_v54 = vld [vmem:[%s18467_s1 + $0x1690] sm:$0xff] }
 0x16d   :  { %6140 = vmatmul.mubr.bf16.vlgmr.msra.gmra.mrb[4].mxu0 %v14132_v43  ;;  %6304 = vmatmul.mubr.bf16.vlgmr.msra.gmra.mrb[4].mxu1 %v14132_v43  ;;  %v812_v23 = vld [vmem:[%s18467_s1 + $0x16d0] sm:$0xff] }
 0x16e   :  { %6149 = vmatpush1.bf16.msra.mxu0 %v11591_v32  ;;  %6313 = vmatpush1.bf16.msra.mxu1 %v11593_v11  ;;  %v733_v32 = vld [vmem:[%s18467_s1 + $0x1458] sm:$0xff]  ;;  %v11703_v11 = vcombine.low %v708_v62, %v716_v0  ;;  %v820_v0 = vld [vmem:[%s18467_s1 + $0x1710] sm:$0xff] }
 0x16f   :  { %6150 = vmatprep.subr.bf16.mxu0 %v11608_v13  ;;  %6314 = vmatprep.subr.bf16.mxu1 %v11610_v59  ;;  %v11705_v13 = vcombine.low %v709_v53, %v717_v1  ;;  %v11720_v59 = vcombine.high %v724_v7, %v732_v8  ;;  %v11722_v14 = vcombine.high %v725_v10, %v733_v32  ;;  %v828_v53 = vld [vmem:[%s18467_s1 + $0x1750] sm:$0xff]  ;;  %v821_v1 = vld [vmem:[%s18467_s1 + $0x1718] sm:$0xff] }
 0x170   :  { %6180 = vmatprep.mubr.bf16.mxu0 %v14146_v52  ;;  %6344 = vmatprep.mubr.bf16.mxu1 %v14146_v52 }
 0x172   :  { %6151 = vmatpush1.bf16.msra.mxu0 %v11607_v19  ;;  %6315 = vmatpush1.bf16.msra.mxu1 %v11609_v20  ;;  %v749_v19 = vld [vmem:[%s18467_s1 + $0x14d8] sm:$0xff]  ;;  %v11719_v20 = vcombine.low %v724_v7, %v732_v8  ;;  %v836_v8 = vld [vmem:[%s18467_s1 + $0x1790] sm:$0xff] }
 0x173   :  { %6152 = vmatprep.subr.bf16.mxu0 %v11624_v21  ;;  %6316 = vmatprep.subr.bf16.mxu1 %v11626_v22  ;;  %v11721_v21 = vcombine.low %v725_v10, %v733_v32  ;;  %v11736_v22 = vcombine.high %v740_v16, %v748_v17  ;;  %v11738_v24 = vcombine.high %v741_v18, %v749_v19  ;;  %v844_v10 = vld [vmem:[%s18467_s1 + $0x17d0] sm:$0xff]  ;;  %v837_v32 = vld [vmem:[%s18467_s1 + $0x1798] sm:$0xff] }
 0x176   :  { %6153 = vmatpush1.bf16.msra.mxu0 %v11623_v29  ;;  %6317 = vmatpush1.bf16.msra.mxu1 %v11625_v30  ;;  %v765_v29 = vld [vmem:[%s18467_s1 + $0x1558] sm:$0xff]  ;;  %v11735_v30 = vcombine.low %v740_v16, %v748_v17  ;;  %v852_v17 = vld [vmem:[%s18467_s1 + $0x1810] sm:$0xff] }
 0x177   :  { %6154 = vmatprep.subr.bf16.mxu0 %v11640_v31  ;;  %6318 = vmatprep.subr.bf16.mxu1 %v11642_v33  ;;  %v11737_v31 = vcombine.low %v741_v18, %v749_v19  ;;  %v11752_v33 = vcombine.high %v756_v26, %v764_v27  ;;  %v11754_v34 = vcombine.high %v757_v28, %v765_v29  ;;  %v860_v18 = vld [vmem:[%s18467_s1 + $0x1850] sm:$0xff]  ;;  %v853_v19 = vld [vmem:[%s18467_s1 + $0x1818] sm:$0xff] }
 0x17a   :  { %6155 = vmatpush1.bf16.msra.mxu0 %v11639_v39  ;;  %6319 = vmatpush1.bf16.msra.mxu1 %v11641_v56  ;;  %v781_v39 = vld [vmem:[%s18467_s1 + $0x15d8] sm:$0xff]  ;;  %v11751_v56 = vcombine.low %v756_v26, %v764_v27  ;;  %v868_v27 = vld [vmem:[%s18467_s1 + $0x1890] sm:$0xff] }
 0x17b   :  { %6156 = vmatprep.subr.bf16.mxu0 %v11656_v40  ;;  %6320 = vmatprep.subr.bf16.mxu1 %v11658_v41  ;;  %v11753_v40 = vcombine.low %v757_v28, %v765_v29  ;;  %v11768_v41 = vcombine.high %v772_v36, %v780_v37  ;;  %v11770_v42 = vcombine.high %v773_v38, %v781_v39  ;;  %v876_v28 = vld [vmem:[%s18467_s1 + $0x18d0] sm:$0xff]  ;;  %v869_v29 = vld [vmem:[%s18467_s1 + $0x1898] sm:$0xff] }
 0x17e   :  { %6157 = vmatpush1.bf16.msra.mxu0 %v11655_v48  ;;  %6321 = vmatpush1.bf16.msra.mxu1 %v11657_v49  ;;  %v797_v48 = vld [vmem:[%s18467_s1 + $0x1658] sm:$0xff]  ;;  %v11767_v49 = vcombine.low %v772_v36, %v780_v37  ;;  %v884_v37 = vld [vmem:[%s18467_s1 + $0x1910] sm:$0xff] }
 0x17f   :  { %6158 = vmatprep.subr.bf16.mxu0 %v11672_v50  ;;  %6322 = vmatprep.subr.bf16.mxu1 %v11674_v15  ;;  %v11769_v50 = vcombine.low %v773_v38, %v781_v39  ;;  %v11784_v15 = vcombine.high %v788_v45, %v796_v46  ;;  %v11786_v51 = vcombine.high %v789_v47, %v797_v48  ;;  %v892_v38 = vld [vmem:[%s18467_s1 + $0x1950] sm:$0xff]  ;;  %v885_v39 = vld [vmem:[%s18467_s1 + $0x1918] sm:$0xff] }
 0x182   :  { %6159 = vmatpush1.bf16.msra.mxu0 %v11671_v57  ;;  %6323 = vmatpush1.bf16.msra.mxu1 %v11673_v58  ;;  %v813_v57 = vld [vmem:[%s18467_s1 + $0x16d8] sm:$0xff]  ;;  %v11783_v58 = vcombine.low %v788_v45, %v796_v46  ;;  %v900_v46 = vld [vmem:[%s18467_s1 + $0x1990] sm:$0xff] }
 0x183   :  { %6160 = vmatprep.subr.bf16.mxu0 %v11688_v60  ;;  %6324 = vmatprep.subr.bf16.mxu1 %v11690_v61  ;;  %v11785_v60 = vcombine.low %v789_v47, %v797_v48  ;;  %v11800_v61 = vcombine.high %v804_v54, %v812_v23  ;;  %v11802_v62 = vcombine.high %v805_v55, %v813_v57  ;;  %v908_v47 = vld [vmem:[%s18467_s1 + $0x19d0] sm:$0xff]  ;;  %v901_v48 = vld [vmem:[%s18467_s1 + $0x1998] sm:$0xff] }
 0x186   :  { %6161 = vmatpush1.bf16.msra.mxu0 %v11687_v2  ;;  %6325 = vmatpush1.bf16.msra.mxu1 %v11689_v4  ;;  %v829_v2 = vld [vmem:[%s18467_s1 + $0x1758] sm:$0xff]  ;;  %v11799_v4 = vcombine.low %v804_v54, %v812_v23  ;;  %v916_v23 = vld [vmem:[%s18467_s1 + $0x1a10] sm:$0xff] }
 0x187   :  { %6162 = vmatprep.subr.bf16.mxu0 %v11704_v5  ;;  %6326 = vmatprep.subr.bf16.mxu1 %v11706_v6  ;;  %v11801_v5 = vcombine.low %v805_v55, %v813_v57  ;;  %v11816_v6 = vcombine.high %v820_v0, %v828_v53  ;;  %v11818_v7 = vcombine.high %v821_v1, %v829_v2  ;;  %v924_v55 = vld [vmem:[%s18467_s1 + $0x1a50] sm:$0xff]  ;;  %v917_v57 = vld [vmem:[%s18467_s1 + $0x1a18] sm:$0xff] }
 0x18a   :  { %6163 = vmatpush1.bf16.msra.mxu0 %v11703_v11  ;;  %6327 = vmatpush1.bf16.msra.mxu1 %v11705_v13  ;;  %v845_v11 = vld [vmem:[%s18467_s1 + $0x17d8] sm:$0xff]  ;;  %v11815_v13 = vcombine.low %v820_v0, %v828_v53  ;;  %v932_v53 = vld [vmem:[%s18467_s1 + $0x1a90] sm:$0xff] }
 0x18b   :  { %6164 = vmatprep.subr.bf16.mxu0 %v11720_v59  ;;  %6328 = vmatprep.subr.bf16.mxu1 %v11722_v14  ;;  %v11817_v59 = vcombine.low %v821_v1, %v829_v2  ;;  %v11832_v14 = vcombine.high %v836_v8, %v844_v10  ;;  %v11834_v16 = vcombine.high %v837_v32, %v845_v11  ;;  %v940_v1 = vld [vmem:[%s18467_s1 + $0x1ad0] sm:$0xff]  ;;  %v933_v2 = vld [vmem:[%s18467_s1 + $0x1a98] sm:$0xff] }
 0x18e   :  { %6165 = vmatpush1.bf16.msra.mxu0 %v11719_v20  ;;  %6329 = vmatpush1.bf16.msra.mxu1 %v11721_v21  ;;  %v861_v20 = vld [vmem:[%s18467_s1 + $0x1858] sm:$0xff]  ;;  %v11831_v21 = vcombine.low %v836_v8, %v844_v10  ;;  %v948_v10 = vld [vmem:[%s18467_s1 + $0x1b10] sm:$0xff] }
 0x18f   :  { %6166 = vmatprep.subr.bf16.mxu0 %v11736_v22  ;;  %6330 = vmatprep.subr.bf16.mxu1 %v11738_v24  ;;  %v11833_v22 = vcombine.low %v837_v32, %v845_v11  ;;  %v11848_v24 = vcombine.high %v852_v17, %v860_v18  ;;  %v11850_v26 = vcombine.high %v853_v19, %v861_v20  ;;  %v956_v32 = vld [vmem:[%s18467_s1 + $0x1b50] sm:$0xff]  ;;  %v949_v11 = vld [vmem:[%s18467_s1 + $0x1b18] sm:$0xff] }
 0x192   :  { %6167 = vmatpush1.bf16.msra.mxu0 %v11735_v30  ;;  %6331 = vmatpush1.bf16.msra.mxu1 %v11737_v31  ;;  %v877_v30 = vld [vmem:[%s18467_s1 + $0x18d8] sm:$0xff]  ;;  %v11847_v31 = vcombine.low %v852_v17, %v860_v18 }
 0x193   :  { %6168 = vmatprep.subr.bf16.mxu0 %v11752_v33  ;;  %6332 = vmatprep.subr.bf16.mxu1 %v11754_v34  ;;  %v11849_v33 = vcombine.low %v853_v19, %v861_v20  ;;  %v11864_v34 = vcombine.high %v868_v27, %v876_v28  ;;  %v11866_v36 = vcombine.high %v869_v29, %v877_v30  ;;  %v964_v19 = vld [vmem:[%s18467_s1 + $0x1b90] sm:$0xff] }
 0x194   :  { %v972_v20 = vld [vmem:[%s18467_s1 + $0x1bd0] sm:$0xff] }
 0x196   :  { %6169 = vmatpush1.bf16.msra.mxu0 %v11751_v56  ;;  %6333 = vmatpush1.bf16.msra.mxu1 %v11753_v40  ;;  %v893_v56 = vld [vmem:[%s18467_s1 + $0x1958] sm:$0xff]  ;;  %v11863_v40 = vcombine.low %v868_v27, %v876_v28 }
 0x197   :  { %6170 = vmatprep.subr.bf16.mxu0 %v11768_v41  ;;  %6334 = vmatprep.subr.bf16.mxu1 %v11770_v42  ;;  %v11865_v41 = vcombine.low %v869_v29, %v877_v30  ;;  %v11880_v42 = vcombine.high %v884_v37, %v892_v38  ;;  %v11882_v45 = vcombine.high %v885_v39, %v893_v56 }
 0x198   :  { %v11943_v29 = vcombine.low %v948_v10, %v956_v32 }
 0x19a   :  { %6171 = vmatpush1.bf16.msra.mxu0 %v11767_v49  ;;  %6335 = vmatpush1.bf16.msra.mxu1 %v11769_v50  ;;  %v909_v49 = vld [vmem:[%s18467_s1 + $0x19d8] sm:$0xff]  ;;  %v11879_v50 = vcombine.low %v884_v37, %v892_v38  ;;  %v980_v38 = vld [vmem:[%s18467_s1 + $0x1c10] sm:$0xff] }
 0x19b   :  { %6172 = vmatprep.subr.bf16.mxu0 %v11784_v15  ;;  %6336 = vmatprep.subr.bf16.mxu1 %v11786_v51  ;;  %v11881_v15 = vcombine.low %v885_v39, %v893_v56  ;;  %v11896_v51 = vcombine.high %v900_v46, %v908_v47  ;;  %v11898_v54 = vcombine.high %v901_v48, %v909_v49  ;;  %v988_v39 = vld [vmem:[%s18467_s1 + $0x1c50] sm:$0xff]  ;;  %v981_v56 = vld [vmem:[%s18467_s1 + $0x1c18] sm:$0xff] }
 0x19e   :  { %6173 = vmatpush1.bf16.msra.mxu0 %v11783_v58  ;;  %6337 = vmatpush1.bf16.msra.mxu1 %v11785_v60  ;;  %v925_v58 = vld [vmem:[%s18467_s1 + $0x1a58] sm:$0xff]  ;;  %v11895_v60 = vcombine.low %v900_v46, %v908_v47  ;;  %v996_v47 = vld [vmem:[%s18467_s1 + $0x1c90] sm:$0xff] }
 0x19f   :  { %6174 = vmatprep.subr.bf16.mxu0 %v11800_v61  ;;  %6338 = vmatprep.subr.bf16.mxu1 %v11802_v62  ;;  %v11897_v61 = vcombine.low %v901_v48, %v909_v49  ;;  %v11912_v62 = vcombine.high %v916_v23, %v924_v55  ;;  %v11914_v0 = vcombine.high %v917_v57, %v925_v58  ;;  %v1004_v48 = vld [vmem:[%s18467_s1 + $0x1cd0] sm:$0xff]  ;;  %v997_v49 = vld [vmem:[%s18467_s1 + $0x1c98] sm:$0xff] }
 0x1a2   :  { %6175 = vmatpush1.bf16.msra.mxu0 %v11799_v4  ;;  %6339 = vmatpush1.bf16.msra.mxu1 %v11801_v5  ;;  %v941_v4 = vld [vmem:[%s18467_s1 + $0x1ad8] sm:$0xff]  ;;  %v11911_v5 = vcombine.low %v916_v23, %v924_v55  ;;  %v86_v55 = vld [vmem:[%s18467_s1 + $0x20] sm:$0xff] }
 0x1a3   :  { %6176 = vmatprep.subr.bf16.mxu0 %v11816_v6  ;;  %6340 = vmatprep.subr.bf16.mxu1 %v11818_v7  ;;  %v11913_v6 = vcombine.low %v917_v57, %v925_v58  ;;  %v11928_v7 = vcombine.high %v932_v53, %v940_v1  ;;  %v11930_v8 = vcombine.high %v933_v2, %v941_v4  ;;  %v94_v57 = vld [vmem:[%s18467_s1 + $0x60] sm:$0xff]  ;;  %v87_v58 = vld [vmem:[%s18467_s1 + $0x28] sm:$0xff] }
 0x1a6   :  { %6177 = vmatpush1.bf16.msra.mxu0 %v11815_v13  ;;  %6341 = vmatpush1.bf16.msra.mxu1 %v11817_v59  ;;  %v957_v13 = vld [vmem:[%s18467_s1 + $0x1b58] sm:$0xff]  ;;  %v11927_v59 = vcombine.low %v932_v53, %v940_v1  ;;  %v102_v1 = vld [vmem:[%s18467_s1 + $0xa0] sm:$0xff] }
 0x1a7   :  { %6178 = vmatprep.subr.bf16.mxu0 %v11832_v14  ;;  %6342 = vmatprep.subr.bf16.mxu1 %v11834_v16  ;;  %v11929_v14 = vcombine.low %v933_v2, %v941_v4  ;;  %v11944_v16 = vcombine.high %v948_v10, %v956_v32  ;;  %v11946_v18 = vcombine.high %v949_v11, %v957_v13  ;;  %v110_v2 = vld [vmem:[%s18467_s1 + $0xe0] sm:$0xff]  ;;  %v103_v4 = vld [vmem:[%s18467_s1 + $0xa8] sm:$0xff] }
 0x1a8   :  { %v118_v32 = vld [vmem:[%s18467_s1 + $0x120] sm:$0xff] }
 0x1aa   :  { %6179 = vmatpush1.bf16.msra.mxu0 %v11831_v21  ;;  %6343 = vmatpush1.bf16.msra.mxu1 %v11833_v22 }
 0x1ab   :  { %6189 = vmatprep.subr.bf16.mxu0 %v11848_v24  ;;  %6353 = vmatprep.subr.bf16.mxu1 %v11850_v26  ;;  %v965_v24 = vld [vmem:[%s18467_s1 + $0x1b98] sm:$0xff] }
 0x1ac   :  { %v973_v26 = vld [vmem:[%s18467_s1 + $0x1bd8] sm:$0xff] }
 0x1ad   :  { %6181 = vmatmul.mubr.bf16.vlgmr.msra.gmra.mrb[4].mxu0 %v14341_v3  ;;  %6345 = vmatmul.mubr.bf16.vlgmr.msra.gmra.mrb[4].mxu1 %v14341_v3  ;;  %v11962_v37 = vcombine.high %v965_v24, %v973_v26 }
 0x1ae   :  { %6190 = vmatpush1.bf16.msra.mxu0 %v11847_v31  ;;  %6354 = vmatpush1.bf16.msra.mxu1 %v11849_v33  ;;  %v11945_v33 = vcombine.low %v949_v11, %v957_v13  ;;  %v126_v11 = vld [vmem:[%s18467_s1 + $0x160] sm:$0xff]  ;;  %v119_v13 = vld [vmem:[%s18467_s1 + $0x128] sm:$0xff] }
 0x1af   :  { %6191 = vmatprep.subr.bf16.mxu0 %v11864_v34  ;;  %6355 = vmatprep.subr.bf16.mxu1 %v11866_v36  ;;  %v11960_v34 = vcombine.high %v964_v19, %v972_v20 }
 0x1b0   :  { %12005 = vmatprep.mubr.msk.bf16.mxu0 %vm5734_vm0, %v14355_v12  ;;  %12006 = vmatprep.mubr.msk.bf16.mxu1 %vm5734_vm0, %v14355_v12 }
 0x1b2   :  { %6192 = vmatpush1.bf16.msra.mxu0 %v11863_v40  ;;  %6356 = vmatpush1.bf16.msra.mxu1 %v11865_v41  ;;  %v989_v40 = vld [vmem:[%s18467_s1 + $0x1c58] sm:$0xff]  ;;  %v11959_v41 = vcombine.low %v964_v19, %v972_v20  ;;  %v134_v20 = vld [vmem:[%s18467_s1 + $0x1a0] sm:$0xff] }
 0x1b3   :  { %6193 = vmatprep.subr.bf16.mxu0 %v11880_v42  ;;  %6357 = vmatprep.subr.bf16.mxu1 %v11882_v45  ;;  %v11961_v42 = vcombine.low %v965_v24, %v973_v26  ;;  %v11976_v45 = vcombine.high %v980_v38, %v988_v39  ;;  %v11978_v46 = vcombine.high %v981_v56, %v989_v40  ;;  %v142_v24 = vld [vmem:[%s18467_s1 + $0x1e0] sm:$0xff]  ;;  %v135_v26 = vld [vmem:[%s18467_s1 + $0x1a8] sm:$0xff] }
 0x1b6   :  { %6194 = vmatpush1.bf16.msra.mxu0 %v11879_v50  ;;  %6358 = vmatpush1.bf16.msra.mxu1 %v11881_v15  ;;  %v1005_v50 = vld [vmem:[%s18467_s1 + $0x1cd8] sm:$0xff]  ;;  %v11975_v15 = vcombine.low %v980_v38, %v988_v39  ;;  %v159_v38 = vld [vmem:[%s18467_s1 + $0x268] sm:$0xff]  ;;  %v11131_v39 = vcombine.low %v134_v20, %v142_v24 }
 0x1b7   :  { %6195 = vmatprep.subr.bf16.mxu0 %v11896_v51  ;;  %6359 = vmatprep.subr.bf16.mxu1 %v11898_v54  ;;  %v11977_v51 = vcombine.low %v981_v56, %v989_v40  ;;  %v11992_v54 = vcombine.high %v996_v47, %v1004_v48  ;;  %v11994_v23 = vcombine.high %v997_v49, %v1005_v50 }
 0x1ba   :  { %6196 = vmatpush1.bf16.msra.mxu0 %v11895_v60  ;;  %6360 = vmatpush1.bf16.msra.mxu1 %v11897_v61  ;;  %v95_v60 = vld [vmem:[%s18467_s1 + $0x68] sm:$0xff]  ;;  %v11991_v61 = vcombine.low %v996_v47, %v1004_v48 }
 0x1bb   :  { %6197 = vmatprep.subr.bf16.mxu0 %v11912_v62  ;;  %6361 = vmatprep.subr.bf16.mxu1 %v11914_v0  ;;  %v11993_v62 = vcombine.low %v997_v49, %v1005_v50  ;;  %v11084_v0 = vcombine.high %v86_v55, %v94_v57  ;;  %v11086_v53 = vcombine.high %v87_v58, %v95_v60  ;;  %v175_v47 = vld [vmem:[%s18467_s1 + $0x2e8] sm:$0xff] }
 0x1be   :  { %6198 = vmatpush1.bf16.msra.mxu0 %v11911_v5  ;;  %6362 = vmatpush1.bf16.msra.mxu1 %v11913_v6  ;;  %v111_v5 = vld [vmem:[%s18467_s1 + $0xe8] sm:$0xff]  ;;  %v11083_v6 = vcombine.low %v86_v55, %v94_v57 }
 0x1bf   :  { %6199 = vmatprep.subr.bf16.mxu0 %v11928_v7  ;;  %6363 = vmatprep.subr.bf16.mxu1 %v11930_v8  ;;  %v11085_v7 = vcombine.low %v87_v58, %v95_v60  ;;  %v11100_v8 = vcombine.high %v102_v1, %v110_v2  ;;  %v11102_v10 = vcombine.high %v103_v4, %v111_v5  ;;  %v191_v55 = vld [vmem:[%s18467_s1 + $0x368] sm:$0xff] }
 0x1c0   :  { %v15129_v17 = vpop.f32.mrb[0].mxu0  ;;  %v15137_v21 = vpop.f32.mrb[0].mxu1 }
 0x1c1   :  { %v15139_v22 = vpop.f32.mrb[1].mxu0  ;;  %v15147_v27 = vpop.f32.mrb[1].mxu1 }
 0x1c2   :  { %v5899_v28 = vpop.f32.mrb[2].mxu0  ;;  %6200 = vmatpush1.bf16.msra.mxu0 %v11927_v59  ;;  %v6063_v30 = vpop.f32.mrb[2].mxu1  ;;  %6364 = vmatpush1.bf16.msra.mxu1 %v11929_v14  ;;  %v127_v59 = vld [vmem:[%s18467_s1 + $0x168] sm:$0xff]  ;;  %v11099_v14 = vcombine.low %v102_v1, %v110_v2 }
 0x1c3   :  { %v5900_v31 = vpop.f32.mrb[3].mxu0  ;;  %6201 = vmatprep.subr.bf16.mxu0 %v11944_v16  ;;  %v6064_v36 = vpop.f32.mrb[3].mxu1  ;;  %6365 = vmatprep.subr.bf16.mxu1 %v11946_v18  ;;  %v11101_v16 = vcombine.low %v103_v4, %v111_v5  ;;  %v11116_v18 = vcombine.high %v118_v32, %v126_v11  ;;  %v11118_v19 = vcombine.high %v119_v13, %v127_v59  ;;  %v143_v28 = vld [vmem:[%s18467_s1 + $0x1e8] sm:$0xff] }
 0x1c4   :  { %v11117_v30 = vcombine.low %v119_v13, %v127_v59  ;;  %v11132_v31 = vcombine.high %v134_v20, %v142_v24  ;;  %v158_v36 = vld [vmem:[%s18467_s1 + $0x260] sm:$0xff]  ;;  %v11133_v56 = vcombine.low %v135_v26, %v143_v28  ;;  %v207_v1 = vld [vmem:[%s18467_s1 + $0x3e8] sm:$0xff] }
 0x1c5   :  { %v239_v20 = vld [vmem:[%s18467_s1 + $0x4e8] sm:$0xff] }
 0x1c6   :  { %6202 = vmatpush1.bf16.msra.mxu0 %v11943_v29  ;;  %6366 = vmatpush1.bf16.msra.mxu1 %v11945_v33  ;;  %v11115_v29 = vcombine.low %v118_v32, %v126_v11  ;;  %v11134_v33 = vcombine.high %v135_v26, %v143_v28  ;;  %v223_v32 = vld [vmem:[%s18467_s1 + $0x468] sm:$0xff] }
 0x1c7   :  { %6203 = vmatprep.subr.bf16.mxu0 %v11960_v34  ;;  %6367 = vmatprep.subr.bf16.mxu1 %v11962_v37  ;;  %v150_v34 = vld [vmem:[%s18467_s1 + $0x220] sm:$0xff]  ;;  %v151_v37 = vld [vmem:[%s18467_s1 + $0x228] sm:$0xff] }
 0x1c8   :  { %v11148_v40 = vcombine.high %v150_v34, %v158_v36  ;;  %v11147_v48 = vcombine.low %v150_v34, %v158_v36  ;;  %v11149_v49 = vcombine.low %v151_v37, %v159_v38  ;;  %v255_v34 = vld [vmem:[%s18467_s1 + $0x568] sm:$0xff] }
 0x1ca   :  { %6204 = vmatpush1.bf16.msra.mxu0 %v11959_v41  ;;  %6368 = vmatpush1.bf16.msra.mxu1 %v11961_v42  ;;  %v11150_v41 = vcombine.high %v151_v37, %v159_v38  ;;  %v166_v42 = vld [vmem:[%s18467_s1 + $0x2a0] sm:$0xff] }
 0x1cb   :  { %6205 = vmatprep.subr.bf16.mxu0 %v11976_v45  ;;  %6369 = vmatprep.subr.bf16.mxu1 %v11978_v46  ;;  %v174_v45 = vld [vmem:[%s18467_s1 + $0x2e0] sm:$0xff]  ;;  %v167_v46 = vld [vmem:[%s18467_s1 + $0x2a8] sm:$0xff] }
 0x1cc   :  { %v11164_v50 = vcombine.high %v166_v42, %v174_v45  ;;  %v11163_v57 = vcombine.low %v166_v42, %v174_v45  ;;  %v11165_v58 = vcombine.low %v167_v46, %v175_v47  ;;  %v271_v42 = vld [vmem:[%s18467_s1 + $0x5e8] sm:$0xff] }
 0x1ce   :  { %6206 = vmatpush1.bf16.msra.mxu0 %v11975_v15  ;;  %6370 = vmatpush1.bf16.msra.mxu1 %v11977_v51  ;;  %v11166_v15 = vcombine.high %v167_v46, %v175_v47  ;;  %v182_v51 = vld [vmem:[%s18467_s1 + $0x320] sm:$0xff] }
 0x1cf   :  { %6207 = vmatprep.subr.bf16.mxu0 %v11992_v54  ;;  %6371 = vmatprep.subr.bf16.mxu1 %v11994_v23  ;;  %v190_v54 = vld [vmem:[%s18467_s1 + $0x360] sm:$0xff]  ;;  %v183_v23 = vld [vmem:[%s18467_s1 + $0x328] sm:$0xff] }
 0x1d0   :  { %v11180_v60 = vcombine.high %v182_v51, %v190_v54  ;;  %v11179_v2 = vcombine.low %v182_v51, %v190_v54  ;;  %v11181_v4 = vcombine.low %v183_v23, %v191_v55  ;;  %v287_v51 = vld [vmem:[%s18467_s1 + $0x668] sm:$0xff] }
 0x1d2   :  { %6208 = vmatpush1.bf16.msra.mxu0 %v11991_v61  ;;  %6372 = vmatpush1.bf16.msra.mxu1 %v11993_v62  ;;  %v11182_v61 = vcombine.high %v183_v23, %v191_v55  ;;  %v198_v62 = vld [vmem:[%s18467_s1 + $0x3a0] sm:$0xff] }
 0x1d3   :  { %6394 = vmatprep.subr.bf16.mxu0 %v11084_v0  ;;  %6558 = vmatprep.subr.bf16.mxu1 %v11086_v53  ;;  %v206_v0 = vld [vmem:[%s18467_s1 + $0x3e0] sm:$0xff]  ;;  %v199_v53 = vld [vmem:[%s18467_s1 + $0x3a8] sm:$0xff] }
 0x1d4   :  { %v11196_v5 = vcombine.high %v198_v62, %v206_v0  ;;  %v11195_v11 = vcombine.low %v198_v62, %v206_v0  ;;  %v11197_v13 = vcombine.low %v199_v53, %v207_v1  ;;  %v303_v62 = vld [vmem:[%s18467_s1 + $0x6e8] sm:$0xff] }
 0x1d5   :  { %6222 = vmatmul.mubr.bf16.vlgmr.msra.gmra.mrb[4].mxu0 %v14473_v63  ;;  %6386 = vmatmul.mubr.bf16.vlgmr.msra.gmra.mrb[4].mxu1 %v14473_v63 }
 0x1d6   :  { %6395 = vmatpush1.bf16.msra.mxu0 %v11083_v6  ;;  %6559 = vmatpush1.bf16.msra.mxu1 %v11085_v7  ;;  %v11198_v6 = vcombine.high %v199_v53, %v207_v1  ;;  %v214_v7 = vld [vmem:[%s18467_s1 + $0x420] sm:$0xff] }
 0x1d7   :  { %6396 = vmatprep.subr.bf16.mxu0 %v11100_v8  ;;  %6560 = vmatprep.subr.bf16.mxu1 %v11102_v10  ;;  %v222_v8 = vld [vmem:[%s18467_s1 + $0x460] sm:$0xff]  ;;  %v215_v10 = vld [vmem:[%s18467_s1 + $0x428] sm:$0xff] }
 0x1d8   :  { %6426 = vmatprep.mubr.bf16.mxu0 %v13792_v9  ;;  %6590 = vmatprep.mubr.bf16.mxu1 %v13792_v9  ;;  %v11212_v59 = vcombine.high %v214_v7, %v222_v8  ;;  %v11211_v24 = vcombine.low %v214_v7, %v222_v8  ;;  %v11213_v26 = vcombine.low %v215_v10, %v223_v32  ;;  %v319_v7 = vld [vmem:[%s18467_s1 + $0x768] sm:$0xff] }
 0x1da   :  { %6397 = vmatpush1.bf16.msra.mxu0 %v11099_v14  ;;  %6561 = vmatpush1.bf16.msra.mxu1 %v11101_v16  ;;  %v11214_v14 = vcombine.high %v215_v10, %v223_v32  ;;  %v230_v16 = vld [vmem:[%s18467_s1 + $0x4a0] sm:$0xff] }
 0x1db   :  { %6398 = vmatprep.subr.bf16.mxu0 %v11116_v18  ;;  %6562 = vmatprep.subr.bf16.mxu1 %v11118_v19  ;;  %v238_v18 = vld [vmem:[%s18467_s1 + $0x4e0] sm:$0xff]  ;;  %v231_v19 = vld [vmem:[%s18467_s1 + $0x4a8] sm:$0xff] }
 0x1dc   :  { %v11228_v28 = vcombine.high %v230_v16, %v238_v18  ;;  %v11227_v36 = vcombine.low %v230_v16, %v238_v18  ;;  %v11229_v37 = vcombine.low %v231_v19, %v239_v20  ;;  %v335_v16 = vld [vmem:[%s18467_s1 + $0x7e8] sm:$0xff] }
 0x1de   :  { %6399 = vmatpush1.bf16.msra.mxu0 %v11115_v29  ;;  %6563 = vmatpush1.bf16.msra.mxu1 %v11117_v30  ;;  %v11230_v29 = vcombine.high %v231_v19, %v239_v20  ;;  %v246_v30 = vld [vmem:[%s18467_s1 + $0x520] sm:$0xff] }
 0x1df   :  { %6400 = vmatprep.subr.bf16.mxu0 %v11132_v31  ;;  %6564 = vmatprep.subr.bf16.mxu1 %v11134_v33  ;;  %v254_v31 = vld [vmem:[%s18467_s1 + $0x560] sm:$0xff]  ;;  %v247_v33 = vld [vmem:[%s18467_s1 + $0x528] sm:$0xff] }
 0x1e0   :  { %v11244_v38 = vcombine.high %v246_v30, %v254_v31  ;;  %v11243_v45 = vcombine.low %v246_v30, %v254_v31  ;;  %v11245_v46 = vcombine.low %v247_v33, %v255_v34  ;;  %v351_v30 = vld [vmem:[%s18467_s1 + $0x868] sm:$0xff] }
 0x1e2   :  { %6401 = vmatpush1.bf16.msra.mxu0 %v11131_v39  ;;  %6565 = vmatpush1.bf16.msra.mxu1 %v11133_v56  ;;  %v11246_v39 = vcombine.high %v247_v33, %v255_v34  ;;  %v262_v56 = vld [vmem:[%s18467_s1 + $0x5a0] sm:$0xff] }
 0x1e3   :  { %6402 = vmatprep.subr.bf16.mxu0 %v11148_v40  ;;  %6566 = vmatprep.subr.bf16.mxu1 %v11150_v41  ;;  %v270_v40 = vld [vmem:[%s18467_s1 + $0x5e0] sm:$0xff]  ;;  %v263_v41 = vld [vmem:[%s18467_s1 + $0x5a8] sm:$0xff] }
 0x1e4   :  { %v11260_v47 = vcombine.high %v262_v56, %v270_v40  ;;  %v11259_v54 = vcombine.low %v262_v56, %v270_v40  ;;  %v11261_v23 = vcombine.low %v263_v41, %v271_v42  ;;  %v367_v56 = vld [vmem:[%s18467_s1 + $0x8e8] sm:$0xff] }
 0x1e6   :  { %6403 = vmatpush1.bf16.msra.mxu0 %v11147_v48  ;;  %6567 = vmatpush1.bf16.msra.mxu1 %v11149_v49  ;;  %v11262_v48 = vcombine.high %v263_v41, %v271_v42  ;;  %v278_v49 = vld [vmem:[%s18467_s1 + $0x620] sm:$0xff] }
 0x1e7   :  { %6404 = vmatprep.subr.bf16.mxu0 %v11164_v50  ;;  %6568 = vmatprep.subr.bf16.mxu1 %v11166_v15  ;;  %v286_v50 = vld [vmem:[%s18467_s1 + $0x660] sm:$0xff]  ;;  %v279_v15 = vld [vmem:[%s18467_s1 + $0x628] sm:$0xff] }
 0x1e8   :  { %v11276_v55 = vcombine.high %v278_v49, %v286_v50  ;;  %v11275_v0 = vcombine.low %v278_v49, %v286_v50  ;;  %v11277_v53 = vcombine.low %v279_v15, %v287_v51  ;;  %v383_v49 = vld [vmem:[%s18467_s1 + $0x968] sm:$0xff] }
 0x1ea   :  { %6405 = vmatpush1.bf16.msra.mxu0 %v11163_v57  ;;  %6569 = vmatpush1.bf16.msra.mxu1 %v11165_v58  ;;  %v11278_v57 = vcombine.high %v279_v15, %v287_v51  ;;  %v294_v58 = vld [vmem:[%s18467_s1 + $0x6a0] sm:$0xff] }
 0x1eb   :  { %6406 = vmatprep.subr.bf16.mxu0 %v11180_v60  ;;  %6570 = vmatprep.subr.bf16.mxu1 %v11182_v61  ;;  %v302_v60 = vld [vmem:[%s18467_s1 + $0x6e0] sm:$0xff]  ;;  %v295_v61 = vld [vmem:[%s18467_s1 + $0x6a8] sm:$0xff] }
 0x1ec   :  { %v11292_v1 = vcombine.high %v294_v58, %v302_v60  ;;  %v11291_v8 = vcombine.low %v294_v58, %v302_v60  ;;  %v11293_v10 = vcombine.low %v295_v61, %v303_v62  ;;  %v399_v58 = vld [vmem:[%s18467_s1 + $0x9e8] sm:$0xff] }
 0x1ee   :  { %6407 = vmatpush1.bf16.msra.mxu0 %v11179_v2  ;;  %6571 = vmatpush1.bf16.msra.mxu1 %v11181_v4  ;;  %v11294_v2 = vcombine.high %v295_v61, %v303_v62  ;;  %v310_v4 = vld [vmem:[%s18467_s1 + $0x720] sm:$0xff] }
 0x1ef   :  { %6408 = vmatprep.subr.bf16.mxu0 %v11196_v5  ;;  %6572 = vmatprep.subr.bf16.mxu1 %v11198_v6  ;;  %v318_v5 = vld [vmem:[%s18467_s1 + $0x760] sm:$0xff]  ;;  %v311_v6 = vld [vmem:[%s18467_s1 + $0x728] sm:$0xff] }
 0x1f0   :  { %v11308_v32 = vcombine.high %v310_v4, %v318_v5  ;;  %v11307_v18 = vcombine.low %v310_v4, %v318_v5  ;;  %v11309_v19 = vcombine.low %v311_v6, %v319_v7  ;;  %v415_v4 = vld [vmem:[%s18467_s1 + $0xa68] sm:$0xff] }
 0x1f2   :  { %6409 = vmatpush1.bf16.msra.mxu0 %v11195_v11  ;;  %6573 = vmatpush1.bf16.msra.mxu1 %v11197_v13  ;;  %v11310_v11 = vcombine.high %v311_v6, %v319_v7  ;;  %v326_v13 = vld [vmem:[%s18467_s1 + $0x7a0] sm:$0xff] }
 0x1f3   :  { %6410 = vmatprep.subr.bf16.mxu0 %v11212_v59  ;;  %6574 = vmatprep.subr.bf16.mxu1 %v11214_v14  ;;  %v334_v59 = vld [vmem:[%s18467_s1 + $0x7e0] sm:$0xff]  ;;  %v327_v14 = vld [vmem:[%s18467_s1 + $0x7a8] sm:$0xff] }
 0x1f4   :  { %v11324_v20 = vcombine.high %v326_v13, %v334_v59  ;;  %v11323_v31 = vcombine.low %v326_v13, %v334_v59  ;;  %v11325_v33 = vcombine.low %v327_v14, %v335_v16  ;;  %v431_v13 = vld [vmem:[%s18467_s1 + $0xae8] sm:$0xff] }
 0x1f6   :  { %6411 = vmatpush1.bf16.msra.mxu0 %v11211_v24  ;;  %6575 = vmatpush1.bf16.msra.mxu1 %v11213_v26  ;;  %v11326_v24 = vcombine.high %v327_v14, %v335_v16  ;;  %v342_v26 = vld [vmem:[%s18467_s1 + $0x820] sm:$0xff] }
 0x1f7   :  { %6412 = vmatprep.subr.bf16.mxu0 %v11228_v28  ;;  %6576 = vmatprep.subr.bf16.mxu1 %v11230_v29  ;;  %v350_v28 = vld [vmem:[%s18467_s1 + $0x860] sm:$0xff]  ;;  %v343_v29 = vld [vmem:[%s18467_s1 + $0x828] sm:$0xff] }
 0x1f8   :  { %v11340_v34 = vcombine.high %v342_v26, %v350_v28  ;;  %v11339_v40 = vcombine.low %v342_v26, %v350_v28  ;;  %v11341_v41 = vcombine.low %v343_v29, %v351_v30  ;;  %v447_v26 = vld [vmem:[%s18467_s1 + $0xb68] sm:$0xff] }
 0x1fa   :  { %6413 = vmatpush1.bf16.msra.mxu0 %v11227_v36  ;;  %6577 = vmatpush1.bf16.msra.mxu1 %v11229_v37  ;;  %v11342_v36 = vcombine.high %v343_v29, %v351_v30  ;;  %v358_v37 = vld [vmem:[%s18467_s1 + $0x8a0] sm:$0xff] }
 0x1fb   :  { %6414 = vmatprep.subr.bf16.mxu0 %v11244_v38  ;;  %6578 = vmatprep.subr.bf16.mxu1 %v11246_v39  ;;  %v366_v38 = vld [vmem:[%s18467_s1 + $0x8e0] sm:$0xff]  ;;  %v359_v39 = vld [vmem:[%s18467_s1 + $0x8a8] sm:$0xff] }
 0x1fc   :  { %v11356_v42 = vcombine.high %v358_v37, %v366_v38  ;;  %v11355_v50 = vcombine.low %v358_v37, %v366_v38  ;;  %v11357_v15 = vcombine.low %v359_v39, %v367_v56  ;;  %v463_v37 = vld [vmem:[%s18467_s1 + $0xbe8] sm:$0xff] }
 0x1fe   :  { %6415 = vmatpush1.bf16.msra.mxu0 %v11243_v45  ;;  %6579 = vmatpush1.bf16.msra.mxu1 %v11245_v46  ;;  %v11358_v45 = vcombine.high %v359_v39, %v367_v56  ;;  %v374_v46 = vld [vmem:[%s18467_s1 + $0x920] sm:$0xff] }
 0x1ff   :  { %6416 = vmatprep.subr.bf16.mxu0 %v11260_v47  ;;  %6580 = vmatprep.subr.bf16.mxu1 %v11262_v48  ;;  %v382_v47 = vld [vmem:[%s18467_s1 + $0x960] sm:$0xff]  ;;  %v375_v48 = vld [vmem:[%s18467_s1 + $0x928] sm:$0xff] }
 0x200   :  { %v11372_v51 = vcombine.high %v374_v46, %v382_v47  ;;  %v11371_v60 = vcombine.low %v374_v46, %v382_v47  ;;  %v11373_v61 = vcombine.low %v375_v48, %v383_v49  ;;  %v479_v46 = vld [vmem:[%s18467_s1 + $0xc68] sm:$0xff] }
 0x202   :  { %6417 = vmatpush1.bf16.msra.mxu0 %v11259_v54  ;;  %6581 = vmatpush1.bf16.msra.mxu1 %v11261_v23  ;;  %v11374_v54 = vcombine.high %v375_v48, %v383_v49  ;;  %v390_v23 = vld [vmem:[%s18467_s1 + $0x9a0] sm:$0xff] }
 0x203   :  { %6418 = vmatprep.subr.bf16.mxu0 %v11276_v55  ;;  %6582 = vmatprep.subr.bf16.mxu1 %v11278_v57  ;;  %v398_v55 = vld [vmem:[%s18467_s1 + $0x9e0] sm:$0xff]  ;;  %v391_v57 = vld [vmem:[%s18467_s1 + $0x9a8] sm:$0xff] }
 0x204   :  { %v11388_v62 = vcombine.high %v390_v23, %v398_v55  ;;  %v11387_v5 = vcombine.low %v390_v23, %v398_v55  ;;  %v11389_v6 = vcombine.low %v391_v57, %v399_v58  ;;  %v495_v23 = vld [vmem:[%s18467_s1 + $0xce8] sm:$0xff] }
 0x206   :  { %6419 = vmatpush1.bf16.msra.mxu0 %v11275_v0  ;;  %6583 = vmatpush1.bf16.msra.mxu1 %v11277_v53  ;;  %v11390_v0 = vcombine.high %v391_v57, %v399_v58  ;;  %v406_v53 = vld [vmem:[%s18467_s1 + $0xa20] sm:$0xff] }
 0x207   :  { %6420 = vmatprep.subr.bf16.mxu0 %v11292_v1  ;;  %6584 = vmatprep.subr.bf16.mxu1 %v11294_v2  ;;  %v414_v1 = vld [vmem:[%s18467_s1 + $0xa60] sm:$0xff]  ;;  %v407_v2 = vld [vmem:[%s18467_s1 + $0xa28] sm:$0xff] }
 0x208   :  { %v11404_v7 = vcombine.high %v406_v53, %v414_v1  ;;  %v11403_v59 = vcombine.low %v406_v53, %v414_v1  ;;  %v11405_v14 = vcombine.low %v407_v2, %v415_v4  ;;  %v511_v53 = vld [vmem:[%s18467_s1 + $0xd68] sm:$0xff] }
 0x20a   :  { %6421 = vmatpush1.bf16.msra.mxu0 %v11291_v8  ;;  %6585 = vmatpush1.bf16.msra.mxu1 %v11293_v10  ;;  %v11406_v8 = vcombine.high %v407_v2, %v415_v4  ;;  %v422_v10 = vld [vmem:[%s18467_s1 + $0xaa0] sm:$0xff] }
 0x20b   :  { %6422 = vmatprep.subr.bf16.mxu0 %v11308_v32  ;;  %6586 = vmatprep.subr.bf16.mxu1 %v11310_v11  ;;  %v430_v32 = vld [vmem:[%s18467_s1 + $0xae0] sm:$0xff]  ;;  %v423_v11 = vld [vmem:[%s18467_s1 + $0xaa8] sm:$0xff] }
 0x20c   :  { %v11420_v16 = vcombine.high %v422_v10, %v430_v32  ;;  %v11419_v28 = vcombine.low %v422_v10, %v430_v32  ;;  %v11421_v29 = vcombine.low %v423_v11, %v431_v13  ;;  %v527_v10 = vld [vmem:[%s18467_s1 + $0xde8] sm:$0xff] }
 0x20e   :  { %6423 = vmatpush1.bf16.msra.mxu0 %v11307_v18  ;;  %6587 = vmatpush1.bf16.msra.mxu1 %v11309_v19  ;;  %v11422_v18 = vcombine.high %v423_v11, %v431_v13  ;;  %v438_v19 = vld [vmem:[%s18467_s1 + $0xb20] sm:$0xff] }
 0x20f   :  { %6424 = vmatprep.subr.bf16.mxu0 %v11324_v20  ;;  %6588 = vmatprep.subr.bf16.mxu1 %v11326_v24  ;;  %v446_v20 = vld [vmem:[%s18467_s1 + $0xb60] sm:$0xff]  ;;  %v439_v24 = vld [vmem:[%s18467_s1 + $0xb28] sm:$0xff] }
 0x210   :  { %v11436_v30 = vcombine.high %v438_v19, %v446_v20  ;;  %v11435_v38 = vcombine.low %v438_v19, %v446_v20  ;;  %v11437_v39 = vcombine.low %v439_v24, %v447_v26  ;;  %v543_v19 = vld [vmem:[%s18467_s1 + $0xe68] sm:$0xff] }
 0x212   :  { %6425 = vmatpush1.bf16.msra.mxu0 %v11323_v31  ;;  %6589 = vmatpush1.bf16.msra.mxu1 %v11325_v33  ;;  %v11438_v31 = vcombine.high %v439_v24, %v447_v26  ;;  %v454_v33 = vld [vmem:[%s18467_s1 + $0xba0] sm:$0xff] }
 0x213   :  { %6435 = vmatprep.subr.bf16.mxu0 %v11340_v34  ;;  %6599 = vmatprep.subr.bf16.mxu1 %v11342_v36  ;;  %v462_v34 = vld [vmem:[%s18467_s1 + $0xbe0] sm:$0xff]  ;;  %v455_v36 = vld [vmem:[%s18467_s1 + $0xba8] sm:$0xff] }
 0x214   :  { %v11452_v56 = vcombine.high %v454_v33, %v462_v34  ;;  %v11451_v47 = vcombine.low %v454_v33, %v462_v34  ;;  %v11453_v48 = vcombine.low %v455_v36, %v463_v37  ;;  %v559_v33 = vld [vmem:[%s18467_s1 + $0xee8] sm:$0xff] }
 0x215   :  { %6427 = vmatmul.mubr.bf16.vlgmr.msra.gmra.mrb[8].mxu0 %v13913_v25  ;;  %6591 = vmatmul.mubr.bf16.vlgmr.msra.gmra.mrb[8].mxu1 %v13913_v25 }
 0x216   :  { %6436 = vmatpush1.bf16.msra.mxu0 %v11339_v40  ;;  %6600 = vmatpush1.bf16.msra.mxu1 %v11341_v41  ;;  %v11454_v40 = vcombine.high %v455_v36, %v463_v37  ;;  %v470_v41 = vld [vmem:[%s18467_s1 + $0xc20] sm:$0xff] }
 0x217   :  { %6437 = vmatprep.subr.bf16.mxu0 %v11356_v42  ;;  %6601 = vmatprep.subr.bf16.mxu1 %v11358_v45  ;;  %v478_v42 = vld [vmem:[%s18467_s1 + $0xc60] sm:$0xff]  ;;  %v471_v45 = vld [vmem:[%s18467_s1 + $0xc28] sm:$0xff] }
 0x218   :  { %6467 = vmatprep.mubr.bf16.mxu0 %v13933_v35  ;;  %6631 = vmatprep.mubr.bf16.mxu1 %v13933_v35  ;;  %v11468_v49 = vcombine.high %v470_v41, %v478_v42  ;;  %v11467_v55 = vcombine.low %v470_v41, %v478_v42  ;;  %v11469_v57 = vcombine.low %v471_v45, %v479_v46  ;;  %v575_v41 = vld [vmem:[%s18467_s1 + $0xf68] sm:$0xff] }
 0x21a   :  { %6438 = vmatpush1.bf16.msra.mxu0 %v11355_v50  ;;  %6602 = vmatpush1.bf16.msra.mxu1 %v11357_v15  ;;  %v11470_v50 = vcombine.high %v471_v45, %v479_v46  ;;  %v486_v15 = vld [vmem:[%s18467_s1 + $0xca0] sm:$0xff] }
 0x21b   :  { %6439 = vmatprep.subr.bf16.mxu0 %v11372_v51  ;;  %6603 = vmatprep.subr.bf16.mxu1 %v11374_v54  ;;  %v494_v51 = vld [vmem:[%s18467_s1 + $0xce0] sm:$0xff]  ;;  %v487_v54 = vld [vmem:[%s18467_s1 + $0xca8] sm:$0xff] }
 0x21c   :  { %v11484_v58 = vcombine.high %v486_v15, %v494_v51  ;;  %v11483_v1 = vcombine.low %v486_v15, %v494_v51  ;;  %v11485_v2 = vcombine.low %v487_v54, %v495_v23  ;;  %v591_v15 = vld [vmem:[%s18467_s1 + $0xfe8] sm:$0xff] }
 0x21e   :  { %6440 = vmatpush1.bf16.msra.mxu0 %v11371_v60  ;;  %6604 = vmatpush1.bf16.msra.mxu1 %v11373_v61  ;;  %v11486_v60 = vcombine.high %v487_v54, %v495_v23  ;;  %v502_v61 = vld [vmem:[%s18467_s1 + $0xd20] sm:$0xff] }
 0x21f   :  { %6441 = vmatprep.subr.bf16.mxu0 %v11388_v62  ;;  %6605 = vmatprep.subr.bf16.mxu1 %v11390_v0  ;;  %v510_v62 = vld [vmem:[%s18467_s1 + $0xd60] sm:$0xff]  ;;  %v503_v0 = vld [vmem:[%s18467_s1 + $0xd28] sm:$0xff] }
 0x220   :  { %v11500_v4 = vcombine.high %v502_v61, %v510_v62  ;;  %v11499_v32 = vcombine.low %v502_v61, %v510_v62  ;;  %v11501_v11 = vcombine.low %v503_v0, %v511_v53  ;;  %v607_v61 = vld [vmem:[%s18467_s1 + $0x1068] sm:$0xff] }
 0x222   :  { %6442 = vmatpush1.bf16.msra.mxu0 %v11387_v5  ;;  %6606 = vmatpush1.bf16.msra.mxu1 %v11389_v6  ;;  %v11502_v5 = vcombine.high %v503_v0, %v511_v53  ;;  %v518_v6 = vld [vmem:[%s18467_s1 + $0xda0] sm:$0xff] }
 0x223   :  { %6443 = vmatprep.subr.bf16.mxu0 %v11404_v7  ;;  %6607 = vmatprep.subr.bf16.mxu1 %v11406_v8  ;;  %v526_v7 = vld [vmem:[%s18467_s1 + $0xde0] sm:$0xff]  ;;  %v519_v8 = vld [vmem:[%s18467_s1 + $0xda8] sm:$0xff] }
 0x224   :  { %v11516_v13 = vcombine.high %v518_v6, %v526_v7  ;;  %v11515_v20 = vcombine.low %v518_v6, %v526_v7  ;;  %v11517_v24 = vcombine.low %v519_v8, %v527_v10  ;;  %v623_v6 = vld [vmem:[%s18467_s1 + $0x10e8] sm:$0xff] }
 0x226   :  { %6444 = vmatpush1.bf16.msra.mxu0 %v11403_v59  ;;  %6608 = vmatpush1.bf16.msra.mxu1 %v11405_v14  ;;  %v11518_v59 = vcombine.high %v519_v8, %v527_v10  ;;  %v534_v14 = vld [vmem:[%s18467_s1 + $0xe20] sm:$0xff] }
 0x227   :  { %6445 = vmatprep.subr.bf16.mxu0 %v11420_v16  ;;  %6609 = vmatprep.subr.bf16.mxu1 %v11422_v18  ;;  %v542_v16 = vld [vmem:[%s18467_s1 + $0xe60] sm:$0xff]  ;;  %v535_v18 = vld [vmem:[%s18467_s1 + $0xe28] sm:$0xff] }
 0x228   :  { %v11532_v26 = vcombine.high %v534_v14, %v542_v16  ;;  %v11531_v34 = vcombine.low %v534_v14, %v542_v16  ;;  %v11533_v36 = vcombine.low %v535_v18, %v543_v19  ;;  %v639_v14 = vld [vmem:[%s18467_s1 + $0x1168] sm:$0xff] }
 0x22a   :  { %6446 = vmatpush1.bf16.msra.mxu0 %v11419_v28  ;;  %6610 = vmatpush1.bf16.msra.mxu1 %v11421_v29  ;;  %v11534_v28 = vcombine.high %v535_v18, %v543_v19  ;;  %v550_v29 = vld [vmem:[%s18467_s1 + $0xea0] sm:$0xff] }
 0x22b   :  { %6447 = vmatprep.subr.bf16.mxu0 %v11436_v30  ;;  %6611 = vmatprep.subr.bf16.mxu1 %v11438_v31  ;;  %v558_v30 = vld [vmem:[%s18467_s1 + $0xee0] sm:$0xff]  ;;  %v551_v31 = vld [vmem:[%s18467_s1 + $0xea8] sm:$0xff] }
 0x22c   :  { %v11548_v37 = vcombine.high %v550_v29, %v558_v30  ;;  %v11547_v42 = vcombine.low %v550_v29, %v558_v30  ;;  %v11549_v45 = vcombine.low %v551_v31, %v559_v33  ;;  %v655_v29 = vld [vmem:[%s18467_s1 + $0x11e8] sm:$0xff] }
 0x22e   :  { %6448 = vmatpush1.bf16.msra.mxu0 %v11435_v38  ;;  %6612 = vmatpush1.bf16.msra.mxu1 %v11437_v39  ;;  %v11550_v38 = vcombine.high %v551_v31, %v559_v33  ;;  %v566_v39 = vld [vmem:[%s18467_s1 + $0xf20] sm:$0xff] }
 0x22f   :  { %6449 = vmatprep.subr.bf16.mxu0 %v11452_v56  ;;  %6613 = vmatprep.subr.bf16.mxu1 %v11454_v40  ;;  %v574_v56 = vld [vmem:[%s18467_s1 + $0xf60] sm:$0xff]  ;;  %v567_v40 = vld [vmem:[%s18467_s1 + $0xf28] sm:$0xff] }
 0x230   :  { %v11564_v46 = vcombine.high %v566_v39, %v574_v56  ;;  %v11563_v51 = vcombine.low %v566_v39, %v574_v56  ;;  %v11565_v54 = vcombine.low %v567_v40, %v575_v41  ;;  %v671_v39 = vld [vmem:[%s18467_s1 + $0x1268] sm:$0xff] }
 0x232   :  { %6450 = vmatpush1.bf16.msra.mxu0 %v11451_v47  ;;  %6614 = vmatpush1.bf16.msra.mxu1 %v11453_v48  ;;  %v11566_v47 = vcombine.high %v567_v40, %v575_v41  ;;  %v582_v48 = vld [vmem:[%s18467_s1 + $0xfa0] sm:$0xff] }
 0x233   :  { %6451 = vmatprep.subr.bf16.mxu0 %v11468_v49  ;;  %6615 = vmatprep.subr.bf16.mxu1 %v11470_v50  ;;  %v590_v49 = vld [vmem:[%s18467_s1 + $0xfe0] sm:$0xff]  ;;  %v583_v50 = vld [vmem:[%s18467_s1 + $0xfa8] sm:$0xff] }
 0x234   :  { %v11580_v23 = vcombine.high %v582_v48, %v590_v49  ;;  %v11579_v62 = vcombine.low %v582_v48, %v590_v49  ;;  %v11581_v0 = vcombine.low %v583_v50, %v591_v15  ;;  %v687_v48 = vld [vmem:[%s18467_s1 + $0x12e8] sm:$0xff] }
 0x236   :  { %6452 = vmatpush1.bf16.msra.mxu0 %v11467_v55  ;;  %6616 = vmatpush1.bf16.msra.mxu1 %v11469_v57  ;;  %v11582_v55 = vcombine.high %v583_v50, %v591_v15  ;;  %v598_v57 = vld [vmem:[%s18467_s1 + $0x1020] sm:$0xff] }
 0x237   :  { %6453 = vmatprep.subr.bf16.mxu0 %v11484_v58  ;;  %6617 = vmatprep.subr.bf16.mxu1 %v11486_v60  ;;  %v606_v58 = vld [vmem:[%s18467_s1 + $0x1060] sm:$0xff]  ;;  %v599_v60 = vld [vmem:[%s18467_s1 + $0x1028] sm:$0xff] }
 0x238   :  { %v11596_v53 = vcombine.high %v598_v57, %v606_v58  ;;  %v11595_v7 = vcombine.low %v598_v57, %v606_v58  ;;  %v11597_v8 = vcombine.low %v599_v60, %v607_v61  ;;  %v703_v57 = vld [vmem:[%s18467_s1 + $0x1368] sm:$0xff] }
 0x23a   :  { %6454 = vmatpush1.bf16.msra.mxu0 %v11483_v1  ;;  %6618 = vmatpush1.bf16.msra.mxu1 %v11485_v2  ;;  %v11598_v1 = vcombine.high %v599_v60, %v607_v61  ;;  %v614_v2 = vld [vmem:[%s18467_s1 + $0x10a0] sm:$0xff] }
 0x23b   :  { %6455 = vmatprep.subr.bf16.mxu0 %v11500_v4  ;;  %6619 = vmatprep.subr.bf16.mxu1 %v11502_v5  ;;  %v622_v4 = vld [vmem:[%s18467_s1 + $0x10e0] sm:$0xff]  ;;  %v615_v5 = vld [vmem:[%s18467_s1 + $0x10a8] sm:$0xff] }
 0x23c   :  { %v11612_v10 = vcombine.high %v614_v2, %v622_v4  ;;  %v11611_v16 = vcombine.low %v614_v2, %v622_v4  ;;  %v11613_v18 = vcombine.low %v615_v5, %v623_v6  ;;  %v719_v2 = vld [vmem:[%s18467_s1 + $0x13e8] sm:$0xff] }
 0x23e   :  { %6456 = vmatpush1.bf16.msra.mxu0 %v11499_v32  ;;  %6620 = vmatpush1.bf16.msra.mxu1 %v11501_v11  ;;  %v11614_v32 = vcombine.high %v615_v5, %v623_v6  ;;  %v630_v11 = vld [vmem:[%s18467_s1 + $0x1120] sm:$0xff] }
 0x23f   :  { %6457 = vmatprep.subr.bf16.mxu0 %v11516_v13  ;;  %6621 = vmatprep.subr.bf16.mxu1 %v11518_v59  ;;  %v638_v13 = vld [vmem:[%s18467_s1 + $0x1160] sm:$0xff]  ;;  %v631_v59 = vld [vmem:[%s18467_s1 + $0x1128] sm:$0xff] }
 0x240   :  { %v11628_v19 = vcombine.high %v630_v11, %v638_v13  ;;  %v11627_v30 = vcombine.low %v630_v11, %v638_v13  ;;  %v11629_v31 = vcombine.low %v631_v59, %v639_v14  ;;  %v735_v11 = vld [vmem:[%s18467_s1 + $0x1468] sm:$0xff] }
 0x242   :  { %6458 = vmatpush1.bf16.msra.mxu0 %v11515_v20  ;;  %6622 = vmatpush1.bf16.msra.mxu1 %v11517_v24  ;;  %v11630_v20 = vcombine.high %v631_v59, %v639_v14  ;;  %v646_v24 = vld [vmem:[%s18467_s1 + $0x11a0] sm:$0xff] }
 0x243   :  { %6459 = vmatprep.subr.bf16.mxu0 %v11532_v26  ;;  %6623 = vmatprep.subr.bf16.mxu1 %v11534_v28  ;;  %v654_v26 = vld [vmem:[%s18467_s1 + $0x11e0] sm:$0xff]  ;;  %v647_v28 = vld [vmem:[%s18467_s1 + $0x11a8] sm:$0xff] }
 0x244   :  { %v11644_v33 = vcombine.high %v646_v24, %v654_v26  ;;  %v11643_v56 = vcombine.low %v646_v24, %v654_v26  ;;  %v11645_v40 = vcombine.low %v647_v28, %v655_v29  ;;  %v751_v24 = vld [vmem:[%s18467_s1 + $0x14e8] sm:$0xff] }
 0x246   :  { %6460 = vmatpush1.bf16.msra.mxu0 %v11531_v34  ;;  %6624 = vmatpush1.bf16.msra.mxu1 %v11533_v36  ;;  %v11646_v34 = vcombine.high %v647_v28, %v655_v29  ;;  %v662_v36 = vld [vmem:[%s18467_s1 + $0x1220] sm:$0xff] }
 0x247   :  { %6461 = vmatprep.subr.bf16.mxu0 %v11548_v37  ;;  %6625 = vmatprep.subr.bf16.mxu1 %v11550_v38  ;;  %v670_v37 = vld [vmem:[%s18467_s1 + $0x1260] sm:$0xff]  ;;  %v663_v38 = vld [vmem:[%s18467_s1 + $0x1228] sm:$0xff] }
 0x248   :  { %v11660_v41 = vcombine.high %v662_v36, %v670_v37  ;;  %v11659_v49 = vcombine.low %v662_v36, %v670_v37  ;;  %v11661_v50 = vcombine.low %v663_v38, %v671_v39  ;;  %v767_v36 = vld [vmem:[%s18467_s1 + $0x1568] sm:$0xff] }
 0x24a   :  { %6462 = vmatpush1.bf16.msra.mxu0 %v11547_v42  ;;  %6626 = vmatpush1.bf16.msra.mxu1 %v11549_v45  ;;  %v11662_v42 = vcombine.high %v663_v38, %v671_v39  ;;  %v678_v45 = vld [vmem:[%s18467_s1 + $0x12a0] sm:$0xff] }
 0x24b   :  { %6463 = vmatprep.subr.bf16.mxu0 %v11564_v46  ;;  %6627 = vmatprep.subr.bf16.mxu1 %v11566_v47  ;;  %v686_v46 = vld [vmem:[%s18467_s1 + $0x12e0] sm:$0xff]  ;;  %v679_v47 = vld [vmem:[%s18467_s1 + $0x12a8] sm:$0xff] }
 0x24c   :  { %v11676_v15 = vcombine.high %v678_v45, %v686_v46  ;;  %v11675_v58 = vcombine.low %v678_v45, %v686_v46  ;;  %v11677_v60 = vcombine.low %v679_v47, %v687_v48  ;;  %v783_v45 = vld [vmem:[%s18467_s1 + $0x15e8] sm:$0xff] }
 0x24e   :  { %6464 = vmatpush1.bf16.msra.mxu0 %v11563_v51  ;;  %6628 = vmatpush1.bf16.msra.mxu1 %v11565_v54  ;;  %v11678_v51 = vcombine.high %v679_v47, %v687_v48  ;;  %v694_v54 = vld [vmem:[%s18467_s1 + $0x1320] sm:$0xff] }
 0x24f   :  { %6465 = vmatprep.subr.bf16.mxu0 %v11580_v23  ;;  %6629 = vmatprep.subr.bf16.mxu1 %v11582_v55  ;;  %v702_v23 = vld [vmem:[%s18467_s1 + $0x1360] sm:$0xff]  ;;  %v695_v55 = vld [vmem:[%s18467_s1 + $0x1328] sm:$0xff] }
 0x250   :  { %v11692_v61 = vcombine.high %v694_v54, %v702_v23  ;;  %v11691_v4 = vcombine.low %v694_v54, %v702_v23  ;;  %v11693_v5 = vcombine.low %v695_v55, %v703_v57  ;;  %v799_v54 = vld [vmem:[%s18467_s1 + $0x1668] sm:$0xff] }
 0x252   :  { %6466 = vmatpush1.bf16.msra.mxu0 %v11579_v62  ;;  %6630 = vmatpush1.bf16.msra.mxu1 %v11581_v0  ;;  %v11694_v62 = vcombine.high %v695_v55, %v703_v57  ;;  %v710_v0 = vld [vmem:[%s18467_s1 + $0x13a0] sm:$0xff] }
 0x253   :  { %6476 = vmatprep.subr.bf16.mxu0 %v11596_v53  ;;  %6640 = vmatprep.subr.bf16.mxu1 %v11598_v1  ;;  %v718_v53 = vld [vmem:[%s18467_s1 + $0x13e0] sm:$0xff]  ;;  %v711_v1 = vld [vmem:[%s18467_s1 + $0x13a8] sm:$0xff] }
 0x254   :  { %v11708_v6 = vcombine.high %v710_v0, %v718_v53  ;;  %v11707_v13 = vcombine.low %v710_v0, %v718_v53  ;;  %v11709_v59 = vcombine.low %v711_v1, %v719_v2  ;;  %v815_v0 = vld [vmem:[%s18467_s1 + $0x16e8] sm:$0xff] }
 0x255   :  { %6468 = vmatmul.mubr.bf16.vlgmr.msra.gmra.mrb[8].mxu0 %v14132_v43  ;;  %6632 = vmatmul.mubr.bf16.vlgmr.msra.gmra.mrb[8].mxu1 %v14132_v43 }
 0x256   :  { %6477 = vmatpush1.bf16.msra.mxu0 %v11595_v7  ;;  %6641 = vmatpush1.bf16.msra.mxu1 %v11597_v8  ;;  %v11710_v7 = vcombine.high %v711_v1, %v719_v2  ;;  %v726_v8 = vld [vmem:[%s18467_s1 + $0x1420] sm:$0xff] }
 0x257   :  { %6478 = vmatprep.subr.bf16.mxu0 %v11612_v10  ;;  %6642 = vmatprep.subr.bf16.mxu1 %v11614_v32  ;;  %v734_v10 = vld [vmem:[%s18467_s1 + $0x1460] sm:$0xff]  ;;  %v727_v32 = vld [vmem:[%s18467_s1 + $0x1428] sm:$0xff] }
 0x258   :  { %6508 = vmatprep.mubr.bf16.mxu0 %v14146_v52  ;;  %6672 = vmatprep.mubr.bf16.mxu1 %v14146_v52  ;;  %v11724_v14 = vcombine.high %v726_v8, %v734_v10  ;;  %v11723_v26 = vcombine.low %v726_v8, %v734_v10  ;;  %v11725_v28 = vcombine.low %v727_v32, %v735_v11  ;;  %v831_v8 = vld [vmem:[%s18467_s1 + $0x1768] sm:$0xff] }
 0x25a   :  { %6479 = vmatpush1.bf16.msra.mxu0 %v11611_v16  ;;  %6643 = vmatpush1.bf16.msra.mxu1 %v11613_v18  ;;  %v11726_v16 = vcombine.high %v727_v32, %v735_v11  ;;  %v742_v18 = vld [vmem:[%s18467_s1 + $0x14a0] sm:$0xff] }
 0x25b   :  { %6480 = vmatprep.subr.bf16.mxu0 %v11628_v19  ;;  %6644 = vmatprep.subr.bf16.mxu1 %v11630_v20  ;;  %v750_v19 = vld [vmem:[%s18467_s1 + $0x14e0] sm:$0xff]  ;;  %v743_v20 = vld [vmem:[%s18467_s1 + $0x14a8] sm:$0xff] }
 0x25c   :  { %v11740_v29 = vcombine.high %v742_v18, %v750_v19  ;;  %v11739_v37 = vcombine.low %v742_v18, %v750_v19  ;;  %v11741_v38 = vcombine.low %v743_v20, %v751_v24  ;;  %v847_v18 = vld [vmem:[%s18467_s1 + $0x17e8] sm:$0xff] }
 0x25e   :  { %6481 = vmatpush1.bf16.msra.mxu0 %v11627_v30  ;;  %6645 = vmatpush1.bf16.msra.mxu1 %v11629_v31  ;;  %v11742_v30 = vcombine.high %v743_v20, %v751_v24  ;;  %v758_v31 = vld [vmem:[%s18467_s1 + $0x1520] sm:$0xff] }
 0x25f   :  { %6482 = vmatprep.subr.bf16.mxu0 %v11644_v33  ;;  %6646 = vmatprep.subr.bf16.mxu1 %v11646_v34  ;;  %v766_v33 = vld [vmem:[%s18467_s1 + $0x1560] sm:$0xff]  ;;  %v759_v34 = vld [vmem:[%s18467_s1 + $0x1528] sm:$0xff] }
 0x260   :  { %v11756_v39 = vcombine.high %v758_v31, %v766_v33  ;;  %v11755_v46 = vcombine.low %v758_v31, %v766_v33  ;;  %v11757_v47 = vcombine.low %v759_v34, %v767_v36  ;;  %v863_v31 = vld [vmem:[%s18467_s1 + $0x1868] sm:$0xff] }
 0x262   :  { %6483 = vmatpush1.bf16.msra.mxu0 %v11643_v56  ;;  %6647 = vmatpush1.bf16.msra.mxu1 %v11645_v40  ;;  %v11758_v56 = vcombine.high %v759_v34, %v767_v36  ;;  %v774_v40 = vld [vmem:[%s18467_s1 + $0x15a0] sm:$0xff] }
 0x263   :  { %6484 = vmatprep.subr.bf16.mxu0 %v11660_v41  ;;  %6648 = vmatprep.subr.bf16.mxu1 %v11662_v42  ;;  %v782_v41 = vld [vmem:[%s18467_s1 + $0x15e0] sm:$0xff]  ;;  %v775_v42 = vld [vmem:[%s18467_s1 + $0x15a8] sm:$0xff] }
 0x264   :  { %v11772_v48 = vcombine.high %v774_v40, %v782_v41  ;;  %v11771_v23 = vcombine.low %v774_v40, %v782_v41  ;;  %v11773_v55 = vcombine.low %v775_v42, %v783_v45  ;;  %v879_v40 = vld [vmem:[%s18467_s1 + $0x18e8] sm:$0xff] }
 0x266   :  { %6485 = vmatpush1.bf16.msra.mxu0 %v11659_v49  ;;  %6649 = vmatpush1.bf16.msra.mxu1 %v11661_v50  ;;  %v11774_v49 = vcombine.high %v775_v42, %v783_v45  ;;  %v790_v50 = vld [vmem:[%s18467_s1 + $0x1620] sm:$0xff] }
 0x267   :  { %6486 = vmatprep.subr.bf16.mxu0 %v11676_v15  ;;  %6650 = vmatprep.subr.bf16.mxu1 %v11678_v51  ;;  %v798_v15 = vld [vmem:[%s18467_s1 + $0x1660] sm:$0xff]  ;;  %v791_v51 = vld [vmem:[%s18467_s1 + $0x1628] sm:$0xff] }
 0x268   :  { %v11788_v57 = vcombine.high %v790_v50, %v798_v15  ;;  %v11787_v53 = vcombine.low %v790_v50, %v798_v15  ;;  %v11789_v1 = vcombine.low %v791_v51, %v799_v54  ;;  %v895_v50 = vld [vmem:[%s18467_s1 + $0x1968] sm:$0xff] }
 0x26a   :  { %6487 = vmatpush1.bf16.msra.mxu0 %v11675_v58  ;;  %6651 = vmatpush1.bf16.msra.mxu1 %v11677_v60  ;;  %v11790_v58 = vcombine.high %v791_v51, %v799_v54  ;;  %v806_v60 = vld [vmem:[%s18467_s1 + $0x16a0] sm:$0xff] }
 0x26b   :  { %6488 = vmatprep.subr.bf16.mxu0 %v11692_v61  ;;  %6652 = vmatprep.subr.bf16.mxu1 %v11694_v62  ;;  %v814_v61 = vld [vmem:[%s18467_s1 + $0x16e0] sm:$0xff]  ;;  %v807_v62 = vld [vmem:[%s18467_s1 + $0x16a8] sm:$0xff] }
 0x26c   :  { %v11804_v2 = vcombine.high %v806_v60, %v814_v61  ;;  %v11803_v10 = vcombine.low %v806_v60, %v814_v61  ;;  %v11805_v32 = vcombine.low %v807_v62, %v815_v0  ;;  %v911_v60 = vld [vmem:[%s18467_s1 + $0x19e8] sm:$0xff] }
 0x26e   :  { %6489 = vmatpush1.bf16.msra.mxu0 %v11691_v4  ;;  %6653 = vmatpush1.bf16.msra.mxu1 %v11693_v5  ;;  %v11806_v4 = vcombine.high %v807_v62, %v815_v0  ;;  %v822_v5 = vld [vmem:[%s18467_s1 + $0x1720] sm:$0xff] }
 0x26f   :  { %6490 = vmatprep.subr.bf16.mxu0 %v11708_v6  ;;  %6654 = vmatprep.subr.bf16.mxu1 %v11710_v7  ;;  %v830_v6 = vld [vmem:[%s18467_s1 + $0x1760] sm:$0xff]  ;;  %v823_v7 = vld [vmem:[%s18467_s1 + $0x1728] sm:$0xff] }
 0x270   :  { %v11820_v11 = vcombine.high %v822_v5, %v830_v6  ;;  %v11819_v19 = vcombine.low %v822_v5, %v830_v6  ;;  %v11821_v20 = vcombine.low %v823_v7, %v831_v8  ;;  %v927_v5 = vld [vmem:[%s18467_s1 + $0x1a68] sm:$0xff] }
 0x272   :  { %6491 = vmatpush1.bf16.msra.mxu0 %v11707_v13  ;;  %6655 = vmatpush1.bf16.msra.mxu1 %v11709_v59  ;;  %v11822_v13 = vcombine.high %v823_v7, %v831_v8  ;;  %v838_v59 = vld [vmem:[%s18467_s1 + $0x17a0] sm:$0xff] }
 0x273   :  { %6492 = vmatprep.subr.bf16.mxu0 %v11724_v14  ;;  %6656 = vmatprep.subr.bf16.mxu1 %v11726_v16  ;;  %v846_v14 = vld [vmem:[%s18467_s1 + $0x17e0] sm:$0xff]  ;;  %v839_v16 = vld [vmem:[%s18467_s1 + $0x17a8] sm:$0xff] }
 0x274   :  { %v11836_v24 = vcombine.high %v838_v59, %v846_v14  ;;  %v11835_v33 = vcombine.low %v838_v59, %v846_v14  ;;  %v11837_v34 = vcombine.low %v839_v16, %v847_v18  ;;  %v943_v59 = vld [vmem:[%s18467_s1 + $0x1ae8] sm:$0xff] }
 0x276   :  { %6493 = vmatpush1.bf16.msra.mxu0 %v11723_v26  ;;  %6657 = vmatpush1.bf16.msra.mxu1 %v11725_v28  ;;  %v11838_v26 = vcombine.high %v839_v16, %v847_v18  ;;  %v854_v28 = vld [vmem:[%s18467_s1 + $0x1820] sm:$0xff] }
 0x277   :  { %6494 = vmatprep.subr.bf16.mxu0 %v11740_v29  ;;  %6658 = vmatprep.subr.bf16.mxu1 %v11742_v30  ;;  %v862_v29 = vld [vmem:[%s18467_s1 + $0x1860] sm:$0xff]  ;;  %v855_v30 = vld [vmem:[%s18467_s1 + $0x1828] sm:$0xff] }
 0x278   :  { %v11852_v36 = vcombine.high %v854_v28, %v862_v29  ;;  %v11851_v41 = vcombine.low %v854_v28, %v862_v29  ;;  %v11853_v42 = vcombine.low %v855_v30, %v863_v31  ;;  %v959_v28 = vld [vmem:[%s18467_s1 + $0x1b68] sm:$0xff] }
 0x27a   :  { %6495 = vmatpush1.bf16.msra.mxu0 %v11739_v37  ;;  %6659 = vmatpush1.bf16.msra.mxu1 %v11741_v38  ;;  %v11854_v37 = vcombine.high %v855_v30, %v863_v31  ;;  %v870_v38 = vld [vmem:[%s18467_s1 + $0x18a0] sm:$0xff] }
 0x27b   :  { %6496 = vmatprep.subr.bf16.mxu0 %v11756_v39  ;;  %6660 = vmatprep.subr.bf16.mxu1 %v11758_v56  ;;  %v878_v39 = vld [vmem:[%s18467_s1 + $0x18e0] sm:$0xff]  ;;  %v871_v56 = vld [vmem:[%s18467_s1 + $0x18a8] sm:$0xff] }
 0x27c   :  { %v11868_v45 = vcombine.high %v870_v38, %v878_v39  ;;  %v11867_v15 = vcombine.low %v870_v38, %v878_v39  ;;  %v11869_v51 = vcombine.low %v871_v56, %v879_v40 }
 0x27e   :  { %6497 = vmatpush1.bf16.msra.mxu0 %v11755_v46  ;;  %6661 = vmatpush1.bf16.msra.mxu1 %v11757_v47  ;;  %v11870_v46 = vcombine.high %v871_v56, %v879_v40  ;;  %v886_v47 = vld [vmem:[%s18467_s1 + $0x1920] sm:$0xff]  ;;  %v967_v56 = vld [vmem:[%s18467_s1 + $0x1ba8] sm:$0xff] }
 0x27f   :  { %6498 = vmatprep.subr.bf16.mxu0 %v11772_v48  ;;  %6662 = vmatprep.subr.bf16.mxu1 %v11774_v49  ;;  %v894_v48 = vld [vmem:[%s18467_s1 + $0x1960] sm:$0xff]  ;;  %v887_v49 = vld [vmem:[%s18467_s1 + $0x1928] sm:$0xff] }
 0x280   :  { %v11884_v54 = vcombine.high %v886_v47, %v894_v48  ;;  %v11883_v61 = vcombine.low %v886_v47, %v894_v48  ;;  %v11885_v62 = vcombine.low %v887_v49, %v895_v50  ;;  %v975_v40 = vld [vmem:[%s18467_s1 + $0x1be8] sm:$0xff] }
 0x282   :  { %6499 = vmatpush1.bf16.msra.mxu0 %v11771_v23  ;;  %6663 = vmatpush1.bf16.msra.mxu1 %v11773_v55  ;;  %v11886_v23 = vcombine.high %v887_v49, %v895_v50  ;;  %v902_v55 = vld [vmem:[%s18467_s1 + $0x19a0] sm:$0xff] }
 0x283   :  { %6500 = vmatprep.subr.bf16.mxu0 %v11788_v57  ;;  %6664 = vmatprep.subr.bf16.mxu1 %v11790_v58  ;;  %v910_v57 = vld [vmem:[%s18467_s1 + $0x19e0] sm:$0xff]  ;;  %v903_v58 = vld [vmem:[%s18467_s1 + $0x19a8] sm:$0xff] }
 0x284   :  { %v11900_v0 = vcombine.high %v902_v55, %v910_v57  ;;  %v11899_v6 = vcombine.low %v902_v55, %v910_v57  ;;  %v11901_v7 = vcombine.low %v903_v58, %v911_v60  ;;  %v991_v55 = vld [vmem:[%s18467_s1 + $0x1c68] sm:$0xff] }
 0x286   :  { %6501 = vmatpush1.bf16.msra.mxu0 %v11787_v53  ;;  %6665 = vmatpush1.bf16.msra.mxu1 %v11789_v1  ;;  %v11902_v53 = vcombine.high %v903_v58, %v911_v60  ;;  %v918_v1 = vld [vmem:[%s18467_s1 + $0x1a20] sm:$0xff]  ;;  %v11965_v58 = vcombine.low %v967_v56, %v975_v40 }
 0x287   :  { %6502 = vmatprep.subr.bf16.mxu0 %v11804_v2  ;;  %6666 = vmatprep.subr.bf16.mxu1 %v11806_v4  ;;  %v926_v2 = vld [vmem:[%s18467_s1 + $0x1a60] sm:$0xff]  ;;  %v919_v4 = vld [vmem:[%s18467_s1 + $0x1a28] sm:$0xff] }
 0x288   :  { %v11916_v8 = vcombine.high %v918_v1, %v926_v2  ;;  %v11915_v14 = vcombine.low %v918_v1, %v926_v2  ;;  %v11917_v16 = vcombine.low %v919_v4, %v927_v5  ;;  %v1007_v1 = vld [vmem:[%s18467_s1 + $0x1ce8] sm:$0xff] }
 0x28a   :  { %6503 = vmatpush1.bf16.msra.mxu0 %v11803_v10  ;;  %6667 = vmatpush1.bf16.msra.mxu1 %v11805_v32  ;;  %v11918_v10 = vcombine.high %v919_v4, %v927_v5  ;;  %v934_v32 = vld [vmem:[%s18467_s1 + $0x1aa0] sm:$0xff] }
 0x28b   :  { %6504 = vmatprep.subr.bf16.mxu0 %v11820_v11  ;;  %6668 = vmatprep.subr.bf16.mxu1 %v11822_v13  ;;  %v942_v11 = vld [vmem:[%s18467_s1 + $0x1ae0] sm:$0xff]  ;;  %v935_v13 = vld [vmem:[%s18467_s1 + $0x1aa8] sm:$0xff] }
 0x28c   :  { %v11932_v18 = vcombine.high %v934_v32, %v942_v11  ;;  %v11931_v29 = vcombine.low %v934_v32, %v942_v11  ;;  %v11933_v30 = vcombine.low %v935_v13, %v943_v59  ;;  %v97_v32 = vld [vmem:[%s18467_s1 + $0x78] sm:$0xff] }
 0x28e   :  { %6505 = vmatpush1.bf16.msra.mxu0 %v11819_v19  ;;  %6669 = vmatpush1.bf16.msra.mxu1 %v11821_v20  ;;  %v11934_v19 = vcombine.high %v935_v13, %v943_v59  ;;  %v950_v20 = vld [vmem:[%s18467_s1 + $0x1b20] sm:$0xff] }
 0x28f   :  { %6506 = vmatprep.subr.bf16.mxu0 %v11836_v24  ;;  %6670 = vmatprep.subr.bf16.mxu1 %v11838_v26  ;;  %v958_v24 = vld [vmem:[%s18467_s1 + $0x1b60] sm:$0xff]  ;;  %v951_v26 = vld [vmem:[%s18467_s1 + $0x1b28] sm:$0xff] }
 0x290   :  { %v11948_v31 = vcombine.high %v950_v20, %v958_v24  ;;  %v11949_v48 = vcombine.low %v951_v26, %v959_v28 }
 0x292   :  { %6507 = vmatpush1.bf16.msra.mxu0 %v11835_v33  ;;  %6671 = vmatpush1.bf16.msra.mxu1 %v11837_v34  ;;  %v11950_v34 = vcombine.high %v951_v26, %v959_v28 }
 0x293   :  { %6517 = vmatprep.subr.bf16.mxu0 %v11852_v36  ;;  %6681 = vmatprep.subr.bf16.mxu1 %v11854_v37  ;;  %v966_v36 = vld [vmem:[%s18467_s1 + $0x1ba0] sm:$0xff] }
 0x294   :  { %v974_v37 = vld [vmem:[%s18467_s1 + $0x1be0] sm:$0xff] }
 0x295   :  { %6509 = vmatmul.mubr.bf16.vlgmr.msra.gmra.mrb[8].mxu0 %v14341_v3  ;;  %6673 = vmatmul.mubr.bf16.vlgmr.msra.gmra.mrb[8].mxu1 %v14341_v3  ;;  %v11964_v49 = vcombine.high %v966_v36, %v974_v37  ;;  %v11963_v57 = vcombine.low %v966_v36, %v974_v37  ;;  %v129_v36 = vld [vmem:[%s18467_s1 + $0x178] sm:$0xff] }
 0x296   :  { %6518 = vmatpush1.bf16.msra.mxu0 %v11851_v41  ;;  %6682 = vmatpush1.bf16.msra.mxu1 %v11853_v42 }
 0x297   :  { %6519 = vmatprep.subr.bf16.mxu0 %v11868_v45  ;;  %6683 = vmatprep.subr.bf16.mxu1 %v11870_v46  ;;  %v11947_v45 = vcombine.low %v950_v20, %v958_v24  ;;  %v113_v20 = vld [vmem:[%s18467_s1 + $0xf8] sm:$0xff] }
 0x298   :  { %12007 = vmatprep.mubr.msk.bf16.mxu0 %vm5734_vm0, %v14355_v12  ;;  %12008 = vmatprep.mubr.msk.bf16.mxu1 %vm5734_vm0, %v14355_v12 }
 0x29a   :  { %6520 = vmatpush1.bf16.msra.mxu0 %v11867_v15  ;;  %6684 = vmatpush1.bf16.msra.mxu1 %v11869_v51  ;;  %v11966_v15 = vcombine.high %v967_v56, %v975_v40  ;;  %v982_v51 = vld [vmem:[%s18467_s1 + $0x1c20] sm:$0xff] }
 0x29b   :  { %6521 = vmatprep.subr.bf16.mxu0 %v11884_v54  ;;  %6685 = vmatprep.subr.bf16.mxu1 %v11886_v23  ;;  %v990_v54 = vld [vmem:[%s18467_s1 + $0x1c60] sm:$0xff]  ;;  %v983_v23 = vld [vmem:[%s18467_s1 + $0x1c28] sm:$0xff] }
 0x29c   :  { %v11980_v60 = vcombine.high %v982_v51, %v990_v54  ;;  %v11979_v2 = vcombine.low %v982_v51, %v990_v54  ;;  %v11981_v4 = vcombine.low %v983_v23, %v991_v55  ;;  %v152_v54 = vld [vmem:[%s18467_s1 + $0x230] sm:$0xff] }
 0x29e   :  { %6522 = vmatpush1.bf16.msra.mxu0 %v11883_v61  ;;  %6686 = vmatpush1.bf16.msra.mxu1 %v11885_v62  ;;  %v11982_v61 = vcombine.high %v983_v23, %v991_v55  ;;  %v998_v62 = vld [vmem:[%s18467_s1 + $0x1ca0] sm:$0xff]  ;;  %v160_v23 = vld [vmem:[%s18467_s1 + $0x270] sm:$0xff]  ;;  %v161_v55 = vld [vmem:[%s18467_s1 + $0x278] sm:$0xff] }
 0x29f   :  { %6523 = vmatprep.subr.bf16.mxu0 %v11900_v0  ;;  %6687 = vmatprep.subr.bf16.mxu1 %v11902_v53  ;;  %v1006_v0 = vld [vmem:[%s18467_s1 + $0x1ce0] sm:$0xff]  ;;  %v999_v53 = vld [vmem:[%s18467_s1 + $0x1ca8] sm:$0xff] }
 0x2a0   :  { %v11996_v5 = vcombine.high %v998_v62, %v1006_v0  ;;  %v11995_v11 = vcombine.low %v998_v62, %v1006_v0  ;;  %v11997_v13 = vcombine.low %v999_v53, %v1007_v1  ;;  %v168_v62 = vld [vmem:[%s18467_s1 + $0x2b0] sm:$0xff] }
 0x2a1   :  { %v176_v0 = vld [vmem:[%s18467_s1 + $0x2f0] sm:$0xff] }
 0x2a2   :  { %6524 = vmatpush1.bf16.msra.mxu0 %v11899_v6  ;;  %6688 = vmatpush1.bf16.msra.mxu1 %v11901_v7  ;;  %v11998_v6 = vcombine.high %v999_v53, %v1007_v1  ;;  %v88_v7 = vld [vmem:[%s18467_s1 + $0x30] sm:$0xff]  ;;  %v169_v53 = vld [vmem:[%s18467_s1 + $0x2b8] sm:$0xff] }
 0x2a3   :  { %6525 = vmatprep.subr.bf16.mxu0 %v11916_v8  ;;  %6689 = vmatprep.subr.bf16.mxu1 %v11918_v10  ;;  %v96_v8 = vld [vmem:[%s18467_s1 + $0x70] sm:$0xff]  ;;  %v89_v10 = vld [vmem:[%s18467_s1 + $0x38] sm:$0xff] }
 0x2a4   :  { %v11088_v59 = vcombine.high %v88_v7, %v96_v8  ;;  %v11087_v24 = vcombine.low %v88_v7, %v96_v8  ;;  %v11089_v26 = vcombine.low %v89_v10, %v97_v32  ;;  %v177_v1 = vld [vmem:[%s18467_s1 + $0x2f8] sm:$0xff]  ;;  %v184_v7 = vld [vmem:[%s18467_s1 + $0x330] sm:$0xff] }
 0x2a5   :  { %v192_v8 = vld [vmem:[%s18467_s1 + $0x370] sm:$0xff] }
 0x2a6   :  { %6526 = vmatpush1.bf16.msra.mxu0 %v11915_v14  ;;  %6690 = vmatpush1.bf16.msra.mxu1 %v11917_v16  ;;  %v11090_v14 = vcombine.high %v89_v10, %v97_v32  ;;  %v104_v16 = vld [vmem:[%s18467_s1 + $0xb0] sm:$0xff]  ;;  %v185_v10 = vld [vmem:[%s18467_s1 + $0x338] sm:$0xff] }
 0x2a7   :  { %6527 = vmatprep.subr.bf16.mxu0 %v11932_v18  ;;  %6691 = vmatprep.subr.bf16.mxu1 %v11934_v19  ;;  %v112_v18 = vld [vmem:[%s18467_s1 + $0xf0] sm:$0xff]  ;;  %v105_v19 = vld [vmem:[%s18467_s1 + $0xb8] sm:$0xff] }
 0x2a8   :  { %v15851_v33 = vpop.f32.mrb[4].mxu0  ;;  %v15859_v38 = vpop.f32.mrb[4].mxu1  ;;  %v11104_v28 = vcombine.high %v104_v16, %v112_v18  ;;  %v11103_v37 = vcombine.low %v104_v16, %v112_v18  ;;  %v11105_v56 = vcombine.low %v105_v19, %v113_v20  ;;  %v193_v32 = vld [vmem:[%s18467_s1 + $0x378] sm:$0xff]  ;;  %v200_v16 = vld [vmem:[%s18467_s1 + $0x3b0] sm:$0xff] }
 0x2a9   :  { %v15861_v39 = vpop.f32.mrb[5].mxu0  ;;  %v15869_v41 = vpop.f32.mrb[5].mxu1  ;;  %v208_v18 = vld [vmem:[%s18467_s1 + $0x3f0] sm:$0xff] }
 0x2aa   :  { %v6227_v42 = vpop.f32.mrb[6].mxu0  ;;  %6528 = vmatpush1.bf16.msra.mxu0 %v11931_v29  ;;  %v6391_v46 = vpop.f32.mrb[6].mxu1  ;;  %6692 = vmatpush1.bf16.msra.mxu1 %v11933_v30  ;;  %v11106_v29 = vcombine.high %v105_v19, %v113_v20  ;;  %v120_v30 = vld [vmem:[%s18467_s1 + $0x130] sm:$0xff]  ;;  %v201_v19 = vld [vmem:[%s18467_s1 + $0x3b8] sm:$0xff] }
 0x2ab   :  { %v6228_v47 = vpop.f32.mrb[7].mxu0  ;;  %6529 = vmatprep.subr.bf16.mxu0 %v11948_v31  ;;  %v6392_v50 = vpop.f32.mrb[7].mxu1  ;;  %6693 = vmatprep.subr.bf16.mxu1 %v11950_v34  ;;  %v128_v31 = vld [vmem:[%s18467_s1 + $0x170] sm:$0xff]  ;;  %v121_v34 = vld [vmem:[%s18467_s1 + $0x138] sm:$0xff] }
 0x2ac   :  { %v11120_v40 = vcombine.high %v120_v30, %v128_v31  ;;  %v11122_v42 = vcombine.high %v121_v34, %v129_v36  ;;  %v144_v46 = vld [vmem:[%s18467_s1 + $0x1f0] sm:$0xff]  ;;  %v137_v47 = vld [vmem:[%s18467_s1 + $0x1b8] sm:$0xff]  ;;  %v11121_v50 = vcombine.low %v121_v34, %v129_v36 }
 0x2ad   :  { %v209_v20 = vld [vmem:[%s18467_s1 + $0x3f8] sm:$0xff] }
 0x2ae   :  { %6530 = vmatpush1.bf16.msra.mxu0 %v11947_v45  ;;  %6694 = vmatpush1.bf16.msra.mxu1 %v11949_v48  ;;  %v136_v45 = vld [vmem:[%s18467_s1 + $0x1b0] sm:$0xff]  ;;  %v145_v48 = vld [vmem:[%s18467_s1 + $0x1f8] sm:$0xff] }
 0x2af   :  { %6531 = vmatprep.subr.bf16.mxu0 %v11964_v49  ;;  %6695 = vmatprep.subr.bf16.mxu1 %v11966_v15  ;;  %v11119_v49 = vcombine.low %v120_v30, %v128_v31  ;;  %v11136_v15 = vcombine.high %v136_v45, %v144_v46  ;;  %v11138_v51 = vcombine.high %v137_v47, %v145_v48  ;;  %v216_v30 = vld [vmem:[%s18467_s1 + $0x430] sm:$0xff]  ;;  %v217_v34 = vld [vmem:[%s18467_s1 + $0x438] sm:$0xff] }
 0x2b0   :  { %v224_v31 = vld [vmem:[%s18467_s1 + $0x470] sm:$0xff]  ;;  %v225_v36 = vld [vmem:[%s18467_s1 + $0x478] sm:$0xff] }
 0x2b2   :  { %6532 = vmatpush1.bf16.msra.mxu0 %v11963_v57  ;;  %6696 = vmatpush1.bf16.msra.mxu1 %v11965_v58  ;;  %v11135_v57 = vcombine.low %v136_v45, %v144_v46  ;;  %v11137_v58 = vcombine.low %v137_v47, %v145_v48  ;;  %v232_v45 = vld [vmem:[%s18467_s1 + $0x4b0] sm:$0xff]  ;;  %v233_v47 = vld [vmem:[%s18467_s1 + $0x4b8] sm:$0xff] }
 0x2b3   :  { %6533 = vmatprep.subr.bf16.mxu0 %v11980_v60  ;;  %6697 = vmatprep.subr.bf16.mxu1 %v11982_v61  ;;  %v11152_v60 = vcombine.high %v152_v54, %v160_v23  ;;  %v240_v46 = vld [vmem:[%s18467_s1 + $0x4f0] sm:$0xff]  ;;  %v241_v48 = vld [vmem:[%s18467_s1 + $0x4f8] sm:$0xff] }
 0x2b6   :  { %6534 = vmatpush1.bf16.msra.mxu0 %v11979_v2  ;;  %6698 = vmatpush1.bf16.msra.mxu1 %v11981_v4  ;;  %v11151_v2 = vcombine.low %v152_v54, %v160_v23  ;;  %v248_v54 = vld [vmem:[%s18467_s1 + $0x530] sm:$0xff] }
 0x2b7   :  { %6535 = vmatprep.subr.bf16.mxu0 %v11996_v5  ;;  %6699 = vmatprep.subr.bf16.mxu1 %v11998_v6  ;;  %v11168_v5 = vcombine.high %v168_v62, %v176_v0  ;;  %v11170_v6 = vcombine.high %v169_v53, %v177_v1  ;;  %v256_v23 = vld [vmem:[%s18467_s1 + $0x570] sm:$0xff] }
 0x2ba   :  { %6536 = vmatpush1.bf16.msra.mxu0 %v11995_v11  ;;  %6700 = vmatpush1.bf16.msra.mxu1 %v11997_v13  ;;  %v11167_v11 = vcombine.low %v168_v62, %v176_v0  ;;  %v11169_v13 = vcombine.low %v169_v53, %v177_v1  ;;  %v264_v62 = vld [vmem:[%s18467_s1 + $0x5b0] sm:$0xff]  ;;  %v265_v53 = vld [vmem:[%s18467_s1 + $0x5b8] sm:$0xff] }
 0x2bb   :  { %6722 = vmatprep.subr.bf16.mxu0 %v11088_v59  ;;  %6886 = vmatprep.subr.bf16.mxu1 %v11090_v14  ;;  %v11184_v59 = vcombine.high %v184_v7, %v192_v8  ;;  %v11186_v14 = vcombine.high %v185_v10, %v193_v32  ;;  %v272_v0 = vld [vmem:[%s18467_s1 + $0x5f0] sm:$0xff]  ;;  %v273_v1 = vld [vmem:[%s18467_s1 + $0x5f8] sm:$0xff] }
 0x2bd   :  { %6550 = vmatmul.mubr.bf16.vlgmr.msra.gmra.mrb[8].mxu0 %v14473_v63  ;;  %6714 = vmatmul.mubr.bf16.vlgmr.msra.gmra.mrb[8].mxu1 %v14473_v63 }
 0x2be   :  { %6723 = vmatpush1.bf16.msra.mxu0 %v11087_v24  ;;  %6887 = vmatpush1.bf16.msra.mxu1 %v11089_v26  ;;  %v11183_v24 = vcombine.low %v184_v7, %v192_v8  ;;  %v11185_v26 = vcombine.low %v185_v10, %v193_v32  ;;  %v280_v7 = vld [vmem:[%s18467_s1 + $0x630] sm:$0xff]  ;;  %v281_v10 = vld [vmem:[%s18467_s1 + $0x638] sm:$0xff] }
 0x2bf   :  { %6724 = vmatprep.subr.bf16.mxu0 %v11104_v28  ;;  %6888 = vmatprep.subr.bf16.mxu1 %v11106_v29  ;;  %v11200_v28 = vcombine.high %v200_v16, %v208_v18  ;;  %v11202_v29 = vcombine.high %v201_v19, %v209_v20  ;;  %v288_v8 = vld [vmem:[%s18467_s1 + $0x670] sm:$0xff]  ;;  %v289_v32 = vld [vmem:[%s18467_s1 + $0x678] sm:$0xff] }
 0x2c0   :  { %6754 = vmatprep.mubr.bf16.mxu0 %v13792_v9  ;;  %6918 = vmatprep.mubr.bf16.mxu1 %v13792_v9  ;;  %v153_v9 = vld [vmem:[%s18467_s1 + $0x238] sm:$0xff] }
 0x2c1   :  { %v11154_v61 = vcombine.high %v153_v9, %v161_v55  ;;  %v11153_v4 = vcombine.low %v153_v9, %v161_v55  ;;  %v249_v9 = vld [vmem:[%s18467_s1 + $0x538] sm:$0xff] }
 0x2c2   :  { %6725 = vmatpush1.bf16.msra.mxu0 %v11103_v37  ;;  %6889 = vmatpush1.bf16.msra.mxu1 %v11105_v56  ;;  %v11199_v37 = vcombine.low %v200_v16, %v208_v18  ;;  %v11201_v56 = vcombine.low %v201_v19, %v209_v20  ;;  %v257_v55 = vld [vmem:[%s18467_s1 + $0x578] sm:$0xff]  ;;  %v296_v16 = vld [vmem:[%s18467_s1 + $0x6b0] sm:$0xff] }
 0x2c3   :  { %6726 = vmatprep.subr.bf16.mxu0 %v11120_v40  ;;  %6890 = vmatprep.subr.bf16.mxu1 %v11122_v42  ;;  %v11216_v40 = vcombine.high %v216_v30, %v224_v31  ;;  %v11218_v42 = vcombine.high %v217_v34, %v225_v36  ;;  %v304_v18 = vld [vmem:[%s18467_s1 + $0x6f0] sm:$0xff]  ;;  %v297_v19 = vld [vmem:[%s18467_s1 + $0x6b8] sm:$0xff] }
 0x2c4   :  { %v305_v20 = vld [vmem:[%s18467_s1 + $0x6f8] sm:$0xff] }
 0x2c6   :  { %6727 = vmatpush1.bf16.msra.mxu0 %v11119_v49  ;;  %6891 = vmatpush1.bf16.msra.mxu1 %v11121_v50  ;;  %v11215_v49 = vcombine.low %v216_v30, %v224_v31  ;;  %v11217_v50 = vcombine.low %v217_v34, %v225_v36  ;;  %v312_v30 = vld [vmem:[%s18467_s1 + $0x730] sm:$0xff]  ;;  %v313_v34 = vld [vmem:[%s18467_s1 + $0x738] sm:$0xff] }
 0x2c7   :  { %6728 = vmatprep.subr.bf16.mxu0 %v11136_v15  ;;  %6892 = vmatprep.subr.bf16.mxu1 %v11138_v51  ;;  %v11232_v15 = vcombine.high %v232_v45, %v240_v46  ;;  %v11234_v51 = vcombine.high %v233_v47, %v241_v48  ;;  %v320_v31 = vld [vmem:[%s18467_s1 + $0x770] sm:$0xff]  ;;  %v321_v36 = vld [vmem:[%s18467_s1 + $0x778] sm:$0xff] }
 0x2ca   :  { %6729 = vmatpush1.bf16.msra.mxu0 %v11135_v57  ;;  %6893 = vmatpush1.bf16.msra.mxu1 %v11137_v58  ;;  %v11231_v57 = vcombine.low %v232_v45, %v240_v46  ;;  %v11233_v58 = vcombine.low %v233_v47, %v241_v48  ;;  %v328_v45 = vld [vmem:[%s18467_s1 + $0x7b0] sm:$0xff]  ;;  %v329_v47 = vld [vmem:[%s18467_s1 + $0x7b8] sm:$0xff] }
 0x2cb   :  { %6730 = vmatprep.subr.bf16.mxu0 %v11152_v60  ;;  %6894 = vmatprep.subr.bf16.mxu1 %v11154_v61  ;;  %v11248_v60 = vcombine.high %v248_v54, %v256_v23  ;;  %v11250_v61 = vcombine.high %v249_v9, %v257_v55  ;;  %v336_v46 = vld [vmem:[%s18467_s1 + $0x7f0] sm:$0xff]  ;;  %v337_v48 = vld [vmem:[%s18467_s1 + $0x7f8] sm:$0xff] }
 0x2ce   :  { %6731 = vmatpush1.bf16.msra.mxu0 %v11151_v2  ;;  %6895 = vmatpush1.bf16.msra.mxu1 %v11153_v4  ;;  %v11247_v2 = vcombine.low %v248_v54, %v256_v23  ;;  %v11249_v4 = vcombine.low %v249_v9, %v257_v55  ;;  %v344_v54 = vld [vmem:[%s18467_s1 + $0x830] sm:$0xff]  ;;  %v345_v9 = vld [vmem:[%s18467_s1 + $0x838] sm:$0xff] }
 0x2cf   :  { %6732 = vmatprep.subr.bf16.mxu0 %v11168_v5  ;;  %6896 = vmatprep.subr.bf16.mxu1 %v11170_v6  ;;  %v11264_v5 = vcombine.high %v264_v62, %v272_v0  ;;  %v11266_v6 = vcombine.high %v265_v53, %v273_v1  ;;  %v352_v23 = vld [vmem:[%s18467_s1 + $0x870] sm:$0xff]  ;;  %v353_v55 = vld [vmem:[%s18467_s1 + $0x878] sm:$0xff] }
 0x2d2   :  { %6733 = vmatpush1.bf16.msra.mxu0 %v11167_v11  ;;  %6897 = vmatpush1.bf16.msra.mxu1 %v11169_v13  ;;  %v11263_v11 = vcombine.low %v264_v62, %v272_v0  ;;  %v11265_v13 = vcombine.low %v265_v53, %v273_v1  ;;  %v360_v62 = vld [vmem:[%s18467_s1 + $0x8b0] sm:$0xff]  ;;  %v361_v53 = vld [vmem:[%s18467_s1 + $0x8b8] sm:$0xff] }
 0x2d3   :  { %6734 = vmatprep.subr.bf16.mxu0 %v11184_v59  ;;  %6898 = vmatprep.subr.bf16.mxu1 %v11186_v14  ;;  %v11280_v59 = vcombine.high %v280_v7, %v288_v8  ;;  %v11282_v14 = vcombine.high %v281_v10, %v289_v32  ;;  %v368_v0 = vld [vmem:[%s18467_s1 + $0x8f0] sm:$0xff]  ;;  %v369_v1 = vld [vmem:[%s18467_s1 + $0x8f8] sm:$0xff] }
 0x2d6   :  { %6735 = vmatpush1.bf16.msra.mxu0 %v11183_v24  ;;  %6899 = vmatpush1.bf16.msra.mxu1 %v11185_v26  ;;  %v11279_v24 = vcombine.low %v280_v7, %v288_v8  ;;  %v11281_v26 = vcombine.low %v281_v10, %v289_v32  ;;  %v376_v7 = vld [vmem:[%s18467_s1 + $0x930] sm:$0xff]  ;;  %v377_v10 = vld [vmem:[%s18467_s1 + $0x938] sm:$0xff] }
 0x2d7   :  { %6736 = vmatprep.subr.bf16.mxu0 %v11200_v28  ;;  %6900 = vmatprep.subr.bf16.mxu1 %v11202_v29  ;;  %v11296_v28 = vcombine.high %v296_v16, %v304_v18  ;;  %v11298_v29 = vcombine.high %v297_v19, %v305_v20  ;;  %v384_v8 = vld [vmem:[%s18467_s1 + $0x970] sm:$0xff]  ;;  %v385_v32 = vld [vmem:[%s18467_s1 + $0x978] sm:$0xff] }
 0x2da   :  { %6737 = vmatpush1.bf16.msra.mxu0 %v11199_v37  ;;  %6901 = vmatpush1.bf16.msra.mxu1 %v11201_v56  ;;  %v11295_v37 = vcombine.low %v296_v16, %v304_v18  ;;  %v11297_v56 = vcombine.low %v297_v19, %v305_v20  ;;  %v392_v16 = vld [vmem:[%s18467_s1 + $0x9b0] sm:$0xff]  ;;  %v401_v19 = vld [vmem:[%s18467_s1 + $0x9f8] sm:$0xff]  ;;  %v11375_v20 = vcombine.low %v376_v7, %v384_v8 }
 0x2db   :  { %6738 = vmatprep.subr.bf16.mxu0 %v11216_v40  ;;  %6902 = vmatprep.subr.bf16.mxu1 %v11218_v42  ;;  %v11312_v40 = vcombine.high %v312_v30, %v320_v31  ;;  %v11314_v42 = vcombine.high %v313_v34, %v321_v36  ;;  %v400_v18 = vld [vmem:[%s18467_s1 + $0x9f0] sm:$0xff] }
 0x2de   :  { %6739 = vmatpush1.bf16.msra.mxu0 %v11215_v49  ;;  %6903 = vmatpush1.bf16.msra.mxu1 %v11217_v50  ;;  %v11311_v49 = vcombine.low %v312_v30, %v320_v31  ;;  %v11313_v50 = vcombine.low %v313_v34, %v321_v36  ;;  %v416_v30 = vld [vmem:[%s18467_s1 + $0xa70] sm:$0xff]  ;;  %v417_v31 = vld [vmem:[%s18467_s1 + $0xa78] sm:$0xff]  ;;  %v11391_v34 = vcombine.low %v392_v16, %v400_v18 }
 0x2df   :  { %6740 = vmatprep.subr.bf16.mxu0 %v11232_v15  ;;  %6904 = vmatprep.subr.bf16.mxu1 %v11234_v51  ;;  %v11328_v15 = vcombine.high %v328_v45, %v336_v46  ;;  %v11330_v51 = vcombine.high %v329_v47, %v337_v48 }
 0x2e2   :  { %6741 = vmatpush1.bf16.msra.mxu0 %v11231_v57  ;;  %6905 = vmatpush1.bf16.msra.mxu1 %v11233_v58  ;;  %v11327_v57 = vcombine.low %v328_v45, %v336_v46  ;;  %v11329_v58 = vcombine.low %v329_v47, %v337_v48  ;;  %v425_v45 = vld [vmem:[%s18467_s1 + $0xab8] sm:$0xff] }
 0x2e3   :  { %6742 = vmatprep.subr.bf16.mxu0 %v11248_v60  ;;  %6906 = vmatprep.subr.bf16.mxu1 %v11250_v61  ;;  %v11344_v60 = vcombine.high %v344_v54, %v352_v23  ;;  %v11346_v61 = vcombine.high %v345_v9, %v353_v55  ;;  %v433_v46 = vld [vmem:[%s18467_s1 + $0xaf8] sm:$0xff] }
 0x2e6   :  { %6743 = vmatpush1.bf16.msra.mxu0 %v11247_v2  ;;  %6907 = vmatpush1.bf16.msra.mxu1 %v11249_v4  ;;  %v11343_v2 = vcombine.low %v344_v54, %v352_v23  ;;  %v11345_v4 = vcombine.low %v345_v9, %v353_v55  ;;  %v441_v54 = vld [vmem:[%s18467_s1 + $0xb38] sm:$0xff]  ;;  %v11425_v55 = vcombine.low %v425_v45, %v433_v46 }
 0x2e7   :  { %6744 = vmatprep.subr.bf16.mxu0 %v11264_v5  ;;  %6908 = vmatprep.subr.bf16.mxu1 %v11266_v6  ;;  %v11360_v5 = vcombine.high %v360_v62, %v368_v0  ;;  %v11362_v6 = vcombine.high %v361_v53, %v369_v1  ;;  %v449_v23 = vld [vmem:[%s18467_s1 + $0xb78] sm:$0xff] }
 0x2ea   :  { %6745 = vmatpush1.bf16.msra.mxu0 %v11263_v11  ;;  %6909 = vmatpush1.bf16.msra.mxu1 %v11265_v13  ;;  %v11359_v11 = vcombine.low %v360_v62, %v368_v0  ;;  %v11361_v13 = vcombine.low %v361_v53, %v369_v1  ;;  %v457_v62 = vld [vmem:[%s18467_s1 + $0xbb8] sm:$0xff]  ;;  %v11441_v1 = vcombine.low %v441_v54, %v449_v23 }
 0x2eb   :  { %6746 = vmatprep.subr.bf16.mxu0 %v11280_v59  ;;  %6910 = vmatprep.subr.bf16.mxu1 %v11282_v14  ;;  %v11376_v59 = vcombine.high %v376_v7, %v384_v8  ;;  %v11378_v14 = vcombine.high %v377_v10, %v385_v32  ;;  %v465_v0 = vld [vmem:[%s18467_s1 + $0xbf8] sm:$0xff] }
 0x2ec   :  { %v473_v7 = vld [vmem:[%s18467_s1 + $0xc38] sm:$0xff] }
 0x2ed   :  { %v481_v8 = vld [vmem:[%s18467_s1 + $0xc78] sm:$0xff] }
 0x2ee   :  { %6747 = vmatpush1.bf16.msra.mxu0 %v11279_v24  ;;  %6911 = vmatpush1.bf16.msra.mxu1 %v11281_v26  ;;  %v11377_v24 = vcombine.low %v377_v10, %v385_v32  ;;  %v11392_v26 = vcombine.high %v392_v16, %v400_v18  ;;  %v11457_v32 = vcombine.low %v457_v62, %v465_v0  ;;  %v489_v16 = vld [vmem:[%s18467_s1 + $0xcb8] sm:$0xff] }
 0x2ef   :  { %6748 = vmatprep.subr.bf16.mxu0 %v11296_v28  ;;  %6912 = vmatprep.subr.bf16.mxu1 %v11298_v29  ;;  %v408_v29 = vld [vmem:[%s18467_s1 + $0xa30] sm:$0xff]  ;;  %v497_v18 = vld [vmem:[%s18467_s1 + $0xcf8] sm:$0xff] }
 0x2f0   :  { %v11407_v47 = vcombine.low %v408_v29, %v416_v30 }
 0x2f2   :  { %6749 = vmatpush1.bf16.msra.mxu0 %v11295_v37  ;;  %6913 = vmatpush1.bf16.msra.mxu1 %v11297_v56  ;;  %v11408_v37 = vcombine.high %v408_v29, %v416_v30  ;;  %v505_v29 = vld [vmem:[%s18467_s1 + $0xd38] sm:$0xff] }
 0x2f3   :  { %6750 = vmatprep.subr.bf16.mxu0 %v11312_v40  ;;  %6914 = vmatprep.subr.bf16.mxu1 %v11314_v42  ;;  %v424_v40 = vld [vmem:[%s18467_s1 + $0xab0] sm:$0xff]  ;;  %v513_v30 = vld [vmem:[%s18467_s1 + $0xd78] sm:$0xff] }
 0x2f4   :  { %v432_v42 = vld [vmem:[%s18467_s1 + $0xaf0] sm:$0xff] }
 0x2f5   :  { %v11423_v9 = vcombine.low %v424_v40, %v432_v42 }
 0x2f6   :  { %6751 = vmatpush1.bf16.msra.mxu0 %v11311_v49  ;;  %6915 = vmatpush1.bf16.msra.mxu1 %v11313_v50  ;;  %v11424_v49 = vcombine.high %v424_v40, %v432_v42  ;;  %v11426_v50 = vcombine.high %v425_v45, %v433_v46  ;;  %v521_v40 = vld [vmem:[%s18467_s1 + $0xdb8] sm:$0xff]  ;;  %v11505_v46 = vcombine.low %v505_v29, %v513_v30 }
 0x2f7   :  { %6752 = vmatprep.subr.bf16.mxu0 %v11328_v15  ;;  %6916 = vmatprep.subr.bf16.mxu1 %v11330_v51  ;;  %v440_v15 = vld [vmem:[%s18467_s1 + $0xb30] sm:$0xff]  ;;  %v529_v42 = vld [vmem:[%s18467_s1 + $0xdf8] sm:$0xff] }
 0x2f8   :  { %v448_v51 = vld [vmem:[%s18467_s1 + $0xb70] sm:$0xff] }
 0x2f9   :  { %v11439_v53 = vcombine.low %v440_v15, %v448_v51 }
 0x2fa   :  { %6753 = vmatpush1.bf16.msra.mxu0 %v11327_v57  ;;  %6917 = vmatpush1.bf16.msra.mxu1 %v11329_v58  ;;  %v11440_v57 = vcombine.high %v440_v15, %v448_v51  ;;  %v11442_v58 = vcombine.high %v441_v54, %v449_v23  ;;  %v537_v15 = vld [vmem:[%s18467_s1 + $0xe38] sm:$0xff]  ;;  %v11521_v23 = vcombine.low %v521_v40, %v529_v42 }
 0x2fb   :  { %6763 = vmatprep.subr.bf16.mxu0 %v11344_v60  ;;  %6927 = vmatprep.subr.bf16.mxu1 %v11346_v61  ;;  %v456_v60 = vld [vmem:[%s18467_s1 + $0xbb0] sm:$0xff]  ;;  %v545_v51 = vld [vmem:[%s18467_s1 + $0xe78] sm:$0xff] }
 0x2fc   :  { %v464_v61 = vld [vmem:[%s18467_s1 + $0xbf0] sm:$0xff] }
 0x2fd   :  { %6755 = vmatmul.mubr.bf16.vlgmr.msra.gmra.mrb[12].mxu0 %v13913_v25  ;;  %6919 = vmatmul.mubr.bf16.vlgmr.msra.gmra.mrb[12].mxu1 %v13913_v25  ;;  %v393_v25 = vld [vmem:[%s18467_s1 + $0x9b8] sm:$0xff]  ;;  %v11455_v10 = vcombine.low %v456_v60, %v464_v61 }
 0x2fe   :  { %6764 = vmatpush1.bf16.msra.mxu0 %v11343_v2  ;;  %6928 = vmatpush1.bf16.msra.mxu1 %v11345_v4  ;;  %v11394_v28 = vcombine.high %v393_v25, %v401_v19  ;;  %v11393_v36 = vcombine.low %v393_v25, %v401_v19  ;;  %v11456_v2 = vcombine.high %v456_v60, %v464_v61  ;;  %v553_v60 = vld [vmem:[%s18467_s1 + $0xeb8] sm:$0xff] }
 0x2ff   :  { %6765 = vmatprep.subr.bf16.mxu0 %v11360_v5  ;;  %6929 = vmatprep.subr.bf16.mxu1 %v11362_v6  ;;  %v11458_v4 = vcombine.high %v457_v62, %v465_v0  ;;  %v472_v5 = vld [vmem:[%s18467_s1 + $0xc30] sm:$0xff]  ;;  %v11473_v19 = vcombine.low %v473_v7, %v481_v8  ;;  %v561_v61 = vld [vmem:[%s18467_s1 + $0xef8] sm:$0xff]  ;;  %v11537_v0 = vcombine.low %v537_v15, %v545_v51 }
 0x300   :  { %6795 = vmatprep.mubr.bf16.mxu0 %v13933_v35  ;;  %6959 = vmatprep.mubr.bf16.mxu1 %v13933_v35  ;;  %v409_v35 = vld [vmem:[%s18467_s1 + $0xa38] sm:$0xff]  ;;  %v480_v6 = vld [vmem:[%s18467_s1 + $0xc70] sm:$0xff] }
 0x301   :  { %v11410_v56 = vcombine.high %v409_v35, %v417_v31  ;;  %v11409_v48 = vcombine.low %v409_v35, %v417_v31  ;;  %v11471_v25 = vcombine.low %v472_v5, %v480_v6  ;;  %v11489_v31 = vcombine.low %v489_v16, %v497_v18 }
 0x302   :  { %6766 = vmatpush1.bf16.msra.mxu0 %v11359_v11  ;;  %6930 = vmatpush1.bf16.msra.mxu1 %v11361_v13  ;;  %v11472_v11 = vcombine.high %v472_v5, %v480_v6  ;;  %v11474_v13 = vcombine.high %v473_v7, %v481_v8  ;;  %v569_v5 = vld [vmem:[%s18467_s1 + $0xf38] sm:$0xff]  ;;  %v11553_v8 = vcombine.low %v553_v60, %v561_v61 }
 0x303   :  { %6767 = vmatprep.subr.bf16.mxu0 %v11376_v59  ;;  %6931 = vmatprep.subr.bf16.mxu1 %v11378_v14  ;;  %v488_v59 = vld [vmem:[%s18467_s1 + $0xcb0] sm:$0xff]  ;;  %v577_v6 = vld [vmem:[%s18467_s1 + $0xf78] sm:$0xff] }
 0x304   :  { %v496_v14 = vld [vmem:[%s18467_s1 + $0xcf0] sm:$0xff] }
 0x305   :  { %v11487_v35 = vcombine.low %v488_v59, %v496_v14 }
 0x306   :  { %6768 = vmatpush1.bf16.msra.mxu0 %v11375_v20  ;;  %6932 = vmatpush1.bf16.msra.mxu1 %v11377_v24  ;;  %v11488_v20 = vcombine.high %v488_v59, %v496_v14  ;;  %v11490_v24 = vcombine.high %v489_v16, %v497_v18  ;;  %v585_v59 = vld [vmem:[%s18467_s1 + $0xfb8] sm:$0xff]  ;;  %v11569_v18 = vcombine.low %v569_v5, %v577_v6 }
 0x307   :  { %6769 = vmatprep.subr.bf16.mxu0 %v11392_v26  ;;  %6933 = vmatprep.subr.bf16.mxu1 %v11394_v28  ;;  %v504_v26 = vld [vmem:[%s18467_s1 + $0xd30] sm:$0xff]  ;;  %v593_v14 = vld [vmem:[%s18467_s1 + $0xff8] sm:$0xff] }
 0x308   :  { %v512_v28 = vld [vmem:[%s18467_s1 + $0xd70] sm:$0xff] }
 0x309   :  { %v11503_v45 = vcombine.low %v504_v26, %v512_v28 }
 0x30a   :  { %6770 = vmatpush1.bf16.msra.mxu0 %v11391_v34  ;;  %6934 = vmatpush1.bf16.msra.mxu1 %v11393_v36  ;;  %v11504_v34 = vcombine.high %v504_v26, %v512_v28  ;;  %v11506_v36 = vcombine.high %v505_v29, %v513_v30  ;;  %v601_v26 = vld [vmem:[%s18467_s1 + $0x1038] sm:$0xff]  ;;  %v11585_v30 = vcombine.low %v585_v59, %v593_v14 }
 0x30b   :  { %6771 = vmatprep.subr.bf16.mxu0 %v11408_v37  ;;  %6935 = vmatprep.subr.bf16.mxu1 %v11410_v56  ;;  %v520_v37 = vld [vmem:[%s18467_s1 + $0xdb0] sm:$0xff]  ;;  %v609_v28 = vld [vmem:[%s18467_s1 + $0x1078] sm:$0xff] }
 0x30c   :  { %v528_v56 = vld [vmem:[%s18467_s1 + $0xdf0] sm:$0xff] }
 0x30d   :  { %v11519_v54 = vcombine.low %v520_v37, %v528_v56 }
 0x30e   :  { %6772 = vmatpush1.bf16.msra.mxu0 %v11407_v47  ;;  %6936 = vmatpush1.bf16.msra.mxu1 %v11409_v48  ;;  %v11520_v47 = vcombine.high %v520_v37, %v528_v56  ;;  %v11522_v48 = vcombine.high %v521_v40, %v529_v42  ;;  %v617_v37 = vld [vmem:[%s18467_s1 + $0x10b8] sm:$0xff]  ;;  %v11601_v42 = vcombine.low %v601_v26, %v609_v28 }
 0x30f   :  { %6773 = vmatprep.subr.bf16.mxu0 %v11424_v49  ;;  %6937 = vmatprep.subr.bf16.mxu1 %v11426_v50  ;;  %v536_v49 = vld [vmem:[%s18467_s1 + $0xe30] sm:$0xff]  ;;  %v625_v56 = vld [vmem:[%s18467_s1 + $0x10f8] sm:$0xff] }
 0x310   :  { %v544_v50 = vld [vmem:[%s18467_s1 + $0xe70] sm:$0xff] }
 0x311   :  { %v11535_v62 = vcombine.low %v536_v49, %v544_v50 }
 0x312   :  { %6774 = vmatpush1.bf16.msra.mxu0 %v11423_v9  ;;  %6938 = vmatpush1.bf16.msra.mxu1 %v11425_v55  ;;  %v11536_v9 = vcombine.high %v536_v49, %v544_v50  ;;  %v11538_v55 = vcombine.high %v537_v15, %v545_v51  ;;  %v633_v49 = vld [vmem:[%s18467_s1 + $0x1138] sm:$0xff]  ;;  %v11617_v51 = vcombine.low %v617_v37, %v625_v56 }
 0x313   :  { %6775 = vmatprep.subr.bf16.mxu0 %v11440_v57  ;;  %6939 = vmatprep.subr.bf16.mxu1 %v11442_v58  ;;  %v552_v57 = vld [vmem:[%s18467_s1 + $0xeb0] sm:$0xff]  ;;  %v641_v50 = vld [vmem:[%s18467_s1 + $0x1178] sm:$0xff] }
 0x314   :  { %v560_v58 = vld [vmem:[%s18467_s1 + $0xef0] sm:$0xff] }
 0x315   :  { %v11551_v7 = vcombine.low %v552_v57, %v560_v58 }
 0x316   :  { %6776 = vmatpush1.bf16.msra.mxu0 %v11439_v53  ;;  %6940 = vmatpush1.bf16.msra.mxu1 %v11441_v1  ;;  %v11552_v53 = vcombine.high %v552_v57, %v560_v58  ;;  %v11554_v1 = vcombine.high %v553_v60, %v561_v61  ;;  %v657_v57 = vld [vmem:[%s18467_s1 + $0x11f8] sm:$0xff]  ;;  %v11633_v60 = vcombine.low %v633_v49, %v641_v50 }
 0x317   :  { %6777 = vmatprep.subr.bf16.mxu0 %v11456_v2  ;;  %6941 = vmatprep.subr.bf16.mxu1 %v11458_v4  ;;  %v568_v2 = vld [vmem:[%s18467_s1 + $0xf30] sm:$0xff] }
 0x318   :  { %v576_v4 = vld [vmem:[%s18467_s1 + $0xf70] sm:$0xff] }
 0x319   :  { %v11567_v16 = vcombine.low %v568_v2, %v576_v4 }
 0x31a   :  { %6778 = vmatpush1.bf16.msra.mxu0 %v11455_v10  ;;  %6942 = vmatpush1.bf16.msra.mxu1 %v11457_v32  ;;  %v11568_v10 = vcombine.high %v568_v2, %v576_v4  ;;  %v11570_v32 = vcombine.high %v569_v5, %v577_v6 }
 0x31b   :  { %6779 = vmatprep.subr.bf16.mxu0 %v11472_v11  ;;  %6943 = vmatprep.subr.bf16.mxu1 %v11474_v13  ;;  %v584_v11 = vld [vmem:[%s18467_s1 + $0xfb0] sm:$0xff] }
 0x31c   :  { %v592_v13 = vld [vmem:[%s18467_s1 + $0xff0] sm:$0xff] }
 0x31d   :  { %v11583_v29 = vcombine.low %v584_v11, %v592_v13 }
 0x31e   :  { %6780 = vmatpush1.bf16.msra.mxu0 %v11471_v25  ;;  %6944 = vmatpush1.bf16.msra.mxu1 %v11473_v19  ;;  %v11584_v25 = vcombine.high %v584_v11, %v592_v13  ;;  %v11586_v19 = vcombine.high %v585_v59, %v593_v14 }
 0x31f   :  { %6781 = vmatprep.subr.bf16.mxu0 %v11488_v20  ;;  %6945 = vmatprep.subr.bf16.mxu1 %v11490_v24  ;;  %v600_v20 = vld [vmem:[%s18467_s1 + $0x1030] sm:$0xff] }
 0x320   :  { %v608_v24 = vld [vmem:[%s18467_s1 + $0x1070] sm:$0xff] }
 0x321   :  { %v11599_v40 = vcombine.low %v600_v20, %v608_v24 }
 0x322   :  { %6782 = vmatpush1.bf16.msra.mxu0 %v11487_v35  ;;  %6946 = vmatpush1.bf16.msra.mxu1 %v11489_v31  ;;  %v11600_v35 = vcombine.high %v600_v20, %v608_v24  ;;  %v11602_v31 = vcombine.high %v601_v26, %v609_v28 }
 0x323   :  { %6783 = vmatprep.subr.bf16.mxu0 %v11504_v34  ;;  %6947 = vmatprep.subr.bf16.mxu1 %v11506_v36  ;;  %v616_v34 = vld [vmem:[%s18467_s1 + $0x10b0] sm:$0xff] }
 0x324   :  { %v624_v36 = vld [vmem:[%s18467_s1 + $0x10f0] sm:$0xff] }
 0x325   :  { %v11615_v15 = vcombine.low %v616_v34, %v624_v36 }
 0x326   :  { %6784 = vmatpush1.bf16.msra.mxu0 %v11503_v45  ;;  %6948 = vmatpush1.bf16.msra.mxu1 %v11505_v46  ;;  %v11616_v45 = vcombine.high %v616_v34, %v624_v36  ;;  %v11618_v46 = vcombine.high %v617_v37, %v625_v56 }
 0x327   :  { %6785 = vmatprep.subr.bf16.mxu0 %v11520_v47  ;;  %6949 = vmatprep.subr.bf16.mxu1 %v11522_v48  ;;  %v632_v47 = vld [vmem:[%s18467_s1 + $0x1130] sm:$0xff] }
 0x328   :  { %v640_v48 = vld [vmem:[%s18467_s1 + $0x1170] sm:$0xff] }
 0x329   :  { %v11631_v58 = vcombine.low %v632_v47, %v640_v48 }
 0x32a   :  { %6786 = vmatpush1.bf16.msra.mxu0 %v11519_v54  ;;  %6950 = vmatpush1.bf16.msra.mxu1 %v11521_v23  ;;  %v11632_v54 = vcombine.high %v632_v47, %v640_v48  ;;  %v11634_v23 = vcombine.high %v633_v49, %v641_v50 }
 0x32b   :  { %6787 = vmatprep.subr.bf16.mxu0 %v11536_v9  ;;  %6951 = vmatprep.subr.bf16.mxu1 %v11538_v55  ;;  %v648_v9 = vld [vmem:[%s18467_s1 + $0x11b0] sm:$0xff] }
 0x32c   :  { %v656_v55 = vld [vmem:[%s18467_s1 + $0x11f0] sm:$0xff] }
 0x32d   :  { %v11648_v61 = vcombine.high %v648_v9, %v656_v55  ;;  %v11647_v2 = vcombine.low %v648_v9, %v656_v55 }
 0x32e   :  { %6788 = vmatpush1.bf16.msra.mxu0 %v11535_v62  ;;  %6952 = vmatpush1.bf16.msra.mxu1 %v11537_v0  ;;  %v664_v0 = vld [vmem:[%s18467_s1 + $0x1230] sm:$0xff] }
 0x32f   :  { %6789 = vmatprep.subr.bf16.mxu0 %v11552_v53  ;;  %6953 = vmatprep.subr.bf16.mxu1 %v11554_v1  ;;  %v672_v53 = vld [vmem:[%s18467_s1 + $0x1270] sm:$0xff]  ;;  %v673_v1 = vld [vmem:[%s18467_s1 + $0x1278] sm:$0xff] }
 0x330   :  { %v11664_v5 = vcombine.high %v664_v0, %v672_v53  ;;  %v11663_v11 = vcombine.low %v664_v0, %v672_v53 }
 0x332   :  { %6790 = vmatpush1.bf16.msra.mxu0 %v11551_v7  ;;  %6954 = vmatpush1.bf16.msra.mxu1 %v11553_v8  ;;  %v680_v7 = vld [vmem:[%s18467_s1 + $0x12b0] sm:$0xff] }
 0x333   :  { %6791 = vmatprep.subr.bf16.mxu0 %v11568_v10  ;;  %6955 = vmatprep.subr.bf16.mxu1 %v11570_v32  ;;  %v688_v8 = vld [vmem:[%s18467_s1 + $0x12f0] sm:$0xff]  ;;  %v681_v10 = vld [vmem:[%s18467_s1 + $0x12b8] sm:$0xff] }
 0x334   :  { %v689_v32 = vld [vmem:[%s18467_s1 + $0x12f8] sm:$0xff]  ;;  %v11680_v59 = vcombine.high %v680_v7, %v688_v8  ;;  %v11679_v20 = vcombine.low %v680_v7, %v688_v8 }
 0x335   :  { %v11682_v14 = vcombine.high %v681_v10, %v689_v32  ;;  %v11681_v24 = vcombine.low %v681_v10, %v689_v32 }
 0x336   :  { %6792 = vmatpush1.bf16.msra.mxu0 %v11567_v16  ;;  %6956 = vmatpush1.bf16.msra.mxu1 %v11569_v18  ;;  %v696_v16 = vld [vmem:[%s18467_s1 + $0x1330] sm:$0xff] }
 0x337   :  { %6793 = vmatprep.subr.bf16.mxu0 %v11584_v25  ;;  %6957 = vmatprep.subr.bf16.mxu1 %v11586_v19  ;;  %v704_v18 = vld [vmem:[%s18467_s1 + $0x1370] sm:$0xff]  ;;  %v697_v25 = vld [vmem:[%s18467_s1 + $0x1338] sm:$0xff] }
 0x338   :  { %v705_v19 = vld [vmem:[%s18467_s1 + $0x1378] sm:$0xff]  ;;  %v11696_v26 = vcombine.high %v696_v16, %v704_v18  ;;  %v11695_v34 = vcombine.low %v696_v16, %v704_v18 }
 0x339   :  { %v11698_v28 = vcombine.high %v697_v25, %v705_v19  ;;  %v11697_v36 = vcombine.low %v697_v25, %v705_v19 }
 0x33a   :  { %6794 = vmatpush1.bf16.msra.mxu0 %v11583_v29  ;;  %6958 = vmatpush1.bf16.msra.mxu1 %v11585_v30  ;;  %v712_v29 = vld [vmem:[%s18467_s1 + $0x13b0] sm:$0xff] }
 0x33b   :  { %6804 = vmatprep.subr.bf16.mxu0 %v11600_v35  ;;  %6968 = vmatprep.subr.bf16.mxu1 %v11602_v31  ;;  %v720_v30 = vld [vmem:[%s18467_s1 + $0x13f0] sm:$0xff]  ;;  %v713_v35 = vld [vmem:[%s18467_s1 + $0x13b8] sm:$0xff] }
 0x33c   :  { %v721_v31 = vld [vmem:[%s18467_s1 + $0x13f8] sm:$0xff]  ;;  %v11712_v37 = vcombine.high %v712_v29, %v720_v30  ;;  %v11711_v47 = vcombine.low %v712_v29, %v720_v30 }
 0x33d   :  { %6796 = vmatmul.mubr.bf16.vlgmr.msra.gmra.mrb[12].mxu0 %v14132_v43  ;;  %6960 = vmatmul.mubr.bf16.vlgmr.msra.gmra.mrb[12].mxu1 %v14132_v43  ;;  %v649_v43 = vld [vmem:[%s18467_s1 + $0x11b8] sm:$0xff]  ;;  %v11714_v56 = vcombine.high %v713_v35, %v721_v31  ;;  %v11713_v48 = vcombine.low %v713_v35, %v721_v31 }
 0x33e   :  { %6805 = vmatpush1.bf16.msra.mxu0 %v11599_v40  ;;  %6969 = vmatpush1.bf16.msra.mxu1 %v11601_v42  ;;  %v11650_v62 = vcombine.high %v649_v43, %v657_v57  ;;  %v11649_v4 = vcombine.low %v649_v43, %v657_v57  ;;  %v728_v40 = vld [vmem:[%s18467_s1 + $0x1430] sm:$0xff] }
 0x33f   :  { %6806 = vmatprep.subr.bf16.mxu0 %v11616_v45  ;;  %6970 = vmatprep.subr.bf16.mxu1 %v11618_v46  ;;  %v736_v42 = vld [vmem:[%s18467_s1 + $0x1470] sm:$0xff]  ;;  %v729_v45 = vld [vmem:[%s18467_s1 + $0x1438] sm:$0xff] }
 0x340   :  { %6836 = vmatprep.mubr.bf16.mxu0 %v14146_v52  ;;  %7000 = vmatprep.mubr.bf16.mxu1 %v14146_v52  ;;  %v665_v52 = vld [vmem:[%s18467_s1 + $0x1238] sm:$0xff]  ;;  %v11728_v49 = vcombine.high %v728_v40, %v736_v42  ;;  %v11727_v9 = vcombine.low %v728_v40, %v736_v42 }
 0x341   :  { %v11666_v6 = vcombine.high %v665_v52, %v673_v1  ;;  %v11665_v13 = vcombine.low %v665_v52, %v673_v1  ;;  %v737_v46 = vld [vmem:[%s18467_s1 + $0x1478] sm:$0xff] }
 0x342   :  { %6807 = vmatpush1.bf16.msra.mxu0 %v11615_v15  ;;  %6971 = vmatpush1.bf16.msra.mxu1 %v11617_v51  ;;  %v11730_v50 = vcombine.high %v729_v45, %v737_v46  ;;  %v744_v15 = vld [vmem:[%s18467_s1 + $0x14b0] sm:$0xff]  ;;  %v11729_v55 = vcombine.low %v729_v45, %v737_v46 }
 0x343   :  { %6808 = vmatprep.subr.bf16.mxu0 %v11632_v54  ;;  %6972 = vmatprep.subr.bf16.mxu1 %v11634_v23  ;;  %v752_v51 = vld [vmem:[%s18467_s1 + $0x14f0] sm:$0xff]  ;;  %v745_v54 = vld [vmem:[%s18467_s1 + $0x14b8] sm:$0xff] }
 0x344   :  { %v753_v23 = vld [vmem:[%s18467_s1 + $0x14f8] sm:$0xff]  ;;  %v11744_v43 = vcombine.high %v744_v15, %v752_v51  ;;  %v11743_v0 = vcombine.low %v744_v15, %v752_v51 }
 0x345   :  { %v11746_v57 = vcombine.high %v745_v54, %v753_v23  ;;  %v11745_v53 = vcombine.low %v745_v54, %v753_v23 }
 0x346   :  { %6809 = vmatpush1.bf16.msra.mxu0 %v11631_v58  ;;  %6973 = vmatpush1.bf16.msra.mxu1 %v11633_v60  ;;  %v760_v58 = vld [vmem:[%s18467_s1 + $0x1530] sm:$0xff] }
 0x347   :  { %6810 = vmatprep.subr.bf16.mxu0 %v11648_v61  ;;  %6974 = vmatprep.subr.bf16.mxu1 %v11650_v62  ;;  %v768_v60 = vld [vmem:[%s18467_s1 + $0x1570] sm:$0xff]  ;;  %v761_v61 = vld [vmem:[%s18467_s1 + $0x1538] sm:$0xff] }
 0x348   :  { %v769_v62 = vld [vmem:[%s18467_s1 + $0x1578] sm:$0xff]  ;;  %v11760_v52 = vcombine.high %v760_v58, %v768_v60  ;;  %v11759_v7 = vcombine.low %v760_v58, %v768_v60 }
 0x349   :  { %v11762_v1 = vcombine.high %v761_v61, %v769_v62  ;;  %v11761_v8 = vcombine.low %v761_v61, %v769_v62 }
 0x34a   :  { %6811 = vmatpush1.bf16.msra.mxu0 %v11647_v2  ;;  %6975 = vmatpush1.bf16.msra.mxu1 %v11649_v4  ;;  %v776_v2 = vld [vmem:[%s18467_s1 + $0x15b0] sm:$0xff] }
 0x34b   :  { %6812 = vmatprep.subr.bf16.mxu0 %v11664_v5  ;;  %6976 = vmatprep.subr.bf16.mxu1 %v11666_v6  ;;  %v784_v4 = vld [vmem:[%s18467_s1 + $0x15f0] sm:$0xff]  ;;  %v777_v5 = vld [vmem:[%s18467_s1 + $0x15b8] sm:$0xff] }
 0x34c   :  { %v785_v6 = vld [vmem:[%s18467_s1 + $0x15f8] sm:$0xff]  ;;  %v11776_v10 = vcombine.high %v776_v2, %v784_v4  ;;  %v11775_v16 = vcombine.low %v776_v2, %v784_v4 }
 0x34d   :  { %v11778_v32 = vcombine.high %v777_v5, %v785_v6  ;;  %v11777_v18 = vcombine.low %v777_v5, %v785_v6 }
 0x34e   :  { %6813 = vmatpush1.bf16.msra.mxu0 %v11663_v11  ;;  %6977 = vmatpush1.bf16.msra.mxu1 %v11665_v13  ;;  %v792_v11 = vld [vmem:[%s18467_s1 + $0x1630] sm:$0xff] }
 0x34f   :  { %6814 = vmatprep.subr.bf16.mxu0 %v11680_v59  ;;  %6978 = vmatprep.subr.bf16.mxu1 %v11682_v14  ;;  %v800_v13 = vld [vmem:[%s18467_s1 + $0x1670] sm:$0xff]  ;;  %v793_v59 = vld [vmem:[%s18467_s1 + $0x1638] sm:$0xff] }
 0x350   :  { %v801_v14 = vld [vmem:[%s18467_s1 + $0x1678] sm:$0xff]  ;;  %v11792_v25 = vcombine.high %v792_v11, %v800_v13  ;;  %v11791_v29 = vcombine.low %v792_v11, %v800_v13 }
 0x351   :  { %v11794_v19 = vcombine.high %v793_v59, %v801_v14  ;;  %v11793_v30 = vcombine.low %v793_v59, %v801_v14 }
 0x352   :  { %6815 = vmatpush1.bf16.msra.mxu0 %v11679_v20  ;;  %6979 = vmatpush1.bf16.msra.mxu1 %v11681_v24  ;;  %v808_v20 = vld [vmem:[%s18467_s1 + $0x16b0] sm:$0xff] }
 0x353   :  { %6816 = vmatprep.subr.bf16.mxu0 %v11696_v26  ;;  %6980 = vmatprep.subr.bf16.mxu1 %v11698_v28  ;;  %v816_v24 = vld [vmem:[%s18467_s1 + $0x16f0] sm:$0xff]  ;;  %v809_v26 = vld [vmem:[%s18467_s1 + $0x16b8] sm:$0xff] }
 0x354   :  { %v817_v28 = vld [vmem:[%s18467_s1 + $0x16f8] sm:$0xff]  ;;  %v11808_v35 = vcombine.high %v808_v20, %v816_v24  ;;  %v11807_v40 = vcombine.low %v808_v20, %v816_v24 }
 0x355   :  { %v11810_v31 = vcombine.high %v809_v26, %v817_v28  ;;  %v11809_v42 = vcombine.low %v809_v26, %v817_v28  ;;  %v920_v28 = vld [vmem:[%s18467_s1 + $0x1a30] sm:$0xff] }
 0x356   :  { %6817 = vmatpush1.bf16.msra.mxu0 %v11695_v34  ;;  %6981 = vmatpush1.bf16.msra.mxu1 %v11697_v36  ;;  %v824_v34 = vld [vmem:[%s18467_s1 + $0x1730] sm:$0xff] }
 0x357   :  { %6818 = vmatprep.subr.bf16.mxu0 %v11712_v37  ;;  %6982 = vmatprep.subr.bf16.mxu1 %v11714_v56  ;;  %v832_v36 = vld [vmem:[%s18467_s1 + $0x1770] sm:$0xff]  ;;  %v825_v37 = vld [vmem:[%s18467_s1 + $0x1738] sm:$0xff] }
 0x358   :  { %v833_v56 = vld [vmem:[%s18467_s1 + $0x1778] sm:$0xff]  ;;  %v11824_v45 = vcombine.high %v824_v34, %v832_v36  ;;  %v11823_v15 = vcombine.low %v824_v34, %v832_v36 }
 0x359   :  { %v11826_v46 = vcombine.high %v825_v37, %v833_v56  ;;  %v11825_v51 = vcombine.low %v825_v37, %v833_v56  ;;  %v936_v37 = vld [vmem:[%s18467_s1 + $0x1ab0] sm:$0xff] }
 0x35a   :  { %6819 = vmatpush1.bf16.msra.mxu0 %v11711_v47  ;;  %6983 = vmatpush1.bf16.msra.mxu1 %v11713_v48  ;;  %v840_v47 = vld [vmem:[%s18467_s1 + $0x17b0] sm:$0xff] }
 0x35b   :  { %6820 = vmatprep.subr.bf16.mxu0 %v11728_v49  ;;  %6984 = vmatprep.subr.bf16.mxu1 %v11730_v50  ;;  %v848_v48 = vld [vmem:[%s18467_s1 + $0x17f0] sm:$0xff]  ;;  %v841_v49 = vld [vmem:[%s18467_s1 + $0x17b8] sm:$0xff] }
 0x35c   :  { %v849_v50 = vld [vmem:[%s18467_s1 + $0x17f8] sm:$0xff]  ;;  %v11840_v54 = vcombine.high %v840_v47, %v848_v48  ;;  %v11839_v58 = vcombine.low %v840_v47, %v848_v48  ;;  %v944_v56 = vld [vmem:[%s18467_s1 + $0x1af0] sm:$0xff] }
 0x35d   :  { %v11842_v23 = vcombine.high %v841_v49, %v849_v50  ;;  %v11841_v60 = vcombine.low %v841_v49, %v849_v50  ;;  %v11936_v47 = vcombine.high %v936_v37, %v944_v56  ;;  %v952_v49 = vld [vmem:[%s18467_s1 + $0x1b30] sm:$0xff] }
 0x35e   :  { %6821 = vmatpush1.bf16.msra.mxu0 %v11727_v9  ;;  %6985 = vmatpush1.bf16.msra.mxu1 %v11729_v55  ;;  %v856_v9 = vld [vmem:[%s18467_s1 + $0x1830] sm:$0xff] }
 0x35f   :  { %6822 = vmatprep.subr.bf16.mxu0 %v11744_v43  ;;  %6986 = vmatprep.subr.bf16.mxu1 %v11746_v57  ;;  %v864_v55 = vld [vmem:[%s18467_s1 + $0x1870] sm:$0xff]  ;;  %v857_v43 = vld [vmem:[%s18467_s1 + $0x1838] sm:$0xff] }
 0x360   :  { %v865_v57 = vld [vmem:[%s18467_s1 + $0x1878] sm:$0xff]  ;;  %v11856_v61 = vcombine.high %v856_v9, %v864_v55  ;;  %v11855_v2 = vcombine.low %v856_v9, %v864_v55  ;;  %v960_v50 = vld [vmem:[%s18467_s1 + $0x1b70] sm:$0xff] }
 0x361   :  { %v11858_v62 = vcombine.high %v857_v43, %v865_v57  ;;  %v11857_v4 = vcombine.low %v857_v43, %v865_v57  ;;  %v11952_v9 = vcombine.high %v952_v49, %v960_v50  ;;  %v968_v57 = vld [vmem:[%s18467_s1 + $0x1bb0] sm:$0xff] }
 0x362   :  { %6823 = vmatpush1.bf16.msra.mxu0 %v11743_v0  ;;  %6987 = vmatpush1.bf16.msra.mxu1 %v11745_v53  ;;  %v872_v0 = vld [vmem:[%s18467_s1 + $0x18b0] sm:$0xff] }
 0x363   :  { %6824 = vmatprep.subr.bf16.mxu0 %v11760_v52  ;;  %6988 = vmatprep.subr.bf16.mxu1 %v11762_v1  ;;  %v880_v53 = vld [vmem:[%s18467_s1 + $0x18f0] sm:$0xff]  ;;  %v873_v52 = vld [vmem:[%s18467_s1 + $0x18b8] sm:$0xff] }
 0x364   :  { %v881_v1 = vld [vmem:[%s18467_s1 + $0x18f8] sm:$0xff]  ;;  %v11872_v5 = vcombine.high %v872_v0, %v880_v53  ;;  %v11871_v11 = vcombine.low %v872_v0, %v880_v53 }
 0x365   :  { %v11874_v6 = vcombine.high %v873_v52, %v881_v1  ;;  %v11873_v13 = vcombine.low %v873_v52, %v881_v1  ;;  %v977_v0 = vld [vmem:[%s18467_s1 + $0x1bf8] sm:$0xff]  ;;  %v11951_v1 = vcombine.low %v952_v49, %v960_v50  ;;  %v12848_v50 = vld [vmem:[%s18469_s3 + $0x44] ss:$16 sps:$4 sm:$0xff]  }
 0x366   :  { %6825 = vmatpush1.bf16.msra.mxu0 %v11759_v7  ;;  %6989 = vmatpush1.bf16.msra.mxu1 %v11761_v8  ;;  %v888_v7 = vld [vmem:[%s18467_s1 + $0x1930] sm:$0xff]  ;;  %v12843_v49 = vld [vmem:[%s18469_s3 + $0x28] ss:$16 sps:$4 sm:$0xff]  }
 0x367   :  { %6826 = vmatprep.subr.bf16.mxu0 %v11776_v10  ;;  %6990 = vmatprep.subr.bf16.mxu1 %v11778_v32  ;;  %v896_v8 = vld [vmem:[%s18467_s1 + $0x1970] sm:$0xff]  ;;  %v889_v10 = vld [vmem:[%s18467_s1 + $0x1938] sm:$0xff] }
 0x368   :  { %v897_v32 = vld [vmem:[%s18467_s1 + $0x1978] sm:$0xff]  ;;  %v11888_v59 = vcombine.high %v888_v7, %v896_v8 }
 0x369   :  { %v11890_v14 = vcombine.high %v889_v10, %v897_v32  ;;  %v11889_v20 = vcombine.low %v889_v10, %v897_v32  ;;  %v984_v10 = vld [vmem:[%s18467_s1 + $0x1c30] sm:$0xff] }
 0x36a   :  { %6827 = vmatpush1.bf16.msra.mxu0 %v11775_v16  ;;  %6991 = vmatpush1.bf16.msra.mxu1 %v11777_v18  ;;  %v904_v16 = vld [vmem:[%s18467_s1 + $0x19b0] sm:$0xff] }
 0x36b   :  { %6828 = vmatprep.subr.bf16.mxu0 %v11792_v25  ;;  %6992 = vmatprep.subr.bf16.mxu1 %v11794_v19  ;;  %v912_v18 = vld [vmem:[%s18467_s1 + $0x19f0] sm:$0xff]  ;;  %v913_v25 = vld [vmem:[%s18467_s1 + $0x19f8] sm:$0xff]  ;;  %v11887_v19 = vcombine.low %v888_v7, %v896_v8 }
 0x36c   :  { %v11904_v24 = vcombine.high %v904_v16, %v912_v18  ;;  %v992_v32 = vld [vmem:[%s18467_s1 + $0x1c70] sm:$0xff] }
 0x36e   :  { %6829 = vmatpush1.bf16.msra.mxu0 %v11791_v29  ;;  %6993 = vmatpush1.bf16.msra.mxu1 %v11793_v30  ;;  %v928_v29 = vld [vmem:[%s18467_s1 + $0x1a70] sm:$0xff]  ;;  %v929_v30 = vld [vmem:[%s18467_s1 + $0x1a78] sm:$0xff] }
 0x36f   :  { %6830 = vmatprep.subr.bf16.mxu0 %v11808_v35  ;;  %6994 = vmatprep.subr.bf16.mxu1 %v11810_v31  ;;  %v11903_v35 = vcombine.low %v904_v16, %v912_v18  ;;  %v11920_v34 = vcombine.high %v920_v28, %v928_v29 }
 0x372   :  { %6831 = vmatpush1.bf16.msra.mxu0 %v11807_v40  ;;  %6995 = vmatpush1.bf16.msra.mxu1 %v11809_v42  ;;  %v937_v40 = vld [vmem:[%s18467_s1 + $0x1ab8] sm:$0xff] }
 0x373   :  { %6832 = vmatprep.subr.bf16.mxu0 %v11824_v45  ;;  %6996 = vmatprep.subr.bf16.mxu1 %v11826_v46  ;;  %v945_v42 = vld [vmem:[%s18467_s1 + $0x1af8] sm:$0xff]  ;;  %v11919_v45 = vcombine.low %v920_v28, %v928_v29  ;;  %v11983_v29 = vcombine.low %v984_v10, %v992_v32 }
 0x374   :  { %v11938_v48 = vcombine.high %v937_v40, %v945_v42  ;;  %v1009_v28 = vld [vmem:[%s18467_s1 + $0x1cf8] sm:$0xff] }
 0x376   :  { %6833 = vmatpush1.bf16.msra.mxu0 %v11823_v15  ;;  %6997 = vmatpush1.bf16.msra.mxu1 %v11825_v51  ;;  %v953_v15 = vld [vmem:[%s18467_s1 + $0x1b38] sm:$0xff] }
 0x377   :  { %6834 = vmatprep.subr.bf16.mxu0 %v11840_v54  ;;  %6998 = vmatprep.subr.bf16.mxu1 %v11842_v23  ;;  %v961_v51 = vld [vmem:[%s18467_s1 + $0x1b78] sm:$0xff]  ;;  %v11935_v54 = vcombine.low %v936_v37, %v944_v56  ;;  %v11937_v23 = vcombine.low %v937_v40, %v945_v42  ;;  %v12836_v37 = vld [vmem:[%s18469_s3 + $0x4] ss:$16 sps:$4 sm:$0xff]  }
 0x378   :  { %v11954_v43 = vcombine.high %v953_v15, %v961_v51  ;;  %v12839_v56 = vld [vmem:[%s18469_s3 + $0xc] ss:$16 sps:$4 sm:$0xff]   ;;  %v12837_v42 = vld [vmem:[%s18469_s3 + $0x8] ss:$16 sps:$4 sm:$0xff]  }
 0x37a   :  { %6835 = vmatpush1.bf16.msra.mxu0 %v11839_v58  ;;  %6999 = vmatpush1.bf16.msra.mxu1 %v11841_v60  ;;  %v976_v58 = vld [vmem:[%s18467_s1 + $0x1bf0] sm:$0xff] }
 0x37b   :  { %6845 = vmatprep.subr.bf16.mxu0 %v11856_v61  ;;  %7009 = vmatprep.subr.bf16.mxu1 %v11858_v62  ;;  %v969_v62 = vld [vmem:[%s18467_s1 + $0x1bb8] sm:$0xff]  ;;  %v11967_v16 = vcombine.low %v968_v57, %v976_v58 }
 0x37c   :  { %v11970_v8 = vcombine.high %v969_v62, %v977_v0  ;;  %v11969_v18 = vcombine.low %v969_v62, %v977_v0  ;;  %v12858_v62 = vld [vmem:[%s18469_s3 + $0x80] ss:$16 sps:$4 sm:$0xff]   ;;  %v12861_v0 = vld [vmem:[%s18469_s3 + $0x88] ss:$16 sps:$4 sm:$0xff]  }
 0x37d   :  { %6837 = vmatmul.mubr.bf16.vlgmr.msra.gmra.mrb[12].mxu0 %v14341_v3  ;;  %7001 = vmatmul.mubr.bf16.vlgmr.msra.gmra.mrb[12].mxu1 %v14341_v3  ;;  %v905_v3 = vld [vmem:[%s18467_s1 + $0x19b8] sm:$0xff] }
 0x37e   :  { %6846 = vmatpush1.bf16.msra.mxu0 %v11855_v2  ;;  %7010 = vmatpush1.bf16.msra.mxu1 %v11857_v4  ;;  %v11906_v26 = vcombine.high %v905_v3, %v913_v25  ;;  %v11905_v31 = vcombine.low %v905_v3, %v913_v25  ;;  %v11984_v3 = vcombine.high %v984_v10, %v992_v32  ;;  %v12878_v10 = vld [vmem:[%s18469_s3 + $0xe4] ss:$16 sps:$4 sm:$0xff]   ;;  %v12881_v32 = vld [vmem:[%s18469_s3 + $0xec] ss:$16 sps:$4 sm:$0xff]  }
 0x37f   :  { %6847 = vmatprep.subr.bf16.mxu0 %v11872_v5  ;;  %7011 = vmatprep.subr.bf16.mxu1 %v11874_v6  ;;  %v11953_v5 = vcombine.low %v953_v15, %v961_v51  ;;  %v11968_v6 = vcombine.high %v968_v57, %v976_v58  ;;  %v12846_v15 = vld [vmem:[%s18469_s3 + $0x40] ss:$16 sps:$4 sm:$0xff]   ;;  %v12849_v51 = vld [vmem:[%s18469_s3 + $0x48] ss:$16 sps:$4 sm:$0xff]   ;;  %v12860_v57 = vld [vmem:[%s18469_s3 + $0x84] ss:$16 sps:$4 sm:$0xff]  }
 0x380   :  { %12009 = vmatprep.mubr.msk.bf16.mxu0 %vm5734_vm0, %v14355_v12  ;;  %12010 = vmatprep.mubr.msk.bf16.mxu1 %vm5734_vm0, %v14355_v12  ;;  %v921_v12 = vld [vmem:[%s18467_s1 + $0x1a38] sm:$0xff] }
 0x381   :  { %v11922_v36 = vcombine.high %v921_v12, %v929_v30  ;;  %v11921_v46 = vcombine.low %v921_v12, %v929_v30  ;;  %v12863_v58 = vld [vmem:[%s18469_s3 + $0x8c] ss:$16 sps:$4 sm:$0xff]  }
 0x382   :  { %6848 = vmatpush1.bf16.msra.mxu0 %v11871_v11  ;;  %7012 = vmatpush1.bf16.msra.mxu1 %v11873_v13  ;;  %v16600_v11 = vsub.s32 1, %v13740_v44  ;;  %v985_v13 = vld [vmem:[%s18467_s1 + $0x1c38] sm:$0xff] }
 0x383   :  { %6849 = vmatprep.subr.bf16.mxu0 %v11888_v59  ;;  %7013 = vmatprep.subr.bf16.mxu1 %v11890_v14  ;;  %v993_v59 = vld [vmem:[%s18467_s1 + $0x1c78] sm:$0xff]  ;;  %v16611_v14 = vld [vmem:[%s18468_s2] sm:$0xff] }
 0x384   :  { %v11986_v25 = vcombine.high %v985_v13, %v993_v59  ;;  %v11985_v12 = vcombine.low %v985_v13, %v993_v59  ;;  %v12876_v13 = vld [vmem:[%s18469_s3 + $0xe0] ss:$16 sps:$4 sm:$0xff]   ;;  %v12879_v59 = vld [vmem:[%s18469_s3 + $0xe8] ss:$16 sps:$4 sm:$0xff]  }
 0x386   :  { %6850 = vmatpush1.bf16.msra.mxu0 %v11887_v19  ;;  %7014 = vmatpush1.bf16.msra.mxu1 %v11889_v20  ;;  %v1000_v19 = vld [vmem:[%s18467_s1 + $0x1cb0] sm:$0xff] }
 0x387   :  { %6851 = vmatprep.subr.bf16.mxu0 %v11904_v24  ;;  %7015 = vmatprep.subr.bf16.mxu1 %v11906_v26  ;;  %v1008_v20 = vld [vmem:[%s18467_s1 + $0x1cf0] sm:$0xff]  ;;  %v1021_v24 = vrot.slane %v16611_v14, %v16600_v11  ;;  %v1001_v26 = vld [vmem:[%s18467_s1 + $0x1cb8] sm:$0xff] }
 0x388   :  { %v12000_v30 = vcombine.high %v1000_v19, %v1008_v20 }
 0x38a   :  { %6852 = vmatpush1.bf16.msra.mxu0 %v11903_v35  ;;  %7016 = vmatpush1.bf16.msra.mxu1 %v11905_v31  ;;  %v12002_v35 = vcombine.high %v1001_v26, %v1009_v28  ;;  %v12659_v31 = vadd.f32 %v15139_v22, %v1021_v24  ;;  %v12834_v22 = vld [vmem:[%s18469_s3] ss:$16 sps:$4 sm:$0xff]  }
 0x38b   :  { %6853 = vmatprep.subr.bf16.mxu0 %v11920_v34  ;;  %7017 = vmatprep.subr.bf16.mxu1 %v11922_v36  ;;  %v11999_v34 = vcombine.low %v1000_v19, %v1008_v20  ;;  %v12001_v36 = vcombine.low %v1001_v26, %v1009_v28  ;;  %v12890_v19 = vld [vmem:[%s18469_s3 + $0x124] ss:$16 sps:$4 sm:$0xff]   ;;  %v12893_v20 = vld [vmem:[%s18469_s3 + $0x12c] ss:$16 sps:$4 sm:$0xff]   ;;  %v12888_v24 = vld [vmem:[%s18469_s3 + $0x120] ss:$16 sps:$4 sm:$0xff]  }
 0x38c   :  { %v7051_v40 = vmax.f32 %v12659_v31, 0.0  ;;  %v12891_v26 = vld [vmem:[%s18469_s3 + $0x128] ss:$16 sps:$4 sm:$0xff]   ;;  %v12896_v28 = vld [vmem:[%s18469_s3 + $0x144] ss:$16 sps:$4 sm:$0xff]  }
 0x38d   :  { %v12905_v31 = vld [vmem:[%s18469_s3 + $0x16c] ss:$16 sps:$4 sm:$0xff]  }
 0x38e   :  { %6854 = vmatpush1.bf16.msra.mxu0 %v11919_v45  ;;  %7018 = vmatpush1.bf16.msra.mxu1 %v11921_v46  ;;  %v12842_v45 = vld [vmem:[%s18469_s3 + $0x24] ss:$16 sps:$4 sm:$0xff]   ;;  %v7067_v46 = vpack.c.bf16 %v7051_v40, %v7051_v40  ;;  %v12906_v40 = vld [vmem:[%s18469_s3 + $0x180] ss:$16 sps:$4 sm:$0xff]  }
 0x38f   :  { %6855 = vmatprep.subr.bf16.mxu0 %v11936_v47  ;;  %7019 = vmatprep.subr.bf16.mxu1 %v11938_v48  ;;  %v12845_v47 = vld [vmem:[%s18469_s3 + $0x2c] ss:$16 sps:$4 sm:$0xff]   ;;  %v12840_v48 = vld [vmem:[%s18469_s3 + $0x20] ss:$16 sps:$4 sm:$0xff]  }
 0x390   :  { %v16573_v55 = vpop.f32.mrb[8].mxu0  ;;  %v16581_v60 = vpop.f32.mrb[8].mxu1 }
 0x391   :  { %v16583_v61 = vpop.f32.mrb[9].mxu0  ;;  %v16591_v53 = vpop.f32.mrb[9].mxu1 }
 0x392   :  { %v6555_v52 = vpop.f32.mrb[10].mxu0  ;;  %6856 = vmatpush1.bf16.msra.mxu0 %v11935_v54  ;;  %v6719_v2 = vpop.f32.mrb[10].mxu1  ;;  %7020 = vmatpush1.bf16.msra.mxu1 %v11937_v23  ;;  %v12854_v54 = vld [vmem:[%s18469_s3 + $0x64] ss:$16 sps:$4 sm:$0xff]   ;;  %v12857_v23 = vld [vmem:[%s18469_s3 + $0x6c] ss:$16 sps:$4 sm:$0xff]  }
 0x393   :  { %v6556_v4 = vpop.f32.mrb[11].mxu0  ;;  %6857 = vmatprep.subr.bf16.mxu0 %v11952_v9  ;;  %v6720_v7 = vpop.f32.mrb[11].mxu1  ;;  %7021 = vmatprep.subr.bf16.mxu1 %v11954_v43  ;;  %v12852_v9 = vld [vmem:[%s18469_s3 + $0x60] ss:$16 sps:$4 sm:$0xff]   ;;  %v12855_v43 = vld [vmem:[%s18469_s3 + $0x68] ss:$16 sps:$4 sm:$0xff]  }
 0x394   :  { %v12866_v52 = vld [vmem:[%s18469_s3 + $0xa4] ss:$16 sps:$4 sm:$0xff]   ;;  %v12864_v2 = vld [vmem:[%s18469_s3 + $0xa0] ss:$16 sps:$4 sm:$0xff]   ;;  %v12867_v4 = vld [vmem:[%s18469_s3 + $0xa8] ss:$16 sps:$4 sm:$0xff]  }
 0x395   :  { %v12870_v7 = vld [vmem:[%s18469_s3 + $0xc0] ss:$16 sps:$4 sm:$0xff]  }
 0x396   :  { %6858 = vmatpush1.bf16.msra.mxu0 %v11951_v1  ;;  %7022 = vmatpush1.bf16.msra.mxu1 %v11953_v5  ;;  %v12869_v1 = vld [vmem:[%s18469_s3 + $0xac] ss:$16 sps:$4 sm:$0xff]   ;;  %v12872_v5 = vld [vmem:[%s18469_s3 + $0xc4] ss:$16 sps:$4 sm:$0xff]  }
 0x397   :  { %6859 = vmatprep.subr.bf16.mxu0 %v11968_v6  ;;  %7023 = vmatprep.subr.bf16.mxu1 %v11970_v8  ;;  %v12875_v6 = vld [vmem:[%s18469_s3 + $0xcc] ss:$16 sps:$4 sm:$0xff]   ;;  %v12873_v8 = vld [vmem:[%s18469_s3 + $0xc8] ss:$16 sps:$4 sm:$0xff]  }
 0x39a   :  { %6860 = vmatpush1.bf16.msra.mxu0 %v11967_v16  ;;  %7024 = vmatpush1.bf16.msra.mxu1 %v11969_v18  ;;  %v12884_v16 = vld [vmem:[%s18469_s3 + $0x104] ss:$16 sps:$4 sm:$0xff]   ;;  %v12887_v18 = vld [vmem:[%s18469_s3 + $0x10c] ss:$16 sps:$4 sm:$0xff]  }
 0x39b   :  { %6861 = vmatprep.subr.bf16.mxu0 %v11984_v3  ;;  %7025 = vmatprep.subr.bf16.mxu1 %v11986_v25  ;;  %v12882_v3 = vld [vmem:[%s18469_s3 + $0x100] ss:$16 sps:$4 sm:$0xff]   ;;  %v12885_v25 = vld [vmem:[%s18469_s3 + $0x108] ss:$16 sps:$4 sm:$0xff]  }
 0x39e   :  { %6862 = vmatpush1.bf16.msra.mxu0 %v11983_v29  ;;  %7026 = vmatpush1.bf16.msra.mxu1 %v11985_v12  ;;  %v12899_v29 = vld [vmem:[%s18469_s3 + $0x14c] ss:$16 sps:$4 sm:$0xff]   ;;  %v12894_v12 = vld [vmem:[%s18469_s3 + $0x140] ss:$16 sps:$4 sm:$0xff]  }
 0x39f   :  { %6863 = vmatprep.subr.bf16.mxu0 %v12000_v30  ;;  %7027 = vmatprep.subr.bf16.mxu1 %v12002_v35  ;;  %v12897_v30 = vld [vmem:[%s18469_s3 + $0x148] ss:$16 sps:$4 sm:$0xff]   ;;  %v12902_v35 = vld [vmem:[%s18469_s3 + $0x164] ss:$16 sps:$4 sm:$0xff]  }
 0x3a2   :  { %6864 = vmatpush1.bf16.msra.mxu0 %v11999_v34  ;;  %7028 = vmatpush1.bf16.msra.mxu1 %v12001_v36  ;;  %v12900_v34 = vld [vmem:[%s18469_s3 + $0x160] ss:$16 sps:$4 sm:$0xff]   ;;  %v12903_v36 = vld [vmem:[%s18469_s3 + $0x168] ss:$16 sps:$4 sm:$0xff]  }
 0x3a3   :  { %10176 = vmatprep.subr.bf16.mxu0 %v12836_v37  ;;  %10504 = vmatprep.subr.bf16.mxu1 %v12839_v56  ;;  %v12908_v37 = vld [vmem:[%s18469_s3 + $0x184] ss:$16 sps:$4 sm:$0xff]   ;;  %v12911_v56 = vld [vmem:[%s18469_s3 + $0x18c] ss:$16 sps:$4 sm:$0xff]  }
 0x3a5   :  { %6878 = vmatmul.mubr.bf16.vlgmr.msra.gmra.mrb[12].mxu0 %v14473_v63  ;;  %7042 = vmatmul.mubr.bf16.vlgmr.msra.gmra.mrb[12].mxu1 %v14473_v63  ;;  %v12851_v63 = vld [vmem:[%s18469_s3 + $0x4c] ss:$16 sps:$4 sm:$0xff]  }
 0x3a6   :  { %10177 = vmatpush1.bf16.msra.mxu0 %v12834_v22  ;;  %10208 = vmatprep.mubr.bf16.mxu0 %v7067_v46  ;;  %v16784_v22 = vsub.s32 0, %v13740_v44 }
 0x3a7   :  { %10505 = vmatpush1.bf16.msra.mxu1 %v12837_v42  ;;  %10536 = vmatprep.mubr.bf16.mxu1 %v7067_v46  ;;  %v12909_v42 = vld [vmem:[%s18469_s3 + $0x188] ss:$16 sps:$4 sm:$0xff]   ;;  %v12917_v46 = vld [vmem:[%s18469_s3 + $0x1ac] ss:$16 sps:$4 sm:$0xff]  }
 0x3a8   :  { %10178 = vmatprep.subr.bf16.mxu0 %v12842_v45  ;;  %10506 = vmatprep.subr.bf16.mxu1 %v12845_v47  ;;  %v12914_v45 = vld [vmem:[%s18469_s3 + $0x1a4] ss:$16 sps:$4 sm:$0xff]   ;;  %v16796_v47 = vsub.s32 3, %v13740_v44 }
 0x3aa   :  { %10179 = vmatpush1.bf16.msra.mxu0 %v12840_v48  ;;  %v12912_v48 = vld [vmem:[%s18469_s3 + $0x1a0] ss:$16 sps:$4 sm:$0xff]  }
 0x3ab   :  { %10507 = vmatpush1.bf16.msra.mxu1 %v12843_v49  ;;  %10180 = vmatprep.subr.bf16.mxu0 %v12848_v50  ;;  %v1017_v49 = vrot.slane %v16611_v14, %v16784_v22  ;;  %v12915_v50 = vld [vmem:[%s18469_s3 + $0x1a8] ss:$16 sps:$4 sm:$0xff]  }
 0x3ac   :  { %10508 = vmatprep.subr.bf16.mxu1 %v12851_v63  ;;  %v12920_v63 = vld [vmem:[%s18469_s3 + $0x1c4] ss:$16 sps:$4 sm:$0xff]  }
 0x3ae   :  { %10181 = vmatpush1.bf16.msra.mxu0 %v12846_v15  ;;  %v12923_v15 = vld [vmem:[%s18469_s3 + $0x1cc] ss:$16 sps:$4 sm:$0xff]  }
 0x3af   :  { %10509 = vmatpush1.bf16.msra.mxu1 %v12849_v51  ;;  %10182 = vmatprep.subr.bf16.mxu0 %v12854_v54  ;;  %v1029_v51 = vrot.slane %v16611_v14, %v16796_v47  ;;  %v12918_v54 = vld [vmem:[%s18469_s3 + $0x1c0] ss:$16 sps:$4 sm:$0xff]  }
 0x3b0   :  { %10510 = vmatprep.subr.bf16.mxu1 %v12857_v23  ;;  %v12658_v23 = vadd.f32 %v15129_v17, %v1017_v49  ;;  %v12924_v17 = vld [vmem:[%s18469_s3 + $0x1e0] ss:$16 sps:$4 sm:$0xff]   ;;  %v12983_v49 = vld [vmem:[%s18469_s3 + $0x30c] ss:$16 sps:$4 sm:$0xff]  }
 0x3b2   :  { %10183 = vmatpush1.bf16.msra.mxu0 %v12852_v9  ;;  %v12921_v9 = vld [vmem:[%s18469_s3 + $0x1c8] ss:$16 sps:$4 sm:$0xff]  }
 0x3b3   :  { %10511 = vmatpush1.bf16.msra.mxu1 %v12855_v43  ;;  %10184 = vmatprep.subr.bf16.mxu0 %v12860_v57  ;;  %v12926_v43 = vld [vmem:[%s18469_s3 + $0x1e4] ss:$16 sps:$4 sm:$0xff]   ;;  %v12929_v57 = vld [vmem:[%s18469_s3 + $0x1ec] ss:$16 sps:$4 sm:$0xff]  }
 0x3b4   :  { %10512 = vmatprep.subr.bf16.mxu1 %v12863_v58  ;;  %v12661_v58 = vadd.f32 %v15147_v27, %v1029_v51  ;;  %v12935_v27 = vld [vmem:[%s18469_s3 + $0x20c] ss:$16 sps:$4 sm:$0xff]  }
 0x3b5   :  { %v12989_v51 = vld [vmem:[%s18469_s3 + $0x32c] ss:$16 sps:$4 sm:$0xff]  }
 0x3b6   :  { %10185 = vmatpush1.bf16.msra.mxu0 %v12858_v62  ;;  %v7050_v62 = vmax.f32 %v12658_v23, 0.0  ;;  %v12987_v23 = vld [vmem:[%s18469_s3 + $0x328] ss:$16 sps:$4 sm:$0xff]  }
 0x3b7   :  { %10513 = vmatpush1.bf16.msra.mxu1 %v12861_v0  ;;  %10186 = vmatprep.subr.bf16.mxu0 %v12866_v52  ;;  %v12927_v0 = vld [vmem:[%s18469_s3 + $0x1e8] ss:$16 sps:$4 sm:$0xff]   ;;  %v12932_v52 = vld [vmem:[%s18469_s3 + $0x204] ss:$16 sps:$4 sm:$0xff]  }
 0x3b8   :  { %10514 = vmatprep.subr.bf16.mxu1 %v12869_v1  ;;  %v7053_v1 = vmax.f32 %v12661_v58, 0.0  ;;  %v12993_v58 = vld [vmem:[%s18469_s3 + $0x348] ss:$16 sps:$4 sm:$0xff]  }
 0x3ba   :  { %10187 = vmatpush1.bf16.msra.mxu0 %v12864_v2  ;;  %v12930_v2 = vld [vmem:[%s18469_s3 + $0x200] ss:$16 sps:$4 sm:$0xff]  }
 0x3bb   :  { %10515 = vmatpush1.bf16.msra.mxu1 %v12867_v4  ;;  %10188 = vmatprep.subr.bf16.mxu0 %v12872_v5  ;;  %v7066_v4 = vpack.c.bf16 %v7050_v62, %v7050_v62  ;;  %v12933_v5 = vld [vmem:[%s18469_s3 + $0x208] ss:$16 sps:$4 sm:$0xff]   ;;  %v13001_v62 = vld [vmem:[%s18469_s3 + $0x36c] ss:$16 sps:$4 sm:$0xff]  }
 0x3bc   :  { %10516 = vmatprep.subr.bf16.mxu1 %v12875_v6  ;;  %v12938_v6 = vld [vmem:[%s18469_s3 + $0x224] ss:$16 sps:$4 sm:$0xff]  }
 0x3be   :  { %10189 = vmatpush1.bf16.msra.mxu0 %v12870_v7  ;;  %v7069_v7 = vpack.c.bf16 %v7053_v1, %v7053_v1  ;;  %v13007_v1 = vld [vmem:[%s18469_s3 + $0x38c] ss:$16 sps:$4 sm:$0xff]  }
 0x3bf   :  { %10517 = vmatpush1.bf16.msra.mxu1 %v12873_v8  ;;  %10190 = vmatprep.subr.bf16.mxu0 %v12878_v10  ;;  %v12941_v8 = vld [vmem:[%s18469_s3 + $0x22c] ss:$16 sps:$4 sm:$0xff]   ;;  %v12936_v10 = vld [vmem:[%s18469_s3 + $0x220] ss:$16 sps:$4 sm:$0xff]  }
 0x3c0   :  { %10518 = vmatprep.subr.bf16.mxu1 %v12881_v32  ;;  %v12939_v32 = vld [vmem:[%s18469_s3 + $0x228] ss:$16 sps:$4 sm:$0xff]  }
 0x3c2   :  { %10191 = vmatpush1.bf16.msra.mxu0 %v12876_v13  ;;  %v12944_v13 = vld [vmem:[%s18469_s3 + $0x244] ss:$16 sps:$4 sm:$0xff]  }
 0x3c3   :  { %10519 = vmatpush1.bf16.msra.mxu1 %v12879_v59  ;;  %10192 = vmatprep.subr.bf16.mxu0 %v12884_v16  ;;  %v12947_v59 = vld [vmem:[%s18469_s3 + $0x24c] ss:$16 sps:$4 sm:$0xff]   ;;  %v12942_v16 = vld [vmem:[%s18469_s3 + $0x240] ss:$16 sps:$4 sm:$0xff]  }
 0x3c4   :  { %10520 = vmatprep.subr.bf16.mxu1 %v12887_v18  ;;  %v12945_v18 = vld [vmem:[%s18469_s3 + $0x248] ss:$16 sps:$4 sm:$0xff]  }
 0x3c6   :  { %10193 = vmatpush1.bf16.msra.mxu0 %v12882_v3  ;;  %v12950_v3 = vld [vmem:[%s18469_s3 + $0x264] ss:$16 sps:$4 sm:$0xff]  }
 0x3c7   :  { %10521 = vmatpush1.bf16.msra.mxu1 %v12885_v25  ;;  %10194 = vmatprep.subr.bf16.mxu0 %v12890_v19  ;;  %v12953_v25 = vld [vmem:[%s18469_s3 + $0x26c] ss:$16 sps:$4 sm:$0xff]   ;;  %v12948_v19 = vld [vmem:[%s18469_s3 + $0x260] ss:$16 sps:$4 sm:$0xff]  }
 0x3c8   :  { %10522 = vmatprep.subr.bf16.mxu1 %v12893_v20  ;;  %v12951_v20 = vld [vmem:[%s18469_s3 + $0x268] ss:$16 sps:$4 sm:$0xff]  }
 0x3ca   :  { %10195 = vmatpush1.bf16.msra.mxu0 %v12888_v24  ;;  %v12956_v24 = vld [vmem:[%s18469_s3 + $0x284] ss:$16 sps:$4 sm:$0xff]  }
 0x3cb   :  { %10523 = vmatpush1.bf16.msra.mxu1 %v12891_v26  ;;  %10196 = vmatprep.subr.bf16.mxu0 %v12896_v28  ;;  %v12959_v26 = vld [vmem:[%s18469_s3 + $0x28c] ss:$16 sps:$4 sm:$0xff]   ;;  %v12954_v28 = vld [vmem:[%s18469_s3 + $0x280] ss:$16 sps:$4 sm:$0xff]  }
 0x3cc   :  { %10524 = vmatprep.subr.bf16.mxu1 %v12899_v29  ;;  %v12957_v29 = vld [vmem:[%s18469_s3 + $0x288] ss:$16 sps:$4 sm:$0xff]  }
 0x3ce   :  { %10197 = vmatpush1.bf16.msra.mxu0 %v12894_v12  ;;  %v12962_v12 = vld [vmem:[%s18469_s3 + $0x2a4] ss:$16 sps:$4 sm:$0xff]  }
 0x3cf   :  { %10525 = vmatpush1.bf16.msra.mxu1 %v12897_v30  ;;  %10198 = vmatprep.subr.bf16.mxu0 %v12902_v35  ;;  %v12965_v30 = vld [vmem:[%s18469_s3 + $0x2ac] ss:$16 sps:$4 sm:$0xff]   ;;  %v12960_v35 = vld [vmem:[%s18469_s3 + $0x2a0] ss:$16 sps:$4 sm:$0xff]  }
 0x3d0   :  { %10526 = vmatprep.subr.bf16.mxu1 %v12905_v31  ;;  %v12963_v31 = vld [vmem:[%s18469_s3 + $0x2a8] ss:$16 sps:$4 sm:$0xff]  }
 0x3d2   :  { %10199 = vmatpush1.bf16.msra.mxu0 %v12900_v34  ;;  %v12968_v34 = vld [vmem:[%s18469_s3 + $0x2c4] ss:$16 sps:$4 sm:$0xff]  }
 0x3d3   :  { %10527 = vmatpush1.bf16.msra.mxu1 %v12903_v36  ;;  %10200 = vmatprep.subr.bf16.mxu0 %v12908_v37  ;;  %v12971_v36 = vld [vmem:[%s18469_s3 + $0x2cc] ss:$16 sps:$4 sm:$0xff]   ;;  %v12966_v37 = vld [vmem:[%s18469_s3 + $0x2c0] ss:$16 sps:$4 sm:$0xff]  }
 0x3d4   :  { %10528 = vmatprep.subr.bf16.mxu1 %v12911_v56  ;;  %v12969_v56 = vld [vmem:[%s18469_s3 + $0x2c8] ss:$16 sps:$4 sm:$0xff]  }
 0x3d6   :  { %10201 = vmatpush1.bf16.msra.mxu0 %v12906_v40  ;;  %v12974_v40 = vld [vmem:[%s18469_s3 + $0x2e4] ss:$16 sps:$4 sm:$0xff]  }
 0x3d7   :  { %10529 = vmatpush1.bf16.msra.mxu1 %v12909_v42  ;;  %10202 = vmatprep.subr.bf16.mxu0 %v12914_v45  ;;  %v12977_v42 = vld [vmem:[%s18469_s3 + $0x2ec] ss:$16 sps:$4 sm:$0xff]   ;;  %v12972_v45 = vld [vmem:[%s18469_s3 + $0x2e0] ss:$16 sps:$4 sm:$0xff]  }
 0x3d8   :  { %10530 = vmatprep.subr.bf16.mxu1 %v12917_v46  ;;  %v12975_v46 = vld [vmem:[%s18469_s3 + $0x2e8] ss:$16 sps:$4 sm:$0xff]  }
 0x3da   :  { %10203 = vmatpush1.bf16.msra.mxu0 %v12912_v48  ;;  %v12980_v48 = vld [vmem:[%s18469_s3 + $0x304] ss:$16 sps:$4 sm:$0xff]  }
 0x3db   :  { %10531 = vmatpush1.bf16.msra.mxu1 %v12915_v50  ;;  %10204 = vmatprep.subr.bf16.mxu0 %v12920_v63  ;;  %v12978_v50 = vld [vmem:[%s18469_s3 + $0x300] ss:$16 sps:$4 sm:$0xff]   ;;  %v12981_v63 = vld [vmem:[%s18469_s3 + $0x308] ss:$16 sps:$4 sm:$0xff]  }
 0x3dc   :  { %10532 = vmatprep.subr.bf16.mxu1 %v12923_v15  ;;  %v12986_v15 = vld [vmem:[%s18469_s3 + $0x324] ss:$16 sps:$4 sm:$0xff]  }
 0x3de   :  { %10205 = vmatpush1.bf16.msra.mxu0 %v12918_v54  ;;  %v12984_v54 = vld [vmem:[%s18469_s3 + $0x320] ss:$16 sps:$4 sm:$0xff]  }
 0x3df   :  { %10533 = vmatpush1.bf16.msra.mxu1 %v12921_v9  ;;  %10206 = vmatprep.subr.bf16.mxu0 %v12926_v43  ;;  %v12992_v9 = vld [vmem:[%s18469_s3 + $0x344] ss:$16 sps:$4 sm:$0xff]   ;;  %v12995_v43 = vld [vmem:[%s18469_s3 + $0x34c] ss:$16 sps:$4 sm:$0xff]  }
 0x3e0   :  { %10534 = vmatprep.subr.bf16.mxu1 %v12929_v57  ;;  %v12990_v57 = vld [vmem:[%s18469_s3 + $0x340] ss:$16 sps:$4 sm:$0xff]  }
 0x3e2   :  { %10207 = vmatpush1.bf16.msra.mxu0 %v12924_v17  ;;  %v12998_v17 = vld [vmem:[%s18469_s3 + $0x364] ss:$16 sps:$4 sm:$0xff]  }
 0x3e3   :  { %10535 = vmatpush1.bf16.msra.mxu1 %v12927_v0  ;;  %10217 = vmatprep.subr.bf16.mxu0 %v12932_v52  ;;  %v12996_v0 = vld [vmem:[%s18469_s3 + $0x360] ss:$16 sps:$4 sm:$0xff]   ;;  %v12999_v52 = vld [vmem:[%s18469_s3 + $0x368] ss:$16 sps:$4 sm:$0xff]  }
 0x3e4   :  { %10545 = vmatprep.subr.bf16.mxu1 %v12935_v27  ;;  %v13004_v27 = vld [vmem:[%s18469_s3 + $0x384] ss:$16 sps:$4 sm:$0xff]  }
 0x3e5   :  { %10209 = vmatmul.mubr.bf16.vlgmr.msra.gmra.mrb[16].mxu0 %v7066_v4 }
 0x3e6   :  { %10537 = vmatmul.mubr.bf16.vlgmr.msra.gmra.mrb[16].mxu1 %v7066_v4  ;;  %10218 = vmatpush1.bf16.msra.mxu0 %v12930_v2  ;;  %v13002_v2 = vld [vmem:[%s18469_s3 + $0x380] ss:$16 sps:$4 sm:$0xff]   ;;  %v16988_v4 = vsub.s32 2, %v13740_v44 }
 0x3e7   :  { %10249 = vmatprep.mubr.bf16.mxu0 %v7069_v7  ;;  %10546 = vmatpush1.bf16.msra.mxu1 %v12933_v5  ;;  %v13005_v5 = vld [vmem:[%s18469_s3 + $0x388] ss:$16 sps:$4 sm:$0xff]  }
 0x3e8   :  { %10577 = vmatprep.mubr.bf16.mxu1 %v7069_v7  ;;  %10219 = vmatprep.subr.bf16.mxu0 %v12938_v6  ;;  %v13010_v6 = vld [vmem:[%s18469_s3 + $0x3a4] ss:$16 sps:$4 sm:$0xff]   ;;  %v13013_v7 = vld [vmem:[%s18469_s3 + $0x3ac] ss:$16 sps:$4 sm:$0xff]  }
 0x3e9   :  { %10547 = vmatprep.subr.bf16.mxu1 %v12941_v8  ;;  %v1036_v8 = vsub.s32 5, %v13740_v44 }
 0x3ea   :  { %10220 = vmatpush1.bf16.msra.mxu0 %v12936_v10  ;;  %v13008_v10 = vld [vmem:[%s18469_s3 + $0x3a0] ss:$16 sps:$4 sm:$0xff]  }
 0x3eb   :  { %10548 = vmatpush1.bf16.msra.mxu1 %v12939_v32  ;;  %10221 = vmatprep.subr.bf16.mxu0 %v12944_v13  ;;  %v1025_v32 = vrot.slane %v16611_v14, %v16988_v4  ;;  %v13011_v13 = vld [vmem:[%s18469_s3 + $0x3a8] ss:$16 sps:$4 sm:$0xff]  }
 0x3ec   :  { %10549 = vmatprep.subr.bf16.mxu1 %v12947_v59  ;;  %v13016_v59 = vld [vmem:[%s18469_s3 + $0x3c4] ss:$16 sps:$4 sm:$0xff]  }
 0x3ee   :  { %10222 = vmatpush1.bf16.msra.mxu0 %v12942_v16  ;;  %v13019_v16 = vld [vmem:[%s18469_s3 + $0x3cc] ss:$16 sps:$4 sm:$0xff]  }
 0x3ef   :  { %10550 = vmatpush1.bf16.msra.mxu1 %v12945_v18  ;;  %10223 = vmatprep.subr.bf16.mxu0 %v12950_v3  ;;  %v1037_v18 = vrot.slane %v16611_v14, %v1036_v8  ;;  %v13014_v3 = vld [vmem:[%s18469_s3 + $0x3c0] ss:$16 sps:$4 sm:$0xff]  }
 0x3f0   :  { %10551 = vmatprep.subr.bf16.mxu1 %v12953_v25  ;;  %v12660_v25 = vadd.f32 %v15137_v21, %v1025_v32  ;;  %v13020_v21 = vld [vmem:[%s18469_s3 + $0x3e0] ss:$16 sps:$4 sm:$0xff]   ;;  %v13079_v32 = vld [vmem:[%s18469_s3 + $0x50c] ss:$16 sps:$4 sm:$0xff]  }
 0x3f2   :  { %10224 = vmatpush1.bf16.msra.mxu0 %v12948_v19  ;;  %v13017_v19 = vld [vmem:[%s18469_s3 + $0x3c8] ss:$16 sps:$4 sm:$0xff]  }
 0x3f3   :  { %10552 = vmatpush1.bf16.msra.mxu1 %v12951_v20  ;;  %10225 = vmatprep.subr.bf16.mxu0 %v12956_v24  ;;  %v13022_v20 = vld [vmem:[%s18469_s3 + $0x3e4] ss:$16 sps:$4 sm:$0xff]   ;;  %v13025_v24 = vld [vmem:[%s18469_s3 + $0x3ec] ss:$16 sps:$4 sm:$0xff]  }
 0x3f4   :  { %10553 = vmatprep.subr.bf16.mxu1 %v12959_v26  ;;  %v12663_v26 = vadd.f32 %v15861_v39, %v1037_v18  ;;  %v13031_v39 = vld [vmem:[%s18469_s3 + $0x40c] ss:$16 sps:$4 sm:$0xff]  }
 0x3f5   :  { %v13085_v18 = vld [vmem:[%s18469_s3 + $0x52c] ss:$16 sps:$4 sm:$0xff]  }
 0x3f6   :  { %10226 = vmatpush1.bf16.msra.mxu0 %v12954_v28  ;;  %v7052_v28 = vmax.f32 %v12660_v25, 0.0  ;;  %v13083_v25 = vld [vmem:[%s18469_s3 + $0x528] ss:$16 sps:$4 sm:$0xff]  }
 0x3f7   :  { %10554 = vmatpush1.bf16.msra.mxu1 %v12957_v29  ;;  %10227 = vmatprep.subr.bf16.mxu0 %v12962_v12  ;;  %v13023_v29 = vld [vmem:[%s18469_s3 + $0x3e8] ss:$16 sps:$4 sm:$0xff]   ;;  %v13028_v12 = vld [vmem:[%s18469_s3 + $0x404] ss:$16 sps:$4 sm:$0xff]  }
 0x3f8   :  { %10555 = vmatprep.subr.bf16.mxu1 %v12965_v30  ;;  %v7055_v30 = vmax.f32 %v12663_v26, 0.0  ;;  %v13089_v26 = vld [vmem:[%s18469_s3 + $0x548] ss:$16 sps:$4 sm:$0xff]  }
 0x3fa   :  { %10228 = vmatpush1.bf16.msra.mxu0 %v12960_v35  ;;  %v13026_v35 = vld [vmem:[%s18469_s3 + $0x400] ss:$16 sps:$4 sm:$0xff]  }
 0x3fb   :  { %10556 = vmatpush1.bf16.msra.mxu1 %v12963_v31  ;;  %10229 = vmatprep.subr.bf16.mxu0 %v12968_v34  ;;  %v7068_v31 = vpack.c.bf16 %v7052_v28, %v7052_v28  ;;  %v13029_v34 = vld [vmem:[%s18469_s3 + $0x408] ss:$16 sps:$4 sm:$0xff]   ;;  %v13097_v28 = vld [vmem:[%s18469_s3 + $0x56c] ss:$16 sps:$4 sm:$0xff]  }
 0x3fc   :  { %10557 = vmatprep.subr.bf16.mxu1 %v12971_v36  ;;  %v13034_v36 = vld [vmem:[%s18469_s3 + $0x424] ss:$16 sps:$4 sm:$0xff]  }
 0x3fe   :  { %10230 = vmatpush1.bf16.msra.mxu0 %v12966_v37  ;;  %v7071_v37 = vpack.c.bf16 %v7055_v30, %v7055_v30  ;;  %v13103_v30 = vld [vmem:[%s18469_s3 + $0x58c] ss:$16 sps:$4 sm:$0xff]  }
 0x3ff   :  { %10558 = vmatpush1.bf16.msra.mxu1 %v12969_v56  ;;  %10231 = vmatprep.subr.bf16.mxu0 %v12974_v40  ;;  %v13037_v56 = vld [vmem:[%s18469_s3 + $0x42c] ss:$16 sps:$4 sm:$0xff]   ;;  %v13032_v40 = vld [vmem:[%s18469_s3 + $0x420] ss:$16 sps:$4 sm:$0xff]  }
 0x400   :  { %10559 = vmatprep.subr.bf16.mxu1 %v12977_v42  ;;  %v13035_v42 = vld [vmem:[%s18469_s3 + $0x428] ss:$16 sps:$4 sm:$0xff]  }
 0x402   :  { %10232 = vmatpush1.bf16.msra.mxu0 %v12972_v45  ;;  %v13040_v45 = vld [vmem:[%s18469_s3 + $0x444] ss:$16 sps:$4 sm:$0xff]  }
 0x403   :  { %10560 = vmatpush1.bf16.msra.mxu1 %v12975_v46  ;;  %10233 = vmatprep.subr.bf16.mxu0 %v12980_v48  ;;  %v13043_v46 = vld [vmem:[%s18469_s3 + $0x44c] ss:$16 sps:$4 sm:$0xff]   ;;  %v13038_v48 = vld [vmem:[%s18469_s3 + $0x440] ss:$16 sps:$4 sm:$0xff]  }
 0x404   :  { %10561 = vmatprep.subr.bf16.mxu1 %v12983_v49  ;;  %v13041_v49 = vld [vmem:[%s18469_s3 + $0x448] ss:$16 sps:$4 sm:$0xff]  }
 0x406   :  { %10234 = vmatpush1.bf16.msra.mxu0 %v12978_v50  ;;  %v13046_v50 = vld [vmem:[%s18469_s3 + $0x464] ss:$16 sps:$4 sm:$0xff]  }
 0x407   :  { %10562 = vmatpush1.bf16.msra.mxu1 %v12981_v63  ;;  %10235 = vmatprep.subr.bf16.mxu0 %v12986_v15  ;;  %v13049_v63 = vld [vmem:[%s18469_s3 + $0x46c] ss:$16 sps:$4 sm:$0xff]   ;;  %v13044_v15 = vld [vmem:[%s18469_s3 + $0x460] ss:$16 sps:$4 sm:$0xff]  }
 0x408   :  { %10563 = vmatprep.subr.bf16.mxu1 %v12989_v51  ;;  %v13047_v51 = vld [vmem:[%s18469_s3 + $0x468] ss:$16 sps:$4 sm:$0xff]  }
 0x40a   :  { %10236 = vmatpush1.bf16.msra.mxu0 %v12984_v54  ;;  %v13052_v54 = vld [vmem:[%s18469_s3 + $0x484] ss:$16 sps:$4 sm:$0xff]  }
 0x40b   :  { %10564 = vmatpush1.bf16.msra.mxu1 %v12987_v23  ;;  %10237 = vmatprep.subr.bf16.mxu0 %v12992_v9  ;;  %v13055_v23 = vld [vmem:[%s18469_s3 + $0x48c] ss:$16 sps:$4 sm:$0xff]   ;;  %v13050_v9 = vld [vmem:[%s18469_s3 + $0x480] ss:$16 sps:$4 sm:$0xff]  }
 0x40c   :  { %10565 = vmatprep.subr.bf16.mxu1 %v12995_v43  ;;  %v13053_v43 = vld [vmem:[%s18469_s3 + $0x488] ss:$16 sps:$4 sm:$0xff]  }
 0x40e   :  { %10238 = vmatpush1.bf16.msra.mxu0 %v12990_v57  ;;  %v13058_v57 = vld [vmem:[%s18469_s3 + $0x4a4] ss:$16 sps:$4 sm:$0xff]  }
 0x40f   :  { %10566 = vmatpush1.bf16.msra.mxu1 %v12993_v58  ;;  %10239 = vmatprep.subr.bf16.mxu0 %v12998_v17  ;;  %v13061_v58 = vld [vmem:[%s18469_s3 + $0x4ac] ss:$16 sps:$4 sm:$0xff]   ;;  %v13056_v17 = vld [vmem:[%s18469_s3 + $0x4a0] ss:$16 sps:$4 sm:$0xff]  }
 0x410   :  { %10567 = vmatprep.subr.bf16.mxu1 %v13001_v62  ;;  %v13059_v62 = vld [vmem:[%s18469_s3 + $0x4a8] ss:$16 sps:$4 sm:$0xff]  }
 0x412   :  { %10240 = vmatpush1.bf16.msra.mxu0 %v12996_v0  ;;  %v13064_v0 = vld [vmem:[%s18469_s3 + $0x4c4] ss:$16 sps:$4 sm:$0xff]  }
 0x413   :  { %10568 = vmatpush1.bf16.msra.mxu1 %v12999_v52  ;;  %10241 = vmatprep.subr.bf16.mxu0 %v13004_v27  ;;  %v13067_v52 = vld [vmem:[%s18469_s3 + $0x4cc] ss:$16 sps:$4 sm:$0xff]   ;;  %v13062_v27 = vld [vmem:[%s18469_s3 + $0x4c0] ss:$16 sps:$4 sm:$0xff]  }
 0x414   :  { %10569 = vmatprep.subr.bf16.mxu1 %v13007_v1  ;;  %v13065_v1 = vld [vmem:[%s18469_s3 + $0x4c8] ss:$16 sps:$4 sm:$0xff]  }
 0x416   :  { %10242 = vmatpush1.bf16.msra.mxu0 %v13002_v2  ;;  %v13070_v2 = vld [vmem:[%s18469_s3 + $0x4e4] ss:$16 sps:$4 sm:$0xff]  }
 0x417   :  { %10570 = vmatpush1.bf16.msra.mxu1 %v13005_v5  ;;  %10243 = vmatprep.subr.bf16.mxu0 %v13010_v6  ;;  %v13073_v5 = vld [vmem:[%s18469_s3 + $0x4ec] ss:$16 sps:$4 sm:$0xff]   ;;  %v13068_v6 = vld [vmem:[%s18469_s3 + $0x4e0] ss:$16 sps:$4 sm:$0xff]  }
 0x418   :  { %10571 = vmatprep.subr.bf16.mxu1 %v13013_v7  ;;  %v13071_v7 = vld [vmem:[%s18469_s3 + $0x4e8] ss:$16 sps:$4 sm:$0xff]  }
 0x41a   :  { %10244 = vmatpush1.bf16.msra.mxu0 %v13008_v10  ;;  %v13076_v10 = vld [vmem:[%s18469_s3 + $0x504] ss:$16 sps:$4 sm:$0xff]  }
 0x41b   :  { %10572 = vmatpush1.bf16.msra.mxu1 %v13011_v13  ;;  %10245 = vmatprep.subr.bf16.mxu0 %v13016_v59  ;;  %v13074_v13 = vld [vmem:[%s18469_s3 + $0x500] ss:$16 sps:$4 sm:$0xff]   ;;  %v13077_v59 = vld [vmem:[%s18469_s3 + $0x508] ss:$16 sps:$4 sm:$0xff]  }
 0x41c   :  { %10573 = vmatprep.subr.bf16.mxu1 %v13019_v16  ;;  %v13082_v16 = vld [vmem:[%s18469_s3 + $0x524] ss:$16 sps:$4 sm:$0xff]  }
 0x41e   :  { %10246 = vmatpush1.bf16.msra.mxu0 %v13014_v3  ;;  %v13080_v3 = vld [vmem:[%s18469_s3 + $0x520] ss:$16 sps:$4 sm:$0xff]  }
 0x41f   :  { %10574 = vmatpush1.bf16.msra.mxu1 %v13017_v19  ;;  %10247 = vmatprep.subr.bf16.mxu0 %v13022_v20  ;;  %v13088_v19 = vld [vmem:[%s18469_s3 + $0x544] ss:$16 sps:$4 sm:$0xff]   ;;  %v13091_v20 = vld [vmem:[%s18469_s3 + $0x54c] ss:$16 sps:$4 sm:$0xff]  }
 0x420   :  { %10575 = vmatprep.subr.bf16.mxu1 %v13025_v24  ;;  %v13086_v24 = vld [vmem:[%s18469_s3 + $0x540] ss:$16 sps:$4 sm:$0xff]  }
 0x422   :  { %10248 = vmatpush1.bf16.msra.mxu0 %v13020_v21  ;;  %v13094_v21 = vld [vmem:[%s18469_s3 + $0x564] ss:$16 sps:$4 sm:$0xff]  }
 0x423   :  { %10576 = vmatpush1.bf16.msra.mxu1 %v13023_v29  ;;  %10258 = vmatprep.subr.bf16.mxu0 %v13028_v12  ;;  %v13092_v29 = vld [vmem:[%s18469_s3 + $0x560] ss:$16 sps:$4 sm:$0xff]   ;;  %v13095_v12 = vld [vmem:[%s18469_s3 + $0x568] ss:$16 sps:$4 sm:$0xff]  }
 0x424   :  { %10586 = vmatprep.subr.bf16.mxu1 %v13031_v39  ;;  %v13100_v39 = vld [vmem:[%s18469_s3 + $0x584] ss:$16 sps:$4 sm:$0xff]  }
 0x425   :  { %10250 = vmatmul.mubr.bf16.vlgmr.msra.gmra.mrb[16].mxu0 %v7068_v31 }
 0x426   :  { %10578 = vmatmul.mubr.bf16.vlgmr.msra.gmra.mrb[16].mxu1 %v7068_v31  ;;  %10259 = vmatpush1.bf16.msra.mxu0 %v13026_v35  ;;  %v13098_v35 = vld [vmem:[%s18469_s3 + $0x580] ss:$16 sps:$4 sm:$0xff]   ;;  %v1032_v31 = vsub.s32 4, %v13740_v44 }
 0x427   :  { %10290 = vmatprep.mubr.bf16.mxu0 %v7071_v37  ;;  %10587 = vmatpush1.bf16.msra.mxu1 %v13029_v34  ;;  %v13101_v34 = vld [vmem:[%s18469_s3 + $0x588] ss:$16 sps:$4 sm:$0xff]  }
 0x428   :  { %10618 = vmatprep.mubr.bf16.mxu1 %v7071_v37  ;;  %10260 = vmatprep.subr.bf16.mxu0 %v13034_v36  ;;  %v13106_v36 = vld [vmem:[%s18469_s3 + $0x5a4] ss:$16 sps:$4 sm:$0xff]   ;;  %v13109_v37 = vld [vmem:[%s18469_s3 + $0x5ac] ss:$16 sps:$4 sm:$0xff]  }
 0x429   :  { %10588 = vmatprep.subr.bf16.mxu1 %v13037_v56  ;;  %v1044_v56 = vsub.s32 7, %v13740_v44 }
 0x42a   :  { %10261 = vmatpush1.bf16.msra.mxu0 %v13032_v40  ;;  %v13104_v40 = vld [vmem:[%s18469_s3 + $0x5a0] ss:$16 sps:$4 sm:$0xff]  }
 0x42b   :  { %10589 = vmatpush1.bf16.msra.mxu1 %v13035_v42  ;;  %10262 = vmatprep.subr.bf16.mxu0 %v13040_v45  ;;  %v1033_v42 = vrot.slane %v16611_v14, %v1032_v31  ;;  %v13107_v45 = vld [vmem:[%s18469_s3 + $0x5a8] ss:$16 sps:$4 sm:$0xff]  }
 0x42c   :  { %10590 = vmatprep.subr.bf16.mxu1 %v13043_v46  ;;  %v13112_v46 = vld [vmem:[%s18469_s3 + $0x5c4] ss:$16 sps:$4 sm:$0xff]  }
 0x42e   :  { %10263 = vmatpush1.bf16.msra.mxu0 %v13038_v48  ;;  %v13115_v48 = vld [vmem:[%s18469_s3 + $0x5cc] ss:$16 sps:$4 sm:$0xff]  }
 0x42f   :  { %10591 = vmatpush1.bf16.msra.mxu1 %v13041_v49  ;;  %10264 = vmatprep.subr.bf16.mxu0 %v13046_v50  ;;  %v1045_v49 = vrot.slane %v16611_v14, %v1044_v56  ;;  %v13110_v50 = vld [vmem:[%s18469_s3 + $0x5c0] ss:$16 sps:$4 sm:$0xff]   ;;  %v13121_v14 = vld [vmem:[%s18469_s3 + $0x5ec] ss:$16 sps:$4 sm:$0xff]  }
 0x430   :  { %10592 = vmatprep.subr.bf16.mxu1 %v13049_v63  ;;  %v12662_v63 = vadd.f32 %v15851_v33, %v1033_v42  ;;  %v13116_v33 = vld [vmem:[%s18469_s3 + $0x5e0] ss:$16 sps:$4 sm:$0xff]   ;;  %v13161_v42 = vld [vmem:[%s18469_s3 + $0x6c8] ss:$16 sps:$4 sm:$0xff]  }
 0x432   :  { %10265 = vmatpush1.bf16.msra.mxu0 %v13044_v15  ;;  %v13113_v15 = vld [vmem:[%s18469_s3 + $0x5c8] ss:$16 sps:$4 sm:$0xff]  }
 0x433   :  { %10593 = vmatpush1.bf16.msra.mxu1 %v13047_v51  ;;  %10266 = vmatprep.subr.bf16.mxu0 %v13052_v54  ;;  %v13118_v51 = vld [vmem:[%s18469_s3 + $0x5e4] ss:$16 sps:$4 sm:$0xff]   ;;  %v12665_v54 = vadd.f32 %v15869_v41, %v1045_v49  ;;  %v13127_v41 = vld [vmem:[%s18469_s3 + $0x60c] ss:$16 sps:$4 sm:$0xff]   ;;  %v13164_v49 = vld [vmem:[%s18469_s3 + $0x6e0] ss:$16 sps:$4 sm:$0xff]  }
 0x434   :  { %10594 = vmatprep.subr.bf16.mxu1 %v13055_v23  ;;  %v7054_v23 = vmax.f32 %v12662_v63, 0.0  ;;  %v13172_v63 = vld [vmem:[%s18469_s3 + $0x704] ss:$16 sps:$4 sm:$0xff]  }
 0x436   :  { %10267 = vmatpush1.bf16.msra.mxu0 %v13050_v9  ;;  %v13119_v9 = vld [vmem:[%s18469_s3 + $0x5e8] ss:$16 sps:$4 sm:$0xff]  }
 0x437   :  { %10595 = vmatpush1.bf16.msra.mxu1 %v13053_v43  ;;  %10268 = vmatprep.subr.bf16.mxu0 %v13058_v57  ;;  %v13124_v43 = vld [vmem:[%s18469_s3 + $0x604] ss:$16 sps:$4 sm:$0xff]   ;;  %v7057_v57 = vmax.f32 %v12665_v54, 0.0 }
 0x438   :  { %10596 = vmatprep.subr.bf16.mxu1 %v13061_v58  ;;  %v13122_v58 = vld [vmem:[%s18469_s3 + $0x600] ss:$16 sps:$4 sm:$0xff]   ;;  %v13178_v54 = vld [vmem:[%s18469_s3 + $0x724] ss:$16 sps:$4 sm:$0xff]  }
 0x43a   :  { %10269 = vmatpush1.bf16.msra.mxu0 %v13056_v17  ;;  %v7070_v17 = vpack.c.bf16 %v7054_v23, %v7054_v23  ;;  %v13176_v23 = vld [vmem:[%s18469_s3 + $0x720] ss:$16 sps:$4 sm:$0xff]  }
 0x43b   :  { %10597 = vmatpush1.bf16.msra.mxu1 %v13059_v62  ;;  %10270 = vmatprep.subr.bf16.mxu0 %v13064_v0  ;;  %v13125_v62 = vld [vmem:[%s18469_s3 + $0x608] ss:$16 sps:$4 sm:$0xff]   ;;  %v13130_v0 = vld [vmem:[%s18469_s3 + $0x624] ss:$16 sps:$4 sm:$0xff]  }
 0x43c   :  { %10598 = vmatprep.subr.bf16.mxu1 %v13067_v52  ;;  %v7073_v52 = vpack.c.bf16 %v7057_v57, %v7057_v57  ;;  %v13182_v57 = vld [vmem:[%s18469_s3 + $0x740] ss:$16 sps:$4 sm:$0xff]  }
 0x43e   :  { %10271 = vmatpush1.bf16.msra.mxu0 %v13062_v27  ;;  %v13133_v27 = vld [vmem:[%s18469_s3 + $0x62c] ss:$16 sps:$4 sm:$0xff]  }
 0x43f   :  { %10599 = vmatpush1.bf16.msra.mxu1 %v13065_v1  ;;  %10272 = vmatprep.subr.bf16.mxu0 %v13070_v2  ;;  %v13128_v1 = vld [vmem:[%s18469_s3 + $0x620] ss:$16 sps:$4 sm:$0xff]   ;;  %v13131_v2 = vld [vmem:[%s18469_s3 + $0x628] ss:$16 sps:$4 sm:$0xff]  }
 0x440   :  { %10600 = vmatprep.subr.bf16.mxu1 %v13073_v5  ;;  %v13136_v5 = vld [vmem:[%s18469_s3 + $0x644] ss:$16 sps:$4 sm:$0xff]  }
 0x442   :  { %10273 = vmatpush1.bf16.msra.mxu0 %v13068_v6  ;;  %v13139_v6 = vld [vmem:[%s18469_s3 + $0x64c] ss:$16 sps:$4 sm:$0xff]  }
 0x443   :  { %10601 = vmatpush1.bf16.msra.mxu1 %v13071_v7  ;;  %10274 = vmatprep.subr.bf16.mxu0 %v13076_v10  ;;  %v13134_v7 = vld [vmem:[%s18469_s3 + $0x640] ss:$16 sps:$4 sm:$0xff]   ;;  %v13137_v10 = vld [vmem:[%s18469_s3 + $0x648] ss:$16 sps:$4 sm:$0xff]  }
 0x444   :  { %10602 = vmatprep.subr.bf16.mxu1 %v13079_v32  ;;  %v13142_v32 = vld [vmem:[%s18469_s3 + $0x664] ss:$16 sps:$4 sm:$0xff]  }
 0x446   :  { %10275 = vmatpush1.bf16.msra.mxu0 %v13074_v13  ;;  %v13145_v13 = vld [vmem:[%s18469_s3 + $0x66c] ss:$16 sps:$4 sm:$0xff]  }
 0x447   :  { %10603 = vmatpush1.bf16.msra.mxu1 %v13077_v59  ;;  %10276 = vmatprep.subr.bf16.mxu0 %v13082_v16  ;;  %v13140_v59 = vld [vmem:[%s18469_s3 + $0x660] ss:$16 sps:$4 sm:$0xff]   ;;  %v13143_v16 = vld [vmem:[%s18469_s3 + $0x668] ss:$16 sps:$4 sm:$0xff]  }
 0x448   :  { %10604 = vmatprep.subr.bf16.mxu1 %v13085_v18  ;;  %v13148_v18 = vld [vmem:[%s18469_s3 + $0x684] ss:$16 sps:$4 sm:$0xff]  }
 0x44a   :  { %10277 = vmatpush1.bf16.msra.mxu0 %v13080_v3  ;;  %v13151_v3 = vld [vmem:[%s18469_s3 + $0x68c] ss:$16 sps:$4 sm:$0xff]  }
 0x44b   :  { %10605 = vmatpush1.bf16.msra.mxu1 %v13083_v25  ;;  %10278 = vmatprep.subr.bf16.mxu0 %v13088_v19  ;;  %v13146_v25 = vld [vmem:[%s18469_s3 + $0x680] ss:$16 sps:$4 sm:$0xff]   ;;  %v13149_v19 = vld [vmem:[%s18469_s3 + $0x688] ss:$16 sps:$4 sm:$0xff]  }
 0x44c   :  { %10606 = vmatprep.subr.bf16.mxu1 %v13091_v20  ;;  %v13154_v20 = vld [vmem:[%s18469_s3 + $0x6a4] ss:$16 sps:$4 sm:$0xff]  }
 0x44e   :  { %10279 = vmatpush1.bf16.msra.mxu0 %v13086_v24  ;;  %v13157_v24 = vld [vmem:[%s18469_s3 + $0x6ac] ss:$16 sps:$4 sm:$0xff]  }
 0x44f   :  { %10607 = vmatpush1.bf16.msra.mxu1 %v13089_v26  ;;  %10280 = vmatprep.subr.bf16.mxu0 %v13094_v21  ;;  %v13152_v26 = vld [vmem:[%s18469_s3 + $0x6a0] ss:$16 sps:$4 sm:$0xff]   ;;  %v13155_v21 = vld [vmem:[%s18469_s3 + $0x6a8] ss:$16 sps:$4 sm:$0xff]  }
 0x450   :  { %10608 = vmatprep.subr.bf16.mxu1 %v13097_v28  ;;  %v13160_v28 = vld [vmem:[%s18469_s3 + $0x6c4] ss:$16 sps:$4 sm:$0xff]  }
 0x452   :  { %10281 = vmatpush1.bf16.msra.mxu0 %v13092_v29 }
 0x453   :  { %10609 = vmatpush1.bf16.msra.mxu1 %v13095_v12  ;;  %10282 = vmatprep.subr.bf16.mxu0 %v13100_v39  ;;  %v13163_v12 = vld [vmem:[%s18469_s3 + $0x6cc] ss:$16 sps:$4 sm:$0xff]  }
 0x454   :  { %10610 = vmatprep.subr.bf16.mxu1 %v13103_v30 }
 0x456   :  { %10283 = vmatpush1.bf16.msra.mxu0 %v13098_v35 }
 0x457   :  { %10611 = vmatpush1.bf16.msra.mxu1 %v13101_v34  ;;  %10284 = vmatprep.subr.bf16.mxu0 %v13106_v36  ;;  %v13158_v36 = vld [vmem:[%s18469_s3 + $0x6c0] ss:$16 sps:$4 sm:$0xff]  }
 0x458   :  { %10612 = vmatprep.subr.bf16.mxu1 %v13109_v37 }
 0x45a   :  { %10285 = vmatpush1.bf16.msra.mxu0 %v13104_v40 }
 0x45b   :  { %10613 = vmatpush1.bf16.msra.mxu1 %v13107_v45  ;;  %10286 = vmatprep.subr.bf16.mxu0 %v13112_v46  ;;  %v13166_v45 = vld [vmem:[%s18469_s3 + $0x6e4] ss:$16 sps:$4 sm:$0xff]  }
 0x45c   :  { %10614 = vmatprep.subr.bf16.mxu1 %v13115_v48  ;;  %v13169_v48 = vld [vmem:[%s18469_s3 + $0x6ec] ss:$16 sps:$4 sm:$0xff]  }
 0x45e   :  { %10287 = vmatpush1.bf16.msra.mxu0 %v13110_v50  ;;  %v13167_v50 = vld [vmem:[%s18469_s3 + $0x6e8] ss:$16 sps:$4 sm:$0xff]  }
 0x45f   :  { %10615 = vmatpush1.bf16.msra.mxu1 %v13113_v15  ;;  %10288 = vmatprep.subr.bf16.mxu0 %v13118_v51  ;;  %v13175_v15 = vld [vmem:[%s18469_s3 + $0x70c] ss:$16 sps:$4 sm:$0xff]   ;;  %v13170_v51 = vld [vmem:[%s18469_s3 + $0x700] ss:$16 sps:$4 sm:$0xff]  }
 0x460   :  { %10616 = vmatprep.subr.bf16.mxu1 %v13121_v14  ;;  %v13173_v14 = vld [vmem:[%s18469_s3 + $0x708] ss:$16 sps:$4 sm:$0xff]  }
 0x462   :  { %10289 = vmatpush1.bf16.msra.mxu0 %v13116_v33  ;;  %v13181_v33 = vld [vmem:[%s18469_s3 + $0x72c] ss:$16 sps:$4 sm:$0xff]  }
 0x463   :  { %10617 = vmatpush1.bf16.msra.mxu1 %v13119_v9  ;;  %10299 = vmatprep.subr.bf16.mxu0 %v13124_v43  ;;  %v13179_v9 = vld [vmem:[%s18469_s3 + $0x728] ss:$16 sps:$4 sm:$0xff]   ;;  %v13184_v43 = vld [vmem:[%s18469_s3 + $0x744] ss:$16 sps:$4 sm:$0xff]  }
 0x464   :  { %10627 = vmatprep.subr.bf16.mxu1 %v13127_v41  ;;  %v13187_v41 = vld [vmem:[%s18469_s3 + $0x74c] ss:$16 sps:$4 sm:$0xff]  }
 0x465   :  { %10291 = vmatmul.mubr.bf16.vlgmr.msra.gmra.mrb[16].mxu0 %v7070_v17 }
 0x466   :  { %10619 = vmatmul.mubr.bf16.vlgmr.msra.gmra.mrb[16].mxu1 %v7070_v17  ;;  %10300 = vmatpush1.bf16.msra.mxu0 %v13122_v58  ;;  %v13185_v58 = vld [vmem:[%s18469_s3 + $0x748] ss:$16 sps:$4 sm:$0xff]   ;;  %v13190_v17 = vld [vmem:[%s18469_s3 + $0x764] ss:$16 sps:$4 sm:$0xff]  }
 0x467   :  { %10331 = vmatprep.mubr.bf16.mxu0 %v7073_v52  ;;  %10628 = vmatpush1.bf16.msra.mxu1 %v13125_v62  ;;  %v13193_v62 = vld [vmem:[%s18469_s3 + $0x76c] ss:$16 sps:$4 sm:$0xff]  }
 0x468   :  { %10659 = vmatprep.mubr.bf16.mxu1 %v7073_v52  ;;  %10301 = vmatprep.subr.bf16.mxu0 %v13130_v0  ;;  %v13188_v0 = vld [vmem:[%s18469_s3 + $0x760] ss:$16 sps:$4 sm:$0xff]   ;;  %v13191_v52 = vld [vmem:[%s18469_s3 + $0x768] ss:$16 sps:$4 sm:$0xff]  }
 0x469   :  { %10629 = vmatprep.subr.bf16.mxu1 %v13133_v27  ;;  %v13196_v27 = vld [vmem:[%s18469_s3 + $0x784] ss:$16 sps:$4 sm:$0xff]  }
 0x46a   :  { %10302 = vmatpush1.bf16.msra.mxu0 %v13128_v1  ;;  %v13199_v1 = vld [vmem:[%s18469_s3 + $0x78c] ss:$16 sps:$4 sm:$0xff]  }
 0x46b   :  { %10630 = vmatpush1.bf16.msra.mxu1 %v13131_v2  ;;  %10303 = vmatprep.subr.bf16.mxu0 %v13136_v5  ;;  %v13194_v2 = vld [vmem:[%s18469_s3 + $0x780] ss:$16 sps:$4 sm:$0xff]   ;;  %v1040_v5 = vsub.s32 6, %v13740_v44 }
 0x46c   :  { %10631 = vmatprep.subr.bf16.mxu1 %v13139_v6  ;;  %v13197_v6 = vld [vmem:[%s18469_s3 + $0x788] ss:$16 sps:$4 sm:$0xff]   ;;  %v13590_v44 = vld [vmem:[%s18469_s3 + $0xfc0] ss:$16 sps:$4 sm:$0xff]  }
 0x46e   :  { %10304 = vmatpush1.bf16.msra.mxu0 %v13134_v7  ;;  %v13202_v7 = vld [vmem:[%s18469_s3 + $0x7a4] ss:$16 sps:$4 sm:$0xff]  }
 0x46f   :  { %10632 = vmatpush1.bf16.msra.mxu1 %v13137_v10  ;;  %10305 = vmatprep.subr.bf16.mxu0 %v13142_v32  ;;  %v13205_v10 = vld [vmem:[%s18469_s3 + $0x7ac] ss:$16 sps:$4 sm:$0xff]  }
 0x470   :  { %10633 = vmatprep.subr.bf16.mxu1 %v13145_v13  ;;  %v17413_v32 = vld [vmem:[%s18468_s2 + $0x8] sm:$0xff]  ;;  %v13200_v13 = vld [vmem:[%s18469_s3 + $0x7a0] ss:$16 sps:$4 sm:$0xff]  }
 0x472   :  { %10306 = vmatpush1.bf16.msra.mxu0 %v13140_v59  ;;  %v13606_v59 = vld [vmem:[%s18468_s2] sm:$0xff] }
 0x473   :  { %10634 = vmatpush1.bf16.msra.mxu1 %v13143_v16  ;;  %10307 = vmatprep.subr.bf16.mxu0 %v13148_v18  ;;  %v1041_v16 = vrot.slane %v13606_v59, %v1040_v5  ;;  %v13203_v18 = vld [vmem:[%s18469_s3 + $0x7a8] ss:$16 sps:$4 sm:$0xff]   ;;  %v13265_v59 = vld [vmem:[%s18469_s3 + $0x8ec] ss:$16 sps:$4 sm:$0xff]  }
 0x474   :  { %10635 = vmatprep.subr.bf16.mxu1 %v13151_v3  ;;  %v13208_v3 = vld [vmem:[%s18469_s3 + $0x7c4] ss:$16 sps:$4 sm:$0xff]  }
 0x476   :  { %10308 = vmatpush1.bf16.msra.mxu0 %v13146_v25  ;;  %v13211_v25 = vld [vmem:[%s18469_s3 + $0x7cc] ss:$16 sps:$4 sm:$0xff]  }
 0x477   :  { %10636 = vmatpush1.bf16.msra.mxu1 %v13149_v19  ;;  %10309 = vmatprep.subr.bf16.mxu0 %v13154_v20  ;;  %v1053_v19 = vrot.slane %v17413_v32, %v16600_v11  ;;  %v13206_v20 = vld [vmem:[%s18469_s3 + $0x7c0] ss:$16 sps:$4 sm:$0xff]  }
 0x478   :  { %v17314_v29 = vpop.f32.mrb[12].mxu0  ;;  %10637 = vmatprep.subr.bf16.mxu1 %v13157_v24  ;;  %v17319_v39 = vpop.f32.mrb[12].mxu1  ;;  %v12664_v24 = vadd.f32 %v15859_v38, %v1041_v16  ;;  %v13212_v38 = vld [vmem:[%s18469_s3 + $0x7e0] ss:$16 sps:$4 sm:$0xff]  }
 0x479   :  { %v17321_v30 = vpop.f32.mrb[13].mxu0  ;;  %v17323_v35 = vpop.f32.mrb[13].mxu1  ;;  %v13260_v16 = vld [vmem:[%s18469_s3 + $0x8e0] ss:$16 sps:$4 sm:$0xff]  }
 0x47a   :  { %v6883_v34 = vpop.f32.mrb[14].mxu0  ;;  %10310 = vmatpush1.bf16.msra.mxu0 %v13152_v26  ;;  %v7047_v37 = vpop.f32.mrb[14].mxu1  ;;  %v13209_v26 = vld [vmem:[%s18469_s3 + $0x7c8] ss:$16 sps:$4 sm:$0xff]  }
 0x47b   :  { %10638 = vmatpush1.bf16.msra.mxu1 %v13155_v21  ;;  %v6884_v40 = vpop.f32.mrb[15].mxu0  ;;  %10311 = vmatprep.subr.bf16.mxu0 %v13160_v28  ;;  %v7048_v46 = vpop.f32.mrb[15].mxu1  ;;  %v13214_v21 = vld [vmem:[%s18469_s3 + $0x7e4] ss:$16 sps:$4 sm:$0xff]   ;;  %v13217_v28 = vld [vmem:[%s18469_s3 + $0x7ec] ss:$16 sps:$4 sm:$0xff]  }
 0x47c   :  { %10639 = vmatprep.subr.bf16.mxu1 %v13163_v12  ;;  %v12667_v12 = vadd.f32 %v16583_v61, %v1053_v19  ;;  %v7056_v34 = vmax.f32 %v12664_v24, 0.0  ;;  %v13220_v37 = vld [vmem:[%s18469_s3 + $0x804] ss:$16 sps:$4 sm:$0xff]   ;;  %v13223_v61 = vld [vmem:[%s18469_s3 + $0x80c] ss:$16 sps:$4 sm:$0xff]  }
 0x47d   :  { %v13221_v46 = vld [vmem:[%s18469_s3 + $0x808] ss:$16 sps:$4 sm:$0xff]   ;;  %v13266_v19 = vld [vmem:[%s18469_s3 + $0x900] ss:$16 sps:$4 sm:$0xff]   ;;  %v13274_v24 = vld [vmem:[%s18469_s3 + $0x924] ss:$16 sps:$4 sm:$0xff]  }
 0x47e   :  { %10312 = vmatpush1.bf16.msra.mxu0 %v13158_v36  ;;  %v13215_v36 = vld [vmem:[%s18469_s3 + $0x7e8] ss:$16 sps:$4 sm:$0xff]   ;;  %v7059_v40 = vmax.f32 %v12667_v12, 0.0  ;;  %v13280_v12 = vld [vmem:[%s18469_s3 + $0x944] ss:$16 sps:$4 sm:$0xff]  }
 0x47f   :  { %10640 = vmatpush1.bf16.msra.mxu1 %v13161_v42  ;;  %10313 = vmatprep.subr.bf16.mxu0 %v13166_v45  ;;  %v13218_v42 = vld [vmem:[%s18469_s3 + $0x800] ss:$16 sps:$4 sm:$0xff]   ;;  %v7072_v45 = vpack.c.bf16 %v7056_v34, %v7056_v34 }
 0x480   :  { %10641 = vmatprep.subr.bf16.mxu1 %v13169_v48  ;;  %v13226_v48 = vld [vmem:[%s18469_s3 + $0x824] ss:$16 sps:$4 sm:$0xff]   ;;  %v13278_v34 = vld [vmem:[%s18469_s3 + $0x940] ss:$16 sps:$4 sm:$0xff]  }
 0x482   :  { %10314 = vmatpush1.bf16.msra.mxu0 %v13164_v49  ;;  %v7075_v49 = vpack.c.bf16 %v7059_v40, %v7059_v40  ;;  %v13284_v40 = vld [vmem:[%s18469_s3 + $0x960] ss:$16 sps:$4 sm:$0xff]  }
 0x483   :  { %10642 = vmatpush1.bf16.msra.mxu1 %v13167_v50  ;;  %10315 = vmatprep.subr.bf16.mxu0 %v13172_v63  ;;  %v13229_v50 = vld [vmem:[%s18469_s3 + $0x82c] ss:$16 sps:$4 sm:$0xff]   ;;  %v13224_v63 = vld [vmem:[%s18469_s3 + $0x820] ss:$16 sps:$4 sm:$0xff]  }
 0x484   :  { %10643 = vmatprep.subr.bf16.mxu1 %v13175_v15  ;;  %v13227_v15 = vld [vmem:[%s18469_s3 + $0x828] ss:$16 sps:$4 sm:$0xff]  }
 0x486   :  { %10316 = vmatpush1.bf16.msra.mxu0 %v13170_v51  ;;  %v13232_v51 = vld [vmem:[%s18469_s3 + $0x844] ss:$16 sps:$4 sm:$0xff]  }
 0x487   :  { %10644 = vmatpush1.bf16.msra.mxu1 %v13173_v14  ;;  %10317 = vmatprep.subr.bf16.mxu0 %v13178_v54  ;;  %v13235_v14 = vld [vmem:[%s18469_s3 + $0x84c] ss:$16 sps:$4 sm:$0xff]   ;;  %v13230_v54 = vld [vmem:[%s18469_s3 + $0x840] ss:$16 sps:$4 sm:$0xff]  }
 0x488   :  { %10645 = vmatprep.subr.bf16.mxu1 %v13181_v33  ;;  %v13233_v33 = vld [vmem:[%s18469_s3 + $0x848] ss:$16 sps:$4 sm:$0xff]  }
 0x48a   :  { %10318 = vmatpush1.bf16.msra.mxu0 %v13176_v23  ;;  %v13238_v23 = vld [vmem:[%s18469_s3 + $0x864] ss:$16 sps:$4 sm:$0xff]  }
 0x48b   :  { %10646 = vmatpush1.bf16.msra.mxu1 %v13179_v9  ;;  %10319 = vmatprep.subr.bf16.mxu0 %v13184_v43  ;;  %v13241_v9 = vld [vmem:[%s18469_s3 + $0x86c] ss:$16 sps:$4 sm:$0xff]   ;;  %v13236_v43 = vld [vmem:[%s18469_s3 + $0x860] ss:$16 sps:$4 sm:$0xff]  }
 0x48c   :  { %10647 = vmatprep.subr.bf16.mxu1 %v13187_v41  ;;  %v13239_v41 = vld [vmem:[%s18469_s3 + $0x868] ss:$16 sps:$4 sm:$0xff]  }
 0x48e   :  { %10320 = vmatpush1.bf16.msra.mxu0 %v13182_v57  ;;  %v13244_v57 = vld [vmem:[%s18469_s3 + $0x884] ss:$16 sps:$4 sm:$0xff]  }
 0x48f   :  { %10648 = vmatpush1.bf16.msra.mxu1 %v13185_v58  ;;  %10321 = vmatprep.subr.bf16.mxu0 %v13190_v17  ;;  %v13247_v58 = vld [vmem:[%s18469_s3 + $0x88c] ss:$16 sps:$4 sm:$0xff]   ;;  %v13242_v17 = vld [vmem:[%s18469_s3 + $0x880] ss:$16 sps:$4 sm:$0xff]  }
 0x490   :  { %10649 = vmatprep.subr.bf16.mxu1 %v13193_v62  ;;  %v13245_v62 = vld [vmem:[%s18469_s3 + $0x888] ss:$16 sps:$4 sm:$0xff]  }
 0x492   :  { %10322 = vmatpush1.bf16.msra.mxu0 %v13188_v0  ;;  %v13250_v0 = vld [vmem:[%s18469_s3 + $0x8a4] ss:$16 sps:$4 sm:$0xff]  }
 0x493   :  { %10650 = vmatpush1.bf16.msra.mxu1 %v13191_v52  ;;  %10323 = vmatprep.subr.bf16.mxu0 %v13196_v27  ;;  %v13253_v52 = vld [vmem:[%s18469_s3 + $0x8ac] ss:$16 sps:$4 sm:$0xff]   ;;  %v13248_v27 = vld [vmem:[%s18469_s3 + $0x8a0] ss:$16 sps:$4 sm:$0xff]  }
 0x494   :  { %10651 = vmatprep.subr.bf16.mxu1 %v13199_v1  ;;  %v13251_v1 = vld [vmem:[%s18469_s3 + $0x8a8] ss:$16 sps:$4 sm:$0xff]  }
 0x496   :  { %10324 = vmatpush1.bf16.msra.mxu0 %v13194_v2  ;;  %v13256_v2 = vld [vmem:[%s18469_s3 + $0x8c4] ss:$16 sps:$4 sm:$0xff]  }
 0x497   :  { %10652 = vmatpush1.bf16.msra.mxu1 %v13197_v6  ;;  %10325 = vmatprep.subr.bf16.mxu0 %v13202_v7  ;;  %v13259_v6 = vld [vmem:[%s18469_s3 + $0x8cc] ss:$16 sps:$4 sm:$0xff]   ;;  %v13254_v7 = vld [vmem:[%s18469_s3 + $0x8c0] ss:$16 sps:$4 sm:$0xff]  }
 0x498   :  { %10653 = vmatprep.subr.bf16.mxu1 %v13205_v10  ;;  %v13257_v10 = vld [vmem:[%s18469_s3 + $0x8c8] ss:$16 sps:$4 sm:$0xff]  }
 0x49a   :  { %10326 = vmatpush1.bf16.msra.mxu0 %v13200_v13  ;;  %v13262_v13 = vld [vmem:[%s18469_s3 + $0x8e4] ss:$16 sps:$4 sm:$0xff]  }
 0x49b   :  { %10654 = vmatpush1.bf16.msra.mxu1 %v13203_v18  ;;  %10327 = vmatprep.subr.bf16.mxu0 %v13208_v3  ;;  %v13263_v18 = vld [vmem:[%s18469_s3 + $0x8e8] ss:$16 sps:$4 sm:$0xff]   ;;  %v13268_v3 = vld [vmem:[%s18469_s3 + $0x904] ss:$16 sps:$4 sm:$0xff]  }
 0x49c   :  { %10655 = vmatprep.subr.bf16.mxu1 %v13211_v25  ;;  %v13271_v25 = vld [vmem:[%s18469_s3 + $0x90c] ss:$16 sps:$4 sm:$0xff]  }
 0x49e   :  { %10328 = vmatpush1.bf16.msra.mxu0 %v13206_v20  ;;  %v13269_v20 = vld [vmem:[%s18469_s3 + $0x908] ss:$16 sps:$4 sm:$0xff]  }
 0x49f   :  { %10656 = vmatpush1.bf16.msra.mxu1 %v13209_v26  ;;  %10329 = vmatprep.subr.bf16.mxu0 %v13214_v21  ;;  %v13277_v26 = vld [vmem:[%s18469_s3 + $0x92c] ss:$16 sps:$4 sm:$0xff]   ;;  %v13272_v21 = vld [vmem:[%s18469_s3 + $0x920] ss:$16 sps:$4 sm:$0xff]  }
 0x4a0   :  { %10657 = vmatprep.subr.bf16.mxu1 %v13217_v28  ;;  %v13275_v28 = vld [vmem:[%s18469_s3 + $0x928] ss:$16 sps:$4 sm:$0xff]  }
 0x4a2   :  { %10330 = vmatpush1.bf16.msra.mxu0 %v13212_v38  ;;  %v13283_v38 = vld [vmem:[%s18469_s3 + $0x94c] ss:$16 sps:$4 sm:$0xff]  }
 0x4a3   :  { %10658 = vmatpush1.bf16.msra.mxu1 %v13215_v36  ;;  %10340 = vmatprep.subr.bf16.mxu0 %v13220_v37  ;;  %v13281_v36 = vld [vmem:[%s18469_s3 + $0x948] ss:$16 sps:$4 sm:$0xff]   ;;  %v13286_v37 = vld [vmem:[%s18469_s3 + $0x964] ss:$16 sps:$4 sm:$0xff]  }
 0x4a4   :  { %10668 = vmatprep.subr.bf16.mxu1 %v13223_v61  ;;  %v13289_v61 = vld [vmem:[%s18469_s3 + $0x96c] ss:$16 sps:$4 sm:$0xff]  }
 0x4a5   :  { %10332 = vmatmul.mubr.bf16.vlgmr.msra.gmra.mrb[16].mxu0 %v7072_v45 }
 0x4a6   :  { %10660 = vmatmul.mubr.bf16.vlgmr.msra.gmra.mrb[16].mxu1 %v7072_v45  ;;  %10341 = vmatpush1.bf16.msra.mxu0 %v13218_v42  ;;  %v13287_v42 = vld [vmem:[%s18469_s3 + $0x968] ss:$16 sps:$4 sm:$0xff]   ;;  %v13292_v45 = vld [vmem:[%s18469_s3 + $0x984] ss:$16 sps:$4 sm:$0xff]  }
 0x4a7   :  { %10372 = vmatprep.mubr.bf16.mxu0 %v7075_v49  ;;  %10669 = vmatpush1.bf16.msra.mxu1 %v13221_v46  ;;  %v13295_v46 = vld [vmem:[%s18469_s3 + $0x98c] ss:$16 sps:$4 sm:$0xff]  }
 0x4a8   :  { %10700 = vmatprep.mubr.bf16.mxu1 %v7075_v49  ;;  %10342 = vmatprep.subr.bf16.mxu0 %v13226_v48  ;;  %v13290_v48 = vld [vmem:[%s18469_s3 + $0x980] ss:$16 sps:$4 sm:$0xff]   ;;  %v13293_v49 = vld [vmem:[%s18469_s3 + $0x988] ss:$16 sps:$4 sm:$0xff]  }
 0x4a9   :  { %10670 = vmatprep.subr.bf16.mxu1 %v13229_v50  ;;  %v13298_v50 = vld [vmem:[%s18469_s3 + $0x9a4] ss:$16 sps:$4 sm:$0xff]  }
 0x4aa   :  { %10343 = vmatpush1.bf16.msra.mxu0 %v13224_v63  ;;  %v13301_v63 = vld [vmem:[%s18469_s3 + $0x9ac] ss:$16 sps:$4 sm:$0xff]  }
 0x4ab   :  { %10671 = vmatpush1.bf16.msra.mxu1 %v13227_v15  ;;  %10344 = vmatprep.subr.bf16.mxu0 %v13232_v51  ;;  %v13296_v15 = vld [vmem:[%s18469_s3 + $0x9a0] ss:$16 sps:$4 sm:$0xff]   ;;  %v1049_v51 = vrot.slane %v17413_v32, %v16784_v22 }
 0x4ac   :  { %10672 = vmatprep.subr.bf16.mxu1 %v13235_v14  ;;  %v13299_v14 = vld [vmem:[%s18469_s3 + $0x9a8] ss:$16 sps:$4 sm:$0xff]  }
 0x4ae   :  { %10345 = vmatpush1.bf16.msra.mxu0 %v13230_v54  ;;  %v13304_v54 = vld [vmem:[%s18469_s3 + $0x9c4] ss:$16 sps:$4 sm:$0xff]  }
 0x4af   :  { %10673 = vmatpush1.bf16.msra.mxu1 %v13233_v33  ;;  %10346 = vmatprep.subr.bf16.mxu0 %v13238_v23  ;;  %v13307_v33 = vld [vmem:[%s18469_s3 + $0x9cc] ss:$16 sps:$4 sm:$0xff]   ;;  %v1061_v23 = vrot.slane %v17413_v32, %v16796_v47 }
 0x4b0   :  { %10674 = vmatprep.subr.bf16.mxu1 %v13241_v9  ;;  %v13302_v9 = vld [vmem:[%s18469_s3 + $0x9c0] ss:$16 sps:$4 sm:$0xff]  }
 0x4b2   :  { %10347 = vmatpush1.bf16.msra.mxu0 %v13236_v43  ;;  %v12666_v43 = vadd.f32 %v16573_v55, %v1049_v51  ;;  %v13308_v55 = vld [vmem:[%s18469_s3 + $0x9e0] ss:$16 sps:$4 sm:$0xff]   ;;  %v13364_v51 = vld [vmem:[%s18469_s3 + $0xb04] ss:$16 sps:$4 sm:$0xff]  }
 0x4b3   :  { %10675 = vmatpush1.bf16.msra.mxu1 %v13239_v41  ;;  %10348 = vmatprep.subr.bf16.mxu0 %v13244_v57  ;;  %v13305_v41 = vld [vmem:[%s18469_s3 + $0x9c8] ss:$16 sps:$4 sm:$0xff]   ;;  %v13310_v57 = vld [vmem:[%s18469_s3 + $0x9e4] ss:$16 sps:$4 sm:$0xff]  }
 0x4b4   :  { %10676 = vmatprep.subr.bf16.mxu1 %v13247_v58  ;;  %v13313_v58 = vld [vmem:[%s18469_s3 + $0x9ec] ss:$16 sps:$4 sm:$0xff]  }
 0x4b6   :  { %10349 = vmatpush1.bf16.msra.mxu0 %v13242_v17  ;;  %v12669_v17 = vadd.f32 %v16591_v53, %v1061_v23  ;;  %v13319_v53 = vld [vmem:[%s18469_s3 + $0xa0c] ss:$16 sps:$4 sm:$0xff]   ;;  %v13370_v23 = vld [vmem:[%s18469_s3 + $0xb24] ss:$16 sps:$4 sm:$0xff]  }
 0x4b7   :  { %10677 = vmatpush1.bf16.msra.mxu1 %v13245_v62  ;;  %10350 = vmatprep.subr.bf16.mxu0 %v13250_v0  ;;  %v7058_v62 = vmax.f32 %v12666_v43, 0.0  ;;  %v13311_v0 = vld [vmem:[%s18469_s3 + $0x9e8] ss:$16 sps:$4 sm:$0xff]   ;;  %v13368_v43 = vld [vmem:[%s18469_s3 + $0xb20] ss:$16 sps:$4 sm:$0xff]  }
 0x4b8   :  { %10678 = vmatprep.subr.bf16.mxu1 %v13253_v52  ;;  %v13316_v52 = vld [vmem:[%s18469_s3 + $0xa04] ss:$16 sps:$4 sm:$0xff]  }
 0x4ba   :  { %10351 = vmatpush1.bf16.msra.mxu0 %v13248_v27  ;;  %v7061_v27 = vmax.f32 %v12669_v17, 0.0  ;;  %v13374_v17 = vld [vmem:[%s18469_s3 + $0xb40] ss:$16 sps:$4 sm:$0xff]  }
 0x4bb   :  { %10679 = vmatpush1.bf16.msra.mxu1 %v13251_v1  ;;  %10352 = vmatprep.subr.bf16.mxu0 %v13256_v2  ;;  %v13314_v1 = vld [vmem:[%s18469_s3 + $0xa00] ss:$16 sps:$4 sm:$0xff]   ;;  %v7074_v2 = vpack.c.bf16 %v7058_v62, %v7058_v62  ;;  %v13382_v62 = vld [vmem:[%s18469_s3 + $0xb64] ss:$16 sps:$4 sm:$0xff]  }
 0x4bc   :  { %10680 = vmatprep.subr.bf16.mxu1 %v13259_v6  ;;  %v13317_v6 = vld [vmem:[%s18469_s3 + $0xa08] ss:$16 sps:$4 sm:$0xff]  }
 0x4be   :  { %10353 = vmatpush1.bf16.msra.mxu0 %v13254_v7  ;;  %v13322_v7 = vld [vmem:[%s18469_s3 + $0xa24] ss:$16 sps:$4 sm:$0xff]  }
 0x4bf   :  { %10681 = vmatpush1.bf16.msra.mxu1 %v13257_v10  ;;  %10354 = vmatprep.subr.bf16.mxu0 %v13262_v13  ;;  %v7077_v10 = vpack.c.bf16 %v7061_v27, %v7061_v27  ;;  %v13325_v13 = vld [vmem:[%s18469_s3 + $0xa2c] ss:$16 sps:$4 sm:$0xff]   ;;  %v13388_v27 = vld [vmem:[%s18469_s3 + $0xb84] ss:$16 sps:$4 sm:$0xff]  }
 0x4c0   :  { %10682 = vmatprep.subr.bf16.mxu1 %v13265_v59  ;;  %v13320_v59 = vld [vmem:[%s18469_s3 + $0xa20] ss:$16 sps:$4 sm:$0xff]  }
 0x4c2   :  { %10355 = vmatpush1.bf16.msra.mxu0 %v13260_v16  ;;  %v13323_v16 = vld [vmem:[%s18469_s3 + $0xa28] ss:$16 sps:$4 sm:$0xff]  }
 0x4c3   :  { %10683 = vmatpush1.bf16.msra.mxu1 %v13263_v18  ;;  %10356 = vmatprep.subr.bf16.mxu0 %v13268_v3  ;;  %v13328_v18 = vld [vmem:[%s18469_s3 + $0xa44] ss:$16 sps:$4 sm:$0xff]   ;;  %v13331_v3 = vld [vmem:[%s18469_s3 + $0xa4c] ss:$16 sps:$4 sm:$0xff]  }
 0x4c4   :  { %10684 = vmatprep.subr.bf16.mxu1 %v13271_v25  ;;  %v13326_v25 = vld [vmem:[%s18469_s3 + $0xa40] ss:$16 sps:$4 sm:$0xff]  }
 0x4c6   :  { %10357 = vmatpush1.bf16.msra.mxu0 %v13266_v19  ;;  %v13329_v19 = vld [vmem:[%s18469_s3 + $0xa48] ss:$16 sps:$4 sm:$0xff]  }
 0x4c7   :  { %10685 = vmatpush1.bf16.msra.mxu1 %v13269_v20  ;;  %10358 = vmatprep.subr.bf16.mxu0 %v13274_v24  ;;  %v13334_v20 = vld [vmem:[%s18469_s3 + $0xa64] ss:$16 sps:$4 sm:$0xff]   ;;  %v13337_v24 = vld [vmem:[%s18469_s3 + $0xa6c] ss:$16 sps:$4 sm:$0xff]  }
 0x4c8   :  { %10686 = vmatprep.subr.bf16.mxu1 %v13277_v26  ;;  %v13332_v26 = vld [vmem:[%s18469_s3 + $0xa60] ss:$16 sps:$4 sm:$0xff]  }
 0x4ca   :  { %10359 = vmatpush1.bf16.msra.mxu0 %v13272_v21  ;;  %v13335_v21 = vld [vmem:[%s18469_s3 + $0xa68] ss:$16 sps:$4 sm:$0xff]  }
 0x4cb   :  { %10687 = vmatpush1.bf16.msra.mxu1 %v13275_v28  ;;  %10360 = vmatprep.subr.bf16.mxu0 %v13280_v12  ;;  %v13340_v28 = vld [vmem:[%s18469_s3 + $0xa84] ss:$16 sps:$4 sm:$0xff]   ;;  %v13343_v12 = vld [vmem:[%s18469_s3 + $0xa8c] ss:$16 sps:$4 sm:$0xff]  }
 0x4cc   :  { %10688 = vmatprep.subr.bf16.mxu1 %v13283_v38  ;;  %v13338_v38 = vld [vmem:[%s18469_s3 + $0xa80] ss:$16 sps:$4 sm:$0xff]  }
 0x4ce   :  { %10361 = vmatpush1.bf16.msra.mxu0 %v13278_v34  ;;  %v13341_v34 = vld [vmem:[%s18469_s3 + $0xa88] ss:$16 sps:$4 sm:$0xff]  }
 0x4cf   :  { %10689 = vmatpush1.bf16.msra.mxu1 %v13281_v36  ;;  %10362 = vmatprep.subr.bf16.mxu0 %v13286_v37  ;;  %v13346_v36 = vld [vmem:[%s18469_s3 + $0xaa4] ss:$16 sps:$4 sm:$0xff]   ;;  %v13349_v37 = vld [vmem:[%s18469_s3 + $0xaac] ss:$16 sps:$4 sm:$0xff]  }
 0x4d0   :  { %10690 = vmatprep.subr.bf16.mxu1 %v13289_v61  ;;  %v13344_v61 = vld [vmem:[%s18469_s3 + $0xaa0] ss:$16 sps:$4 sm:$0xff]  }
 0x4d2   :  { %10363 = vmatpush1.bf16.msra.mxu0 %v13284_v40  ;;  %v13347_v40 = vld [vmem:[%s18469_s3 + $0xaa8] ss:$16 sps:$4 sm:$0xff]  }
 0x4d3   :  { %10691 = vmatpush1.bf16.msra.mxu1 %v13287_v42  ;;  %10364 = vmatprep.subr.bf16.mxu0 %v13292_v45  ;;  %v13352_v42 = vld [vmem:[%s18469_s3 + $0xac4] ss:$16 sps:$4 sm:$0xff]   ;;  %v13355_v45 = vld [vmem:[%s18469_s3 + $0xacc] ss:$16 sps:$4 sm:$0xff]  }
 0x4d4   :  { %10692 = vmatprep.subr.bf16.mxu1 %v13295_v46  ;;  %v13350_v46 = vld [vmem:[%s18469_s3 + $0xac0] ss:$16 sps:$4 sm:$0xff]  }
 0x4d6   :  { %10365 = vmatpush1.bf16.msra.mxu0 %v13290_v48  ;;  %v13353_v48 = vld [vmem:[%s18469_s3 + $0xac8] ss:$16 sps:$4 sm:$0xff]  }
 0x4d7   :  { %10693 = vmatpush1.bf16.msra.mxu1 %v13293_v49  ;;  %10366 = vmatprep.subr.bf16.mxu0 %v13298_v50  ;;  %v13358_v49 = vld [vmem:[%s18469_s3 + $0xae4] ss:$16 sps:$4 sm:$0xff]   ;;  %v13361_v50 = vld [vmem:[%s18469_s3 + $0xaec] ss:$16 sps:$4 sm:$0xff]  }
 0x4d8   :  { %10694 = vmatprep.subr.bf16.mxu1 %v13301_v63  ;;  %v13356_v63 = vld [vmem:[%s18469_s3 + $0xae0] ss:$16 sps:$4 sm:$0xff]  }
 0x4da   :  { %10367 = vmatpush1.bf16.msra.mxu0 %v13296_v15  ;;  %v13359_v15 = vld [vmem:[%s18469_s3 + $0xae8] ss:$16 sps:$4 sm:$0xff]  }
 0x4db   :  { %10695 = vmatpush1.bf16.msra.mxu1 %v13299_v14  ;;  %10368 = vmatprep.subr.bf16.mxu0 %v13304_v54  ;;  %v13367_v14 = vld [vmem:[%s18469_s3 + $0xb0c] ss:$16 sps:$4 sm:$0xff]   ;;  %v13362_v54 = vld [vmem:[%s18469_s3 + $0xb00] ss:$16 sps:$4 sm:$0xff]  }
 0x4dc   :  { %10696 = vmatprep.subr.bf16.mxu1 %v13307_v33  ;;  %v13365_v33 = vld [vmem:[%s18469_s3 + $0xb08] ss:$16 sps:$4 sm:$0xff]  }
 0x4de   :  { %10369 = vmatpush1.bf16.msra.mxu0 %v13302_v9  ;;  %v13373_v9 = vld [vmem:[%s18469_s3 + $0xb2c] ss:$16 sps:$4 sm:$0xff]  }
 0x4df   :  { %10697 = vmatpush1.bf16.msra.mxu1 %v13305_v41  ;;  %10370 = vmatprep.subr.bf16.mxu0 %v13310_v57  ;;  %v13371_v41 = vld [vmem:[%s18469_s3 + $0xb28] ss:$16 sps:$4 sm:$0xff]   ;;  %v13376_v57 = vld [vmem:[%s18469_s3 + $0xb44] ss:$16 sps:$4 sm:$0xff]  }
 0x4e0   :  { %10698 = vmatprep.subr.bf16.mxu1 %v13313_v58  ;;  %v13379_v58 = vld [vmem:[%s18469_s3 + $0xb4c] ss:$16 sps:$4 sm:$0xff]  }
 0x4e2   :  { %10371 = vmatpush1.bf16.msra.mxu0 %v13308_v55  ;;  %v13377_v55 = vld [vmem:[%s18469_s3 + $0xb48] ss:$16 sps:$4 sm:$0xff]  }
 0x4e3   :  { %10699 = vmatpush1.bf16.msra.mxu1 %v13311_v0  ;;  %10381 = vmatprep.subr.bf16.mxu0 %v13316_v52  ;;  %v13385_v0 = vld [vmem:[%s18469_s3 + $0xb6c] ss:$16 sps:$4 sm:$0xff]   ;;  %v13380_v52 = vld [vmem:[%s18469_s3 + $0xb60] ss:$16 sps:$4 sm:$0xff]  }
 0x4e4   :  { %10709 = vmatprep.subr.bf16.mxu1 %v13319_v53  ;;  %v13383_v53 = vld [vmem:[%s18469_s3 + $0xb68] ss:$16 sps:$4 sm:$0xff]  }
 0x4e5   :  { %10373 = vmatmul.mubr.bf16.vlgmr.msra.gmra.mrb[16].mxu0 %v7074_v2 }
 0x4e6   :  { %10701 = vmatmul.mubr.bf16.vlgmr.msra.gmra.mrb[16].mxu1 %v7074_v2  ;;  %10382 = vmatpush1.bf16.msra.mxu0 %v13314_v1  ;;  %v13391_v1 = vld [vmem:[%s18469_s3 + $0xb8c] ss:$16 sps:$4 sm:$0xff]   ;;  %v13386_v2 = vld [vmem:[%s18469_s3 + $0xb80] ss:$16 sps:$4 sm:$0xff]  }
 0x4e7   :  { %10413 = vmatprep.mubr.bf16.mxu0 %v7077_v10  ;;  %10710 = vmatpush1.bf16.msra.mxu1 %v13317_v6  ;;  %v13389_v6 = vld [vmem:[%s18469_s3 + $0xb88] ss:$16 sps:$4 sm:$0xff]  }
 0x4e8   :  { %10741 = vmatprep.mubr.bf16.mxu1 %v7077_v10  ;;  %10383 = vmatprep.subr.bf16.mxu0 %v13322_v7  ;;  %v13394_v7 = vld [vmem:[%s18469_s3 + $0xba4] ss:$16 sps:$4 sm:$0xff]   ;;  %v13397_v10 = vld [vmem:[%s18469_s3 + $0xbac] ss:$16 sps:$4 sm:$0xff]  }
 0x4e9   :  { %10711 = vmatprep.subr.bf16.mxu1 %v13325_v13  ;;  %v13392_v13 = vld [vmem:[%s18469_s3 + $0xba0] ss:$16 sps:$4 sm:$0xff]  }
 0x4ea   :  { %10384 = vmatpush1.bf16.msra.mxu0 %v13320_v59  ;;  %v1057_v59 = vrot.slane %v17413_v32, %v16988_v4 }
 0x4eb   :  { %10712 = vmatpush1.bf16.msra.mxu1 %v13323_v16  ;;  %10385 = vmatprep.subr.bf16.mxu0 %v13328_v18  ;;  %v13395_v16 = vld [vmem:[%s18469_s3 + $0xba8] ss:$16 sps:$4 sm:$0xff]   ;;  %v13400_v18 = vld [vmem:[%s18469_s3 + $0xbc4] ss:$16 sps:$4 sm:$0xff]  }
 0x4ec   :  { %10713 = vmatprep.subr.bf16.mxu1 %v13331_v3  ;;  %v13403_v3 = vld [vmem:[%s18469_s3 + $0xbcc] ss:$16 sps:$4 sm:$0xff]  }
 0x4ee   :  { %10386 = vmatpush1.bf16.msra.mxu0 %v13326_v25  ;;  %v1069_v25 = vrot.slane %v17413_v32, %v1036_v8  ;;  %v13409_v8 = vld [vmem:[%s18469_s3 + $0xbec] ss:$16 sps:$4 sm:$0xff]  }
 0x4ef   :  { %10714 = vmatpush1.bf16.msra.mxu1 %v13329_v19  ;;  %10387 = vmatprep.subr.bf16.mxu0 %v13334_v20  ;;  %v13398_v19 = vld [vmem:[%s18469_s3 + $0xbc0] ss:$16 sps:$4 sm:$0xff]   ;;  %v12668_v20 = vadd.f32 %v16581_v60, %v1057_v59  ;;  %v13461_v59 = vld [vmem:[%s18469_s3 + $0xd08] ss:$16 sps:$4 sm:$0xff]  }
 0x4f0   :  { %10715 = vmatprep.subr.bf16.mxu1 %v13337_v24  ;;  %v13401_v24 = vld [vmem:[%s18469_s3 + $0xbc8] ss:$16 sps:$4 sm:$0xff]   ;;  %v13404_v60 = vld [vmem:[%s18469_s3 + $0xbe0] ss:$16 sps:$4 sm:$0xff]  }
 0x4f2   :  { %10388 = vmatpush1.bf16.msra.mxu0 %v13332_v26  ;;  %v13406_v26 = vld [vmem:[%s18469_s3 + $0xbe4] ss:$16 sps:$4 sm:$0xff]  }
 0x4f3   :  { %10716 = vmatpush1.bf16.msra.mxu1 %v13335_v21  ;;  %10389 = vmatprep.subr.bf16.mxu0 %v13340_v28  ;;  %v12671_v21 = vadd.f32 %v17321_v30, %v1069_v25  ;;  %v7060_v28 = vmax.f32 %v12668_v20, 0.0  ;;  %v13415_v30 = vld [vmem:[%s18469_s3 + $0xc0c] ss:$16 sps:$4 sm:$0xff]   ;;  %v13467_v25 = vld [vmem:[%s18469_s3 + $0xd28] ss:$16 sps:$4 sm:$0xff]  }
 0x4f4   :  { %10717 = vmatprep.subr.bf16.mxu1 %v13343_v12  ;;  %v13407_v12 = vld [vmem:[%s18469_s3 + $0xbe8] ss:$16 sps:$4 sm:$0xff]   ;;  %v13475_v20 = vld [vmem:[%s18469_s3 + $0xd4c] ss:$16 sps:$4 sm:$0xff]  }
 0x4f6   :  { %10390 = vmatpush1.bf16.msra.mxu0 %v13338_v38  ;;  %v13412_v38 = vld [vmem:[%s18469_s3 + $0xc04] ss:$16 sps:$4 sm:$0xff]  }
 0x4f7   :  { %10718 = vmatpush1.bf16.msra.mxu1 %v13341_v34  ;;  %10391 = vmatprep.subr.bf16.mxu0 %v13346_v36  ;;  %v7063_v34 = vmax.f32 %v12671_v21, 0.0  ;;  %v13410_v36 = vld [vmem:[%s18469_s3 + $0xc00] ss:$16 sps:$4 sm:$0xff]   ;;  %v13481_v21 = vld [vmem:[%s18469_s3 + $0xd6c] ss:$16 sps:$4 sm:$0xff]  }
 0x4f8   :  { %10719 = vmatprep.subr.bf16.mxu1 %v13349_v37  ;;  %v7076_v37 = vpack.c.bf16 %v7060_v28, %v7060_v28  ;;  %v13479_v28 = vld [vmem:[%s18469_s3 + $0xd68] ss:$16 sps:$4 sm:$0xff]  }
 0x4fa   :  { %10392 = vmatpush1.bf16.msra.mxu0 %v13344_v61  ;;  %v13413_v61 = vld [vmem:[%s18469_s3 + $0xc08] ss:$16 sps:$4 sm:$0xff]  }
 0x4fb   :  { %10720 = vmatpush1.bf16.msra.mxu1 %v13347_v40  ;;  %10393 = vmatprep.subr.bf16.mxu0 %v13352_v42  ;;  %v13418_v40 = vld [vmem:[%s18469_s3 + $0xc24] ss:$16 sps:$4 sm:$0xff]   ;;  %v7079_v42 = vpack.c.bf16 %v7063_v34, %v7063_v34  ;;  %v13485_v34 = vld [vmem:[%s18469_s3 + $0xd88] ss:$16 sps:$4 sm:$0xff]  }
 0x4fc   :  { %10721 = vmatprep.subr.bf16.mxu1 %v13355_v45  ;;  %v13421_v45 = vld [vmem:[%s18469_s3 + $0xc2c] ss:$16 sps:$4 sm:$0xff]  }
 0x4fe   :  { %10394 = vmatpush1.bf16.msra.mxu0 %v13350_v46  ;;  %v13416_v46 = vld [vmem:[%s18469_s3 + $0xc20] ss:$16 sps:$4 sm:$0xff]  }
 0x4ff   :  { %10722 = vmatpush1.bf16.msra.mxu1 %v13353_v48  ;;  %10395 = vmatprep.subr.bf16.mxu0 %v13358_v49  ;;  %v13419_v48 = vld [vmem:[%s18469_s3 + $0xc28] ss:$16 sps:$4 sm:$0xff]   ;;  %v13424_v49 = vld [vmem:[%s18469_s3 + $0xc44] ss:$16 sps:$4 sm:$0xff]  }
 0x500   :  { %10723 = vmatprep.subr.bf16.mxu1 %v13361_v50  ;;  %v13427_v50 = vld [vmem:[%s18469_s3 + $0xc4c] ss:$16 sps:$4 sm:$0xff]  }
 0x502   :  { %10396 = vmatpush1.bf16.msra.mxu0 %v13356_v63  ;;  %v13422_v63 = vld [vmem:[%s18469_s3 + $0xc40] ss:$16 sps:$4 sm:$0xff]  }
 0x503   :  { %10724 = vmatpush1.bf16.msra.mxu1 %v13359_v15  ;;  %10397 = vmatprep.subr.bf16.mxu0 %v13364_v51  ;;  %v13425_v15 = vld [vmem:[%s18469_s3 + $0xc48] ss:$16 sps:$4 sm:$0xff]   ;;  %v13430_v51 = vld [vmem:[%s18469_s3 + $0xc64] ss:$16 sps:$4 sm:$0xff]  }
 0x504   :  { %10725 = vmatprep.subr.bf16.mxu1 %v13367_v14  ;;  %v13433_v14 = vld [vmem:[%s18469_s3 + $0xc6c] ss:$16 sps:$4 sm:$0xff]  }
 0x506   :  { %10398 = vmatpush1.bf16.msra.mxu0 %v13362_v54  ;;  %v13428_v54 = vld [vmem:[%s18469_s3 + $0xc60] ss:$16 sps:$4 sm:$0xff]  }
 0x507   :  { %10726 = vmatpush1.bf16.msra.mxu1 %v13365_v33  ;;  %10399 = vmatprep.subr.bf16.mxu0 %v13370_v23  ;;  %v13431_v33 = vld [vmem:[%s18469_s3 + $0xc68] ss:$16 sps:$4 sm:$0xff]   ;;  %v13436_v23 = vld [vmem:[%s18469_s3 + $0xc84] ss:$16 sps:$4 sm:$0xff]  }
 0x508   :  { %10727 = vmatprep.subr.bf16.mxu1 %v13373_v9  ;;  %v13439_v9 = vld [vmem:[%s18469_s3 + $0xc8c] ss:$16 sps:$4 sm:$0xff]  }
 0x50a   :  { %10400 = vmatpush1.bf16.msra.mxu0 %v13368_v43  ;;  %v13434_v43 = vld [vmem:[%s18469_s3 + $0xc80] ss:$16 sps:$4 sm:$0xff]  }
 0x50b   :  { %10728 = vmatpush1.bf16.msra.mxu1 %v13371_v41  ;;  %10401 = vmatprep.subr.bf16.mxu0 %v13376_v57  ;;  %v13437_v41 = vld [vmem:[%s18469_s3 + $0xc88] ss:$16 sps:$4 sm:$0xff]   ;;  %v13442_v57 = vld [vmem:[%s18469_s3 + $0xca4] ss:$16 sps:$4 sm:$0xff]  }
 0x50c   :  { %10729 = vmatprep.subr.bf16.mxu1 %v13379_v58  ;;  %v13445_v58 = vld [vmem:[%s18469_s3 + $0xcac] ss:$16 sps:$4 sm:$0xff]  }
 0x50e   :  { %10402 = vmatpush1.bf16.msra.mxu0 %v13374_v17  ;;  %v13440_v17 = vld [vmem:[%s18469_s3 + $0xca0] ss:$16 sps:$4 sm:$0xff]  }
 0x50f   :  { %10730 = vmatpush1.bf16.msra.mxu1 %v13377_v55  ;;  %10403 = vmatprep.subr.bf16.mxu0 %v13382_v62  ;;  %v13443_v55 = vld [vmem:[%s18469_s3 + $0xca8] ss:$16 sps:$4 sm:$0xff]   ;;  %v13448_v62 = vld [vmem:[%s18469_s3 + $0xcc4] ss:$16 sps:$4 sm:$0xff]  }
 0x510   :  { %10731 = vmatprep.subr.bf16.mxu1 %v13385_v0  ;;  %v13451_v0 = vld [vmem:[%s18469_s3 + $0xccc] ss:$16 sps:$4 sm:$0xff]  }
 0x512   :  { %10404 = vmatpush1.bf16.msra.mxu0 %v13380_v52  ;;  %v13446_v52 = vld [vmem:[%s18469_s3 + $0xcc0] ss:$16 sps:$4 sm:$0xff]  }
 0x513   :  { %10732 = vmatpush1.bf16.msra.mxu1 %v13383_v53  ;;  %10405 = vmatprep.subr.bf16.mxu0 %v13388_v27  ;;  %v13449_v53 = vld [vmem:[%s18469_s3 + $0xcc8] ss:$16 sps:$4 sm:$0xff]   ;;  %v13454_v27 = vld [vmem:[%s18469_s3 + $0xce4] ss:$16 sps:$4 sm:$0xff]  }
 0x514   :  { %10733 = vmatprep.subr.bf16.mxu1 %v13391_v1  ;;  %v13457_v1 = vld [vmem:[%s18469_s3 + $0xcec] ss:$16 sps:$4 sm:$0xff]  }
 0x516   :  { %10406 = vmatpush1.bf16.msra.mxu0 %v13386_v2  ;;  %v13452_v2 = vld [vmem:[%s18469_s3 + $0xce0] ss:$16 sps:$4 sm:$0xff]  }
 0x517   :  { %10734 = vmatpush1.bf16.msra.mxu1 %v13389_v6  ;;  %10407 = vmatprep.subr.bf16.mxu0 %v13394_v7  ;;  %v13455_v6 = vld [vmem:[%s18469_s3 + $0xce8] ss:$16 sps:$4 sm:$0xff]   ;;  %v13460_v7 = vld [vmem:[%s18469_s3 + $0xd04] ss:$16 sps:$4 sm:$0xff]  }
 0x518   :  { %10735 = vmatprep.subr.bf16.mxu1 %v13397_v10  ;;  %v13463_v10 = vld [vmem:[%s18469_s3 + $0xd0c] ss:$16 sps:$4 sm:$0xff]  }
 0x51a   :  { %10408 = vmatpush1.bf16.msra.mxu0 %v13392_v13  ;;  %v13458_v13 = vld [vmem:[%s18469_s3 + $0xd00] ss:$16 sps:$4 sm:$0xff]  }
 0x51b   :  { %10736 = vmatpush1.bf16.msra.mxu1 %v13395_v16  ;;  %10409 = vmatprep.subr.bf16.mxu0 %v13400_v18  ;;  %v13466_v16 = vld [vmem:[%s18469_s3 + $0xd24] ss:$16 sps:$4 sm:$0xff]   ;;  %v13469_v18 = vld [vmem:[%s18469_s3 + $0xd2c] ss:$16 sps:$4 sm:$0xff]  }
 0x51c   :  { %10737 = vmatprep.subr.bf16.mxu1 %v13403_v3  ;;  %v13464_v3 = vld [vmem:[%s18469_s3 + $0xd20] ss:$16 sps:$4 sm:$0xff]  }
 0x51e   :  { %10410 = vmatpush1.bf16.msra.mxu0 %v13398_v19  ;;  %v13472_v19 = vld [vmem:[%s18469_s3 + $0xd44] ss:$16 sps:$4 sm:$0xff]  }
 0x51f   :  { %10738 = vmatpush1.bf16.msra.mxu1 %v13401_v24  ;;  %10411 = vmatprep.subr.bf16.mxu0 %v13406_v26  ;;  %v13470_v24 = vld [vmem:[%s18469_s3 + $0xd40] ss:$16 sps:$4 sm:$0xff]   ;;  %v13473_v26 = vld [vmem:[%s18469_s3 + $0xd48] ss:$16 sps:$4 sm:$0xff]  }
 0x520   :  { %10739 = vmatprep.subr.bf16.mxu1 %v13409_v8  ;;  %v13478_v8 = vld [vmem:[%s18469_s3 + $0xd64] ss:$16 sps:$4 sm:$0xff]  }
 0x522   :  { %10412 = vmatpush1.bf16.msra.mxu0 %v13404_v60  ;;  %v13476_v60 = vld [vmem:[%s18469_s3 + $0xd60] ss:$16 sps:$4 sm:$0xff]  }
 0x523   :  { %10740 = vmatpush1.bf16.msra.mxu1 %v13407_v12  ;;  %10422 = vmatprep.subr.bf16.mxu0 %v13412_v38  ;;  %v13484_v12 = vld [vmem:[%s18469_s3 + $0xd84] ss:$16 sps:$4 sm:$0xff]   ;;  %v13487_v38 = vld [vmem:[%s18469_s3 + $0xd8c] ss:$16 sps:$4 sm:$0xff]  }
 0x524   :  { %10750 = vmatprep.subr.bf16.mxu1 %v13415_v30  ;;  %v13482_v30 = vld [vmem:[%s18469_s3 + $0xd80] ss:$16 sps:$4 sm:$0xff]  }
 0x525   :  { %10414 = vmatmul.mubr.bf16.vlgmr.msra.gmra.mrb[16].mxu0 %v7076_v37 }
 0x526   :  { %10742 = vmatmul.mubr.bf16.vlgmr.msra.gmra.mrb[16].mxu1 %v7076_v37  ;;  %10423 = vmatpush1.bf16.msra.mxu0 %v13410_v36  ;;  %v13490_v36 = vld [vmem:[%s18469_s3 + $0xda4] ss:$16 sps:$4 sm:$0xff]   ;;  %v13493_v37 = vld [vmem:[%s18469_s3 + $0xdac] ss:$16 sps:$4 sm:$0xff]  }
 0x527   :  { %10454 = vmatprep.mubr.bf16.mxu0 %v7079_v42  ;;  %10751 = vmatpush1.bf16.msra.mxu1 %v13413_v61  ;;  %v13488_v61 = vld [vmem:[%s18469_s3 + $0xda0] ss:$16 sps:$4 sm:$0xff]  }
 0x528   :  { %10782 = vmatprep.mubr.bf16.mxu1 %v7079_v42  ;;  %10424 = vmatprep.subr.bf16.mxu0 %v13418_v40  ;;  %v1065_v40 = vrot.slane %v17413_v32, %v1032_v31  ;;  %v13491_v42 = vld [vmem:[%s18469_s3 + $0xda8] ss:$16 sps:$4 sm:$0xff]   ;;  %v13494_v31 = vld [vmem:[%s18469_s3 + $0xdc0] ss:$16 sps:$4 sm:$0xff]  }
 0x529   :  { %10752 = vmatprep.subr.bf16.mxu1 %v13421_v45  ;;  %v13496_v45 = vld [vmem:[%s18469_s3 + $0xdc4] ss:$16 sps:$4 sm:$0xff]  }
 0x52a   :  { %10425 = vmatpush1.bf16.msra.mxu0 %v13416_v46  ;;  %v13499_v46 = vld [vmem:[%s18469_s3 + $0xdcc] ss:$16 sps:$4 sm:$0xff]  }
 0x52b   :  { %10753 = vmatpush1.bf16.msra.mxu1 %v13419_v48  ;;  %10426 = vmatprep.subr.bf16.mxu0 %v13424_v49  ;;  %v1077_v48 = vrot.slane %v17413_v32, %v1044_v56  ;;  %v12670_v49 = vadd.f32 %v17314_v29, %v1065_v40  ;;  %v13505_v56 = vld [vmem:[%s18469_s3 + $0xdec] ss:$16 sps:$4 sm:$0xff]   ;;  %v13500_v29 = vld [vmem:[%s18469_s3 + $0xde0] ss:$16 sps:$4 sm:$0xff]   ;;  %v13568_v40 = vld [vmem:[%s18469_s3 + $0xf44] ss:$16 sps:$4 sm:$0xff]  }
 0x52c   :  { %10754 = vmatprep.subr.bf16.mxu1 %v13427_v50  ;;  %v13497_v50 = vld [vmem:[%s18469_s3 + $0xdc8] ss:$16 sps:$4 sm:$0xff]  }
 0x52d   :  { %v12673_v32 = vadd.f32 %v17323_v35, %v1077_v48  ;;  %v13511_v35 = vld [vmem:[%s18469_s3 + $0xe0c] ss:$16 sps:$4 sm:$0xff]   ;;  %v13574_v48 = vld [vmem:[%s18469_s3 + $0xf64] ss:$16 sps:$4 sm:$0xff]  }
 0x52e   :  { %10427 = vmatpush1.bf16.msra.mxu0 %v13422_v63  ;;  %v13502_v63 = vld [vmem:[%s18469_s3 + $0xde4] ss:$16 sps:$4 sm:$0xff]  }
 0x52f   :  { %10755 = vmatpush1.bf16.msra.mxu1 %v13425_v15  ;;  %10428 = vmatprep.subr.bf16.mxu0 %v13430_v51  ;;  %v7062_v15 = vmax.f32 %v12670_v49, 0.0  ;;  %v13503_v51 = vld [vmem:[%s18469_s3 + $0xde8] ss:$16 sps:$4 sm:$0xff]   ;;  %v13572_v49 = vld [vmem:[%s18469_s3 + $0xf60] ss:$16 sps:$4 sm:$0xff]  }
 0x530   :  { %10756 = vmatprep.subr.bf16.mxu1 %v13433_v14  ;;  %v13508_v14 = vld [vmem:[%s18469_s3 + $0xe04] ss:$16 sps:$4 sm:$0xff]  }
 0x532   :  { %10429 = vmatpush1.bf16.msra.mxu0 %v13428_v54  ;;  %v7065_v54 = vmax.f32 %v12673_v32, 0.0  ;;  %v13578_v32 = vld [vmem:[%s18469_s3 + $0xf80] ss:$16 sps:$4 sm:$0xff]  }
 0x533   :  { %10757 = vmatpush1.bf16.msra.mxu1 %v13431_v33  ;;  %10430 = vmatprep.subr.bf16.mxu0 %v13436_v23  ;;  %v13506_v33 = vld [vmem:[%s18469_s3 + $0xe00] ss:$16 sps:$4 sm:$0xff]   ;;  %v7078_v23 = vpack.c.bf16 %v7062_v15, %v7062_v15  ;;  %v13586_v15 = vld [vmem:[%s18469_s3 + $0xfa4] ss:$16 sps:$4 sm:$0xff]  }
 0x534   :  { %10758 = vmatprep.subr.bf16.mxu1 %v13439_v9  ;;  %v13509_v9 = vld [vmem:[%s18469_s3 + $0xe08] ss:$16 sps:$4 sm:$0xff]  }
 0x536   :  { %10431 = vmatpush1.bf16.msra.mxu0 %v13434_v43  ;;  %v13514_v43 = vld [vmem:[%s18469_s3 + $0xe24] ss:$16 sps:$4 sm:$0xff]  }
 0x537   :  { %10759 = vmatpush1.bf16.msra.mxu1 %v13437_v41  ;;  %10432 = vmatprep.subr.bf16.mxu0 %v13442_v57  ;;  %v7081_v41 = vpack.c.bf16 %v7065_v54, %v7065_v54  ;;  %v13517_v57 = vld [vmem:[%s18469_s3 + $0xe2c] ss:$16 sps:$4 sm:$0xff]  }
 0x538   :  { %10760 = vmatprep.subr.bf16.mxu1 %v13445_v58  ;;  %v13512_v58 = vld [vmem:[%s18469_s3 + $0xe20] ss:$16 sps:$4 sm:$0xff]  }
 0x53a   :  { %10433 = vmatpush1.bf16.msra.mxu0 %v13440_v17  ;;  %v13515_v17 = vld [vmem:[%s18469_s3 + $0xe28] ss:$16 sps:$4 sm:$0xff]  }
 0x53b   :  { %10761 = vmatpush1.bf16.msra.mxu1 %v13443_v55  ;;  %10434 = vmatprep.subr.bf16.mxu0 %v13448_v62  ;;  %v13520_v55 = vld [vmem:[%s18469_s3 + $0xe44] ss:$16 sps:$4 sm:$0xff]   ;;  %v13523_v62 = vld [vmem:[%s18469_s3 + $0xe4c] ss:$16 sps:$4 sm:$0xff]  }
 0x53c   :  { %10762 = vmatprep.subr.bf16.mxu1 %v13451_v0  ;;  %v13518_v0 = vld [vmem:[%s18469_s3 + $0xe40] ss:$16 sps:$4 sm:$0xff]  }
 0x53e   :  { %10435 = vmatpush1.bf16.msra.mxu0 %v13446_v52  ;;  %v13521_v52 = vld [vmem:[%s18469_s3 + $0xe48] ss:$16 sps:$4 sm:$0xff]  }
 0x53f   :  { %10763 = vmatpush1.bf16.msra.mxu1 %v13449_v53  ;;  %10436 = vmatprep.subr.bf16.mxu0 %v13454_v27  ;;  %v13526_v53 = vld [vmem:[%s18469_s3 + $0xe64] ss:$16 sps:$4 sm:$0xff]   ;;  %v13529_v27 = vld [vmem:[%s18469_s3 + $0xe6c] ss:$16 sps:$4 sm:$0xff]  }
 0x540   :  { %10764 = vmatprep.subr.bf16.mxu1 %v13457_v1  ;;  %v13524_v1 = vld [vmem:[%s18469_s3 + $0xe60] ss:$16 sps:$4 sm:$0xff]  }
 0x542   :  { %10437 = vmatpush1.bf16.msra.mxu0 %v13452_v2  ;;  %v13527_v2 = vld [vmem:[%s18469_s3 + $0xe68] ss:$16 sps:$4 sm:$0xff]  }
 0x543   :  { %10765 = vmatpush1.bf16.msra.mxu1 %v13455_v6  ;;  %10438 = vmatprep.subr.bf16.mxu0 %v13460_v7  ;;  %v13532_v6 = vld [vmem:[%s18469_s3 + $0xe84] ss:$16 sps:$4 sm:$0xff]   ;;  %v13535_v7 = vld [vmem:[%s18469_s3 + $0xe8c] ss:$16 sps:$4 sm:$0xff]  }
 0x544   :  { %10766 = vmatprep.subr.bf16.mxu1 %v13463_v10  ;;  %v13530_v10 = vld [vmem:[%s18469_s3 + $0xe80] ss:$16 sps:$4 sm:$0xff]  }
 0x546   :  { %10439 = vmatpush1.bf16.msra.mxu0 %v13458_v13  ;;  %v13533_v13 = vld [vmem:[%s18469_s3 + $0xe88] ss:$16 sps:$4 sm:$0xff]  }
 0x547   :  { %10767 = vmatpush1.bf16.msra.mxu1 %v13461_v59  ;;  %10440 = vmatprep.subr.bf16.mxu0 %v13466_v16  ;;  %v13538_v59 = vld [vmem:[%s18469_s3 + $0xea4] ss:$16 sps:$4 sm:$0xff]   ;;  %v13541_v16 = vld [vmem:[%s18469_s3 + $0xeac] ss:$16 sps:$4 sm:$0xff]  }
 0x548   :  { %10768 = vmatprep.subr.bf16.mxu1 %v13469_v18  ;;  %v13536_v18 = vld [vmem:[%s18469_s3 + $0xea0] ss:$16 sps:$4 sm:$0xff]  }
 0x54a   :  { %10441 = vmatpush1.bf16.msra.mxu0 %v13464_v3  ;;  %v13539_v3 = vld [vmem:[%s18469_s3 + $0xea8] ss:$16 sps:$4 sm:$0xff]  }
 0x54b   :  { %10769 = vmatpush1.bf16.msra.mxu1 %v13467_v25  ;;  %10442 = vmatprep.subr.bf16.mxu0 %v13472_v19  ;;  %v13544_v25 = vld [vmem:[%s18469_s3 + $0xec4] ss:$16 sps:$4 sm:$0xff]   ;;  %v13547_v19 = vld [vmem:[%s18469_s3 + $0xecc] ss:$16 sps:$4 sm:$0xff]  }
 0x54c   :  { %10770 = vmatprep.subr.bf16.mxu1 %v13475_v20  ;;  %v13542_v20 = vld [vmem:[%s18469_s3 + $0xec0] ss:$16 sps:$4 sm:$0xff]  }
 0x54e   :  { %10443 = vmatpush1.bf16.msra.mxu0 %v13470_v24  ;;  %v13545_v24 = vld [vmem:[%s18469_s3 + $0xec8] ss:$16 sps:$4 sm:$0xff]  }
 0x54f   :  { %10771 = vmatpush1.bf16.msra.mxu1 %v13473_v26  ;;  %10444 = vmatprep.subr.bf16.mxu0 %v13478_v8  ;;  %v13550_v26 = vld [vmem:[%s18469_s3 + $0xee4] ss:$16 sps:$4 sm:$0xff]   ;;  %v13553_v8 = vld [vmem:[%s18469_s3 + $0xeec] ss:$16 sps:$4 sm:$0xff]  }
 0x550   :  { %10772 = vmatprep.subr.bf16.mxu1 %v13481_v21  ;;  %v13548_v21 = vld [vmem:[%s18469_s3 + $0xee0] ss:$16 sps:$4 sm:$0xff]  }
 0x552   :  { %10445 = vmatpush1.bf16.msra.mxu0 %v13476_v60  ;;  %v13551_v60 = vld [vmem:[%s18469_s3 + $0xee8] ss:$16 sps:$4 sm:$0xff]  }
 0x553   :  { %10773 = vmatpush1.bf16.msra.mxu1 %v13479_v28  ;;  %10446 = vmatprep.subr.bf16.mxu0 %v13484_v12  ;;  %v13556_v28 = vld [vmem:[%s18469_s3 + $0xf04] ss:$16 sps:$4 sm:$0xff]   ;;  %v13559_v12 = vld [vmem:[%s18469_s3 + $0xf0c] ss:$16 sps:$4 sm:$0xff]  }
 0x554   :  { %10774 = vmatprep.subr.bf16.mxu1 %v13487_v38  ;;  %v13554_v38 = vld [vmem:[%s18469_s3 + $0xf00] ss:$16 sps:$4 sm:$0xff]  }
 0x556   :  { %10447 = vmatpush1.bf16.msra.mxu0 %v13482_v30  ;;  %v13557_v30 = vld [vmem:[%s18469_s3 + $0xf08] ss:$16 sps:$4 sm:$0xff]  }
 0x557   :  { %10775 = vmatpush1.bf16.msra.mxu1 %v13485_v34  ;;  %10448 = vmatprep.subr.bf16.mxu0 %v13490_v36  ;;  %v13562_v34 = vld [vmem:[%s18469_s3 + $0xf24] ss:$16 sps:$4 sm:$0xff]   ;;  %v13565_v36 = vld [vmem:[%s18469_s3 + $0xf2c] ss:$16 sps:$4 sm:$0xff]  }
 0x558   :  { %10776 = vmatprep.subr.bf16.mxu1 %v13493_v37  ;;  %v13560_v37 = vld [vmem:[%s18469_s3 + $0xf20] ss:$16 sps:$4 sm:$0xff]  }
 0x55a   :  { %10449 = vmatpush1.bf16.msra.mxu0 %v13488_v61  ;;  %v13563_v61 = vld [vmem:[%s18469_s3 + $0xf28] ss:$16 sps:$4 sm:$0xff]  }
 0x55b   :  { %10777 = vmatpush1.bf16.msra.mxu1 %v13491_v42  ;;  %10450 = vmatprep.subr.bf16.mxu0 %v13496_v45  ;;  %v13571_v42 = vld [vmem:[%s18469_s3 + $0xf4c] ss:$16 sps:$4 sm:$0xff]   ;;  %v13566_v45 = vld [vmem:[%s18469_s3 + $0xf40] ss:$16 sps:$4 sm:$0xff]  }
 0x55c   :  { %10778 = vmatprep.subr.bf16.mxu1 %v13499_v46  ;;  %v13569_v46 = vld [vmem:[%s18469_s3 + $0xf48] ss:$16 sps:$4 sm:$0xff]  }
 0x55e   :  { %10451 = vmatpush1.bf16.msra.mxu0 %v13494_v31  ;;  %v13577_v31 = vld [vmem:[%s18469_s3 + $0xf6c] ss:$16 sps:$4 sm:$0xff]  }
 0x55f   :  { %10779 = vmatpush1.bf16.msra.mxu1 %v13497_v50  ;;  %10452 = vmatprep.subr.bf16.mxu0 %v13502_v63  ;;  %v13575_v50 = vld [vmem:[%s18469_s3 + $0xf68] ss:$16 sps:$4 sm:$0xff]   ;;  %v13580_v63 = vld [vmem:[%s18469_s3 + $0xf84] ss:$16 sps:$4 sm:$0xff]  }
 0x560   :  { %10780 = vmatprep.subr.bf16.mxu1 %v13505_v56  ;;  %v13583_v56 = vld [vmem:[%s18469_s3 + $0xf8c] ss:$16 sps:$4 sm:$0xff]  }
 0x562   :  { %10453 = vmatpush1.bf16.msra.mxu0 %v13500_v29  ;;  %v13581_v29 = vld [vmem:[%s18469_s3 + $0xf88] ss:$16 sps:$4 sm:$0xff]  }
 0x563   :  { %10781 = vmatpush1.bf16.msra.mxu1 %v13503_v51  ;;  %10463 = vmatprep.subr.bf16.mxu0 %v13508_v14  ;;  %v13589_v51 = vld [vmem:[%s18469_s3 + $0xfac] ss:$16 sps:$4 sm:$0xff]   ;;  %v13584_v14 = vld [vmem:[%s18469_s3 + $0xfa0] ss:$16 sps:$4 sm:$0xff]  }
 0x564   :  { %10791 = vmatprep.subr.bf16.mxu1 %v13511_v35  ;;  %v13607_v35 = vld [vmem:[%s18468_s2 + $0x8] sm:$0xff] }
 0x565   :  { %10455 = vmatmul.mubr.bf16.vlgmr.msra.gmra.mrb[16].mxu0 %v7078_v23  ;;  %v1073_v54 = vrot.slane %v13607_v35, %v1040_v5  ;;  %v10860_v35 = vld [vmem:[%s18471_s5 + $0xc0] sm:$0xff] }
 0x566   :  { %10783 = vmatmul.mubr.bf16.vlgmr.msra.gmra.mrb[16].mxu1 %v7078_v23  ;;  %10464 = vmatpush1.bf16.msra.mxu0 %v13506_v33  ;;  %v13587_v33 = vld [vmem:[%s18469_s3 + $0xfa8] ss:$16 sps:$4 sm:$0xff]   ;;  %v13592_v23 = vld [vmem:[%s18469_s3 + $0xfc4] ss:$16 sps:$4 sm:$0xff]  }
 0x567   :  { %10495 = vmatprep.mubr.bf16.mxu0 %v7081_v41  ;;  %10792 = vmatpush1.bf16.msra.mxu1 %v13509_v9  ;;  %v13595_v9 = vld [vmem:[%s18469_s3 + $0xfcc] ss:$16 sps:$4 sm:$0xff]   ;;  %v12672_v5 = vadd.f32 %v17319_v39, %v1073_v54 }
 0x568   :  { %10823 = vmatprep.mubr.bf16.mxu1 %v7081_v41  ;;  %10465 = vmatprep.subr.bf16.mxu0 %v13514_v43  ;;  %v13593_v43 = vld [vmem:[%s18469_s3 + $0xfc8] ss:$16 sps:$4 sm:$0xff]   ;;  %v13598_v41 = vld [vmem:[%s18469_s3 + $0xfe4] ss:$16 sps:$4 sm:$0xff]  }
 0x569   :  { %10793 = vmatprep.subr.bf16.mxu1 %v13517_v57  ;;  %v13601_v57 = vld [vmem:[%s18469_s3 + $0xfec] ss:$16 sps:$4 sm:$0xff]  }
 0x56a   :  { %10466 = vmatpush1.bf16.msra.mxu0 %v13512_v58  ;;  %v10852_v58 = vld [vmem:[%s18471_s5 + $0x80] sm:$0xff]  ;;  %v10853_v39 = vld [vmem:[%s18471_s5 + $0x88] sm:$0xff] }
 0x56b   :  { %10794 = vmatpush1.bf16.msra.mxu1 %v13515_v17  ;;  %10467 = vmatprep.subr.bf16.mxu0 %v13520_v55  ;;  %v10884_v17 = vld [vmem:[%s18471_s5 + $0x180] sm:$0xff]  ;;  %v10885_v55 = vld [vmem:[%s18471_s5 + $0x188] sm:$0xff] }
 0x56c   :  { %10795 = vmatprep.subr.bf16.mxu1 %v13523_v62  ;;  %v13596_v62 = vld [vmem:[%s18469_s3 + $0xfe0] ss:$16 sps:$4 sm:$0xff]   ;;  %v10861_v54 = vld [vmem:[%s18471_s5 + $0xc8] sm:$0xff] }
 0x56e   :  { %10468 = vmatpush1.bf16.msra.mxu0 %v13518_v0  ;;  %v13599_v0 = vld [vmem:[%s18469_s3 + $0xfe8] ss:$16 sps:$4 sm:$0xff]  }
 0x56f   :  { %10796 = vmatpush1.bf16.msra.mxu1 %v13521_v52  ;;  %10469 = vmatprep.subr.bf16.mxu0 %v13526_v53  ;;  %v7064_v52 = vmax.f32 %v12672_v5, 0.0  ;;  %v12594_v53 = vpack.c.bf16 %v10853_v39, %v10852_v58  ;;  %v12610_v5 = vpack.c.bf16 %v10861_v54, %v10860_v35  ;;  %v10877_v39 = vld [vmem:[%s18471_s5 + $0x148] sm:$0xff] }
 0x570   :  { %10797 = vmatprep.subr.bf16.mxu1 %v13529_v27  ;;  %v10836_v27 = vld [vmem:[%s18471_s5] sm:$0xff] }
 0x572   :  { %10470 = vmatpush1.bf16.msra.mxu0 %v13524_v1  ;;  %v10837_v1 = vld [vmem:[%s18471_s5 + $0x8] sm:$0xff] }
 0x573   :  { %10798 = vmatpush1.bf16.msra.mxu1 %v13527_v2  ;;  %10471 = vmatprep.subr.bf16.mxu0 %v13532_v6  ;;  %v10868_v2 = vld [vmem:[%s18471_s5 + $0x100] sm:$0xff]  ;;  %v12626_v6 = vpack.c.bf16 %v10885_v55, %v10884_v17  ;;  %v10862_v17 = vld [vmem:[%s18471_s5 + $0xd0] sm:$0xff]  ;;  %v10863_v55 = vld [vmem:[%s18471_s5 + $0xd8] sm:$0xff] }
 0x574   :  { %10799 = vmatprep.subr.bf16.mxu1 %v13535_v7  ;;  %v10869_v7 = vld [vmem:[%s18471_s5 + $0x108] sm:$0xff] }
 0x576   :  { %10472 = vmatpush1.bf16.msra.mxu0 %v13530_v10  ;;  %v10854_v10 = vld [vmem:[%s18471_s5 + $0x90] sm:$0xff] }
 0x577   :  { %10800 = vmatpush1.bf16.msra.mxu1 %v13533_v13  ;;  %10473 = vmatprep.subr.bf16.mxu0 %v13538_v59  ;;  %v10855_v13 = vld [vmem:[%s18471_s5 + $0x98] sm:$0xff]  ;;  %v10886_v59 = vld [vmem:[%s18471_s5 + $0x190] sm:$0xff] }
 0x578   :  { %10801 = vmatprep.subr.bf16.mxu1 %v13541_v16  ;;  %v10887_v16 = vld [vmem:[%s18471_s5 + $0x198] sm:$0xff] }
 0x57a   :  { %10474 = vmatpush1.bf16.msra.mxu0 %v13536_v18  ;;  %v12596_v18 = vpack.c.bf16 %v10837_v1, %v10836_v27  ;;  %v12614_v27 = vpack.c.bf16 %v10863_v55, %v10862_v17  ;;  %v10846_v1 = vld [vmem:[%s18471_s5 + $0x50] sm:$0xff] }
 0x57b   :  { %10802 = vmatpush1.bf16.msra.mxu1 %v13539_v3  ;;  %10475 = vmatprep.subr.bf16.mxu0 %v13544_v25  ;;  %v7080_v3 = vpack.c.bf16 %v7064_v52, %v7064_v52  ;;  %v12628_v25 = vpack.c.bf16 %v10869_v7, %v10868_v2  ;;  %v10847_v2 = vld [vmem:[%s18471_s5 + $0x58] sm:$0xff] }
 0x57c   :  { %10803 = vmatprep.subr.bf16.mxu1 %v13547_v19  ;;  %v12598_v19 = vpack.c.bf16 %v10855_v13, %v10854_v10  ;;  %v10879_v10 = vld [vmem:[%s18471_s5 + $0x158] sm:$0xff]  ;;  %v10864_v13 = vld [vmem:[%s18471_s5 + $0xe0] sm:$0xff] }
 0x57e   :  { %10476 = vmatpush1.bf16.msra.mxu0 %v13542_v20  ;;  %v10838_v20 = vld [vmem:[%s18471_s5 + $0x10] sm:$0xff] }
 0x57f   :  { %10804 = vmatpush1.bf16.msra.mxu1 %v13545_v24  ;;  %10477 = vmatprep.subr.bf16.mxu0 %v13550_v26  ;;  %v10839_v24 = vld [vmem:[%s18471_s5 + $0x18] sm:$0xff]  ;;  %v10870_v26 = vld [vmem:[%s18471_s5 + $0x110] sm:$0xff] }
 0x580   :  { %10805 = vmatprep.subr.bf16.mxu1 %v13553_v8  ;;  %v12630_v8 = vpack.c.bf16 %v10887_v16, %v10886_v59  ;;  %v10865_v59 = vld [vmem:[%s18471_s5 + $0xe8] sm:$0xff]  ;;  %v10896_v16 = vld [vmem:[%s18471_s5 + $0x1e0] sm:$0xff] }
 0x582   :  { %10478 = vmatpush1.bf16.msra.mxu0 %v13548_v21  ;;  %v10871_v21 = vld [vmem:[%s18471_s5 + $0x118] sm:$0xff] }
 0x583   :  { %10806 = vmatpush1.bf16.msra.mxu1 %v13551_v60  ;;  %10479 = vmatprep.subr.bf16.mxu0 %v13556_v28  ;;  %v10856_v60 = vld [vmem:[%s18471_s5 + $0xa0] sm:$0xff]  ;;  %v10857_v28 = vld [vmem:[%s18471_s5 + $0xa8] sm:$0xff] }
 0x584   :  { %10807 = vmatprep.subr.bf16.mxu1 %v13559_v12  ;;  %v10888_v12 = vld [vmem:[%s18471_s5 + $0x1a0] sm:$0xff] }
 0x586   :  { %10480 = vmatpush1.bf16.msra.mxu0 %v13554_v38  ;;  %v10889_v38 = vld [vmem:[%s18471_s5 + $0x1a8] sm:$0xff] }
 0x587   :  { %10808 = vmatpush1.bf16.msra.mxu1 %v13557_v30  ;;  %10481 = vmatprep.subr.bf16.mxu0 %v13562_v34  ;;  %v12600_v30 = vpack.c.bf16 %v10839_v24, %v10838_v20  ;;  %v12632_v34 = vpack.c.bf16 %v10871_v21, %v10870_v26  ;;  %v10848_v24 = vld [vmem:[%s18471_s5 + $0x60] sm:$0xff]  ;;  %v10849_v26 = vld [vmem:[%s18471_s5 + $0x68] sm:$0xff] }
 0x588   :  { %10809 = vmatprep.subr.bf16.mxu1 %v13565_v36  ;;  %v12602_v36 = vpack.c.bf16 %v10857_v28, %v10856_v60  ;;  %v12620_v21 = vpack.c.bf16 %v10849_v26, %v10848_v24  ;;  %v10881_v60 = vld [vmem:[%s18471_s5 + $0x168] sm:$0xff] }
 0x58a   :  { %10482 = vmatpush1.bf16.msra.mxu0 %v13560_v37  ;;  %v10840_v37 = vld [vmem:[%s18471_s5 + $0x20] sm:$0xff] }
 0x58b   :  { %10810 = vmatpush1.bf16.msra.mxu1 %v13563_v61  ;;  %10483 = vmatprep.subr.bf16.mxu0 %v13568_v40  ;;  %v10841_v61 = vld [vmem:[%s18471_s5 + $0x28] sm:$0xff]  ;;  %v10872_v40 = vld [vmem:[%s18471_s5 + $0x120] sm:$0xff] }
 0x58c   :  { %10811 = vmatprep.subr.bf16.mxu1 %v13571_v42  ;;  %v12634_v42 = vpack.c.bf16 %v10889_v38, %v10888_v12  ;;  %v10866_v12 = vld [vmem:[%s18471_s5 + $0xf0] sm:$0xff]  ;;  %v10867_v38 = vld [vmem:[%s18471_s5 + $0xf8] sm:$0xff] }
 0x58e   :  { %10484 = vmatpush1.bf16.msra.mxu0 %v13566_v45  ;;  %v10873_v45 = vld [vmem:[%s18471_s5 + $0x128] sm:$0xff] }
 0x58f   :  { %10812 = vmatpush1.bf16.msra.mxu1 %v13569_v46  ;;  %10485 = vmatprep.subr.bf16.mxu0 %v13574_v48  ;;  %v10858_v46 = vld [vmem:[%s18471_s5 + $0xb0] sm:$0xff]  ;;  %v10859_v48 = vld [vmem:[%s18471_s5 + $0xb8] sm:$0xff] }
 0x590   :  { %10813 = vmatprep.subr.bf16.mxu1 %v13577_v31  ;;  %v10890_v31 = vld [vmem:[%s18471_s5 + $0x1b0] sm:$0xff] }
 0x592   :  { %10486 = vmatpush1.bf16.msra.mxu0 %v13572_v49  ;;  %v10891_v49 = vld [vmem:[%s18471_s5 + $0x1b8] sm:$0xff] }
 0x593   :  { %10814 = vmatpush1.bf16.msra.mxu1 %v13575_v50  ;;  %10487 = vmatprep.subr.bf16.mxu0 %v13580_v63  ;;  %v12604_v50 = vpack.c.bf16 %v10841_v61, %v10840_v37  ;;  %v12636_v63 = vpack.c.bf16 %v10873_v45, %v10872_v40  ;;  %v10850_v37 = vld [vmem:[%s18471_s5 + $0x70] sm:$0xff]  ;;  %v10851_v61 = vld [vmem:[%s18471_s5 + $0x78] sm:$0xff] }
 0x594   :  { %10815 = vmatprep.subr.bf16.mxu1 %v13583_v56  ;;  %v12606_v56 = vpack.c.bf16 %v10859_v48, %v10858_v46  ;;  %v10882_v45 = vld [vmem:[%s18471_s5 + $0x170] sm:$0xff]  ;;  %v10883_v46 = vld [vmem:[%s18471_s5 + $0x178] sm:$0xff] }
 0x595   :  { %v12656_v48 = vpack.c.bf16 %v10883_v46, %v10882_v45 }
 0x596   :  { %10488 = vmatpush1.bf16.msra.mxu0 %v13578_v32  ;;  %v10842_v32 = vld [vmem:[%s18471_s5 + $0x30] sm:$0xff] }
 0x597   :  { %10816 = vmatpush1.bf16.msra.mxu1 %v13581_v29  ;;  %10489 = vmatprep.subr.bf16.mxu0 %v13586_v15  ;;  %v10843_v29 = vld [vmem:[%s18471_s5 + $0x38] sm:$0xff]  ;;  %v10874_v15 = vld [vmem:[%s18471_s5 + $0x130] sm:$0xff] }
 0x598   :  { %10817 = vmatprep.subr.bf16.mxu1 %v13589_v51  ;;  %v12638_v51 = vpack.c.bf16 %v10891_v49, %v10890_v31  ;;  %v7594_v31 = vld [vmem:[%s18470_s4] sm:$0xf] }
 0x599   :  { %v7599_v49 = vrot.slane %v7594_v31, %v16784_v22 }
 0x59a   :  { %10490 = vmatpush1.bf16.msra.mxu0 %v13584_v14  ;;  %v10875_v14 = vld [vmem:[%s18471_s5 + $0x138] sm:$0xff] }
 0x59b   :  { %10818 = vmatpush1.bf16.msra.mxu1 %v13587_v33  ;;  %10491 = vmatprep.subr.bf16.mxu0 %v13592_v23  ;;  %v10892_v33 = vld [vmem:[%s18471_s5 + $0x1c0] sm:$0xff]  ;;  %v10893_v23 = vld [vmem:[%s18471_s5 + $0x1c8] sm:$0xff] }
 0x59c   :  { %10819 = vmatprep.subr.bf16.mxu1 %v13595_v9  ;;  %v12608_v9 = vpack.c.bf16 %v10843_v29, %v10842_v32  ;;  %v12642_v58 = vpack.c.bf16 %v10893_v23, %v10892_v33 }
 0x59e   :  { %10492 = vmatpush1.bf16.msra.mxu0 %v13590_v44  ;;  %v12640_v44 = vpack.c.bf16 %v10875_v14, %v10874_v15 }
 0x59f   :  { %10820 = vmatpush1.bf16.msra.mxu1 %v13593_v43  ;;  %10493 = vmatprep.subr.bf16.mxu0 %v13598_v41  ;;  %v10844_v43 = vld [vmem:[%s18471_s5 + $0x40] sm:$0xff]  ;;  %v10845_v41 = vld [vmem:[%s18471_s5 + $0x48] sm:$0xff] }
 0x5a0   :  { %10821 = vmatprep.subr.bf16.mxu1 %v13601_v57  ;;  %v10876_v57 = vld [vmem:[%s18471_s5 + $0x140] sm:$0xff]  ;;  %v12612_v52 = vpack.c.bf16 %v10845_v41, %v10844_v43 }
 0x5a2   :  { %10494 = vmatpush1.bf16.msra.mxu0 %v13596_v62  ;;  %v10894_v62 = vld [vmem:[%s18471_s5 + $0x1d0] sm:$0xff] }
 0x5a3   :  { %10822 = vmatpush1.bf16.msra.mxu1 %v13599_v0  ;;  %12595 = vmatprep.subr.bf16.mxu0 %v12594_v53  ;;  %v10895_v0 = vld [vmem:[%s18471_s5 + $0x1d8] sm:$0xff]  ;;  %v12644_v53 = vpack.c.bf16 %v10877_v39, %v10876_v57  ;;  %v12523_v57 = vld [vmem:[%s18472_s6] ss:$0 sm:$0xff]  ;;  %s13633_s6 = smov [#allocation2]  }
 0x5a4   :  { %12627 = vmatprep.subr.bf16.mxu1 %v12626_v6  ;;  %v10878_v6 = vld [vmem:[%s18471_s5 + $0x150] sm:$0xff]  ;;  %v12646_v7 = vpack.c.bf16 %v10895_v0, %v10894_v62  ;;  %s11067_s24 = sshll.u32 %s13633_s6, 4  ;;  %s11068_s24 = int_to_ptr.vmem [resolvable:$true] %s11067_s24 }
 0x5a5   :  { %10496 = vmatmul.mubr.bf16.vlgmr.msra.gmra.mrb[16].mxu0 %v7080_v3  ;;  %s13608_s25 = scalar_lea.vmem %s11068_s24, 32  ;;  %p13613_p1 = scmp.lt.s32.totalorder %s11068_s24, %s11068_s24 }
 0x5a6   :  { %10824 = vmatmul.mubr.bf16.vlgmr.msra.gmra.mrb[16].mxu1 %v7080_v3  ;;  %12597 = vmatpush3.bf16.msra.mxu0 %v12596_v18  ;;  %v10897_v18 = vld [vmem:[%s18471_s5 + $0x1e8] sm:$0xff]  ;;  %v12616_v3 = vpack.c.bf16 %v10847_v2, %v10846_v1  ;;  %p13609_p0 = scmp.ne.s32.totalorder %s11068_s24, %s13608_s25  ;;  %p13614_p2 = scmp.lt.s32.totalorder %s13608_s25, %s13608_s25 }
 0x5a7   :  { %12629 = vmatpush3.bf16.msra.mxu1 %v12628_v25  ;;  %12599 = vmatprep.subr.bf16.mxu0 %v12598_v19  ;;  %v12648_v25 = vpack.c.bf16 %v10879_v10, %v10878_v6  ;;  %v12618_v19 = vpack.c.bf16 %v10865_v59, %v10864_v13  ;;  %v12650_v20 = vpack.c.bf16 %v10897_v18, %v10896_v16 }
 0x5a8   :  { %12631 = vmatprep.subr.bf16.mxu1 %v12630_v8  ;;  %v10880_v8 = vld [vmem:[%s18471_s5 + $0x160] sm:$0xff]  ;;  %p13615_p3 = por %p13614_p2, %p13613_p1 }
 0x5a9   :  { %v12652_v28 = vpack.c.bf16 %v10881_v60, %v10880_v8 }
 0x5aa   :  { %12601 = vmatpush3.bf16.msra.mxu0 %v12600_v30  ;;  %v10898_v30 = vld [vmem:[%s18471_s5 + $0x1f0] sm:$0xff]  ;;  %p13616_p4 = pnand %p13615_p3, %p13609_p0 }
 0x5ab   :  { %12633 = vmatpush3.bf16.msra.mxu1 %v12632_v34  ;;  %12603 = vmatprep.subr.bf16.mxu0 %v12602_v36  ;;  %v12622_v34 = vpack.c.bf16 %v10867_v38, %v10866_v12  ;;  %v10899_v36 = vld [vmem:[%s18471_s5 + $0x1f8] sm:$0xff] }
 0x5ac   :  { %12635 = vmatprep.subr.bf16.mxu1 %v12634_v42  ;;  %v12654_v40 = vpack.c.bf16 %v10899_v36, %v10898_v30  ;;  %v12624_v42 = vpack.c.bf16 %v10851_v61, %v10850_v37 }
 0x5ae   :  { %12605 = vmatpush3.bf16.msra.mxu0 %v12604_v50  ;;  %v7607_v50 = vrot.slane %v7594_v31, %v16988_v4 }
 0x5af   :  { %12637 = vmatpush3.bf16.msra.mxu1 %v12636_v63  ;;  %12607 = vmatprep.subr.bf16.mxu0 %v12606_v56  ;;  %v7603_v63 = vrot.slane %v7594_v31, %v16600_v11  ;;  %v7611_v56 = vrot.slane %v7594_v31, %v16796_v47 }
 0x5b0   :  { %12639 = vmatprep.subr.bf16.mxu1 %v12638_v51 }
 0x5b2   :  { %12609 = vmatpush3.bf16.msra.mxu0 %v12608_v9 }
 0x5b3   :  { %12641 = vmatpush3.bf16.msra.mxu1 %v12640_v44  ;;  %12611 = vmatprep.subr.bf16.mxu0 %v12610_v5 }
 0x5b4   :  { %12643 = vmatprep.subr.bf16.mxu1 %v12642_v58 }
 0x5b6   :  { %12613 = vmatpush3.bf16.msra.mxu0 %v12612_v52 }
 0x5b7   :  { %12645 = vmatpush3.bf16.msra.mxu1 %v12644_v53  ;;  %12615 = vmatprep.subr.bf16.mxu0 %v12614_v27 }
 0x5b8   :  { %12647 = vmatprep.subr.bf16.mxu1 %v12646_v7 }
 0x5ba   :  { %12617 = vmatpush3.bf16.msra.mxu0 %v12616_v3 }
 0x5bb   :  { %12649 = vmatpush3.bf16.msra.mxu1 %v12648_v25  ;;  %12619 = vmatprep.subr.bf16.mxu0 %v12618_v19 }
 0x5bc   :  { %12651 = vmatprep.subr.bf16.mxu1 %v12650_v20 }
 0x5be   :  { %12621 = vmatpush3.bf16.msra.mxu0 %v12620_v21 }
 0x5bf   :  { %12653 = vmatpush3.bf16.msra.mxu1 %v12652_v28  ;;  %12623 = vmatprep.subr.bf16.mxu0 %v12622_v34 }
 0x5c0   :  { %12655 = vmatprep.subr.bf16.mxu1 %v12654_v40 }
 0x5c2   :  { %12625 = vmatpush3.bf16.msra.mxu0 %v12624_v42 }
 0x5c3   :  { %12657 = vmatpush3.bf16.msra.mxu1 %v12656_v48 }
 0x678   :  { %v10497_v32 = vpop.f32.mrb[16].mxu0 }
 0x679   :  { %v12674_v29 = vadd.f32 %v10497_v32, %v7599_v49  ;;  %v10825_v15 = vpop.f32.mrb[16].mxu1  ;;  %v10499_v51 = vpop.f32.mrb[17].mxu0 }
 0x67a   :  { %v12676_v14 = vadd.f32 %v10825_v15, %v7607_v50  ;;  %v12675_v35 = vadd.f32 %v10499_v51, %v7603_v63  ;;  %v10827_v54 = vpop.f32.mrb[17].mxu1  ;;  %v10501_v33 = vpop.f32.mrb[18].mxu0 }
 0x67b   :  { %v12677_v23 = vadd.f32 %v10827_v54, %v7611_v56  ;;  %v10829_v9 = vpop.f32.mrb[18].mxu1  ;;  %v10502_v44 = vpop.f32.mrb[19].mxu0  ;;  %v10832_v22 = vmax.f32 %v12674_v29, 0.0 }
 0x67c   :  { %v10833_v5 = vmax.f32 %v12675_v35, 0.0  ;;  %v10830_v43 = vpop.f32.mrb[19].mxu1  ;;  %v10834_v4 = vmax.f32 %v12676_v14, 0.0 }
 0x67d   :  { %v10835_v41 = vmax.f32 %v12677_v23, 0.0 }
 0x67e   :  { %10971 = vmatprep.mubr.f32.mxu0 %v10833_v5 }
 0x67f   :  { %11041 = vmatprep.mubr.f32.mxu1 %v10835_v41  ;;  %10972 = vmatmul.mubr.f32.vlgmr.msra.gmra.mrb[20].mxu0 %v10832_v22 }
 0x680   :  { %11042 = vmatmul.mubr.f32.vlgmr.msra.gmra.mrb[20].mxu1 %v10834_v4 }
 0x752   :  { %v12556_v11 = vpop.f32.mrb[20].mxu0 }
 0x753   :  { %v12591_v47 = vpop.f32.mrb[20].mxu1  ;;  %v12557_v58 = vpop.f32.mrb[21].mxu0 }
 0x754   :  { %v12558_v39 = vadd.f32 %v12557_v58, %v12556_v11  ;;  %v12592_v17 = vpop.f32.mrb[21].mxu1 }
 0x755   :  { %v12593_v55 = vadd.f32 %v12592_v17, %v12591_v47 }
 0x756   :  { %v10974_v62 = vadd.f32 %v12558_v39, %v12523_v57 }
 0x758   :  { %v11044_v0 = vadd.f32 %v12593_v55, %v10974_v62 }
 0x75a   :  { %v11048_v52 = vsel %vm11047_vm1, %v11044_v0, -inf }
 0x75b   :  { %11049 = vmax.xlane.f32.xlu0 %v11048_v52 }
 0x7e8   :  { %v11050_v53 = vpop.xlane.xlu0 %11049 }
 0x7e9   :  { %v11051_v27 = vsub.f32 %v11044_v0, %v11050_v53 }
 0x7eb   :  { %v11052_v1 = vmul.f32 1.442695, %v11051_v27 }
 0x7ed   :  { %13602 = vpow2.f32 %v11052_v1 }
 0x7f7   :  { %v13603_v2 = vpop.eup %13602 }
 0x7f8   :  { %v11054_v6 = vsel %vm11047_vm1, %v13603_v2, 0.0 }
 0x7f9   :  { %11055 = vadd.xlane.f32.xlu0 %v11054_v6 }
 0x886   :  { %v11056_v7 = vpop.xlane.xlu0 %11055 }
 0x887   :  { %13604 = vlog2.f32 %v11056_v7 }
 0x891   :  { %v13605_v10 = vpop.eup %13604 }
 0x892   :  { %v11058_v13 = vmul.f32 0.6931472, %v13605_v10 }
 0x894   :  { %v11059_v59 = vsub.f32 %v11051_v27, %v11058_v13 }
 0x896   :  { %11060 = vst.msk [vmem:[#allocation2] sm:$0x3] %vm11047_vm1, %v11059_v59 }
 0x897   :  { %13619 = shalt.err (!%p13616_p4)
}
 0x898   :  { %s13620_s27 = scalar_lea.hbm %s18473_s7, 32 }
 0x899   :  { %p13621_p5 = scmp.ne.s32.totalorder %s18473_s7, %s13620_s27  ;;  %p13624_p6 = scmp.lt.u32.totalorder %s13620_s27, %s18473_s7 }
 0x89b   :  { %p13626_p7 = pnand %p13624_p6, %p13621_p5 }
 0x89d   :  { %13629 = shalt.err (!%p13626_p7)
}
 0x89e   :  { %11070 = dma.vmem_to_hbm [thread:$0]  %s11068_s24, 32, %s18473_s7, [#allocation3]  }
 0x89f   :  { %13630 = dma.done.wait [#allocation3], 32  }
 0x8a0   :  { %13631 = vsyncadd [#allocation3], 4294967264 }
 0x8a1   :  { %11074 = vsyncpa [#allocation3], 1 }

</bundles_post_ra>
